<compile_context>
chip_gen: v6e
topology: v6e:2x2x1
jax: 0.10.0
libtpu: 0.0.40
codegen_flags: <defaults>
</compile_context>

<pallas_src>
import functools
import math

import numpy as np

import jax
import jax.numpy as jnp
from jax.experimental import pallas as pl
from jax.experimental.pallas import tpu as pltpu

EPS = 1e-3
NUM_CLASSES = 8


def _round_up(x, m):
    return (x + m - 1) // m * m


def _cparams():
    # 48 MiB scoped VMEM: below v7x's 64 MiB physical, generous on v5e/v6e.
    return pltpu.CompilerParams(dimension_semantics=("parallel",),
                                vmem_limit_bytes=48 * 1024 * 1024)


@functools.lru_cache(maxsize=None)
def _col_index(H, W):
    """(H*W, 1) int32 column index of each flattened row -- kernel operand."""
    return jnp.asarray((np.arange(H * W, dtype=np.int32) % W).reshape(H * W, 1))


# ---------------------------------------------------------------------------
# In-kernel shifted-window helper (replaces im2col for stride-1 convs)
# ---------------------------------------------------------------------------
def _tap(x, dh, dw, H, W, widx):
    """Value whose row m=(h,w) holds x[(h+dh, w+dw)], zero when out of bounds.

    x is a flattened (H*W, C) value; widx the (H*W, 1) int32 column index.
    Returns None when the tap is statically outside the image (skip matmul).
    """
    M, C = x.shape
    if abs(dh) >= H or abs(dw) >= W:
        return None
    off = dh * W + dw
    if off == 0:
        u = x
    elif off > 0:
        u = jnp.concatenate([x[off:], jnp.zeros((off, C), x.dtype)], axis=0)
    else:
        u = jnp.concatenate([jnp.zeros((-off, C), x.dtype), x[:M + off]],
                            axis=0)
    if dw > 0:
        u = jnp.where(widx < (W - dw), u, jnp.zeros_like(u))
    elif dw < 0:
        u = jnp.where(widx >= (-dw), u, jnp.zeros_like(u))
    return u


# ---------------------------------------------------------------------------
# Pallas kernels
# ---------------------------------------------------------------------------
def _nb_kernel(widx_ref, x_ref, w_ref, p_ref, o_ref, *, H, W, C, d):
    """Fused non_bottleneck_1d: conv3x1 -> conv1x3(+BN) -> conv3x1(dil) ->
    conv1x3(dil, +BN) + residual, ReLU after every stage, all in one kernel."""
    x = x_ref[...]                          # (M, C) bf16
    widx = widx_ref[...]                    # (M, 1) int32

    def conv3(inp, base, taps):
        acc = None
        for t, (dh, dw) in enumerate(taps):
            u = _tap(inp, dh, dw, H, W, widx)
            if u is None:                   # tap statically outside the image
                continue
            wt = w_ref[(base + t) * C:(base + t + 1) * C, :]
            c = jnp.dot(u, wt, preferred_element_type=jnp.float32)
            acc = c if acc is None else acc + c
        return acc

    b1 = p_ref[0:1, :]
    s2 = p_ref[1:2, :]
    t2 = p_ref[2:3, :]
    b3 = p_ref[3:4, :]
    s4 = p_ref[4:5, :]
    t4 = p_ref[5:6, :]

    h = jnp.maximum(conv3(x, 0, ((-1, 0), (0, 0), (1, 0))) + b1, 0.0)
    h = h.astype(jnp.bfloat16)
    h = jnp.maximum(conv3(h, 3, ((0, -1), (0, 0), (0, 1))) * s2 + t2, 0.0)
    h = h.astype(jnp.bfloat16)
    h = jnp.maximum(conv3(h, 6, ((-d, 0), (0, 0), (d, 0))) + b3, 0.0)
    h = h.astype(jnp.bfloat16)
    out = conv3(h, 9, ((0, -d), (0, 0), (0, d))) * s4 + t4
    # TODO(synk): Dropout2d treated as inference-mode identity (no RNG drop).
    out = out + x.astype(jnp.float32)       # residual
    o_ref[...] = jnp.maximum(out, 0.0).astype(o_ref.dtype)


def _deconv_kernel(widx_ref, x_ref, w_ref, p_ref, o_ref, *, H, W, Cin, taps,
                   relu):
    """Sub-pixel ConvTranspose2d: stride-1 shifted matmuls producing s*s*Cout
    phase channels, folded BN/bias (+ReLU) epilogue."""
    x = x_ref[...]
    widx = widx_ref[...]
    acc = None
    for t, (dh, dw) in enumerate(taps):
        u = _tap(x, dh, dw, H, W, widx)
        if u is None:
            continue
        wt = w_ref[t * Cin:(t + 1) * Cin, :]
        c = jnp.dot(u, wt, preferred_element_type=jnp.float32)
        acc = c if acc is None else acc + c
    out = acc * p_ref[0:1, :] + p_ref[1:2, :]
    if relu:
        out = jnp.maximum(out, 0.0)
    o_ref[...] = out.astype(o_ref.dtype)


def _mm_kernel(a_ref, b_ref, s_ref, t_ref, o_ref, *, relu):
    """Generic matmul + per-channel affine (+ReLU) -- used by the 3 stride-2
    DownsamplerBlock convs only."""
    acc = jnp.dot(a_ref[...], b_ref[...], preferred_element_type=jnp.float32)
    out = acc * s_ref[...] + t_ref[...]
    if relu:
        out = jnp.maximum(out, 0.0)
    o_ref[...] = out.astype(o_ref.dtype)


# ---------------------------------------------------------------------------
# pallas_call builders (cached per static shape)
# ---------------------------------------------------------------------------
@functools.lru_cache(maxsize=None)
def _build_nb(B, H, W, C, d):
    M = H * W
    kernel = functools.partial(_nb_kernel, H=H, W=W, C=C, d=d)
    return pl.pallas_call(
        kernel,
        out_shape=jax.ShapeDtypeStruct((B, M, C), jnp.bfloat16),
        grid_spec=pltpu.PrefetchScalarGridSpec(
            num_scalar_prefetch=0,
            grid=(B,),
            in_specs=[
                pl.BlockSpec((M, 1), lambda b: (0, 0)),          # col index
                pl.BlockSpec((None, M, C), lambda b: (b, 0, 0)),  # activation
                pl.BlockSpec((12 * C, C), lambda b: (0, 0)),     # packed W
                pl.BlockSpec((6, C), lambda b: (0, 0)),          # packed affine
            ],
            out_specs=pl.BlockSpec((None, M, C), lambda b: (b, 0, 0)),
        ),
        compiler_params=_cparams(),
    )


@functools.lru_cache(maxsize=None)
def _build_deconv(B, H, W, Cin, Nout, win, relu):
    M = H * W
    taps = tuple((dh, dw) for dh in range(win) for dw in range(win))
    kernel = functools.partial(_deconv_kernel, H=H, W=W, Cin=Cin, taps=taps,
                               relu=relu)
    return pl.pallas_call(
        kernel,
        out_shape=jax.ShapeDtypeStruct((B, M, Nout), jnp.bfloat16),
        grid_spec=pltpu.PrefetchScalarGridSpec(
            num_scalar_prefetch=0,
            grid=(B,),
            in_specs=[
                pl.BlockSpec((M, 1), lambda b: (0, 0)),
                pl.BlockSpec((None, M, Cin), lambda b: (b, 0, 0)),
                pl.BlockSpec((win * win * Cin, Nout), lambda b: (0, 0)),
                pl.BlockSpec((2, Nout), lambda b: (0, 0)),
            ],
            out_specs=pl.BlockSpec((None, M, Nout), lambda b: (b, 0, 0)),
        ),
        compiler_params=_cparams(),
    )


def _choose_row_tiles(m):
    """>=2 parallel M blocks whenever possible (keeps both v7x TCs busy),
    tile cap 1024 to amortize per-grid-step overhead on large images."""
    mp = _round_up(m, 32)
    if mp <= 32:
        return mp, mp
    tm = min(1024, _round_up(-(-mp // 2), 32))
    mp = _round_up(mp, tm)
    return mp, tm


@functools.lru_cache(maxsize=None)
def _build_matmul(Mp, K, N, tm, relu):
    kernel = functools.partial(_mm_kernel, relu=relu)
    return pl.pallas_call(
        kernel,
        out_shape=jax.ShapeDtypeStruct((Mp, N), jnp.bfloat16),
        grid_spec=pltpu.PrefetchScalarGridSpec(
            num_scalar_prefetch=0,
            grid=(Mp // tm,),
            in_specs=[
                pl.BlockSpec((tm, K), lambda i: (i, 0)),   # im2col rows
                pl.BlockSpec((K, N), lambda i: (0, 0)),    # whole weight
                pl.BlockSpec((1, N), lambda i: (0, 0)),    # folded BN scale
                pl.BlockSpec((1, N), lambda i: (0, 0)),    # folded BN shift
            ],
            out_specs=pl.BlockSpec((tm, N), lambda i: (i, 0)),
        ),
        compiler_params=_cparams(),
    )


def matmul_affine(a, b, scale, shift, relu=False):
    """out = maybe_relu((a @ b) * scale + shift)."""
    a = a.astype(jnp.bfloat16)
    M, K = a.shape
    Kb, N = b.shape
    if Kb != K:                 # weight K rounded up once at prepare time
        a = jnp.pad(a, ((0, 0), (0, Kb - K)))
    Mp, tm = _choose_row_tiles(M)
    if Mp != M:                 # ragged-M fallback (not hit at demo shapes)
        a = jnp.pad(a, ((0, Mp - M), (0, 0)))
    out = _build_matmul(Mp, Kb, N, tm, bool(relu))(
        a, b, scale.reshape(1, N), shift.reshape(1, N))
    return out if Mp == M else out[:M]


# ---------------------------------------------------------------------------
# Block forwards
# ---------------------------------------------------------------------------
def _im2col(x, kh, kw, sh, sw, ph, pw, dh, dw):
    # TODO(synk): im2col kept only for the 3 stride-2 DownsamplerBlock convs;
    # stride-1 convs are realized inside the fused kernels instead.
    B, H, W, C = x.shape
    x_p = jnp.pad(x, ((0, 0), (ph, ph), (pw, pw), (0, 0)))
    Hout = (H + 2 * ph - dh * (kh - 1) - 1) // sh + 1
    Wout = (W + 2 * pw - dw * (kw - 1) - 1) // sw + 1
    cols = []
    for i in range(kh):
        for j in range(kw):
            patch = jax.lax.slice(
                x_p,
                (0, i * dh, j * dw, 0),
                (B, i * dh + (Hout - 1) * sh + 1,
                 j * dw + (Wout - 1) * sw + 1, C),
                (1, sh, sw, 1))
            cols.append(patch)
    patches = jnp.stack(cols, axis=3)          # (B, Hout, Wout, kh*kw, C)
    return patches.reshape(B * Hout * Wout, kh * kw * C), (B, Hout, Wout)


def maxpool2x2(x):
    # TODO(synk): assumes even H/W (floor-mode MaxPool2d(2,2) differs for odd).
    B, H, W, C = x.shape
    return x.reshape(B, H // 2, 2, W // 2, 2, C).max(axis=(2, 4))


def downsampler_forward(p, x):
    B, H, W, Cin = x.shape
    a, (_, Ho, Wo) = _im2col(x, 3, 3, 2, 2, 1, 1, 1, 1)
    cconv = p['conv']['scale'].shape[0]
    conv_out = matmul_affine(a, p['conv']['wm'], p['conv']['scale'],
                             p['conv']['shift'], relu=True)
    conv_out = conv_out.reshape(B, Ho, Wo, cconv)
    # Max-pool branch: BN+ReLU on its few channels stays in plain XLA so it
    # fuses with pool/concat (no dedicated tiny pallas_call).
    pool = maxpool2x2(x).astype(jnp.float32)
    pool = jnp.maximum(pool * p['pool']['scale'] + p['pool']['shift'], 0.0)
    return jnp.concatenate([conv_out, pool.astype(jnp.bfloat16)], axis=-1)


def non_bottleneck_forward(p, x, d):
    B, H, W, C = x.shape
    widx = _col_index(H, W)
    out = _build_nb(B, H, W, C, d)(widx, x.reshape(B, H * W, C),
                                   p['w'], p['p'])
    return out.reshape(B, H, W, C)


def _deconv_taps(k, s, pad):
    """Per output-phase (tap offset, kernel index) lists for sub-pixel deconv."""
    taps = []
    for ph in range(s):
        lst = []
        for kk in range(k):
            if (kk % s) == ((ph + pad) % s):
                d = (ph + pad - kk) // s
                assert d >= 0, "unsupported ConvTranspose2d geometry"
                lst.append((d, kk))
        taps.append(lst)
    win = 1 + max(d for lst in taps for d, _ in lst)
    return taps, win


def upsampler_forward(p, x, cfg):
    B, H, W, Cin = x.shape
    s, cout, relu = cfg['s'], cfg['cout'], cfg['relu']
    _, win = _deconv_taps(cfg['k'], s, cfg['pad'])
    nout = s * s * cout
    widx = _col_index(H, W)
    out = _build_deconv(B, H, W, Cin, nout, win, relu)(
        widx, x.reshape(B, H * W, Cin), p['wm'], p['p'])
    # TODO(synk): fold the pixel shuffle into the kernel's output index_map
    # (strided phase writes) to drop this XLA transpose at large resolutions.
    out = out.reshape(B, H, W, s, s, cout)
    out = jnp.transpose(out, (0, 1, 3, 2, 4, 5)).reshape(B, s * H, s * W, cout)
    return out


# ---------------------------------------------------------------------------
# Parameter construction (deterministic, in-script) + one-time preparation
# ---------------------------------------------------------------------------
class ParamGen:
    def __init__(self, key):
        self.key = key

    def normal(self, shape, std):
        self.key, sub = jax.random.split(self.key)
        return jax.random.normal(sub, shape, jnp.float32) * std


def make_conv(pg, cout, cin, kh, kw):
    std = math.sqrt(2.0 / (cin * kh * kw))
    return dict(w=pg.normal((cout, cin, kh, kw), std),
                b=pg.normal((cout,), 0.01))


def make_convT(pg, cin, cout, k):
    std = math.sqrt(2.0 / (cin * k * k))
    return dict(w=pg.normal((cin, cout, k, k), std),
                b=pg.normal((cout,), 0.01))


def make_bn(c):
    # PyTorch defaults: weight=1, bias=0, running_mean=0, running_var=1
    return dict(gamma=jnp.ones((c,), jnp.float32),
                beta=jnp.zeros((c,), jnp.float32),
                mean=jnp.zeros((c,), jnp.float32),
                var=jnp.ones((c,), jnp.float32))


def make_nb(pg, c):
    return dict(c1=make_conv(pg, c, c, 3, 1), c2=make_conv(pg, c, c, 1, 3),
                bn1=make_bn(c), c3=make_conv(pg, c, c, 3, 1),
                c4=make_conv(pg, c, c, 1, 3), bn2=make_bn(c))


# static layer schedule (dilations / deconv geometry kept out of the pytree)
ENC_KINDS = ([('down', None)] + [('nb', 1)] * 5 + [('down', None)]
             + [('nb', d) for _ in range(2) for d in (2, 4, 8, 16)])
UP1_CFG = dict(k=3, s=2, pad=1, cout=64, relu=True)
UP2_CFG = dict(k=3, s=2, pad=1, cout=16, relu=True)
OUT_CFG = dict(k=2, s=2, pad=0, cout=NUM_CLASSES, relu=False)
DEC_KINDS = [('up', UP1_CFG), ('nb', 1), ('nb', 1),
             ('up', UP2_CFG), ('nb', 1), ('nb', 1)]


def init_net(key, num_classes):
    pg = ParamGen(key)
    enc_initial = dict(conv=make_conv(pg, 13, 3, 3, 3), bn=make_bn(16))
    enc_layers = [dict(conv=make_conv(pg, 48, 16, 3, 3), bn=make_bn(64))]
    for _ in range(5):
        enc_layers.append(make_nb(pg, 64))
    enc_layers.append(dict(conv=make_conv(pg, 64, 64, 3, 3), bn=make_bn(128)))
    for _ in range(2):
        for _d in (2, 4, 8, 16):
            enc_layers.append(make_nb(pg, 128))
    dec_layers = [
        dict(conv=make_convT(pg, 128, 64, 3), bn=make_bn(64)),
        make_nb(pg, 64), make_nb(pg, 64),
        dict(conv=make_convT(pg, 64, 16, 3), bn=make_bn(16)),
        make_nb(pg, 16), make_nb(pg, 16),
    ]
    dec_out = make_convT(pg, 16, num_classes, 2)
    return dict(enc_initial=enc_initial, enc_layers=enc_layers,
                dec_layers=dec_layers, dec_out=dec_out)


def _w_to_mat(w, pad_to=None):
    # (Cout, Cin, kh, kw) -> (kh*kw*Cin, Cout) bf16 (tap-major rows).
    cout, cin, kh, kw = w.shape
    K = kh * kw * cin
    wm = jnp.transpose(w, (2, 3, 1, 0)).reshape(K, cout)
    if pad_to:
        Kp = _round_up(K, pad_to)
        if Kp != K:
            wm = jnp.pad(wm, ((0, Kp - K), (0, 0)))
    return wm.astype(jnp.bfloat16)


def _fold_bn(bias, bn):
    s = bn['gamma'] / jnp.sqrt(bn['var'] + EPS)
    t = (bias - bn['mean']) * s + bn['beta']
    return s.astype(jnp.float32), t.astype(jnp.float32)


def prep_down(p):
    conv, bn = p['conv'], p['bn']
    cconv = conv['w'].shape[0]
    s_all = bn['gamma'] / jnp.sqrt(bn['var'] + EPS)
    t_all = bn['beta'] - bn['mean'] * s_all
    return dict(
        conv=dict(wm=_w_to_mat(conv['w'], pad_to=16),
                  scale=s_all[:cconv].astype(jnp.float32),
                  shift=(conv['b'] * s_all[:cconv]
                         + t_all[:cconv]).astype(jnp.float32)),
        pool=dict(scale=s_all[cconv:].astype(jnp.float32),
                  shift=t_all[cconv:].astype(jnp.float32)))


def prep_nb(p):
    # Pack the four (3C, C) tap-major weight matrices into one (12C, C) bf16
    # matrix and the six per-channel affine vectors into one (6, C) f32.
    w = jnp.concatenate([_w_to_mat(p[k]['w']) for k in ('c1', 'c2', 'c3', 'c4')],
                        axis=0)
    s2, t2 = _fold_bn(p['c2']['b'], p['bn1'])
    s4, t4 = _fold_bn(p['c4']['b'], p['bn2'])
    pv = jnp.stack([p['c1']['b'].astype(jnp.float32), s2, t2,
                    p['c3']['b'].astype(jnp.float32), s4, t4], axis=0)
    return dict(w=w, p=pv)


def prep_deconv(convT, cfg, bn=None):
    k, s, pad, cout = cfg['k'], cfg['s'], cfg['pad'], cfg['cout']
    w = convT['w']                                   # (Cin, Cout, k, k)
    cin = w.shape[0]
    taps, win = _deconv_taps(k, s, pad)
    w_eq = jnp.zeros((win, win, cin, s, s, cout), jnp.float32)
    for ph in range(s):
        for pw_ in range(s):
            for dh, khh in taps[ph]:
                for dw, kww in taps[pw_]:
                    w_eq = w_eq.at[dh, dw, :, ph, pw_, :].set(w[:, :, khh, kww])
    wm = w_eq.reshape(win * win * cin, s * s * cout).astype(jnp.bfloat16)
    if bn is None:
        sc = jnp.ones((cout,), jnp.float32)
        sh = convT['b'].astype(jnp.float32)
    else:
        sc, sh = _fold_bn(convT['b'], bn)
    pvec = jnp.stack([jnp.tile(sc, s * s), jnp.tile(sh, s * s)], axis=0)
    return dict(wm=wm, p=pvec)


def prepare_params(raw):
    """One-time conversion to matmul-ready bf16 weights + folded BN affine."""
    prep = dict(enc_initial=prep_down(raw['enc_initial']))
    prep['enc_layers'] = [prep_down(p) if kind == 'down' else prep_nb(p)
                          for (kind, _), p in zip(ENC_KINDS, raw['enc_layers'])]
    dec = []
    for (kind, cfg), p in zip(DEC_KINDS, raw['dec_layers']):
        dec.append(prep_deconv(p['conv'], cfg, p['bn']) if kind == 'up'
                   else prep_nb(p))
    prep['dec_layers'] = dec
    prep['dec_out'] = prep_deconv(raw['dec_out'], OUT_CFG, None)
    return prep


# ---------------------------------------------------------------------------
# Full network forward
# ---------------------------------------------------------------------------
def net_forward(params, x_nchw):
    x = jnp.transpose(x_nchw, (0, 2, 3, 1)).astype(jnp.bfloat16)   # NHWC bf16
    out = downsampler_forward(params['enc_initial'], x)
    for (kind, d), p in zip(ENC_KINDS, params['enc_layers']):
        out = downsampler_forward(p, out) if kind == 'down' \
            else non_bottleneck_forward(p, out, d)
    for (kind, cfg), p in zip(DEC_KINDS, params['dec_layers']):
        out = upsampler_forward(p, out, cfg) if kind == 'up' \
            else non_bottleneck_forward(p, out, cfg)
    out = upsampler_forward(params['dec_out'], out, OUT_CFG)
    return jnp.transpose(out, (0, 3, 1, 2)).astype(jnp.float32)    # NCHW f32


# ---------------------------------------------------------------------------
if __name__ == "__main__":
    key = jax.random.PRNGKey(0)
    k_params, k_x = jax.random.split(key)

    raw = init_net(k_params, NUM_CLASSES)
    params = prepare_params(raw)      # fold BN / build bf16 weight mats once

    # RGB image, spatial divisible by 8 (three stride-2 downsamplers)
    x = jax.random.normal(k_x, (2, 3, 32, 32), jnp.float32)

    fwd = jax.jit(net_forward)
    y = jax.block_until_ready(fwd(params, x))

    assert y.shape == (2, NUM_CLASSES, 32, 32), y.shape
    assert bool(jnp.all(jnp.isfinite(y)))
    print("KERNEL_OK")
</pallas_src>

<mosaic_0001>
module attributes {stable_mosaic.version = 11 : i64} {
  func.func @_mm_kernel(%arg0: i32, %arg1: memref<256x32xbf16, #tpu.memory_space<vmem>>, %arg2: memref<32x13xbf16, #tpu.memory_space<vmem>>, %arg3: memref<1x13xf32, #tpu.memory_space<vmem>>, %arg4: memref<1x13xf32, #tpu.memory_space<vmem>>, %arg5: memref<256x13xbf16, #tpu.memory_space<vmem>>) attributes {dimension_semantics = [#tpu.dimension_semantics<parallel>], iteration_bounds = array<i64: 2>, scalar_prefetch = 0 : i64, scratch_operands = 0 : i64, tpu.core_type = #tpu.core_type<tc>, window_params = [{transform_indices = @transform_0, window_bounds = array<i64: 256, 32>}, {pipeline_mode = #tpu.pipeline_mode<synchronous>, transform_indices = @transform_1, window_bounds = array<i64: 32, 13>}, {pipeline_mode = #tpu.pipeline_mode<synchronous>, transform_indices = @transform_2, window_bounds = array<i64: 1, 13>}, {pipeline_mode = #tpu.pipeline_mode<synchronous>, transform_indices = @transform_3, window_bounds = array<i64: 1, 13>}, {transform_indices = @transform_4, window_bounds = array<i64: 256, 13>}]} {
    %c0 = arith.constant 0 : index
    %c0_0 = arith.constant 0 : index
    %0 = vector.load %arg1[%c0, %c0_0] : memref<256x32xbf16, #tpu.memory_space<vmem>>, vector<256x32xbf16>
    %c0_1 = arith.constant 0 : index
    %c0_2 = arith.constant 0 : index
    %1 = vector.load %arg2[%c0_1, %c0_2] : memref<32x13xbf16, #tpu.memory_space<vmem>>, vector<32x13xbf16>
    %cst = arith.constant dense<0.000000e+00> : vector<256x13xf32>
    %2 = tpu.matmul %0, %1, %cst {dimension_numbers = #tpu.dot_dimension_numbers<[1], [0], [0], [1], [0, 0, 1, 1], [], []>} : vector<256x32xbf16>, vector<32x13xbf16>, vector<256x13xf32> -> vector<256x13xf32>
    %c0_3 = arith.constant 0 : index
    %c0_4 = arith.constant 0 : index
    %3 = vector.load %arg3[%c0_3, %c0_4] : memref<1x13xf32, #tpu.memory_space<vmem>>, vector<1x13xf32>
    %4 = vector.broadcast %3 : vector<1x13xf32> to vector<256x13xf32>
    %5 = arith.mulf %2, %4 : vector<256x13xf32>
    %c0_5 = arith.constant 0 : index
    %c0_6 = arith.constant 0 : index
    %6 = vector.load %arg4[%c0_5, %c0_6] : memref<1x13xf32, #tpu.memory_space<vmem>>, vector<1x13xf32>
    %7 = vector.broadcast %6 : vector<1x13xf32> to vector<256x13xf32>
    %8 = arith.addf %5, %7 : vector<256x13xf32>
    %cst_7 = arith.constant 0.000000e+00 : f32
    %9 = vector.broadcast %cst_7 : f32 to vector<256x13xf32>
    %10 = arith.maximumf %8, %9 : vector<256x13xf32>
    %11 = arith.truncf %10 : vector<256x13xf32> to vector<256x13xbf16>
    %c0_8 = arith.constant 0 : index
    %c0_9 = arith.constant 0 : index
    %12 = vector.load %arg5[%c0_8, %c0_9] : memref<256x13xbf16, #tpu.memory_space<vmem>>, vector<256x13xbf16>
    tpu.vector_store %arg5[%c0_8, %c0_9], %11 {strides = array<i32>} : memref<256x13xbf16, #tpu.memory_space<vmem>>, vector<256x13xbf16>,
    return
  }
  func.func @transform_0(%arg0: i32) -> (i32, i32) {
    %c0_i32 = arith.constant 0 : i32
    %c0_i32_0 = arith.constant 0 : i32
    return %arg0, %c0_i32 : i32, i32
  }
  func.func @transform_1(%arg0: i32) -> (i32, i32) {
    %c0_i32 = arith.constant 0 : i32
    %c0_i32_0 = arith.constant 0 : i32
    %c0_i32_1 = arith.constant 0 : i32
    return %c0_i32, %c0_i32_0 : i32, i32
  }
  func.func @transform_2(%arg0: i32) -> (i32, i32) {
    %c0_i32 = arith.constant 0 : i32
    %c0_i32_0 = arith.constant 0 : i32
    %c0_i32_1 = arith.constant 0 : i32
    return %c0_i32, %c0_i32_0 : i32, i32
  }
  func.func @transform_3(%arg0: i32) -> (i32, i32) {
    %c0_i32 = arith.constant 0 : i32
    %c0_i32_0 = arith.constant 0 : i32
    %c0_i32_1 = arith.constant 0 : i32
    return %c0_i32, %c0_i32_0 : i32, i32
  }
  func.func @transform_4(%arg0: i32) -> (i32, i32) {
    %c0_i32 = arith.constant 0 : i32
    %c0_i32_0 = arith.constant 0 : i32
    return %arg0, %c0_i32 : i32, i32
  }
}

module attributes {stable_mosaic.version = 11 : i64} {
  func.func @_mm_kernel(%arg0: i32, %arg1: memref<64x144xbf16, #tpu.memory_space<vmem>>, %arg2: memref<144x48xbf16, #tpu.memory_space<vmem>>, %arg3: memref<1x48xf32, #tpu.memory_space<vmem>>, %arg4: memref<1x48xf32, #tpu.memory_space<vmem>>, %arg5: memref<64x48xbf16, #tpu.memory_space<vmem>>) attributes {dimension_semantics = [#tpu.dimension_semantics<parallel>], iteration_bounds = array<i64: 2>, scalar_prefetch = 0 : i64, scratch_operands = 0 : i64, tpu.core_type = #tpu.core_type<tc>, window_params = [{transform_indices = @transform_0, window_bounds = array<i64: 64, 144>}, {pipeline_mode = #tpu.pipeline_mode<synchronous>, transform_indices = @transform_1, window_bounds = array<i64: 144, 48>}, {pipeline_mode = #tpu.pipeline_mode<synchronous>, transform_indices = @transform_2, window_bounds = array<i64: 1, 48>}, {pipeline_mode = #tpu.pipeline_mode<synchronous>, transform_indices = @transform_3, window_bounds = array<i64: 1, 48>}, {transform_indices = @transform_4, window_bounds = array<i64: 64, 48>}]} {
    %c0 = arith.constant 0 : index
    %c0_0 = arith.constant 0 : index
    %0 = vector.load %arg1[%c0, %c0_0] : memref<64x144xbf16, #tpu.memory_space<vmem>>, vector<64x144xbf16>
    %c0_1 = arith.constant 0 : index
    %c0_2 = arith.constant 0 : index
    %1 = vector.load %arg2[%c0_1, %c0_2] : memref<144x48xbf16, #tpu.memory_space<vmem>>, vector<144x48xbf16>
    %cst = arith.constant dense<0.000000e+00> : vector<64x48xf32>
    %2 = tpu.matmul %0, %1, %cst {dimension_numbers = #tpu.dot_dimension_numbers<[1], [0], [0], [1], [0, 0, 1, 1], [], []>} : vector<64x144xbf16>, vector<144x48xbf16>, vector<64x48xf32> -> vector<64x48xf32>
    %c0_3 = arith.constant 0 : index
    %c0_4 = arith.constant 0 : index
    %3 = vector.load %arg3[%c0_3, %c0_4] : memref<1x48xf32, #tpu.memory_space<vmem>>, vector<1x48xf32>
    %4 = vector.broadcast %3 : vector<1x48xf32> to vector<64x48xf32>
    %5 = arith.mulf %2, %4 : vector<64x48xf32>
    %c0_5 = arith.constant 0 : index
    %c0_6 = arith.constant 0 : index
    %6 = vector.load %arg4[%c0_5, %c0_6] : memref<1x48xf32, #tpu.memory_space<vmem>>, vector<1x48xf32>
    %7 = vector.broadcast %6 : vector<1x48xf32> to vector<64x48xf32>
    %8 = arith.addf %5, %7 : vector<64x48xf32>
    %cst_7 = arith.constant 0.000000e+00 : f32
    %9 = vector.broadcast %cst_7 : f32 to vector<64x48xf32>
    %10 = arith.maximumf %8, %9 : vector<64x48xf32>
    %11 = arith.truncf %10 : vector<64x48xf32> to vector<64x48xbf16>
    %c0_8 = arith.constant 0 : index
    %c0_9 = arith.constant 0 : index
    %12 = vector.load %arg5[%c0_8, %c0_9] : memref<64x48xbf16, #tpu.memory_space<vmem>>, vector<64x48xbf16>
    tpu.vector_store %arg5[%c0_8, %c0_9], %11 {strides = array<i32>} : memref<64x48xbf16, #tpu.memory_space<vmem>>, vector<64x48xbf16>,
    return
  }
  func.func @transform_0(%arg0: i32) -> (i32, i32) {
    %c0_i32 = arith.constant 0 : i32
    %c0_i32_0 = arith.constant 0 : i32
    return %arg0, %c0_i32 : i32, i32
  }
  func.func @transform_1(%arg0: i32) -> (i32, i32) {
    %c0_i32 = arith.constant 0 : i32
    %c0_i32_0 = arith.constant 0 : i32
    %c0_i32_1 = arith.constant 0 : i32
    return %c0_i32, %c0_i32_0 : i32, i32
  }
  func.func @transform_2(%arg0: i32) -> (i32, i32) {
    %c0_i32 = arith.constant 0 : i32
    %c0_i32_0 = arith.constant 0 : i32
    %c0_i32_1 = arith.constant 0 : i32
    return %c0_i32, %c0_i32_0 : i32, i32
  }
  func.func @transform_3(%arg0: i32) -> (i32, i32) {
    %c0_i32 = arith.constant 0 : i32
    %c0_i32_0 = arith.constant 0 : i32
    %c0_i32_1 = arith.constant 0 : i32
    return %c0_i32, %c0_i32_0 : i32, i32
  }
  func.func @transform_4(%arg0: i32) -> (i32, i32) {
    %c0_i32 = arith.constant 0 : i32
    %c0_i32_0 = arith.constant 0 : i32
    return %arg0, %c0_i32 : i32, i32
  }
}

module attributes {stable_mosaic.version = 11 : i64} {
  func.func @_nb_kernel(%arg0: i32, %arg1: memref<64x1xi32, #tpu.memory_space<vmem>>, %arg2: memref<1x64x64xbf16, #tpu.memory_space<vmem>>, %arg3: memref<768x64xbf16, #tpu.memory_space<vmem>>, %arg4: memref<6x64xf32, #tpu.memory_space<vmem>>, %arg5: memref<1x64x64xbf16, #tpu.memory_space<vmem>>) attributes {dimension_semantics = [#tpu.dimension_semantics<parallel>], iteration_bounds = array<i64: 2>, scalar_prefetch = 0 : i64, scratch_operands = 0 : i64, tpu.core_type = #tpu.core_type<tc>, window_params = [{pipeline_mode = #tpu.pipeline_mode<synchronous>, transform_indices = @transform_0, window_bounds = array<i64: 64, 1>}, {transform_indices = @transform_1, window_bounds = array<i64: 1, 64, 64>}, {pipeline_mode = #tpu.pipeline_mode<synchronous>, transform_indices = @transform_2, window_bounds = array<i64: 768, 64>}, {pipeline_mode = #tpu.pipeline_mode<synchronous>, transform_indices = @transform_3, window_bounds = array<i64: 6, 64>}, {transform_indices = @transform_4, window_bounds = array<i64: 1, 64, 64>}]} {
    %c0 = arith.constant 0 : index
    %c0_0 = arith.constant 0 : index
    %c0_1 = arith.constant 0 : index
    %0 = vector.load %arg2[%c0, %c0_0, %c0_1] : memref<1x64x64xbf16, #tpu.memory_space<vmem>>, vector<1x64x64xbf16>
    %1 = vector.shape_cast %0 : vector<1x64x64xbf16> to vector<64x64xbf16>
    %c0_2 = arith.constant 0 : index
    %c0_3 = arith.constant 0 : index
    %2 = vector.load %arg1[%c0_2, %c0_3] : memref<64x1xi32, #tpu.memory_space<vmem>>, vector<64x1xi32>
    %c0_4 = arith.constant 0 : index
    %c0_5 = arith.constant 0 : index
    %3 = vector.load %arg4[%c0_4, %c0_5] : memref<6x64xf32, #tpu.memory_space<vmem>>, vector<1x64xf32>
    %c1 = arith.constant 1 : index
    %c0_6 = arith.constant 0 : index
    %4 = vector.load %arg4[%c1, %c0_6] : memref<6x64xf32, #tpu.memory_space<vmem>>, vector<1x64xf32>
    %c2 = arith.constant 2 : index
    %c0_7 = arith.constant 0 : index
    %5 = vector.load %arg4[%c2, %c0_7] : memref<6x64xf32, #tpu.memory_space<vmem>>, vector<1x64xf32>
    %c3 = arith.constant 3 : index
    %c0_8 = arith.constant 0 : index
    %6 = vector.load %arg4[%c3, %c0_8] : memref<6x64xf32, #tpu.memory_space<vmem>>, vector<1x64xf32>
    %c4 = arith.constant 4 : index
    %c0_9 = arith.constant 0 : index
    %7 = vector.load %arg4[%c4, %c0_9] : memref<6x64xf32, #tpu.memory_space<vmem>>, vector<1x64xf32>
    %c5 = arith.constant 5 : index
    %c0_10 = arith.constant 0 : index
    %8 = vector.load %arg4[%c5, %c0_10] : memref<6x64xf32, #tpu.memory_space<vmem>>, vector<1x64xf32>
    %cst = arith.constant 0.000000e+00 : bf16
    %9 = vector.broadcast %cst : bf16 to vector<8x64xbf16>
    %10 = vector.extract_strided_slice %1 {offsets = [0, 0], sizes = [56, 64], strides = [1, 1]} : vector<64x64xbf16> to vector<56x64xbf16>
    %11 = tpu.concatenate %9, %10 in 0 : vector<8x64xbf16>, vector<56x64xbf16> -> vector<64x64xbf16>
    %c0_11 = arith.constant 0 : index
    %c0_12 = arith.constant 0 : index
    %12 = vector.load %arg3[%c0_11, %c0_12] : memref<768x64xbf16, #tpu.memory_space<vmem>>, vector<64x64xbf16>
    %cst_13 = arith.constant dense<0.000000e+00> : vector<64x64xf32>
    %13 = tpu.matmul %11, %12, %cst_13 {dimension_numbers = #tpu.dot_dimension_numbers<[1], [0], [0], [1], [0, 0, 1, 1], [], []>} : vector<64x64xbf16>, vector<64x64xbf16>, vector<64x64xf32> -> vector<64x64xf32>
    %c64 = arith.constant 64 : index
    %c0_14 = arith.constant 0 : index
    %14 = vector.load %arg3[%c64, %c0_14] : memref<768x64xbf16, #tpu.memory_space<vmem>>, vector<64x64xbf16>
    %cst_15 = arith.constant dense<0.000000e+00> : vector<64x64xf32>
    %15 = tpu.matmul %1, %14, %cst_15 {dimension_numbers = #tpu.dot_dimension_numbers<[1], [0], [0], [1], [0, 0, 1, 1], [], []>} : vector<64x64xbf16>, vector<64x64xbf16>, vector<64x64xf32> -> vector<64x64xf32>
    %16 = arith.addf %13, %15 : vector<64x64xf32>
    %17 = vector.extract_strided_slice %1 {offsets = [8, 0], sizes = [56, 64], strides = [1, 1]} : vector<64x64xbf16> to vector<56x64xbf16>
    %cst_16 = arith.constant 0.000000e+00 : bf16
    %18 = vector.broadcast %cst_16 : bf16 to vector<8x64xbf16>
    %19 = tpu.concatenate %17, %18 in 0 : vector<56x64xbf16>, vector<8x64xbf16> -> vector<64x64xbf16>
    %c128 = arith.constant 128 : index
    %c0_17 = arith.constant 0 : index
    %20 = vector.load %arg3[%c128, %c0_17] : memref<768x64xbf16, #tpu.memory_space<vmem>>, vector<64x64xbf16>
    %cst_18 = arith.constant dense<0.000000e+00> : vector<64x64xf32>
    %21 = tpu.matmul %19, %20, %cst_18 {dimension_numbers = #tpu.dot_dimension_numbers<[1], [0], [0], [1], [0, 0, 1, 1], [], []>} : vector<64x64xbf16>, vector<64x64xbf16>, vector<64x64xf32> -> vector<64x64xf32>
    %22 = arith.addf %16, %21 : vector<64x64xf32>
    %23 = vector.broadcast %3 : vector<1x64xf32> to vector<64x64xf32>
    %24 = arith.addf %22, %23 : vector<64x64xf32>
    %cst_19 = arith.constant 0.000000e+00 : f32
    %25 = vector.broadcast %cst_19 : f32 to vector<64x64xf32>
    %26 = arith.maximumf %24, %25 : vector<64x64xf32>
    %27 = arith.truncf %26 : vector<64x64xf32> to vector<64x64xbf16>
    %cst_20 = arith.constant 0.000000e+00 : bf16
    %28 = vector.broadcast %cst_20 : bf16 to vector<1x64xbf16>
    %29 = vector.extract_strided_slice %27 {offsets = [0, 0], sizes = [63, 64], strides = [1, 1]} : vector<64x64xbf16> to vector<63x64xbf16>
    %30 = tpu.concatenate %28, %29 in 0 : vector<1x64xbf16>, vector<63x64xbf16> -> vector<64x64xbf16>
    %c1_i32 = arith.constant 1 : i32
    %31 = vector.broadcast %c1_i32 : i32 to vector<64x1xi32>
    %32 = arith.cmpi sge, %2, %31 : vector<64x1xi32>
    %cst_21 = arith.constant 0.000000e+00 : bf16
    %33 = vector.broadcast %cst_21 : bf16 to vector<64x64xbf16>
    %34 = vector.shape_cast %32 : vector<64x1xi1> to vector<64x1xi1>
    %35 = vector.broadcast %34 : vector<64x1xi1> to vector<64x64xi1>
    %36 = arith.select %35, %30, %33 : vector<64x64xi1>, vector<64x64xbf16>
    %c192 = arith.constant 192 : index
    %c0_22 = arith.constant 0 : index
    %37 = vector.load %arg3[%c192, %c0_22] : memref<768x64xbf16, #tpu.memory_space<vmem>>, vector<64x64xbf16>
    %cst_23 = arith.constant dense<0.000000e+00> : vector<64x64xf32>
    %38 = tpu.matmul %36, %37, %cst_23 {dimension_numbers = #tpu.dot_dimension_numbers<[1], [0], [0], [1], [0, 0, 1, 1], [], []>} : vector<64x64xbf16>, vector<64x64xbf16>, vector<64x64xf32> -> vector<64x64xf32>
    %c256 = arith.constant 256 : index
    %c0_24 = arith.constant 0 : index
    %39 = vector.load %arg3[%c256, %c0_24] : memref<768x64xbf16, #tpu.memory_space<vmem>>, vector<64x64xbf16>
    %cst_25 = arith.constant dense<0.000000e+00> : vector<64x64xf32>
    %40 = tpu.matmul %27, %39, %cst_25 {dimension_numbers = #tpu.dot_dimension_numbers<[1], [0], [0], [1], [0, 0, 1, 1], [], []>} : vector<64x64xbf16>, vector<64x64xbf16>, vector<64x64xf32> -> vector<64x64xf32>
    %41 = arith.addf %38, %40 : vector<64x64xf32>
    %42 = vector.extract_strided_slice %27 {offsets = [1, 0], sizes = [63, 64], strides = [1, 1]} : vector<64x64xbf16> to vector<63x64xbf16>
    %cst_26 = arith.constant 0.000000e+00 : bf16
    %43 = vector.broadcast %cst_26 : bf16 to vector<1x64xbf16>
    %44 = tpu.concatenate %42, %43 in 0 : vector<63x64xbf16>, vector<1x64xbf16> -> vector<64x64xbf16>
    %c7_i32 = arith.constant 7 : i32
    %45 = vector.broadcast %c7_i32 : i32 to vector<64x1xi32>
    %46 = arith.cmpi slt, %2, %45 : vector<64x1xi32>
    %cst_27 = arith.constant 0.000000e+00 : bf16
    %47 = vector.broadcast %cst_27 : bf16 to vector<64x64xbf16>
    %48 = vector.shape_cast %46 : vector<64x1xi1> to vector<64x1xi1>
    %49 = vector.broadcast %48 : vector<64x1xi1> to vector<64x64xi1>
    %50 = arith.select %49, %44, %47 : vector<64x64xi1>, vector<64x64xbf16>
    %c320 = arith.constant 320 : index
    %c0_28 = arith.constant 0 : index
    %51 = vector.load %arg3[%c320, %c0_28] : memref<768x64xbf16, #tpu.memory_space<vmem>>, vector<64x64xbf16>
    %cst_29 = arith.constant dense<0.000000e+00> : vector<64x64xf32>
    %52 = tpu.matmul %50, %51, %cst_29 {dimension_numbers = #tpu.dot_dimension_numbers<[1], [0], [0], [1], [0, 0, 1, 1], [], []>} : vector<64x64xbf16>, vector<64x64xbf16>, vector<64x64xf32> -> vector<64x64xf32>
    %53 = arith.addf %41, %52 : vector<64x64xf32>
    %54 = vector.broadcast %4 : vector<1x64xf32> to vector<64x64xf32>
    %55 = arith.mulf %53, %54 : vector<64x64xf32>
    %56 = vector.broadcast %5 : vector<1x64xf32> to vector<64x64xf32>
    %57 = arith.addf %55, %56 : vector<64x64xf32>
    %cst_30 = arith.constant 0.000000e+00 : f32
    %58 = vector.broadcast %cst_30 : f32 to vector<64x64xf32>
    %59 = arith.maximumf %57, %58 : vector<64x64xf32>
    %60 = arith.truncf %59 : vector<64x64xf32> to vector<64x64xbf16>
    %cst_31 = arith.constant 0.000000e+00 : bf16
    %61 = vector.broadcast %cst_31 : bf16 to vector<8x64xbf16>
    %62 = vector.extract_strided_slice %60 {offsets = [0, 0], sizes = [56, 64], strides = [1, 1]} : vector<64x64xbf16> to vector<56x64xbf16>
    %63 = tpu.concatenate %61, %62 in 0 : vector<8x64xbf16>, vector<56x64xbf16> -> vector<64x64xbf16>
    %c384 = arith.constant 384 : index
    %c0_32 = arith.constant 0 : index
    %64 = vector.load %arg3[%c384, %c0_32] : memref<768x64xbf16, #tpu.memory_space<vmem>>, vector<64x64xbf16>
    %cst_33 = arith.constant dense<0.000000e+00> : vector<64x64xf32>
    %65 = tpu.matmul %63, %64, %cst_33 {dimension_numbers = #tpu.dot_dimension_numbers<[1], [0], [0], [1], [0, 0, 1, 1], [], []>} : vector<64x64xbf16>, vector<64x64xbf16>, vector<64x64xf32> -> vector<64x64xf32>
    %c448 = arith.constant 448 : index
    %c0_34 = arith.constant 0 : index
    %66 = vector.load %arg3[%c448, %c0_34] : memref<768x64xbf16, #tpu.memory_space<vmem>>, vector<64x64xbf16>
    %cst_35 = arith.constant dense<0.000000e+00> : vector<64x64xf32>
    %67 = tpu.matmul %60, %66, %cst_35 {dimension_numbers = #tpu.dot_dimension_numbers<[1], [0], [0], [1], [0, 0, 1, 1], [], []>} : vector<64x64xbf16>, vector<64x64xbf16>, vector<64x64xf32> -> vector<64x64xf32>
    %68 = arith.addf %65, %67 : vector<64x64xf32>
    %69 = vector.extract_strided_slice %60 {offsets = [8, 0], sizes = [56, 64], strides = [1, 1]} : vector<64x64xbf16> to vector<56x64xbf16>
    %cst_36 = arith.constant 0.000000e+00 : bf16
    %70 = vector.broadcast %cst_36 : bf16 to vector<8x64xbf16>
    %71 = tpu.concatenate %69, %70 in 0 : vector<56x64xbf16>, vector<8x64xbf16> -> vector<64x64xbf16>
    %c512 = arith.constant 512 : index
    %c0_37 = arith.constant 0 : index
    %72 = vector.load %arg3[%c512, %c0_37] : memref<768x64xbf16, #tpu.memory_space<vmem>>, vector<64x64xbf16>
    %cst_38 = arith.constant dense<0.000000e+00> : vector<64x64xf32>
    %73 = tpu.matmul %71, %72, %cst_38 {dimension_numbers = #tpu.dot_dimension_numbers<[1], [0], [0], [1], [0, 0, 1, 1], [], []>} : vector<64x64xbf16>, vector<64x64xbf16>, vector<64x64xf32> -> vector<64x64xf32>
    %74 = arith.addf %68, %73 : vector<64x64xf32>
    %75 = vector.broadcast %6 : vector<1x64xf32> to vector<64x64xf32>
    %76 = arith.addf %74, %75 : vector<64x64xf32>
    %cst_39 = arith.constant 0.000000e+00 : f32
    %77 = vector.broadcast %cst_39 : f32 to vector<64x64xf32>
    %78 = arith.maximumf %76, %77 : vector<64x64xf32>
    %79 = arith.truncf %78 : vector<64x64xf32> to vector<64x64xbf16>
    %cst_40 = arith.constant 0.000000e+00 : bf16
    %80 = vector.broadcast %cst_40 : bf16 to vector<1x64xbf16>
    %81 = vector.extract_strided_slice %79 {offsets = [0, 0], sizes = [63, 64], strides = [1, 1]} : vector<64x64xbf16> to vector<63x64xbf16>
    %82 = tpu.concatenate %80, %81 in 0 : vector<1x64xbf16>, vector<63x64xbf16> -> vector<64x64xbf16>
    %c1_i32_41 = arith.constant 1 : i32
    %83 = vector.broadcast %c1_i32_41 : i32 to vector<64x1xi32>
    %84 = arith.cmpi sge, %2, %83 : vector<64x1xi32>
    %cst_42 = arith.constant 0.000000e+00 : bf16
    %85 = vector.broadcast %cst_42 : bf16 to vector<64x64xbf16>
    %86 = vector.shape_cast %84 : vector<64x1xi1> to vector<64x1xi1>
    %87 = vector.broadcast %86 : vector<64x1xi1> to vector<64x64xi1>
    %88 = arith.select %87, %82, %85 : vector<64x64xi1>, vector<64x64xbf16>
    %c576 = arith.constant 576 : index
    %c0_43 = arith.constant 0 : index
    %89 = vector.load %arg3[%c576, %c0_43] : memref<768x64xbf16, #tpu.memory_space<vmem>>, vector<64x64xbf16>
    %cst_44 = arith.constant dense<0.000000e+00> : vector<64x64xf32>
    %90 = tpu.matmul %88, %89, %cst_44 {dimension_numbers = #tpu.dot_dimension_numbers<[1], [0], [0], [1], [0, 0, 1, 1], [], []>} : vector<64x64xbf16>, vector<64x64xbf16>, vector<64x64xf32> -> vector<64x64xf32>
    %c640 = arith.constant 640 : index
    %c0_45 = arith.constant 0 : index
    %91 = vector.load %arg3[%c640, %c0_45] : memref<768x64xbf16, #tpu.memory_space<vmem>>, vector<64x64xbf16>
    %cst_46 = arith.constant dense<0.000000e+00> : vector<64x64xf32>
    %92 = tpu.matmul %79, %91, %cst_46 {dimension_numbers = #tpu.dot_dimension_numbers<[1], [0], [0], [1], [0, 0, 1, 1], [], []>} : vector<64x64xbf16>, vector<64x64xbf16>, vector<64x64xf32> -> vector<64x64xf32>
    %93 = arith.addf %90, %92 : vector<64x64xf32>
    %94 = vector.extract_strided_slice %79 {offsets = [1, 0], sizes = [63, 64], strides = [1, 1]} : vector<64x64xbf16> to vector<63x64xbf16>
    %cst_47 = arith.constant 0.000000e+00 : bf16
    %95 = vector.broadcast %cst_47 : bf16 to vector<1x64xbf16>
    %96 = tpu.concatenate %94, %95 in 0 : vector<63x64xbf16>, vector<1x64xbf16> -> vector<64x64xbf16>
    %c7_i32_48 = arith.constant 7 : i32
    %97 = vector.broadcast %c7_i32_48 : i32 to vector<64x1xi32>
    %98 = arith.cmpi slt, %2, %97 : vector<64x1xi32>
    %cst_49 = arith.constant 0.000000e+00 : bf16
    %99 = vector.broadcast %cst_49 : bf16 to vector<64x64xbf16>
    %100 = vector.shape_cast %98 : vector<64x1xi1> to vector<64x1xi1>
    %101 = vector.broadcast %100 : vector<64x1xi1> to vector<64x64xi1>
    %102 = arith.select %101, %96, %99 : vector<64x64xi1>, vector<64x64xbf16>
    %c704 = arith.constant 704 : index
    %c0_50 = arith.constant 0 : index
    %103 = vector.load %arg3[%c704, %c0_50] : memref<768x64xbf16, #tpu.memory_space<vmem>>, vector<64x64xbf16>
    %cst_51 = arith.constant dense<0.000000e+00> : vector<64x64xf32>
    %104 = tpu.matmul %102, %103, %cst_51 {dimension_numbers = #tpu.dot_dimension_numbers<[1], [0], [0], [1], [0, 0, 1, 1], [], []>} : vector<64x64xbf16>, vector<64x64xbf16>, vector<64x64xf32> -> vector<64x64xf32>
    %105 = arith.addf %93, %104 : vector<64x64xf32>
    %106 = vector.broadcast %7 : vector<1x64xf32> to vector<64x64xf32>
    %107 = arith.mulf %105, %106 : vector<64x64xf32>
    %108 = vector.broadcast %8 : vector<1x64xf32> to vector<64x64xf32>
    %109 = arith.addf %107, %108 : vector<64x64xf32>
    %110 = arith.extf %1 : vector<64x64xbf16> to vector<64x64xf32>
    %111 = arith.addf %109, %110 : vector<64x64xf32>
    %cst_52 = arith.constant 0.000000e+00 : f32
    %112 = vector.broadcast %cst_52 : f32 to vector<64x64xf32>
    %113 = arith.maximumf %111, %112 : vector<64x64xf32>
    %114 = arith.truncf %113 : vector<64x64xf32> to vector<64x64xbf16>
    %c0_53 = arith.constant 0 : index
    %c0_54 = arith.constant 0 : index
    %c0_55 = arith.constant 0 : index
    %115 = vector.load %arg5[%c0_53, %c0_54, %c0_55] : memref<1x64x64xbf16, #tpu.memory_space<vmem>>, vector<1x64x64xbf16>
    %116 = vector.shape_cast %115 : vector<1x64x64xbf16> to vector<64x64xbf16>
    %117 = vector.shape_cast %114 : vector<64x64xbf16> to vector<1x64x64xbf16>
    tpu.vector_store %arg5[%c0_53, %c0_54, %c0_55], %117 {strides = array<i32>} : memref<1x64x64xbf16, #tpu.memory_space<vmem>>, vector<1x64x64xbf16>,
    return
  }
  func.func @transform_0(%arg0: i32) -> (i32, i32) {
    %c0_i32 = arith.constant 0 : i32
    %c0_i32_0 = arith.constant 0 : i32
    %c0_i32_1 = arith.constant 0 : i32
    return %c0_i32, %c0_i32_0 : i32, i32
  }
  func.func @transform_1(%arg0: i32) -> (i32, i32, i32) {
    %c0_i32 = arith.constant 0 : i32
    %c0_i32_0 = arith.constant 0 : i32
    %c0_i32_1 = arith.constant 0 : i32
    return %arg0, %c0_i32, %c0_i32_0 : i32, i32, i32
  }
  func.func @transform_2(%arg0: i32) -> (i32, i32) {
    %c0_i32 = arith.constant 0 : i32
    %c0_i32_0 = arith.constant 0 : i32
    %c0_i32_1 = arith.constant 0 : i32
    return %c0_i32, %c0_i32_0 : i32, i32
  }
  func.func @transform_3(%arg0: i32) -> (i32, i32) {
    %c0_i32 = arith.constant 0 : i32
    %c0_i32_0 = arith.constant 0 : i32
    %c0_i32_1 = arith.constant 0 : i32
    return %c0_i32, %c0_i32_0 : i32, i32
  }
  func.func @transform_4(%arg0: i32) -> (i32, i32, i32) {
    %c0_i32 = arith.constant 0 : i32
    %c0_i32_0 = arith.constant 0 : i32
    %c0_i32_1 = arith.constant 0 : i32
    return %arg0, %c0_i32, %c0_i32_0 : i32, i32, i32
  }
}

module attributes {stable_mosaic.version = 11 : i64} {
  func.func @_mm_kernel(%arg0: i32, %arg1: memref<32x576xbf16, #tpu.memory_space<vmem>>, %arg2: memref<576x64xbf16, #tpu.memory_space<vmem>>, %arg3: memref<1x64xf32, #tpu.memory_space<vmem>>, %arg4: memref<1x64xf32, #tpu.memory_space<vmem>>, %arg5: memref<32x64xbf16, #tpu.memory_space<vmem>>) attributes {dimension_semantics = [#tpu.dimension_semantics<parallel>], iteration_bounds = array<i64: 1>, scalar_prefetch = 0 : i64, scratch_operands = 0 : i64, tpu.core_type = #tpu.core_type<tc>, window_params = [{transform_indices = @transform_0, window_bounds = array<i64: 32, 576>}, {pipeline_mode = #tpu.pipeline_mode<synchronous>, transform_indices = @transform_1, window_bounds = array<i64: 576, 64>}, {pipeline_mode = #tpu.pipeline_mode<synchronous>, transform_indices = @transform_2, window_bounds = array<i64: 1, 64>}, {pipeline_mode = #tpu.pipeline_mode<synchronous>, transform_indices = @transform_3, window_bounds = array<i64: 1, 64>}, {transform_indices = @transform_4, window_bounds = array<i64: 32, 64>}]} {
    %c0 = arith.constant 0 : index
    %c0_0 = arith.constant 0 : index
    %0 = vector.load %arg1[%c0, %c0_0] : memref<32x576xbf16, #tpu.memory_space<vmem>>, vector<32x576xbf16>
    %c0_1 = arith.constant 0 : index
    %c0_2 = arith.constant 0 : index
    %1 = vector.load %arg2[%c0_1, %c0_2] : memref<576x64xbf16, #tpu.memory_space<vmem>>, vector<576x64xbf16>
    %cst = arith.constant dense<0.000000e+00> : vector<32x64xf32>
    %2 = tpu.matmul %0, %1, %cst {dimension_numbers = #tpu.dot_dimension_numbers<[1], [0], [0], [1], [0, 0, 1, 1], [], []>} : vector<32x576xbf16>, vector<576x64xbf16>, vector<32x64xf32> -> vector<32x64xf32>
    %c0_3 = arith.constant 0 : index
    %c0_4 = arith.constant 0 : index
    %3 = vector.load %arg3[%c0_3, %c0_4] : memref<1x64xf32, #tpu.memory_space<vmem>>, vector<1x64xf32>
    %4 = vector.broadcast %3 : vector<1x64xf32> to vector<32x64xf32>
    %5 = arith.mulf %2, %4 : vector<32x64xf32>
    %c0_5 = arith.constant 0 : index
    %c0_6 = arith.constant 0 : index
    %6 = vector.load %arg4[%c0_5, %c0_6] : memref<1x64xf32, #tpu.memory_space<vmem>>, vector<1x64xf32>
    %7 = vector.broadcast %6 : vector<1x64xf32> to vector<32x64xf32>
    %8 = arith.addf %5, %7 : vector<32x64xf32>
    %cst_7 = arith.constant 0.000000e+00 : f32
    %9 = vector.broadcast %cst_7 : f32 to vector<32x64xf32>
    %10 = arith.maximumf %8, %9 : vector<32x64xf32>
    %11 = arith.truncf %10 : vector<32x64xf32> to vector<32x64xbf16>
    %c0_8 = arith.constant 0 : index
    %c0_9 = arith.constant 0 : index
    %12 = vector.load %arg5[%c0_8, %c0_9] : memref<32x64xbf16, #tpu.memory_space<vmem>>, vector<32x64xbf16>
    tpu.vector_store %arg5[%c0_8, %c0_9], %11 {strides = array<i32>} : memref<32x64xbf16, #tpu.memory_space<vmem>>, vector<32x64xbf16>,
    return
  }
  func.func @transform_0(%arg0: i32) -> (i32, i32) {
    %c0_i32 = arith.constant 0 : i32
    %c0_i32_0 = arith.constant 0 : i32
    return %arg0, %c0_i32 : i32, i32
  }
  func.func @transform_1(%arg0: i32) -> (i32, i32) {
    %c0_i32 = arith.constant 0 : i32
    %c0_i32_0 = arith.constant 0 : i32
    %c0_i32_1 = arith.constant 0 : i32
    return %c0_i32, %c0_i32_0 : i32, i32
  }
  func.func @transform_2(%arg0: i32) -> (i32, i32) {
    %c0_i32 = arith.constant 0 : i32
    %c0_i32_0 = arith.constant 0 : i32
    %c0_i32_1 = arith.constant 0 : i32
    return %c0_i32, %c0_i32_0 : i32, i32
  }
  func.func @transform_3(%arg0: i32) -> (i32, i32) {
    %c0_i32 = arith.constant 0 : i32
    %c0_i32_0 = arith.constant 0 : i32
    %c0_i32_1 = arith.constant 0 : i32
    return %c0_i32, %c0_i32_0 : i32, i32
  }
  func.func @transform_4(%arg0: i32) -> (i32, i32) {
    %c0_i32 = arith.constant 0 : i32
    %c0_i32_0 = arith.constant 0 : i32
    return %arg0, %c0_i32 : i32, i32
  }
}

module attributes {stable_mosaic.version = 11 : i64} {
  func.func @_nb_kernel(%arg0: i32, %arg1: memref<16x1xi32, #tpu.memory_space<vmem>>, %arg2: memref<1x16x128xbf16, #tpu.memory_space<vmem>>, %arg3: memref<1536x128xbf16, #tpu.memory_space<vmem>>, %arg4: memref<6x128xf32, #tpu.memory_space<vmem>>, %arg5: memref<1x16x128xbf16, #tpu.memory_space<vmem>>) attributes {dimension_semantics = [#tpu.dimension_semantics<parallel>], iteration_bounds = array<i64: 2>, scalar_prefetch = 0 : i64, scratch_operands = 0 : i64, tpu.core_type = #tpu.core_type<tc>, window_params = [{pipeline_mode = #tpu.pipeline_mode<synchronous>, transform_indices = @transform_0, window_bounds = array<i64: 16, 1>}, {transform_indices = @transform_1, window_bounds = array<i64: 1, 16, 128>}, {pipeline_mode = #tpu.pipeline_mode<synchronous>, transform_indices = @transform_2, window_bounds = array<i64: 1536, 128>}, {pipeline_mode = #tpu.pipeline_mode<synchronous>, transform_indices = @transform_3, window_bounds = array<i64: 6, 128>}, {transform_indices = @transform_4, window_bounds = array<i64: 1, 16, 128>}]} {
    %c0 = arith.constant 0 : index
    %c0_0 = arith.constant 0 : index
    %c0_1 = arith.constant 0 : index
    %0 = vector.load %arg2[%c0, %c0_0, %c0_1] : memref<1x16x128xbf16, #tpu.memory_space<vmem>>, vector<1x16x128xbf16>
    %1 = vector.shape_cast %0 : vector<1x16x128xbf16> to vector<16x128xbf16>
    %c0_2 = arith.constant 0 : index
    %c0_3 = arith.constant 0 : index
    %2 = vector.load %arg1[%c0_2, %c0_3] : memref<16x1xi32, #tpu.memory_space<vmem>>, vector<16x1xi32>
    %c0_4 = arith.constant 0 : index
    %c0_5 = arith.constant 0 : index
    %3 = vector.load %arg4[%c0_4, %c0_5] : memref<6x128xf32, #tpu.memory_space<vmem>>, vector<1x128xf32>
    %c1 = arith.constant 1 : index
    %c0_6 = arith.constant 0 : index
    %4 = vector.load %arg4[%c1, %c0_6] : memref<6x128xf32, #tpu.memory_space<vmem>>, vector<1x128xf32>
    %c2 = arith.constant 2 : index
    %c0_7 = arith.constant 0 : index
    %5 = vector.load %arg4[%c2, %c0_7] : memref<6x128xf32, #tpu.memory_space<vmem>>, vector<1x128xf32>
    %c3 = arith.constant 3 : index
    %c0_8 = arith.constant 0 : index
    %6 = vector.load %arg4[%c3, %c0_8] : memref<6x128xf32, #tpu.memory_space<vmem>>, vector<1x128xf32>
    %c4 = arith.constant 4 : index
    %c0_9 = arith.constant 0 : index
    %7 = vector.load %arg4[%c4, %c0_9] : memref<6x128xf32, #tpu.memory_space<vmem>>, vector<1x128xf32>
    %c5 = arith.constant 5 : index
    %c0_10 = arith.constant 0 : index
    %8 = vector.load %arg4[%c5, %c0_10] : memref<6x128xf32, #tpu.memory_space<vmem>>, vector<1x128xf32>
    %cst = arith.constant 0.000000e+00 : bf16
    %9 = vector.broadcast %cst : bf16 to vector<4x128xbf16>
    %10 = vector.extract_strided_slice %1 {offsets = [0, 0], sizes = [12, 128], strides = [1, 1]} : vector<16x128xbf16> to vector<12x128xbf16>
    %11 = tpu.concatenate %9, %10 in 0 : vector<4x128xbf16>, vector<12x128xbf16> -> vector<16x128xbf16>
    %c0_11 = arith.constant 0 : index
    %c0_12 = arith.constant 0 : index
    %12 = vector.load %arg3[%c0_11, %c0_12] : memref<1536x128xbf16, #tpu.memory_space<vmem>>, vector<128x128xbf16>
    %cst_13 = arith.constant dense<0.000000e+00> : vector<16x128xf32>
    %13 = tpu.matmul %11, %12, %cst_13 {dimension_numbers = #tpu.dot_dimension_numbers<[1], [0], [0], [1], [0, 0, 1, 1], [], []>} : vector<16x128xbf16>, vector<128x128xbf16>, vector<16x128xf32> -> vector<16x128xf32>
    %c128 = arith.constant 128 : index
    %c0_14 = arith.constant 0 : index
    %14 = vector.load %arg3[%c128, %c0_14] : memref<1536x128xbf16, #tpu.memory_space<vmem>>, vector<128x128xbf16>
    %cst_15 = arith.constant dense<0.000000e+00> : vector<16x128xf32>
    %15 = tpu.matmul %1, %14, %cst_15 {dimension_numbers = #tpu.dot_dimension_numbers<[1], [0], [0], [1], [0, 0, 1, 1], [], []>} : vector<16x128xbf16>, vector<128x128xbf16>, vector<16x128xf32> -> vector<16x128xf32>
    %16 = arith.addf %13, %15 : vector<16x128xf32>
    %17 = vector.extract_strided_slice %1 {offsets = [4, 0], sizes = [12, 128], strides = [1, 1]} : vector<16x128xbf16> to vector<12x128xbf16>
    %cst_16 = arith.constant 0.000000e+00 : bf16
    %18 = vector.broadcast %cst_16 : bf16 to vector<4x128xbf16>
    %19 = tpu.concatenate %17, %18 in 0 : vector<12x128xbf16>, vector<4x128xbf16> -> vector<16x128xbf16>
    %c256 = arith.constant 256 : index
    %c0_17 = arith.constant 0 : index
    %20 = vector.load %arg3[%c256, %c0_17] : memref<1536x128xbf16, #tpu.memory_space<vmem>>, vector<128x128xbf16>
    %cst_18 = arith.constant dense<0.000000e+00> : vector<16x128xf32>
    %21 = tpu.matmul %19, %20, %cst_18 {dimension_numbers = #tpu.dot_dimension_numbers<[1], [0], [0], [1], [0, 0, 1, 1], [], []>} : vector<16x128xbf16>, vector<128x128xbf16>, vector<16x128xf32> -> vector<16x128xf32>
    %22 = arith.addf %16, %21 : vector<16x128xf32>
    %23 = vector.broadcast %3 : vector<1x128xf32> to vector<16x128xf32>
    %24 = arith.addf %22, %23 : vector<16x128xf32>
    %cst_19 = arith.constant 0.000000e+00 : f32
    %25 = vector.broadcast %cst_19 : f32 to vector<16x128xf32>
    %26 = arith.maximumf %24, %25 : vector<16x128xf32>
    %27 = arith.truncf %26 : vector<16x128xf32> to vector<16x128xbf16>
    %cst_20 = arith.constant 0.000000e+00 : bf16
    %28 = vector.broadcast %cst_20 : bf16 to vector<1x128xbf16>
    %29 = vector.extract_strided_slice %27 {offsets = [0, 0], sizes = [15, 128], strides = [1, 1]} : vector<16x128xbf16> to vector<15x128xbf16>
    %30 = tpu.concatenate %28, %29 in 0 : vector<1x128xbf16>, vector<15x128xbf16> -> vector<16x128xbf16>
    %c1_i32 = arith.constant 1 : i32
    %31 = vector.broadcast %c1_i32 : i32 to vector<16x1xi32>
    %32 = arith.cmpi sge, %2, %31 : vector<16x1xi32>
    %cst_21 = arith.constant 0.000000e+00 : bf16
    %33 = vector.broadcast %cst_21 : bf16 to vector<16x128xbf16>
    %34 = vector.shape_cast %32 : vector<16x1xi1> to vector<16x1xi1>
    %35 = vector.broadcast %34 : vector<16x1xi1> to vector<16x128xi1>
    %36 = arith.select %35, %30, %33 : vector<16x128xi1>, vector<16x128xbf16>
    %c384 = arith.constant 384 : index
    %c0_22 = arith.constant 0 : index
    %37 = vector.load %arg3[%c384, %c0_22] : memref<1536x128xbf16, #tpu.memory_space<vmem>>, vector<128x128xbf16>
    %cst_23 = arith.constant dense<0.000000e+00> : vector<16x128xf32>
    %38 = tpu.matmul %36, %37, %cst_23 {dimension_numbers = #tpu.dot_dimension_numbers<[1], [0], [0], [1], [0, 0, 1, 1], [], []>} : vector<16x128xbf16>, vector<128x128xbf16>, vector<16x128xf32> -> vector<16x128xf32>
    %c512 = arith.constant 512 : index
    %c0_24 = arith.constant 0 : index
    %39 = vector.load %arg3[%c512, %c0_24] : memref<1536x128xbf16, #tpu.memory_space<vmem>>, vector<128x128xbf16>
    %cst_25 = arith.constant dense<0.000000e+00> : vector<16x128xf32>
    %40 = tpu.matmul %27, %39, %cst_25 {dimension_numbers = #tpu.dot_dimension_numbers<[1], [0], [0], [1], [0, 0, 1, 1], [], []>} : vector<16x128xbf16>, vector<128x128xbf16>, vector<16x128xf32> -> vector<16x128xf32>
    %41 = arith.addf %38, %40 : vector<16x128xf32>
    %42 = vector.extract_strided_slice %27 {offsets = [1, 0], sizes = [15, 128], strides = [1, 1]} : vector<16x128xbf16> to vector<15x128xbf16>
    %cst_26 = arith.constant 0.000000e+00 : bf16
    %43 = vector.broadcast %cst_26 : bf16 to vector<1x128xbf16>
    %44 = tpu.concatenate %42, %43 in 0 : vector<15x128xbf16>, vector<1x128xbf16> -> vector<16x128xbf16>
    %c3_i32 = arith.constant 3 : i32
    %45 = vector.broadcast %c3_i32 : i32 to vector<16x1xi32>
    %46 = arith.cmpi slt, %2, %45 : vector<16x1xi32>
    %cst_27 = arith.constant 0.000000e+00 : bf16
    %47 = vector.broadcast %cst_27 : bf16 to vector<16x128xbf16>
    %48 = vector.shape_cast %46 : vector<16x1xi1> to vector<16x1xi1>
    %49 = vector.broadcast %48 : vector<16x1xi1> to vector<16x128xi1>
    %50 = arith.select %49, %44, %47 : vector<16x128xi1>, vector<16x128xbf16>
    %c640 = arith.constant 640 : index
    %c0_28 = arith.constant 0 : index
    %51 = vector.load %arg3[%c640, %c0_28] : memref<1536x128xbf16, #tpu.memory_space<vmem>>, vector<128x128xbf16>
    %cst_29 = arith.constant dense<0.000000e+00> : vector<16x128xf32>
    %52 = tpu.matmul %50, %51, %cst_29 {dimension_numbers = #tpu.dot_dimension_numbers<[1], [0], [0], [1], [0, 0, 1, 1], [], []>} : vector<16x128xbf16>, vector<128x128xbf16>, vector<16x128xf32> -> vector<16x128xf32>
    %53 = arith.addf %41, %52 : vector<16x128xf32>
    %54 = vector.broadcast %4 : vector<1x128xf32> to vector<16x128xf32>
    %55 = arith.mulf %53, %54 : vector<16x128xf32>
    %56 = vector.broadcast %5 : vector<1x128xf32> to vector<16x128xf32>
    %57 = arith.addf %55, %56 : vector<16x128xf32>
    %cst_30 = arith.constant 0.000000e+00 : f32
    %58 = vector.broadcast %cst_30 : f32 to vector<16x128xf32>
    %59 = arith.maximumf %57, %58 : vector<16x128xf32>
    %60 = arith.truncf %59 : vector<16x128xf32> to vector<16x128xbf16>
    %cst_31 = arith.constant 0.000000e+00 : bf16
    %61 = vector.broadcast %cst_31 : bf16 to vector<8x128xbf16>
    %62 = vector.extract_strided_slice %60 {offsets = [0, 0], sizes = [8, 128], strides = [1, 1]} : vector<16x128xbf16> to vector<8x128xbf16>
    %63 = tpu.concatenate %61, %62 in 0 : vector<8x128xbf16>, vector<8x128xbf16> -> vector<16x128xbf16>
    %c768 = arith.constant 768 : index
    %c0_32 = arith.constant 0 : index
    %64 = vector.load %arg3[%c768, %c0_32] : memref<1536x128xbf16, #tpu.memory_space<vmem>>, vector<128x128xbf16>
    %cst_33 = arith.constant dense<0.000000e+00> : vector<16x128xf32>
    %65 = tpu.matmul %63, %64, %cst_33 {dimension_numbers = #tpu.dot_dimension_numbers<[1], [0], [0], [1], [0, 0, 1, 1], [], []>} : vector<16x128xbf16>, vector<128x128xbf16>, vector<16x128xf32> -> vector<16x128xf32>
    %c896 = arith.constant 896 : index
    %c0_34 = arith.constant 0 : index
    %66 = vector.load %arg3[%c896, %c0_34] : memref<1536x128xbf16, #tpu.memory_space<vmem>>, vector<128x128xbf16>
    %cst_35 = arith.constant dense<0.000000e+00> : vector<16x128xf32>
    %67 = tpu.matmul %60, %66, %cst_35 {dimension_numbers = #tpu.dot_dimension_numbers<[1], [0], [0], [1], [0, 0, 1, 1], [], []>} : vector<16x128xbf16>, vector<128x128xbf16>, vector<16x128xf32> -> vector<16x128xf32>
    %68 = arith.addf %65, %67 : vector<16x128xf32>
    %69 = vector.extract_strided_slice %60 {offsets = [8, 0], sizes = [8, 128], strides = [1, 1]} : vector<16x128xbf16> to vector<8x128xbf16>
    %cst_36 = arith.constant 0.000000e+00 : bf16
    %70 = vector.broadcast %cst_36 : bf16 to vector<8x128xbf16>
    %71 = tpu.concatenate %69, %70 in 0 : vector<8x128xbf16>, vector<8x128xbf16> -> vector<16x128xbf16>
    %c1024 = arith.constant 1024 : index
    %c0_37 = arith.constant 0 : index
    %72 = vector.load %arg3[%c1024, %c0_37] : memref<1536x128xbf16, #tpu.memory_space<vmem>>, vector<128x128xbf16>
    %cst_38 = arith.constant dense<0.000000e+00> : vector<16x128xf32>
    %73 = tpu.matmul %71, %72, %cst_38 {dimension_numbers = #tpu.dot_dimension_numbers<[1], [0], [0], [1], [0, 0, 1, 1], [], []>} : vector<16x128xbf16>, vector<128x128xbf16>, vector<16x128xf32> -> vector<16x128xf32>
    %74 = arith.addf %68, %73 : vector<16x128xf32>
    %75 = vector.broadcast %6 : vector<1x128xf32> to vector<16x128xf32>
    %76 = arith.addf %74, %75 : vector<16x128xf32>
    %cst_39 = arith.constant 0.000000e+00 : f32
    %77 = vector.broadcast %cst_39 : f32 to vector<16x128xf32>
    %78 = arith.maximumf %76, %77 : vector<16x128xf32>
    %79 = arith.truncf %78 : vector<16x128xf32> to vector<16x128xbf16>
    %cst_40 = arith.constant 0.000000e+00 : bf16
    %80 = vector.broadcast %cst_40 : bf16 to vector<2x128xbf16>
    %81 = vector.extract_strided_slice %79 {offsets = [0, 0], sizes = [14, 128], strides = [1, 1]} : vector<16x128xbf16> to vector<14x128xbf16>
    %82 = tpu.concatenate %80, %81 in 0 : vector<2x128xbf16>, vector<14x128xbf16> -> vector<16x128xbf16>
    %c2_i32 = arith.constant 2 : i32
    %83 = vector.broadcast %c2_i32 : i32 to vector<16x1xi32>
    %84 = arith.cmpi sge, %2, %83 : vector<16x1xi32>
    %cst_41 = arith.constant 0.000000e+00 : bf16
    %85 = vector.broadcast %cst_41 : bf16 to vector<16x128xbf16>
    %86 = vector.shape_cast %84 : vector<16x1xi1> to vector<16x1xi1>
    %87 = vector.broadcast %86 : vector<16x1xi1> to vector<16x128xi1>
    %88 = arith.select %87, %82, %85 : vector<16x128xi1>, vector<16x128xbf16>
    %c1152 = arith.constant 1152 : index
    %c0_42 = arith.constant 0 : index
    %89 = vector.load %arg3[%c1152, %c0_42] : memref<1536x128xbf16, #tpu.memory_space<vmem>>, vector<128x128xbf16>
    %cst_43 = arith.constant dense<0.000000e+00> : vector<16x128xf32>
    %90 = tpu.matmul %88, %89, %cst_43 {dimension_numbers = #tpu.dot_dimension_numbers<[1], [0], [0], [1], [0, 0, 1, 1], [], []>} : vector<16x128xbf16>, vector<128x128xbf16>, vector<16x128xf32> -> vector<16x128xf32>
    %c1280 = arith.constant 1280 : index
    %c0_44 = arith.constant 0 : index
    %91 = vector.load %arg3[%c1280, %c0_44] : memref<1536x128xbf16, #tpu.memory_space<vmem>>, vector<128x128xbf16>
    %cst_45 = arith.constant dense<0.000000e+00> : vector<16x128xf32>
    %92 = tpu.matmul %79, %91, %cst_45 {dimension_numbers = #tpu.dot_dimension_numbers<[1], [0], [0], [1], [0, 0, 1, 1], [], []>} : vector<16x128xbf16>, vector<128x128xbf16>, vector<16x128xf32> -> vector<16x128xf32>
    %93 = arith.addf %90, %92 : vector<16x128xf32>
    %94 = vector.extract_strided_slice %79 {offsets = [2, 0], sizes = [14, 128], strides = [1, 1]} : vector<16x128xbf16> to vector<14x128xbf16>
    %cst_46 = arith.constant 0.000000e+00 : bf16
    %95 = vector.broadcast %cst_46 : bf16 to vector<2x128xbf16>
    %96 = tpu.concatenate %94, %95 in 0 : vector<14x128xbf16>, vector<2x128xbf16> -> vector<16x128xbf16>
    %c2_i32_47 = arith.constant 2 : i32
    %97 = vector.broadcast %c2_i32_47 : i32 to vector<16x1xi32>
    %98 = arith.cmpi slt, %2, %97 : vector<16x1xi32>
    %cst_48 = arith.constant 0.000000e+00 : bf16
    %99 = vector.broadcast %cst_48 : bf16 to vector<16x128xbf16>
    %100 = vector.shape_cast %98 : vector<16x1xi1> to vector<16x1xi1>
    %101 = vector.broadcast %100 : vector<16x1xi1> to vector<16x128xi1>
    %102 = arith.select %101, %96, %99 : vector<16x128xi1>, vector<16x128xbf16>
    %c1408 = arith.constant 1408 : index
    %c0_49 = arith.constant 0 : index
    %103 = vector.load %arg3[%c1408, %c0_49] : memref<1536x128xbf16, #tpu.memory_space<vmem>>, vector<128x128xbf16>
    %cst_50 = arith.constant dense<0.000000e+00> : vector<16x128xf32>
    %104 = tpu.matmul %102, %103, %cst_50 {dimension_numbers = #tpu.dot_dimension_numbers<[1], [0], [0], [1], [0, 0, 1, 1], [], []>} : vector<16x128xbf16>, vector<128x128xbf16>, vector<16x128xf32> -> vector<16x128xf32>
    %105 = arith.addf %93, %104 : vector<16x128xf32>
    %106 = vector.broadcast %7 : vector<1x128xf32> to vector<16x128xf32>
    %107 = arith.mulf %105, %106 : vector<16x128xf32>
    %108 = vector.broadcast %8 : vector<1x128xf32> to vector<16x128xf32>
    %109 = arith.addf %107, %108 : vector<16x128xf32>
    %110 = arith.extf %1 : vector<16x128xbf16> to vector<16x128xf32>
    %111 = arith.addf %109, %110 : vector<16x128xf32>
    %cst_51 = arith.constant 0.000000e+00 : f32
    %112 = vector.broadcast %cst_51 : f32 to vector<16x128xf32>
    %113 = arith.maximumf %111, %112 : vector<16x128xf32>
    %114 = arith.truncf %113 : vector<16x128xf32> to vector<16x128xbf16>
    %c0_52 = arith.constant 0 : index
    %c0_53 = arith.constant 0 : index
    %c0_54 = arith.constant 0 : index
    %115 = vector.load %arg5[%c0_52, %c0_53, %c0_54] : memref<1x16x128xbf16, #tpu.memory_space<vmem>>, vector<1x16x128xbf16>
    %116 = vector.shape_cast %115 : vector<1x16x128xbf16> to vector<16x128xbf16>
    %117 = vector.shape_cast %114 : vector<16x128xbf16> to vector<1x16x128xbf16>
    tpu.vector_store %arg5[%c0_52, %c0_53, %c0_54], %117 {strides = array<i32>} : memref<1x16x128xbf16, #tpu.memory_space<vmem>>, vector<1x16x128xbf16>,
    return
  }
  func.func @transform_0(%arg0: i32) -> (i32, i32) {
    %c0_i32 = arith.constant 0 : i32
    %c0_i32_0 = arith.constant 0 : i32
    %c0_i32_1 = arith.constant 0 : i32
    return %c0_i32, %c0_i32_0 : i32, i32
  }
  func.func @transform_1(%arg0: i32) -> (i32, i32, i32) {
    %c0_i32 = arith.constant 0 : i32
    %c0_i32_0 = arith.constant 0 : i32
    %c0_i32_1 = arith.constant 0 : i32
    return %arg0, %c0_i32, %c0_i32_0 : i32, i32, i32
  }
  func.func @transform_2(%arg0: i32) -> (i32, i32) {
    %c0_i32 = arith.constant 0 : i32
    %c0_i32_0 = arith.constant 0 : i32
    %c0_i32_1 = arith.constant 0 : i32
    return %c0_i32, %c0_i32_0 : i32, i32
  }
  func.func @transform_3(%arg0: i32) -> (i32, i32) {
    %c0_i32 = arith.constant 0 : i32
    %c0_i32_0 = arith.constant 0 : i32
    %c0_i32_1 = arith.constant 0 : i32
    return %c0_i32, %c0_i32_0 : i32, i32
  }
  func.func @transform_4(%arg0: i32) -> (i32, i32, i32) {
    %c0_i32 = arith.constant 0 : i32
    %c0_i32_0 = arith.constant 0 : i32
    %c0_i32_1 = arith.constant 0 : i32
    return %arg0, %c0_i32, %c0_i32_0 : i32, i32, i32
  }
}

module attributes {stable_mosaic.version = 11 : i64} {
  func.func @_nb_kernel(%arg0: i32, %arg1: memref<16x1xi32, #tpu.memory_space<vmem>>, %arg2: memref<1x16x128xbf16, #tpu.memory_space<vmem>>, %arg3: memref<1536x128xbf16, #tpu.memory_space<vmem>>, %arg4: memref<6x128xf32, #tpu.memory_space<vmem>>, %arg5: memref<1x16x128xbf16, #tpu.memory_space<vmem>>) attributes {dimension_semantics = [#tpu.dimension_semantics<parallel>], iteration_bounds = array<i64: 2>, scalar_prefetch = 0 : i64, scratch_operands = 0 : i64, tpu.core_type = #tpu.core_type<tc>, window_params = [{pipeline_mode = #tpu.pipeline_mode<synchronous>, transform_indices = @transform_0, window_bounds = array<i64: 16, 1>}, {transform_indices = @transform_1, window_bounds = array<i64: 1, 16, 128>}, {pipeline_mode = #tpu.pipeline_mode<synchronous>, transform_indices = @transform_2, window_bounds = array<i64: 1536, 128>}, {pipeline_mode = #tpu.pipeline_mode<synchronous>, transform_indices = @transform_3, window_bounds = array<i64: 6, 128>}, {transform_indices = @transform_4, window_bounds = array<i64: 1, 16, 128>}]} {
    %c0 = arith.constant 0 : index
    %c0_0 = arith.constant 0 : index
    %c0_1 = arith.constant 0 : index
    %0 = vector.load %arg2[%c0, %c0_0, %c0_1] : memref<1x16x128xbf16, #tpu.memory_space<vmem>>, vector<1x16x128xbf16>
    %1 = vector.shape_cast %0 : vector<1x16x128xbf16> to vector<16x128xbf16>
    %c0_2 = arith.constant 0 : index
    %c0_3 = arith.constant 0 : index
    %2 = vector.load %arg1[%c0_2, %c0_3] : memref<16x1xi32, #tpu.memory_space<vmem>>, vector<16x1xi32>
    %c0_4 = arith.constant 0 : index
    %c0_5 = arith.constant 0 : index
    %3 = vector.load %arg4[%c0_4, %c0_5] : memref<6x128xf32, #tpu.memory_space<vmem>>, vector<1x128xf32>
    %c1 = arith.constant 1 : index
    %c0_6 = arith.constant 0 : index
    %4 = vector.load %arg4[%c1, %c0_6] : memref<6x128xf32, #tpu.memory_space<vmem>>, vector<1x128xf32>
    %c2 = arith.constant 2 : index
    %c0_7 = arith.constant 0 : index
    %5 = vector.load %arg4[%c2, %c0_7] : memref<6x128xf32, #tpu.memory_space<vmem>>, vector<1x128xf32>
    %c3 = arith.constant 3 : index
    %c0_8 = arith.constant 0 : index
    %6 = vector.load %arg4[%c3, %c0_8] : memref<6x128xf32, #tpu.memory_space<vmem>>, vector<1x128xf32>
    %c4 = arith.constant 4 : index
    %c0_9 = arith.constant 0 : index
    %7 = vector.load %arg4[%c4, %c0_9] : memref<6x128xf32, #tpu.memory_space<vmem>>, vector<1x128xf32>
    %c5 = arith.constant 5 : index
    %c0_10 = arith.constant 0 : index
    %8 = vector.load %arg4[%c5, %c0_10] : memref<6x128xf32, #tpu.memory_space<vmem>>, vector<1x128xf32>
    %cst = arith.constant 0.000000e+00 : bf16
    %9 = vector.broadcast %cst : bf16 to vector<4x128xbf16>
    %10 = vector.extract_strided_slice %1 {offsets = [0, 0], sizes = [12, 128], strides = [1, 1]} : vector<16x128xbf16> to vector<12x128xbf16>
    %11 = tpu.concatenate %9, %10 in 0 : vector<4x128xbf16>, vector<12x128xbf16> -> vector<16x128xbf16>
    %c0_11 = arith.constant 0 : index
    %c0_12 = arith.constant 0 : index
    %12 = vector.load %arg3[%c0_11, %c0_12] : memref<1536x128xbf16, #tpu.memory_space<vmem>>, vector<128x128xbf16>
    %cst_13 = arith.constant dense<0.000000e+00> : vector<16x128xf32>
    %13 = tpu.matmul %11, %12, %cst_13 {dimension_numbers = #tpu.dot_dimension_numbers<[1], [0], [0], [1], [0, 0, 1, 1], [], []>} : vector<16x128xbf16>, vector<128x128xbf16>, vector<16x128xf32> -> vector<16x128xf32>
    %c128 = arith.constant 128 : index
    %c0_14 = arith.constant 0 : index
    %14 = vector.load %arg3[%c128, %c0_14] : memref<1536x128xbf16, #tpu.memory_space<vmem>>, vector<128x128xbf16>
    %cst_15 = arith.constant dense<0.000000e+00> : vector<16x128xf32>
    %15 = tpu.matmul %1, %14, %cst_15 {dimension_numbers = #tpu.dot_dimension_numbers<[1], [0], [0], [1], [0, 0, 1, 1], [], []>} : vector<16x128xbf16>, vector<128x128xbf16>, vector<16x128xf32> -> vector<16x128xf32>
    %16 = arith.addf %13, %15 : vector<16x128xf32>
    %17 = vector.extract_strided_slice %1 {offsets = [4, 0], sizes = [12, 128], strides = [1, 1]} : vector<16x128xbf16> to vector<12x128xbf16>
    %cst_16 = arith.constant 0.000000e+00 : bf16
    %18 = vector.broadcast %cst_16 : bf16 to vector<4x128xbf16>
    %19 = tpu.concatenate %17, %18 in 0 : vector<12x128xbf16>, vector<4x128xbf16> -> vector<16x128xbf16>
    %c256 = arith.constant 256 : index
    %c0_17 = arith.constant 0 : index
    %20 = vector.load %arg3[%c256, %c0_17] : memref<1536x128xbf16, #tpu.memory_space<vmem>>, vector<128x128xbf16>
    %cst_18 = arith.constant dense<0.000000e+00> : vector<16x128xf32>
    %21 = tpu.matmul %19, %20, %cst_18 {dimension_numbers = #tpu.dot_dimension_numbers<[1], [0], [0], [1], [0, 0, 1, 1], [], []>} : vector<16x128xbf16>, vector<128x128xbf16>, vector<16x128xf32> -> vector<16x128xf32>
    %22 = arith.addf %16, %21 : vector<16x128xf32>
    %23 = vector.broadcast %3 : vector<1x128xf32> to vector<16x128xf32>
    %24 = arith.addf %22, %23 : vector<16x128xf32>
    %cst_19 = arith.constant 0.000000e+00 : f32
    %25 = vector.broadcast %cst_19 : f32 to vector<16x128xf32>
    %26 = arith.maximumf %24, %25 : vector<16x128xf32>
    %27 = arith.truncf %26 : vector<16x128xf32> to vector<16x128xbf16>
    %cst_20 = arith.constant 0.000000e+00 : bf16
    %28 = vector.broadcast %cst_20 : bf16 to vector<1x128xbf16>
    %29 = vector.extract_strided_slice %27 {offsets = [0, 0], sizes = [15, 128], strides = [1, 1]} : vector<16x128xbf16> to vector<15x128xbf16>
    %30 = tpu.concatenate %28, %29 in 0 : vector<1x128xbf16>, vector<15x128xbf16> -> vector<16x128xbf16>
    %c1_i32 = arith.constant 1 : i32
    %31 = vector.broadcast %c1_i32 : i32 to vector<16x1xi32>
    %32 = arith.cmpi sge, %2, %31 : vector<16x1xi32>
    %cst_21 = arith.constant 0.000000e+00 : bf16
    %33 = vector.broadcast %cst_21 : bf16 to vector<16x128xbf16>
    %34 = vector.shape_cast %32 : vector<16x1xi1> to vector<16x1xi1>
    %35 = vector.broadcast %34 : vector<16x1xi1> to vector<16x128xi1>
    %36 = arith.select %35, %30, %33 : vector<16x128xi1>, vector<16x128xbf16>
    %c384 = arith.constant 384 : index
    %c0_22 = arith.constant 0 : index
    %37 = vector.load %arg3[%c384, %c0_22] : memref<1536x128xbf16, #tpu.memory_space<vmem>>, vector<128x128xbf16>
    %cst_23 = arith.constant dense<0.000000e+00> : vector<16x128xf32>
    %38 = tpu.matmul %36, %37, %cst_23 {dimension_numbers = #tpu.dot_dimension_numbers<[1], [0], [0], [1], [0, 0, 1, 1], [], []>} : vector<16x128xbf16>, vector<128x128xbf16>, vector<16x128xf32> -> vector<16x128xf32>
    %c512 = arith.constant 512 : index
    %c0_24 = arith.constant 0 : index
    %39 = vector.load %arg3[%c512, %c0_24] : memref<1536x128xbf16, #tpu.memory_space<vmem>>, vector<128x128xbf16>
    %cst_25 = arith.constant dense<0.000000e+00> : vector<16x128xf32>
    %40 = tpu.matmul %27, %39, %cst_25 {dimension_numbers = #tpu.dot_dimension_numbers<[1], [0], [0], [1], [0, 0, 1, 1], [], []>} : vector<16x128xbf16>, vector<128x128xbf16>, vector<16x128xf32> -> vector<16x128xf32>
    %41 = arith.addf %38, %40 : vector<16x128xf32>
    %42 = vector.extract_strided_slice %27 {offsets = [1, 0], sizes = [15, 128], strides = [1, 1]} : vector<16x128xbf16> to vector<15x128xbf16>
    %cst_26 = arith.constant 0.000000e+00 : bf16
    %43 = vector.broadcast %cst_26 : bf16 to vector<1x128xbf16>
    %44 = tpu.concatenate %42, %43 in 0 : vector<15x128xbf16>, vector<1x128xbf16> -> vector<16x128xbf16>
    %c3_i32 = arith.constant 3 : i32
    %45 = vector.broadcast %c3_i32 : i32 to vector<16x1xi32>
    %46 = arith.cmpi slt, %2, %45 : vector<16x1xi32>
    %cst_27 = arith.constant 0.000000e+00 : bf16
    %47 = vector.broadcast %cst_27 : bf16 to vector<16x128xbf16>
    %48 = vector.shape_cast %46 : vector<16x1xi1> to vector<16x1xi1>
    %49 = vector.broadcast %48 : vector<16x1xi1> to vector<16x128xi1>
    %50 = arith.select %49, %44, %47 : vector<16x128xi1>, vector<16x128xbf16>
    %c640 = arith.constant 640 : index
    %c0_28 = arith.constant 0 : index
    %51 = vector.load %arg3[%c640, %c0_28] : memref<1536x128xbf16, #tpu.memory_space<vmem>>, vector<128x128xbf16>
    %cst_29 = arith.constant dense<0.000000e+00> : vector<16x128xf32>
    %52 = tpu.matmul %50, %51, %cst_29 {dimension_numbers = #tpu.dot_dimension_numbers<[1], [0], [0], [1], [0, 0, 1, 1], [], []>} : vector<16x128xbf16>, vector<128x128xbf16>, vector<16x128xf32> -> vector<16x128xf32>
    %53 = arith.addf %41, %52 : vector<16x128xf32>
    %54 = vector.broadcast %4 : vector<1x128xf32> to vector<16x128xf32>
    %55 = arith.mulf %53, %54 : vector<16x128xf32>
    %56 = vector.broadcast %5 : vector<1x128xf32> to vector<16x128xf32>
    %57 = arith.addf %55, %56 : vector<16x128xf32>
    %cst_30 = arith.constant 0.000000e+00 : f32
    %58 = vector.broadcast %cst_30 : f32 to vector<16x128xf32>
    %59 = arith.maximumf %57, %58 : vector<16x128xf32>
    %60 = arith.truncf %59 : vector<16x128xf32> to vector<16x128xbf16>
    %c896 = arith.constant 896 : index
    %c0_31 = arith.constant 0 : index
    %61 = vector.load %arg3[%c896, %c0_31] : memref<1536x128xbf16, #tpu.memory_space<vmem>>, vector<128x128xbf16>
    %cst_32 = arith.constant dense<0.000000e+00> : vector<16x128xf32>
    %62 = tpu.matmul %60, %61, %cst_32 {dimension_numbers = #tpu.dot_dimension_numbers<[1], [0], [0], [1], [0, 0, 1, 1], [], []>} : vector<16x128xbf16>, vector<128x128xbf16>, vector<16x128xf32> -> vector<16x128xf32>
    %63 = vector.broadcast %6 : vector<1x128xf32> to vector<16x128xf32>
    %64 = arith.addf %62, %63 : vector<16x128xf32>
    %cst_33 = arith.constant 0.000000e+00 : f32
    %65 = vector.broadcast %cst_33 : f32 to vector<16x128xf32>
    %66 = arith.maximumf %64, %65 : vector<16x128xf32>
    %67 = arith.truncf %66 : vector<16x128xf32> to vector<16x128xbf16>
    %c1280 = arith.constant 1280 : index
    %c0_34 = arith.constant 0 : index
    %68 = vector.load %arg3[%c1280, %c0_34] : memref<1536x128xbf16, #tpu.memory_space<vmem>>, vector<128x128xbf16>
    %cst_35 = arith.constant dense<0.000000e+00> : vector<16x128xf32>
    %69 = tpu.matmul %67, %68, %cst_35 {dimension_numbers = #tpu.dot_dimension_numbers<[1], [0], [0], [1], [0, 0, 1, 1], [], []>} : vector<16x128xbf16>, vector<128x128xbf16>, vector<16x128xf32> -> vector<16x128xf32>
    %70 = vector.broadcast %7 : vector<1x128xf32> to vector<16x128xf32>
    %71 = arith.mulf %69, %70 : vector<16x128xf32>
    %72 = vector.broadcast %8 : vector<1x128xf32> to vector<16x128xf32>
    %73 = arith.addf %71, %72 : vector<16x128xf32>
    %74 = arith.extf %1 : vector<16x128xbf16> to vector<16x128xf32>
    %75 = arith.addf %73, %74 : vector<16x128xf32>
    %cst_36 = arith.constant 0.000000e+00 : f32
    %76 = vector.broadcast %cst_36 : f32 to vector<16x128xf32>
    %77 = arith.maximumf %75, %76 : vector<16x128xf32>
    %78 = arith.truncf %77 : vector<16x128xf32> to vector<16x128xbf16>
    %c0_37 = arith.constant 0 : index
    %c0_38 = arith.constant 0 : index
    %c0_39 = arith.constant 0 : index
    %79 = vector.load %arg5[%c0_37, %c0_38, %c0_39] : memref<1x16x128xbf16, #tpu.memory_space<vmem>>, vector<1x16x128xbf16>
    %80 = vector.shape_cast %79 : vector<1x16x128xbf16> to vector<16x128xbf16>
    %81 = vector.shape_cast %78 : vector<16x128xbf16> to vector<1x16x128xbf16>
    tpu.vector_store %arg5[%c0_37, %c0_38, %c0_39], %81 {strides = array<i32>} : memref<1x16x128xbf16, #tpu.memory_space<vmem>>, vector<1x16x128xbf16>,
    return
  }
  func.func @transform_0(%arg0: i32) -> (i32, i32) {
    %c0_i32 = arith.constant 0 : i32
    %c0_i32_0 = arith.constant 0 : i32
    %c0_i32_1 = arith.constant 0 : i32
    return %c0_i32, %c0_i32_0 : i32, i32
  }
  func.func @transform_1(%arg0: i32) -> (i32, i32, i32) {
    %c0_i32 = arith.constant 0 : i32
    %c0_i32_0 = arith.constant 0 : i32
    %c0_i32_1 = arith.constant 0 : i32
    return %arg0, %c0_i32, %c0_i32_0 : i32, i32, i32
  }
  func.func @transform_2(%arg0: i32) -> (i32, i32) {
    %c0_i32 = arith.constant 0 : i32
    %c0_i32_0 = arith.constant 0 : i32
    %c0_i32_1 = arith.constant 0 : i32
    return %c0_i32, %c0_i32_0 : i32, i32
  }
  func.func @transform_3(%arg0: i32) -> (i32, i32) {
    %c0_i32 = arith.constant 0 : i32
    %c0_i32_0 = arith.constant 0 : i32
    %c0_i32_1 = arith.constant 0 : i32
    return %c0_i32, %c0_i32_0 : i32, i32
  }
  func.func @transform_4(%arg0: i32) -> (i32, i32, i32) {
    %c0_i32 = arith.constant 0 : i32
    %c0_i32_0 = arith.constant 0 : i32
    %c0_i32_1 = arith.constant 0 : i32
    return %arg0, %c0_i32, %c0_i32_0 : i32, i32, i32
  }
}

module attributes {stable_mosaic.version = 11 : i64} {
  func.func @_deconv_kernel(%arg0: i32, %arg1: memref<16x1xi32, #tpu.memory_space<vmem>>, %arg2: memref<1x16x128xbf16, #tpu.memory_space<vmem>>, %arg3: memref<512x256xbf16, #tpu.memory_space<vmem>>, %arg4: memref<2x256xf32, #tpu.memory_space<vmem>>, %arg5: memref<1x16x256xbf16, #tpu.memory_space<vmem>>) attributes {dimension_semantics = [#tpu.dimension_semantics<parallel>], iteration_bounds = array<i64: 2>, scalar_prefetch = 0 : i64, scratch_operands = 0 : i64, tpu.core_type = #tpu.core_type<tc>, window_params = [{pipeline_mode = #tpu.pipeline_mode<synchronous>, transform_indices = @transform_0, window_bounds = array<i64: 16, 1>}, {transform_indices = @transform_1, window_bounds = array<i64: 1, 16, 128>}, {pipeline_mode = #tpu.pipeline_mode<synchronous>, transform_indices = @transform_2, window_bounds = array<i64: 512, 256>}, {pipeline_mode = #tpu.pipeline_mode<synchronous>, transform_indices = @transform_3, window_bounds = array<i64: 2, 256>}, {transform_indices = @transform_4, window_bounds = array<i64: 1, 16, 256>}]} {
    %c0 = arith.constant 0 : index
    %c0_0 = arith.constant 0 : index
    %c0_1 = arith.constant 0 : index
    %0 = vector.load %arg2[%c0, %c0_0, %c0_1] : memref<1x16x128xbf16, #tpu.memory_space<vmem>>, vector<1x16x128xbf16>
    %1 = vector.shape_cast %0 : vector<1x16x128xbf16> to vector<16x128xbf16>
    %c0_2 = arith.constant 0 : index
    %c0_3 = arith.constant 0 : index
    %2 = vector.load %arg1[%c0_2, %c0_3] : memref<16x1xi32, #tpu.memory_space<vmem>>, vector<16x1xi32>
    %c0_4 = arith.constant 0 : index
    %c0_5 = arith.constant 0 : index
    %3 = vector.load %arg3[%c0_4, %c0_5] : memref<512x256xbf16, #tpu.memory_space<vmem>>, vector<128x256xbf16>
    %cst = arith.constant dense<0.000000e+00> : vector<16x256xf32>
    %4 = tpu.matmul %1, %3, %cst {dimension_numbers = #tpu.dot_dimension_numbers<[1], [0], [0], [1], [0, 0, 1, 1], [], []>} : vector<16x128xbf16>, vector<128x256xbf16>, vector<16x256xf32> -> vector<16x256xf32>
    %5 = vector.extract_strided_slice %1 {offsets = [1, 0], sizes = [15, 128], strides = [1, 1]} : vector<16x128xbf16> to vector<15x128xbf16>
    %cst_6 = arith.constant 0.000000e+00 : bf16
    %6 = vector.broadcast %cst_6 : bf16 to vector<1x128xbf16>
    %7 = tpu.concatenate %5, %6 in 0 : vector<15x128xbf16>, vector<1x128xbf16> -> vector<16x128xbf16>
    %c3_i32 = arith.constant 3 : i32
    %8 = vector.broadcast %c3_i32 : i32 to vector<16x1xi32>
    %9 = arith.cmpi slt, %2, %8 : vector<16x1xi32>
    %cst_7 = arith.constant 0.000000e+00 : bf16
    %10 = vector.broadcast %cst_7 : bf16 to vector<16x128xbf16>
    %11 = vector.shape_cast %9 : vector<16x1xi1> to vector<16x1xi1>
    %12 = vector.broadcast %11 : vector<16x1xi1> to vector<16x128xi1>
    %13 = arith.select %12, %7, %10 : vector<16x128xi1>, vector<16x128xbf16>
    %c128 = arith.constant 128 : index
    %c0_8 = arith.constant 0 : index
    %14 = vector.load %arg3[%c128, %c0_8] : memref<512x256xbf16, #tpu.memory_space<vmem>>, vector<128x256xbf16>
    %cst_9 = arith.constant dense<0.000000e+00> : vector<16x256xf32>
    %15 = tpu.matmul %13, %14, %cst_9 {dimension_numbers = #tpu.dot_dimension_numbers<[1], [0], [0], [1], [0, 0, 1, 1], [], []>} : vector<16x128xbf16>, vector<128x256xbf16>, vector<16x256xf32> -> vector<16x256xf32>
    %16 = arith.addf %4, %15 : vector<16x256xf32>
    %17 = vector.extract_strided_slice %1 {offsets = [4, 0], sizes = [12, 128], strides = [1, 1]} : vector<16x128xbf16> to vector<12x128xbf16>
    %cst_10 = arith.constant 0.000000e+00 : bf16
    %18 = vector.broadcast %cst_10 : bf16 to vector<4x128xbf16>
    %19 = tpu.concatenate %17, %18 in 0 : vector<12x128xbf16>, vector<4x128xbf16> -> vector<16x128xbf16>
    %c256 = arith.constant 256 : index
    %c0_11 = arith.constant 0 : index
    %20 = vector.load %arg3[%c256, %c0_11] : memref<512x256xbf16, #tpu.memory_space<vmem>>, vector<128x256xbf16>
    %cst_12 = arith.constant dense<0.000000e+00> : vector<16x256xf32>
    %21 = tpu.matmul %19, %20, %cst_12 {dimension_numbers = #tpu.dot_dimension_numbers<[1], [0], [0], [1], [0, 0, 1, 1], [], []>} : vector<16x128xbf16>, vector<128x256xbf16>, vector<16x256xf32> -> vector<16x256xf32>
    %22 = arith.addf %16, %21 : vector<16x256xf32>
    %23 = vector.extract_strided_slice %1 {offsets = [5, 0], sizes = [11, 128], strides = [1, 1]} : vector<16x128xbf16> to vector<11x128xbf16>
    %cst_13 = arith.constant 0.000000e+00 : bf16
    %24 = vector.broadcast %cst_13 : bf16 to vector<5x128xbf16>
    %25 = tpu.concatenate %23, %24 in 0 : vector<11x128xbf16>, vector<5x128xbf16> -> vector<16x128xbf16>
    %c3_i32_14 = arith.constant 3 : i32
    %26 = vector.broadcast %c3_i32_14 : i32 to vector<16x1xi32>
    %27 = arith.cmpi slt, %2, %26 : vector<16x1xi32>
    %cst_15 = arith.constant 0.000000e+00 : bf16
    %28 = vector.broadcast %cst_15 : bf16 to vector<16x128xbf16>
    %29 = vector.shape_cast %27 : vector<16x1xi1> to vector<16x1xi1>
    %30 = vector.broadcast %29 : vector<16x1xi1> to vector<16x128xi1>
    %31 = arith.select %30, %25, %28 : vector<16x128xi1>, vector<16x128xbf16>
    %c384 = arith.constant 384 : index
    %c0_16 = arith.constant 0 : index
    %32 = vector.load %arg3[%c384, %c0_16] : memref<512x256xbf16, #tpu.memory_space<vmem>>, vector<128x256xbf16>
    %cst_17 = arith.constant dense<0.000000e+00> : vector<16x256xf32>
    %33 = tpu.matmul %31, %32, %cst_17 {dimension_numbers = #tpu.dot_dimension_numbers<[1], [0], [0], [1], [0, 0, 1, 1], [], []>} : vector<16x128xbf16>, vector<128x256xbf16>, vector<16x256xf32> -> vector<16x256xf32>
    %34 = arith.addf %22, %33 : vector<16x256xf32>
    %c0_18 = arith.constant 0 : index
    %c0_19 = arith.constant 0 : index
    %35 = vector.load %arg4[%c0_18, %c0_19] : memref<2x256xf32, #tpu.memory_space<vmem>>, vector<1x256xf32>
    %36 = vector.broadcast %35 : vector<1x256xf32> to vector<16x256xf32>
    %37 = arith.mulf %34, %36 : vector<16x256xf32>
    %c1 = arith.constant 1 : index
    %c0_20 = arith.constant 0 : index
    %38 = vector.load %arg4[%c1, %c0_20] : memref<2x256xf32, #tpu.memory_space<vmem>>, vector<1x256xf32>
    %39 = vector.broadcast %38 : vector<1x256xf32> to vector<16x256xf32>
    %40 = arith.addf %37, %39 : vector<16x256xf32>
    %cst_21 = arith.constant 0.000000e+00 : f32
    %41 = vector.broadcast %cst_21 : f32 to vector<16x256xf32>
    %42 = arith.maximumf %40, %41 : vector<16x256xf32>
    %43 = arith.truncf %42 : vector<16x256xf32> to vector<16x256xbf16>
    %c0_22 = arith.constant 0 : index
    %c0_23 = arith.constant 0 : index
    %c0_24 = arith.constant 0 : index
    %44 = vector.load %arg5[%c0_22, %c0_23, %c0_24] : memref<1x16x256xbf16, #tpu.memory_space<vmem>>, vector<1x16x256xbf16>
    %45 = vector.shape_cast %44 : vector<1x16x256xbf16> to vector<16x256xbf16>
    %46 = vector.shape_cast %43 : vector<16x256xbf16> to vector<1x16x256xbf16>
    tpu.vector_store %arg5[%c0_22, %c0_23, %c0_24], %46 {strides = array<i32>} : memref<1x16x256xbf16, #tpu.memory_space<vmem>>, vector<1x16x256xbf16>,
    return
  }
  func.func @transform_0(%arg0: i32) -> (i32, i32) {
    %c0_i32 = arith.constant 0 : i32
    %c0_i32_0 = arith.constant 0 : i32
    %c0_i32_1 = arith.constant 0 : i32
    return %c0_i32, %c0_i32_0 : i32, i32
  }
  func.func @transform_1(%arg0: i32) -> (i32, i32, i32) {
    %c0_i32 = arith.constant 0 : i32
    %c0_i32_0 = arith.constant 0 : i32
    %c0_i32_1 = arith.constant 0 : i32
    return %arg0, %c0_i32, %c0_i32_0 : i32, i32, i32
  }
  func.func @transform_2(%arg0: i32) -> (i32, i32) {
    %c0_i32 = arith.constant 0 : i32
    %c0_i32_0 = arith.constant 0 : i32
    %c0_i32_1 = arith.constant 0 : i32
    return %c0_i32, %c0_i32_0 : i32, i32
  }
  func.func @transform_3(%arg0: i32) -> (i32, i32) {
    %c0_i32 = arith.constant 0 : i32
    %c0_i32_0 = arith.constant 0 : i32
    %c0_i32_1 = arith.constant 0 : i32
    return %c0_i32, %c0_i32_0 : i32, i32
  }
  func.func @transform_4(%arg0: i32) -> (i32, i32, i32) {
    %c0_i32 = arith.constant 0 : i32
    %c0_i32_0 = arith.constant 0 : i32
    %c0_i32_1 = arith.constant 0 : i32
    return %arg0, %c0_i32, %c0_i32_0 : i32, i32, i32
  }
}

module attributes {stable_mosaic.version = 11 : i64} {
  func.func @_deconv_kernel(%arg0: i32, %arg1: memref<64x1xi32, #tpu.memory_space<vmem>>, %arg2: memref<1x64x64xbf16, #tpu.memory_space<vmem>>, %arg3: memref<256x64xbf16, #tpu.memory_space<vmem>>, %arg4: memref<2x64xf32, #tpu.memory_space<vmem>>, %arg5: memref<1x64x64xbf16, #tpu.memory_space<vmem>>) attributes {dimension_semantics = [#tpu.dimension_semantics<parallel>], iteration_bounds = array<i64: 2>, scalar_prefetch = 0 : i64, scratch_operands = 0 : i64, tpu.core_type = #tpu.core_type<tc>, window_params = [{pipeline_mode = #tpu.pipeline_mode<synchronous>, transform_indices = @transform_0, window_bounds = array<i64: 64, 1>}, {transform_indices = @transform_1, window_bounds = array<i64: 1, 64, 64>}, {pipeline_mode = #tpu.pipeline_mode<synchronous>, transform_indices = @transform_2, window_bounds = array<i64: 256, 64>}, {pipeline_mode = #tpu.pipeline_mode<synchronous>, transform_indices = @transform_3, window_bounds = array<i64: 2, 64>}, {transform_indices = @transform_4, window_bounds = array<i64: 1, 64, 64>}]} {
    %c0 = arith.constant 0 : index
    %c0_0 = arith.constant 0 : index
    %c0_1 = arith.constant 0 : index
    %0 = vector.load %arg2[%c0, %c0_0, %c0_1] : memref<1x64x64xbf16, #tpu.memory_space<vmem>>, vector<1x64x64xbf16>
    %1 = vector.shape_cast %0 : vector<1x64x64xbf16> to vector<64x64xbf16>
    %c0_2 = arith.constant 0 : index
    %c0_3 = arith.constant 0 : index
    %2 = vector.load %arg1[%c0_2, %c0_3] : memref<64x1xi32, #tpu.memory_space<vmem>>, vector<64x1xi32>
    %c0_4 = arith.constant 0 : index
    %c0_5 = arith.constant 0 : index
    %3 = vector.load %arg3[%c0_4, %c0_5] : memref<256x64xbf16, #tpu.memory_space<vmem>>, vector<64x64xbf16>
    %cst = arith.constant dense<0.000000e+00> : vector<64x64xf32>
    %4 = tpu.matmul %1, %3, %cst {dimension_numbers = #tpu.dot_dimension_numbers<[1], [0], [0], [1], [0, 0, 1, 1], [], []>} : vector<64x64xbf16>, vector<64x64xbf16>, vector<64x64xf32> -> vector<64x64xf32>
    %5 = vector.extract_strided_slice %1 {offsets = [1, 0], sizes = [63, 64], strides = [1, 1]} : vector<64x64xbf16> to vector<63x64xbf16>
    %cst_6 = arith.constant 0.000000e+00 : bf16
    %6 = vector.broadcast %cst_6 : bf16 to vector<1x64xbf16>
    %7 = tpu.concatenate %5, %6 in 0 : vector<63x64xbf16>, vector<1x64xbf16> -> vector<64x64xbf16>
    %c7_i32 = arith.constant 7 : i32
    %8 = vector.broadcast %c7_i32 : i32 to vector<64x1xi32>
    %9 = arith.cmpi slt, %2, %8 : vector<64x1xi32>
    %cst_7 = arith.constant 0.000000e+00 : bf16
    %10 = vector.broadcast %cst_7 : bf16 to vector<64x64xbf16>
    %11 = vector.shape_cast %9 : vector<64x1xi1> to vector<64x1xi1>
    %12 = vector.broadcast %11 : vector<64x1xi1> to vector<64x64xi1>
    %13 = arith.select %12, %7, %10 : vector<64x64xi1>, vector<64x64xbf16>
    %c64 = arith.constant 64 : index
    %c0_8 = arith.constant 0 : index
    %14 = vector.load %arg3[%c64, %c0_8] : memref<256x64xbf16, #tpu.memory_space<vmem>>, vector<64x64xbf16>
    %cst_9 = arith.constant dense<0.000000e+00> : vector<64x64xf32>
    %15 = tpu.matmul %13, %14, %cst_9 {dimension_numbers = #tpu.dot_dimension_numbers<[1], [0], [0], [1], [0, 0, 1, 1], [], []>} : vector<64x64xbf16>, vector<64x64xbf16>, vector<64x64xf32> -> vector<64x64xf32>
    %16 = arith.addf %4, %15 : vector<64x64xf32>
    %17 = vector.extract_strided_slice %1 {offsets = [8, 0], sizes = [56, 64], strides = [1, 1]} : vector<64x64xbf16> to vector<56x64xbf16>
    %cst_10 = arith.constant 0.000000e+00 : bf16
    %18 = vector.broadcast %cst_10 : bf16 to vector<8x64xbf16>
    %19 = tpu.concatenate %17, %18 in 0 : vector<56x64xbf16>, vector<8x64xbf16> -> vector<64x64xbf16>
    %c128 = arith.constant 128 : index
    %c0_11 = arith.constant 0 : index
    %20 = vector.load %arg3[%c128, %c0_11] : memref<256x64xbf16, #tpu.memory_space<vmem>>, vector<64x64xbf16>
    %cst_12 = arith.constant dense<0.000000e+00> : vector<64x64xf32>
    %21 = tpu.matmul %19, %20, %cst_12 {dimension_numbers = #tpu.dot_dimension_numbers<[1], [0], [0], [1], [0, 0, 1, 1], [], []>} : vector<64x64xbf16>, vector<64x64xbf16>, vector<64x64xf32> -> vector<64x64xf32>
    %22 = arith.addf %16, %21 : vector<64x64xf32>
    %23 = vector.extract_strided_slice %1 {offsets = [9, 0], sizes = [55, 64], strides = [1, 1]} : vector<64x64xbf16> to vector<55x64xbf16>
    %cst_13 = arith.constant 0.000000e+00 : bf16
    %24 = vector.broadcast %cst_13 : bf16 to vector<9x64xbf16>
    %25 = tpu.concatenate %23, %24 in 0 : vector<55x64xbf16>, vector<9x64xbf16> -> vector<64x64xbf16>
    %c7_i32_14 = arith.constant 7 : i32
    %26 = vector.broadcast %c7_i32_14 : i32 to vector<64x1xi32>
    %27 = arith.cmpi slt, %2, %26 : vector<64x1xi32>
    %cst_15 = arith.constant 0.000000e+00 : bf16
    %28 = vector.broadcast %cst_15 : bf16 to vector<64x64xbf16>
    %29 = vector.shape_cast %27 : vector<64x1xi1> to vector<64x1xi1>
    %30 = vector.broadcast %29 : vector<64x1xi1> to vector<64x64xi1>
    %31 = arith.select %30, %25, %28 : vector<64x64xi1>, vector<64x64xbf16>
    %c192 = arith.constant 192 : index
    %c0_16 = arith.constant 0 : index
    %32 = vector.load %arg3[%c192, %c0_16] : memref<256x64xbf16, #tpu.memory_space<vmem>>, vector<64x64xbf16>
    %cst_17 = arith.constant dense<0.000000e+00> : vector<64x64xf32>
    %33 = tpu.matmul %31, %32, %cst_17 {dimension_numbers = #tpu.dot_dimension_numbers<[1], [0], [0], [1], [0, 0, 1, 1], [], []>} : vector<64x64xbf16>, vector<64x64xbf16>, vector<64x64xf32> -> vector<64x64xf32>
    %34 = arith.addf %22, %33 : vector<64x64xf32>
    %c0_18 = arith.constant 0 : index
    %c0_19 = arith.constant 0 : index
    %35 = vector.load %arg4[%c0_18, %c0_19] : memref<2x64xf32, #tpu.memory_space<vmem>>, vector<1x64xf32>
    %36 = vector.broadcast %35 : vector<1x64xf32> to vector<64x64xf32>
    %37 = arith.mulf %34, %36 : vector<64x64xf32>
    %c1 = arith.constant 1 : index
    %c0_20 = arith.constant 0 : index
    %38 = vector.load %arg4[%c1, %c0_20] : memref<2x64xf32, #tpu.memory_space<vmem>>, vector<1x64xf32>
    %39 = vector.broadcast %38 : vector<1x64xf32> to vector<64x64xf32>
    %40 = arith.addf %37, %39 : vector<64x64xf32>
    %cst_21 = arith.constant 0.000000e+00 : f32
    %41 = vector.broadcast %cst_21 : f32 to vector<64x64xf32>
    %42 = arith.maximumf %40, %41 : vector<64x64xf32>
    %43 = arith.truncf %42 : vector<64x64xf32> to vector<64x64xbf16>
    %c0_22 = arith.constant 0 : index
    %c0_23 = arith.constant 0 : index
    %c0_24 = arith.constant 0 : index
    %44 = vector.load %arg5[%c0_22, %c0_23, %c0_24] : memref<1x64x64xbf16, #tpu.memory_space<vmem>>, vector<1x64x64xbf16>
    %45 = vector.shape_cast %44 : vector<1x64x64xbf16> to vector<64x64xbf16>
    %46 = vector.shape_cast %43 : vector<64x64xbf16> to vector<1x64x64xbf16>
    tpu.vector_store %arg5[%c0_22, %c0_23, %c0_24], %46 {strides = array<i32>} : memref<1x64x64xbf16, #tpu.memory_space<vmem>>, vector<1x64x64xbf16>,
    return
  }
  func.func @transform_0(%arg0: i32) -> (i32, i32) {
    %c0_i32 = arith.constant 0 : i32
    %c0_i32_0 = arith.constant 0 : i32
    %c0_i32_1 = arith.constant 0 : i32
    return %c0_i32, %c0_i32_0 : i32, i32
  }
  func.func @transform_1(%arg0: i32) -> (i32, i32, i32) {
    %c0_i32 = arith.constant 0 : i32
    %c0_i32_0 = arith.constant 0 : i32
    %c0_i32_1 = arith.constant 0 : i32
    return %arg0, %c0_i32, %c0_i32_0 : i32, i32, i32
  }
  func.func @transform_2(%arg0: i32) -> (i32, i32) {
    %c0_i32 = arith.constant 0 : i32
    %c0_i32_0 = arith.constant 0 : i32
    %c0_i32_1 = arith.constant 0 : i32
    return %c0_i32, %c0_i32_0 : i32, i32
  }
  func.func @transform_3(%arg0: i32) -> (i32, i32) {
    %c0_i32 = arith.constant 0 : i32
    %c0_i32_0 = arith.constant 0 : i32
    %c0_i32_1 = arith.constant 0 : i32
    return %c0_i32, %c0_i32_0 : i32, i32
  }
  func.func @transform_4(%arg0: i32) -> (i32, i32, i32) {
    %c0_i32 = arith.constant 0 : i32
    %c0_i32_0 = arith.constant 0 : i32
    %c0_i32_1 = arith.constant 0 : i32
    return %arg0, %c0_i32, %c0_i32_0 : i32, i32, i32
  }
}

module attributes {stable_mosaic.version = 11 : i64} {
  func.func @_nb_kernel(%arg0: i32, %arg1: memref<256x1xi32, #tpu.memory_space<vmem>>, %arg2: memref<1x256x16xbf16, #tpu.memory_space<vmem>>, %arg3: memref<192x16xbf16, #tpu.memory_space<vmem>>, %arg4: memref<6x16xf32, #tpu.memory_space<vmem>>, %arg5: memref<1x256x16xbf16, #tpu.memory_space<vmem>>) attributes {dimension_semantics = [#tpu.dimension_semantics<parallel>], iteration_bounds = array<i64: 2>, scalar_prefetch = 0 : i64, scratch_operands = 0 : i64, tpu.core_type = #tpu.core_type<tc>, window_params = [{pipeline_mode = #tpu.pipeline_mode<synchronous>, transform_indices = @transform_0, window_bounds = array<i64: 256, 1>}, {transform_indices = @transform_1, window_bounds = array<i64: 1, 256, 16>}, {pipeline_mode = #tpu.pipeline_mode<synchronous>, transform_indices = @transform_2, window_bounds = array<i64: 192, 16>}, {pipeline_mode = #tpu.pipeline_mode<synchronous>, transform_indices = @transform_3, window_bounds = array<i64: 6, 16>}, {transform_indices = @transform_4, window_bounds = array<i64: 1, 256, 16>}]} {
    %c0 = arith.constant 0 : index
    %c0_0 = arith.constant 0 : index
    %c0_1 = arith.constant 0 : index
    %0 = vector.load %arg2[%c0, %c0_0, %c0_1] : memref<1x256x16xbf16, #tpu.memory_space<vmem>>, vector<1x256x16xbf16>
    %1 = vector.shape_cast %0 : vector<1x256x16xbf16> to vector<256x16xbf16>
    %c0_2 = arith.constant 0 : index
    %c0_3 = arith.constant 0 : index
    %2 = vector.load %arg1[%c0_2, %c0_3] : memref<256x1xi32, #tpu.memory_space<vmem>>, vector<256x1xi32>
    %c0_4 = arith.constant 0 : index
    %c0_5 = arith.constant 0 : index
    %3 = vector.load %arg4[%c0_4, %c0_5] : memref<6x16xf32, #tpu.memory_space<vmem>>, vector<1x16xf32>
    %c1 = arith.constant 1 : index
    %c0_6 = arith.constant 0 : index
    %4 = vector.load %arg4[%c1, %c0_6] : memref<6x16xf32, #tpu.memory_space<vmem>>, vector<1x16xf32>
    %c2 = arith.constant 2 : index
    %c0_7 = arith.constant 0 : index
    %5 = vector.load %arg4[%c2, %c0_7] : memref<6x16xf32, #tpu.memory_space<vmem>>, vector<1x16xf32>
    %c3 = arith.constant 3 : index
    %c0_8 = arith.constant 0 : index
    %6 = vector.load %arg4[%c3, %c0_8] : memref<6x16xf32, #tpu.memory_space<vmem>>, vector<1x16xf32>
    %c4 = arith.constant 4 : index
    %c0_9 = arith.constant 0 : index
    %7 = vector.load %arg4[%c4, %c0_9] : memref<6x16xf32, #tpu.memory_space<vmem>>, vector<1x16xf32>
    %c5 = arith.constant 5 : index
    %c0_10 = arith.constant 0 : index
    %8 = vector.load %arg4[%c5, %c0_10] : memref<6x16xf32, #tpu.memory_space<vmem>>, vector<1x16xf32>
    %cst = arith.constant 0.000000e+00 : bf16
    %9 = vector.broadcast %cst : bf16 to vector<16x16xbf16>
    %10 = vector.extract_strided_slice %1 {offsets = [0, 0], sizes = [240, 16], strides = [1, 1]} : vector<256x16xbf16> to vector<240x16xbf16>
    %11 = tpu.concatenate %9, %10 in 0 : vector<16x16xbf16>, vector<240x16xbf16> -> vector<256x16xbf16>
    %c0_11 = arith.constant 0 : index
    %c0_12 = arith.constant 0 : index
    %12 = vector.load %arg3[%c0_11, %c0_12] : memref<192x16xbf16, #tpu.memory_space<vmem>>, vector<16x16xbf16>
    %cst_13 = arith.constant dense<0.000000e+00> : vector<256x16xf32>
    %13 = tpu.matmul %11, %12, %cst_13 {dimension_numbers = #tpu.dot_dimension_numbers<[1], [0], [0], [1], [0, 0, 1, 1], [], []>} : vector<256x16xbf16>, vector<16x16xbf16>, vector<256x16xf32> -> vector<256x16xf32>
    %c16 = arith.constant 16 : index
    %c0_14 = arith.constant 0 : index
    %14 = vector.load %arg3[%c16, %c0_14] : memref<192x16xbf16, #tpu.memory_space<vmem>>, vector<16x16xbf16>
    %cst_15 = arith.constant dense<0.000000e+00> : vector<256x16xf32>
    %15 = tpu.matmul %1, %14, %cst_15 {dimension_numbers = #tpu.dot_dimension_numbers<[1], [0], [0], [1], [0, 0, 1, 1], [], []>} : vector<256x16xbf16>, vector<16x16xbf16>, vector<256x16xf32> -> vector<256x16xf32>
    %16 = arith.addf %13, %15 : vector<256x16xf32>
    %17 = vector.extract_strided_slice %1 {offsets = [16, 0], sizes = [240, 16], strides = [1, 1]} : vector<256x16xbf16> to vector<240x16xbf16>
    %cst_16 = arith.constant 0.000000e+00 : bf16
    %18 = vector.broadcast %cst_16 : bf16 to vector<16x16xbf16>
    %19 = tpu.concatenate %17, %18 in 0 : vector<240x16xbf16>, vector<16x16xbf16> -> vector<256x16xbf16>
    %c32 = arith.constant 32 : index
    %c0_17 = arith.constant 0 : index
    %20 = vector.load %arg3[%c32, %c0_17] : memref<192x16xbf16, #tpu.memory_space<vmem>>, vector<16x16xbf16>
    %cst_18 = arith.constant dense<0.000000e+00> : vector<256x16xf32>
    %21 = tpu.matmul %19, %20, %cst_18 {dimension_numbers = #tpu.dot_dimension_numbers<[1], [0], [0], [1], [0, 0, 1, 1], [], []>} : vector<256x16xbf16>, vector<16x16xbf16>, vector<256x16xf32> -> vector<256x16xf32>
    %22 = arith.addf %16, %21 : vector<256x16xf32>
    %23 = vector.broadcast %3 : vector<1x16xf32> to vector<256x16xf32>
    %24 = arith.addf %22, %23 : vector<256x16xf32>
    %cst_19 = arith.constant 0.000000e+00 : f32
    %25 = vector.broadcast %cst_19 : f32 to vector<256x16xf32>
    %26 = arith.maximumf %24, %25 : vector<256x16xf32>
    %27 = arith.truncf %26 : vector<256x16xf32> to vector<256x16xbf16>
    %cst_20 = arith.constant 0.000000e+00 : bf16
    %28 = vector.broadcast %cst_20 : bf16 to vector<1x16xbf16>
    %29 = vector.extract_strided_slice %27 {offsets = [0, 0], sizes = [255, 16], strides = [1, 1]} : vector<256x16xbf16> to vector<255x16xbf16>
    %30 = tpu.concatenate %28, %29 in 0 : vector<1x16xbf16>, vector<255x16xbf16> -> vector<256x16xbf16>
    %c1_i32 = arith.constant 1 : i32
    %31 = vector.broadcast %c1_i32 : i32 to vector<256x1xi32>
    %32 = arith.cmpi sge, %2, %31 : vector<256x1xi32>
    %cst_21 = arith.constant 0.000000e+00 : bf16
    %33 = vector.broadcast %cst_21 : bf16 to vector<256x16xbf16>
    %34 = vector.shape_cast %32 : vector<256x1xi1> to vector<256x1xi1>
    %35 = vector.broadcast %34 : vector<256x1xi1> to vector<256x16xi1>
    %36 = arith.select %35, %30, %33 : vector<256x16xi1>, vector<256x16xbf16>
    %c48 = arith.constant 48 : index
    %c0_22 = arith.constant 0 : index
    %37 = vector.load %arg3[%c48, %c0_22] : memref<192x16xbf16, #tpu.memory_space<vmem>>, vector<16x16xbf16>
    %cst_23 = arith.constant dense<0.000000e+00> : vector<256x16xf32>
    %38 = tpu.matmul %36, %37, %cst_23 {dimension_numbers = #tpu.dot_dimension_numbers<[1], [0], [0], [1], [0, 0, 1, 1], [], []>} : vector<256x16xbf16>, vector<16x16xbf16>, vector<256x16xf32> -> vector<256x16xf32>
    %c64 = arith.constant 64 : index
    %c0_24 = arith.constant 0 : index
    %39 = vector.load %arg3[%c64, %c0_24] : memref<192x16xbf16, #tpu.memory_space<vmem>>, vector<16x16xbf16>
    %cst_25 = arith.constant dense<0.000000e+00> : vector<256x16xf32>
    %40 = tpu.matmul %27, %39, %cst_25 {dimension_numbers = #tpu.dot_dimension_numbers<[1], [0], [0], [1], [0, 0, 1, 1], [], []>} : vector<256x16xbf16>, vector<16x16xbf16>, vector<256x16xf32> -> vector<256x16xf32>
    %41 = arith.addf %38, %40 : vector<256x16xf32>
    %42 = vector.extract_strided_slice %27 {offsets = [1, 0], sizes = [255, 16], strides = [1, 1]} : vector<256x16xbf16> to vector<255x16xbf16>
    %cst_26 = arith.constant 0.000000e+00 : bf16
    %43 = vector.broadcast %cst_26 : bf16 to vector<1x16xbf16>
    %44 = tpu.concatenate %42, %43 in 0 : vector<255x16xbf16>, vector<1x16xbf16> -> vector<256x16xbf16>
    %c15_i32 = arith.constant 15 : i32
    %45 = vector.broadcast %c15_i32 : i32 to vector<256x1xi32>
    %46 = arith.cmpi slt, %2, %45 : vector<256x1xi32>
    %cst_27 = arith.constant 0.000000e+00 : bf16
    %47 = vector.broadcast %cst_27 : bf16 to vector<256x16xbf16>
    %48 = vector.shape_cast %46 : vector<256x1xi1> to vector<256x1xi1>
    %49 = vector.broadcast %48 : vector<256x1xi1> to vector<256x16xi1>
    %50 = arith.select %49, %44, %47 : vector<256x16xi1>, vector<256x16xbf16>
    %c80 = arith.constant 80 : index
    %c0_28 = arith.constant 0 : index
    %51 = vector.load %arg3[%c80, %c0_28] : memref<192x16xbf16, #tpu.memory_space<vmem>>, vector<16x16xbf16>
    %cst_29 = arith.constant dense<0.000000e+00> : vector<256x16xf32>
    %52 = tpu.matmul %50, %51, %cst_29 {dimension_numbers = #tpu.dot_dimension_numbers<[1], [0], [0], [1], [0, 0, 1, 1], [], []>} : vector<256x16xbf16>, vector<16x16xbf16>, vector<256x16xf32> -> vector<256x16xf32>
    %53 = arith.addf %41, %52 : vector<256x16xf32>
    %54 = vector.broadcast %4 : vector<1x16xf32> to vector<256x16xf32>
    %55 = arith.mulf %53, %54 : vector<256x16xf32>
    %56 = vector.broadcast %5 : vector<1x16xf32> to vector<256x16xf32>
    %57 = arith.addf %55, %56 : vector<256x16xf32>
    %cst_30 = arith.constant 0.000000e+00 : f32
    %58 = vector.broadcast %cst_30 : f32 to vector<256x16xf32>
    %59 = arith.maximumf %57, %58 : vector<256x16xf32>
    %60 = arith.truncf %59 : vector<256x16xf32> to vector<256x16xbf16>
    %cst_31 = arith.constant 0.000000e+00 : bf16
    %61 = vector.broadcast %cst_31 : bf16 to vector<16x16xbf16>
    %62 = vector.extract_strided_slice %60 {offsets = [0, 0], sizes = [240, 16], strides = [1, 1]} : vector<256x16xbf16> to vector<240x16xbf16>
    %63 = tpu.concatenate %61, %62 in 0 : vector<16x16xbf16>, vector<240x16xbf16> -> vector<256x16xbf16>
    %c96 = arith.constant 96 : index
    %c0_32 = arith.constant 0 : index
    %64 = vector.load %arg3[%c96, %c0_32] : memref<192x16xbf16, #tpu.memory_space<vmem>>, vector<16x16xbf16>
    %cst_33 = arith.constant dense<0.000000e+00> : vector<256x16xf32>
    %65 = tpu.matmul %63, %64, %cst_33 {dimension_numbers = #tpu.dot_dimension_numbers<[1], [0], [0], [1], [0, 0, 1, 1], [], []>} : vector<256x16xbf16>, vector<16x16xbf16>, vector<256x16xf32> -> vector<256x16xf32>
    %c112 = arith.constant 112 : index
    %c0_34 = arith.constant 0 : index
    %66 = vector.load %arg3[%c112, %c0_34] : memref<192x16xbf16, #tpu.memory_space<vmem>>, vector<16x16xbf16>
    %cst_35 = arith.constant dense<0.000000e+00> : vector<256x16xf32>
    %67 = tpu.matmul %60, %66, %cst_35 {dimension_numbers = #tpu.dot_dimension_numbers<[1], [0], [0], [1], [0, 0, 1, 1], [], []>} : vector<256x16xbf16>, vector<16x16xbf16>, vector<256x16xf32> -> vector<256x16xf32>
    %68 = arith.addf %65, %67 : vector<256x16xf32>
    %69 = vector.extract_strided_slice %60 {offsets = [16, 0], sizes = [240, 16], strides = [1, 1]} : vector<256x16xbf16> to vector<240x16xbf16>
    %cst_36 = arith.constant 0.000000e+00 : bf16
    %70 = vector.broadcast %cst_36 : bf16 to vector<16x16xbf16>
    %71 = tpu.concatenate %69, %70 in 0 : vector<240x16xbf16>, vector<16x16xbf16> -> vector<256x16xbf16>
    %c128 = arith.constant 128 : index
    %c0_37 = arith.constant 0 : index
    %72 = vector.load %arg3[%c128, %c0_37] : memref<192x16xbf16, #tpu.memory_space<vmem>>, vector<16x16xbf16>
    %cst_38 = arith.constant dense<0.000000e+00> : vector<256x16xf32>
    %73 = tpu.matmul %71, %72, %cst_38 {dimension_numbers = #tpu.dot_dimension_numbers<[1], [0], [0], [1], [0, 0, 1, 1], [], []>} : vector<256x16xbf16>, vector<16x16xbf16>, vector<256x16xf32> -> vector<256x16xf32>
    %74 = arith.addf %68, %73 : vector<256x16xf32>
    %75 = vector.broadcast %6 : vector<1x16xf32> to vector<256x16xf32>
    %76 = arith.addf %74, %75 : vector<256x16xf32>
    %cst_39 = arith.constant 0.000000e+00 : f32
    %77 = vector.broadcast %cst_39 : f32 to vector<256x16xf32>
    %78 = arith.maximumf %76, %77 : vector<256x16xf32>
    %79 = arith.truncf %78 : vector<256x16xf32> to vector<256x16xbf16>
    %cst_40 = arith.constant 0.000000e+00 : bf16
    %80 = vector.broadcast %cst_40 : bf16 to vector<1x16xbf16>
    %81 = vector.extract_strided_slice %79 {offsets = [0, 0], sizes = [255, 16], strides = [1, 1]} : vector<256x16xbf16> to vector<255x16xbf16>
    %82 = tpu.concatenate %80, %81 in 0 : vector<1x16xbf16>, vector<255x16xbf16> -> vector<256x16xbf16>
    %c1_i32_41 = arith.constant 1 : i32
    %83 = vector.broadcast %c1_i32_41 : i32 to vector<256x1xi32>
    %84 = arith.cmpi sge, %2, %83 : vector<256x1xi32>
    %cst_42 = arith.constant 0.000000e+00 : bf16
    %85 = vector.broadcast %cst_42 : bf16 to vector<256x16xbf16>
    %86 = vector.shape_cast %84 : vector<256x1xi1> to vector<256x1xi1>
    %87 = vector.broadcast %86 : vector<256x1xi1> to vector<256x16xi1>
    %88 = arith.select %87, %82, %85 : vector<256x16xi1>, vector<256x16xbf16>
    %c144 = arith.constant 144 : index
    %c0_43 = arith.constant 0 : index
    %89 = vector.load %arg3[%c144, %c0_43] : memref<192x16xbf16, #tpu.memory_space<vmem>>, vector<16x16xbf16>
    %cst_44 = arith.constant dense<0.000000e+00> : vector<256x16xf32>
    %90 = tpu.matmul %88, %89, %cst_44 {dimension_numbers = #tpu.dot_dimension_numbers<[1], [0], [0], [1], [0, 0, 1, 1], [], []>} : vector<256x16xbf16>, vector<16x16xbf16>, vector<256x16xf32> -> vector<256x16xf32>
    %c160 = arith.constant 160 : index
    %c0_45 = arith.constant 0 : index
    %91 = vector.load %arg3[%c160, %c0_45] : memref<192x16xbf16, #tpu.memory_space<vmem>>, vector<16x16xbf16>
    %cst_46 = arith.constant dense<0.000000e+00> : vector<256x16xf32>
    %92 = tpu.matmul %79, %91, %cst_46 {dimension_numbers = #tpu.dot_dimension_numbers<[1], [0], [0], [1], [0, 0, 1, 1], [], []>} : vector<256x16xbf16>, vector<16x16xbf16>, vector<256x16xf32> -> vector<256x16xf32>
    %93 = arith.addf %90, %92 : vector<256x16xf32>
    %94 = vector.extract_strided_slice %79 {offsets = [1, 0], sizes = [255, 16], strides = [1, 1]} : vector<256x16xbf16> to vector<255x16xbf16>
    %cst_47 = arith.constant 0.000000e+00 : bf16
    %95 = vector.broadcast %cst_47 : bf16 to vector<1x16xbf16>
    %96 = tpu.concatenate %94, %95 in 0 : vector<255x16xbf16>, vector<1x16xbf16> -> vector<256x16xbf16>
    %c15_i32_48 = arith.constant 15 : i32
    %97 = vector.broadcast %c15_i32_48 : i32 to vector<256x1xi32>
    %98 = arith.cmpi slt, %2, %97 : vector<256x1xi32>
    %cst_49 = arith.constant 0.000000e+00 : bf16
    %99 = vector.broadcast %cst_49 : bf16 to vector<256x16xbf16>
    %100 = vector.shape_cast %98 : vector<256x1xi1> to vector<256x1xi1>
    %101 = vector.broadcast %100 : vector<256x1xi1> to vector<256x16xi1>
    %102 = arith.select %101, %96, %99 : vector<256x16xi1>, vector<256x16xbf16>
    %c176 = arith.constant 176 : index
    %c0_50 = arith.constant 0 : index
    %103 = vector.load %arg3[%c176, %c0_50] : memref<192x16xbf16, #tpu.memory_space<vmem>>, vector<16x16xbf16>
    %cst_51 = arith.constant dense<0.000000e+00> : vector<256x16xf32>
    %104 = tpu.matmul %102, %103, %cst_51 {dimension_numbers = #tpu.dot_dimension_numbers<[1], [0], [0], [1], [0, 0, 1, 1], [], []>} : vector<256x16xbf16>, vector<16x16xbf16>, vector<256x16xf32> -> vector<256x16xf32>
    %105 = arith.addf %93, %104 : vector<256x16xf32>
    %106 = vector.broadcast %7 : vector<1x16xf32> to vector<256x16xf32>
    %107 = arith.mulf %105, %106 : vector<256x16xf32>
    %108 = vector.broadcast %8 : vector<1x16xf32> to vector<256x16xf32>
    %109 = arith.addf %107, %108 : vector<256x16xf32>
    %110 = arith.extf %1 : vector<256x16xbf16> to vector<256x16xf32>
    %111 = arith.addf %109, %110 : vector<256x16xf32>
    %cst_52 = arith.constant 0.000000e+00 : f32
    %112 = vector.broadcast %cst_52 : f32 to vector<256x16xf32>
    %113 = arith.maximumf %111, %112 : vector<256x16xf32>
    %114 = arith.truncf %113 : vector<256x16xf32> to vector<256x16xbf16>
    %c0_53 = arith.constant 0 : index
    %c0_54 = arith.constant 0 : index
    %c0_55 = arith.constant 0 : index
    %115 = vector.load %arg5[%c0_53, %c0_54, %c0_55] : memref<1x256x16xbf16, #tpu.memory_space<vmem>>, vector<1x256x16xbf16>
    %116 = vector.shape_cast %115 : vector<1x256x16xbf16> to vector<256x16xbf16>
    %117 = vector.shape_cast %114 : vector<256x16xbf16> to vector<1x256x16xbf16>
    tpu.vector_store %arg5[%c0_53, %c0_54, %c0_55], %117 {strides = array<i32>} : memref<1x256x16xbf16, #tpu.memory_space<vmem>>, vector<1x256x16xbf16>,
    return
  }
  func.func @transform_0(%arg0: i32) -> (i32, i32) {
    %c0_i32 = arith.constant 0 : i32
    %c0_i32_0 = arith.constant 0 : i32
    %c0_i32_1 = arith.constant 0 : i32
    return %c0_i32, %c0_i32_0 : i32, i32
  }
  func.func @transform_1(%arg0: i32) -> (i32, i32, i32) {
    %c0_i32 = arith.constant 0 : i32
    %c0_i32_0 = arith.constant 0 : i32
    %c0_i32_1 = arith.constant 0 : i32
    return %arg0, %c0_i32, %c0_i32_0 : i32, i32, i32
  }
  func.func @transform_2(%arg0: i32) -> (i32, i32) {
    %c0_i32 = arith.constant 0 : i32
    %c0_i32_0 = arith.constant 0 : i32
    %c0_i32_1 = arith.constant 0 : i32
    return %c0_i32, %c0_i32_0 : i32, i32
  }
  func.func @transform_3(%arg0: i32) -> (i32, i32) {
    %c0_i32 = arith.constant 0 : i32
    %c0_i32_0 = arith.constant 0 : i32
    %c0_i32_1 = arith.constant 0 : i32
    return %c0_i32, %c0_i32_0 : i32, i32
  }
  func.func @transform_4(%arg0: i32) -> (i32, i32, i32) {
    %c0_i32 = arith.constant 0 : i32
    %c0_i32_0 = arith.constant 0 : i32
    %c0_i32_1 = arith.constant 0 : i32
    return %arg0, %c0_i32, %c0_i32_0 : i32, i32, i32
  }
}

module attributes {stable_mosaic.version = 11 : i64} {
  func.func @_deconv_kernel(%arg0: i32, %arg1: memref<256x1xi32, #tpu.memory_space<vmem>>, %arg2: memref<1x256x16xbf16, #tpu.memory_space<vmem>>, %arg3: memref<16x32xbf16, #tpu.memory_space<vmem>>, %arg4: memref<2x32xf32, #tpu.memory_space<vmem>>, %arg5: memref<1x256x32xbf16, #tpu.memory_space<vmem>>) attributes {dimension_semantics = [#tpu.dimension_semantics<parallel>], iteration_bounds = array<i64: 2>, scalar_prefetch = 0 : i64, scratch_operands = 0 : i64, tpu.core_type = #tpu.core_type<tc>, window_params = [{pipeline_mode = #tpu.pipeline_mode<synchronous>, transform_indices = @transform_0, window_bounds = array<i64: 256, 1>}, {transform_indices = @transform_1, window_bounds = array<i64: 1, 256, 16>}, {pipeline_mode = #tpu.pipeline_mode<synchronous>, transform_indices = @transform_2, window_bounds = array<i64: 16, 32>}, {pipeline_mode = #tpu.pipeline_mode<synchronous>, transform_indices = @transform_3, window_bounds = array<i64: 2, 32>}, {transform_indices = @transform_4, window_bounds = array<i64: 1, 256, 32>}]} {
    %c0 = arith.constant 0 : index
    %c0_0 = arith.constant 0 : index
    %c0_1 = arith.constant 0 : index
    %0 = vector.load %arg2[%c0, %c0_0, %c0_1] : memref<1x256x16xbf16, #tpu.memory_space<vmem>>, vector<1x256x16xbf16>
    %1 = vector.shape_cast %0 : vector<1x256x16xbf16> to vector<256x16xbf16>
    %c0_2 = arith.constant 0 : index
    %c0_3 = arith.constant 0 : index
    %2 = vector.load %arg3[%c0_2, %c0_3] : memref<16x32xbf16, #tpu.memory_space<vmem>>, vector<16x32xbf16>
    %cst = arith.constant dense<0.000000e+00> : vector<256x32xf32>
    %3 = tpu.matmul %1, %2, %cst {dimension_numbers = #tpu.dot_dimension_numbers<[1], [0], [0], [1], [0, 0, 1, 1], [], []>} : vector<256x16xbf16>, vector<16x32xbf16>, vector<256x32xf32> -> vector<256x32xf32>
    %c0_4 = arith.constant 0 : index
    %c0_5 = arith.constant 0 : index
    %4 = vector.load %arg4[%c0_4, %c0_5] : memref<2x32xf32, #tpu.memory_space<vmem>>, vector<1x32xf32>
    %5 = vector.broadcast %4 : vector<1x32xf32> to vector<256x32xf32>
    %6 = arith.mulf %3, %5 : vector<256x32xf32>
    %c1 = arith.constant 1 : index
    %c0_6 = arith.constant 0 : index
    %7 = vector.load %arg4[%c1, %c0_6] : memref<2x32xf32, #tpu.memory_space<vmem>>, vector<1x32xf32>
    %8 = vector.broadcast %7 : vector<1x32xf32> to vector<256x32xf32>
    %9 = arith.addf %6, %8 : vector<256x32xf32>
    %10 = arith.truncf %9 : vector<256x32xf32> to vector<256x32xbf16>
    %c0_7 = arith.constant 0 : index
    %c0_8 = arith.constant 0 : index
    %c0_9 = arith.constant 0 : index
    %11 = vector.load %arg5[%c0_7, %c0_8, %c0_9] : memref<1x256x32xbf16, #tpu.memory_space<vmem>>, vector<1x256x32xbf16>
    %12 = vector.shape_cast %11 : vector<1x256x32xbf16> to vector<256x32xbf16>
    %13 = vector.shape_cast %10 : vector<256x32xbf16> to vector<1x256x32xbf16>
    tpu.vector_store %arg5[%c0_7, %c0_8, %c0_9], %13 {strides = array<i32>} : memref<1x256x32xbf16, #tpu.memory_space<vmem>>, vector<1x256x32xbf16>,
    return
  }
  func.func @transform_0(%arg0: i32) -> (i32, i32) {
    %c0_i32 = arith.constant 0 : i32
    %c0_i32_0 = arith.constant 0 : i32
    %c0_i32_1 = arith.constant 0 : i32
    return %c0_i32, %c0_i32_0 : i32, i32
  }
  func.func @transform_1(%arg0: i32) -> (i32, i32, i32) {
    %c0_i32 = arith.constant 0 : i32
    %c0_i32_0 = arith.constant 0 : i32
    %c0_i32_1 = arith.constant 0 : i32
    return %arg0, %c0_i32, %c0_i32_0 : i32, i32, i32
  }
  func.func @transform_2(%arg0: i32) -> (i32, i32) {
    %c0_i32 = arith.constant 0 : i32
    %c0_i32_0 = arith.constant 0 : i32
    %c0_i32_1 = arith.constant 0 : i32
    return %c0_i32, %c0_i32_0 : i32, i32
  }
  func.func @transform_3(%arg0: i32) -> (i32, i32) {
    %c0_i32 = arith.constant 0 : i32
    %c0_i32_0 = arith.constant 0 : i32
    %c0_i32_1 = arith.constant 0 : i32
    return %c0_i32, %c0_i32_0 : i32, i32
  }
  func.func @transform_4(%arg0: i32) -> (i32, i32, i32) {
    %c0_i32 = arith.constant 0 : i32
    %c0_i32_0 = arith.constant 0 : i32
    %c0_i32_1 = arith.constant 0 : i32
    return %arg0, %c0_i32, %c0_i32_0 : i32, i32, i32
  }
}

</mosaic_0001>

<bundles_post_ra>
// kernel: net_forward.23
= control target key start
LH: loop header
LB: loop body
LE: loop exit
PB: predicated region body
PF: predicated region fallthrough
CT: control target
= control target key end

     0   :  { %s1095_s15 = smov 0   ;;  %s1299_s0 = inlined_call_operand.vmem [shape: bf16[512,32], index: 0, kind: input, shape index: {}]   ;;  %s1300_s1 = inlined_call_operand.vmem [shape: bf16[32,13], index: 1, kind: input, shape index: {}]   ;;  %s1301_s2 = inlined_call_operand.vmem [shape: f32[1,13], index: 2, kind: input, shape index: {}]   ;;  %s1302_s3 = inlined_call_operand.vmem [shape: f32[1,13], index: 3, kind: input, shape index: {}]   ;;  %s1303_s4 = inlined_call_operand.vmem [shape: bf16[512,13], index: 4, kind: output, shape index: {}]  }
   0x1 LB: > { %s867_s16 = sadd.s32 4294967295, %s1068_s15   ;;  %p871_p0 = scmp.ge.s32.totalorder %s1068_s15, 1  ;;  %s1068_s15 = sphi %s1095_s15, %s14_s15  }
   0x2   : > { %p163_p1 = scmp.lt.s32.totalorder %s1068_s15, 3 }
   0x4   : > { %p164_p2 = pnand %p871_p0, %p163_p1 }
   0x5   : > { %s872_s19 = sshll.u32 (!%p164_p2), %s867_s16, 5 }
   0x6   : > { %167 = sbr.rel (%p164_p2) target bundleno = 253 (0xfd), region = 36  ;;  %p190_p3 = scmp.lt.s32.totalorder (!%p164_p2), %s872_s19, 63 }
   0xb   : > { %v1044_v0 = vld [vmem:[%s1300_s1 + $0x8] sm:$0xff]   ;;  %v1045_v1 = vld [vmem:[%s1300_s1] sm:$0xff]   ;;  %s1305_s19 = smov (!%p190_p3, %s872_s19), 63  ;;  %vm330_vm0 = vcmask 261120   ;;  %vm778_vm1 = vcmask 101376  }
   0xc   : > { %996 = vmatprep.subr.bf16.mxu0 %v1044_v0  ;;  %1032 = vmatprep.subr.bf16.mxu1 %v1044_v0  ;;  %s873_s22 = sshll.u32 %s1305_s19, 2  ;;  %v1154_v18 = vld [vmem:[%s1301_s2] ss:$0 sm:$0xff] }
   0xd   : > { %997 = vmatpush3.bf16.msra.mxu0 %v1044_v0  ;;  %1034 = vmatpush3.bf16.msra.mxu1 %v1044_v0  ;;  %s1117_s25 = scalar_lea.vmem %s1299_s0, %s873_s22  ;;  %v1159_v20 = vld [vmem:[%s1302_s3] ss:$0 sm:$0xff]  ;;  %s1174_s6 = scalar_lea.vmem %s1303_s4, %s873_s22 }
   0xe   : > { %998 = vmatprep.subr.bf16.mxu0 %v1045_v1  ;;  %1033 = vmatprep.subr.bf16.mxu1 %v1045_v1  ;;  %v1046_v2 = vld [vmem:[%s1117_s25] sm:$0xff]   ;;  %v1048_v4 = vld [vmem:[%s1117_s25 + $0x8] sm:$0xff]   ;;  %v1050_v6 = vld [vmem:[%s1117_s25 + $0x10] sm:$0xff]  }
   0xf   : > { %v1047_v3 = vld [vmem:[%s1117_s25 + $0x40] sm:$0xff]   ;;  %1000 = vmatprep.mubr.msk.bf16.mxu0 %vm330_vm0, %v1046_v2  ;;  %v1049_v5 = vld [vmem:[%s1117_s25 + $0x48] sm:$0xff]   ;;  %v1051_v7 = vld [vmem:[%s1117_s25 + $0x50] sm:$0xff]  }
  0x10   : > { %1016 = vmatprep.mubr.msk.bf16.mxu1 %vm330_vm0, %v1047_v3  ;;  %v1052_v8 = vld [vmem:[%s1117_s25 + $0x18] sm:$0xff]   ;;  %v1054_v10 = vld [vmem:[%s1117_s25 + $0x20] sm:$0xff]   ;;  %v1056_v12 = vld [vmem:[%s1117_s25 + $0x28] sm:$0xff]  }
  0x11   : > { %999 = vmatpush3.bf16.msra.mxu0 %v1045_v1  ;;  %1035 = vmatpush3.bf16.msra.mxu1 %v1045_v1  ;;  %v1053_v9 = vld [vmem:[%s1117_s25 + $0x58] sm:$0xff]   ;;  %v1055_v11 = vld [vmem:[%s1117_s25 + $0x60] sm:$0xff]   ;;  %v1057_v13 = vld [vmem:[%s1117_s25 + $0x68] sm:$0xff]  }
  0x12   : > { %v1058_v14 = vld [vmem:[%s1117_s25 + $0x30] sm:$0xff]   ;;  %v1060_v16 = vld [vmem:[%s1117_s25 + $0x38] sm:$0xff]  }
  0x13   : > { %v1059_v15 = vld [vmem:[%s1117_s25 + $0x70] sm:$0xff]   ;;  %v1061_v17 = vld [vmem:[%s1117_s25 + $0x78] sm:$0xff]  }
  0x14   : > { %1001 = vmatmul.mubr.msk.bf16.vlgmr.msra.gmra.mxu0 %vm330_vm0, %v1048_v4  ;;  %1017 = vmatmul.mubr.msk.bf16.vlgmr.msra.gmra.mxu1 %vm330_vm0, %v1049_v5 }
  0x15   : > { %1004 = vmatprep.mubr.msk.bf16.mxu0 %vm330_vm0, %v1050_v6  ;;  %1020 = vmatprep.mubr.msk.bf16.mxu1 %vm330_vm0, %v1051_v7 }
  0x1c   : > { %1005 = vmatmul.mubr.msk.bf16.gmra.mxu0 %vm330_vm0, %v1052_v8  ;;  %1021 = vmatmul.mubr.msk.bf16.gmra.mxu1 %vm330_vm0, %v1053_v9 }
  0x1d   : > { %1008 = vmatprep.mubr.msk.bf16.mxu0 %vm330_vm0, %v1054_v10  ;;  %1024 = vmatprep.mubr.msk.bf16.mxu1 %vm330_vm0, %v1055_v11 }
  0x24   : > { %1009 = vmatmul.mubr.msk.bf16.gmra.mxu0 %vm330_vm0, %v1056_v12  ;;  %1025 = vmatmul.mubr.msk.bf16.gmra.mxu1 %vm330_vm0, %v1057_v13 }
  0x25   : > { %1012 = vmatprep.mubr.msk.bf16.mxu0 %vm330_vm0, %v1058_v14  ;;  %1028 = vmatprep.mubr.msk.bf16.mxu1 %vm330_vm0, %v1059_v15 }
  0x2c   : > { %1013 = vmatmul.mubr.msk.bf16.gmra.mxu0 %vm330_vm0, %v1060_v16  ;;  %1029 = vmatmul.mubr.msk.bf16.gmra.mxu1 %vm330_vm0, %v1061_v17 }
  0xd4   : > { %v1002_v19 = vpop.f32.mrf.mxu0  ;;  %v1018_v22 = vpop.f32.mrf.mxu1 }
  0xd5   : > { %v549_v21 = vmul.f32 %v1002_v19, %v1154_v18  ;;  %v565_v23 = vmul.f32 %v1018_v22, %v1154_v18 }
  0xd6   : > { %v413_v24 = vpop.f32.mrf.mxu0  ;;  %v477_v27 = vpop.f32.mrf.mxu1 }
  0xd7   : > { %v588_v25 = vadd.f32 %v1159_v20, %v549_v21  ;;  %v547_v26 = vmul.f32 %v1154_v18, %v413_v24  ;;  %v604_v28 = vadd.f32 %v1159_v20, %v565_v23  ;;  %v563_v29 = vmul.f32 %v1154_v18, %v477_v27 }
  0xd8   : > { %v1003_v30 = vpop.f32.mrf.mxu0  ;;  %v1019_v34 = vpop.f32.mrf.mxu1 }
  0xd9   : > { %v620_v31 = vmax.f32 %v588_v25, 0.0  ;;  %v586_v32 = vadd.f32 %v1159_v20, %v547_v26  ;;  %v550_v33 = vmul.f32 %v1003_v30, %v1154_v18  ;;  %v636_v35 = vmax.f32 %v604_v28, 0.0 }
  0xda   : > { %v602_v36 = vadd.f32 %v1159_v20, %v563_v29  ;;  %v566_v37 = vmul.f32 %v1019_v34, %v1154_v18  ;;  %v416_v38 = vpop.f32.mrf.mxu0  ;;  %v480_v43 = vpop.f32.mrf.mxu1 }
  0xdb   : > { %v948_v39 = vpack.c.bf16 %v620_v31, %v620_v31  ;;  %v618_v40 = vmax.f32 %v586_v32, 0.0  ;;  %v589_v41 = vadd.f32 %v1159_v20, %v550_v33  ;;  %v548_v42 = vmul.f32 %v1154_v18, %v416_v38 }
  0xdc   : > { %v964_v44 = vpack.c.bf16 %v636_v35, %v636_v35  ;;  %v634_v45 = vmax.f32 %v602_v36, 0.0  ;;  %v605_v46 = vadd.f32 %v1159_v20, %v566_v37  ;;  %v564_v47 = vmul.f32 %v1154_v18, %v480_v43  ;;  %v1006_v48 = vpop.f32.mrf.mxu0  ;;  %v1022_v53 = vpop.f32.mrf.mxu1 }
  0xdd   : > { %781 = vst.msk [vmem:[%s1174_s6 + $0x8] sm:$0xf] %vm778_vm1, %v948_v39  ;;  %v946_v49 = vpack.c.bf16 %v618_v40, %v618_v40  ;;  %v621_v50 = vmax.f32 %v589_v41, 0.0  ;;  %v587_v51 = vadd.f32 %v1159_v20, %v548_v42  ;;  %v553_v52 = vmul.f32 %v1006_v48, %v1154_v18 }
  0xde   : > { %797 = vst.msk [vmem:[%s1174_s6 + $0x48] sm:$0xf] %vm778_vm1, %v964_v44  ;;  %v962_v54 = vpack.c.bf16 %v634_v45, %v634_v45  ;;  %v637_v55 = vmax.f32 %v605_v46, 0.0  ;;  %v603_v56 = vadd.f32 %v1159_v20, %v564_v47  ;;  %v569_v57 = vmul.f32 %v1022_v53, %v1154_v18  ;;  %v429_v58 = vpop.f32.mrf.mxu0  ;;  %v493_v63 = vpop.f32.mrf.mxu1 }
  0xdf   : > { %779 = vst.msk [vmem:[%s1174_s6] sm:$0xf] %vm778_vm1, %v946_v49  ;;  %v949_v59 = vpack.c.bf16 %v621_v50, %v621_v50  ;;  %v619_v60 = vmax.f32 %v587_v51, 0.0  ;;  %v592_v61 = vadd.f32 %v1159_v20, %v553_v52  ;;  %v551_v62 = vmul.f32 %v1154_v18, %v429_v58 }
  0xe0   : > { %795 = vst.msk [vmem:[%s1174_s6 + $0x40] sm:$0xf] %vm778_vm1, %v962_v54  ;;  %v965_v0 = vpack.c.bf16 %v637_v55, %v637_v55  ;;  %v635_v1 = vmax.f32 %v603_v56, 0.0  ;;  %v608_v2 = vadd.f32 %v1159_v20, %v569_v57  ;;  %v567_v3 = vmul.f32 %v1154_v18, %v493_v63  ;;  %v1007_v4 = vpop.f32.mrf.mxu0  ;;  %v1023_v9 = vpop.f32.mrf.mxu1 }
  0xe1   : > { %782 = vst.msk [vmem:[%s1174_s6 + $0xc] sm:$0xf] %vm778_vm1, %v949_v59  ;;  %v947_v5 = vpack.c.bf16 %v619_v60, %v619_v60  ;;  %v624_v6 = vmax.f32 %v592_v61, 0.0  ;;  %v590_v7 = vadd.f32 %v1159_v20, %v551_v62  ;;  %v554_v8 = vmul.f32 %v1007_v4, %v1154_v18 }
  0xe2   : > { %798 = vst.msk [vmem:[%s1174_s6 + $0x4c] sm:$0xf] %vm778_vm1, %v965_v0  ;;  %v963_v10 = vpack.c.bf16 %v635_v1, %v635_v1  ;;  %v640_v11 = vmax.f32 %v608_v2, 0.0  ;;  %v606_v12 = vadd.f32 %v1159_v20, %v567_v3  ;;  %v570_v13 = vmul.f32 %v1023_v9, %v1154_v18  ;;  %v432_v14 = vpop.f32.mrf.mxu0  ;;  %v496_v21 = vpop.f32.mrf.mxu1 }
  0xe3   : > { %780 = vst.msk [vmem:[%s1174_s6 + $0x4] sm:$0xf] %vm778_vm1, %v947_v5  ;;  %v952_v15 = vpack.c.bf16 %v624_v6, %v624_v6  ;;  %v622_v16 = vmax.f32 %v590_v7, 0.0  ;;  %v593_v17 = vadd.f32 %v1159_v20, %v554_v8  ;;  %v552_v19 = vmul.f32 %v1154_v18, %v432_v14 }
  0xe4   : > { %796 = vst.msk [vmem:[%s1174_s6 + $0x44] sm:$0xf] %vm778_vm1, %v963_v10  ;;  %v968_v22 = vpack.c.bf16 %v640_v11, %v640_v11  ;;  %v638_v23 = vmax.f32 %v606_v12, 0.0  ;;  %v609_v24 = vadd.f32 %v1159_v20, %v570_v13  ;;  %v568_v25 = vmul.f32 %v1154_v18, %v496_v21  ;;  %v1010_v26 = vpop.f32.mrf.mxu0  ;;  %v1026_v31 = vpop.f32.mrf.mxu1 }
  0xe5   : > { %785 = vst.msk [vmem:[%s1174_s6 + $0x18] sm:$0xf] %vm778_vm1, %v952_v15  ;;  %v950_v27 = vpack.c.bf16 %v622_v16, %v622_v16  ;;  %v625_v28 = vmax.f32 %v593_v17, 0.0  ;;  %v591_v29 = vadd.f32 %v1159_v20, %v552_v19  ;;  %v557_v30 = vmul.f32 %v1010_v26, %v1154_v18 }
  0xe6   : > { %801 = vst.msk [vmem:[%s1174_s6 + $0x58] sm:$0xf] %vm778_vm1, %v968_v22  ;;  %v966_v32 = vpack.c.bf16 %v638_v23, %v638_v23  ;;  %v641_v33 = vmax.f32 %v609_v24, 0.0  ;;  %v607_v34 = vadd.f32 %v1159_v20, %v568_v25  ;;  %v573_v35 = vmul.f32 %v1026_v31, %v1154_v18  ;;  %v445_v36 = vpop.f32.mrf.mxu0  ;;  %v509_v41 = vpop.f32.mrf.mxu1 }
  0xe7   : > { %783 = vst.msk [vmem:[%s1174_s6 + $0x10] sm:$0xf] %vm778_vm1, %v950_v27  ;;  %v953_v37 = vpack.c.bf16 %v625_v28, %v625_v28  ;;  %v623_v38 = vmax.f32 %v591_v29, 0.0  ;;  %v596_v39 = vadd.f32 %v1159_v20, %v557_v30  ;;  %v555_v40 = vmul.f32 %v1154_v18, %v445_v36 }
  0xe8   : > { %799 = vst.msk [vmem:[%s1174_s6 + $0x50] sm:$0xf] %vm778_vm1, %v966_v32  ;;  %v969_v42 = vpack.c.bf16 %v641_v33, %v641_v33  ;;  %v639_v43 = vmax.f32 %v607_v34, 0.0  ;;  %v612_v44 = vadd.f32 %v1159_v20, %v573_v35  ;;  %v571_v45 = vmul.f32 %v1154_v18, %v509_v41  ;;  %v1011_v46 = vpop.f32.mrf.mxu0  ;;  %v1027_v51 = vpop.f32.mrf.mxu1 }
  0xe9   : > { %786 = vst.msk [vmem:[%s1174_s6 + $0x1c] sm:$0xf] %vm778_vm1, %v953_v37  ;;  %v951_v47 = vpack.c.bf16 %v623_v38, %v623_v38  ;;  %v628_v48 = vmax.f32 %v596_v39, 0.0  ;;  %v594_v49 = vadd.f32 %v1159_v20, %v555_v40  ;;  %v558_v50 = vmul.f32 %v1011_v46, %v1154_v18 }
  0xea   : > { %802 = vst.msk [vmem:[%s1174_s6 + $0x5c] sm:$0xf] %vm778_vm1, %v969_v42  ;;  %v967_v52 = vpack.c.bf16 %v639_v43, %v639_v43  ;;  %v644_v53 = vmax.f32 %v612_v44, 0.0  ;;  %v610_v54 = vadd.f32 %v1159_v20, %v571_v45  ;;  %v574_v55 = vmul.f32 %v1027_v51, %v1154_v18  ;;  %v448_v56 = vpop.f32.mrf.mxu0  ;;  %v512_v61 = vpop.f32.mrf.mxu1 }
  0xeb   : > { %784 = vst.msk [vmem:[%s1174_s6 + $0x14] sm:$0xf] %vm778_vm1, %v951_v47  ;;  %v956_v57 = vpack.c.bf16 %v628_v48, %v628_v48  ;;  %v626_v58 = vmax.f32 %v594_v49, 0.0  ;;  %v597_v59 = vadd.f32 %v1159_v20, %v558_v50  ;;  %v556_v60 = vmul.f32 %v1154_v18, %v448_v56 }
  0xec   : > { %800 = vst.msk [vmem:[%s1174_s6 + $0x54] sm:$0xf] %vm778_vm1, %v967_v52  ;;  %v972_v62 = vpack.c.bf16 %v644_v53, %v644_v53  ;;  %v642_v63 = vmax.f32 %v610_v54, 0.0  ;;  %v613_v0 = vadd.f32 %v1159_v20, %v574_v55  ;;  %v572_v1 = vmul.f32 %v1154_v18, %v512_v61  ;;  %v1014_v2 = vpop.f32.mrf.mxu0  ;;  %v1030_v7 = vpop.f32.mrf.mxu1 }
  0xed   : > { %789 = vst.msk [vmem:[%s1174_s6 + $0x28] sm:$0xf] %vm778_vm1, %v956_v57  ;;  %v954_v3 = vpack.c.bf16 %v626_v58, %v626_v58  ;;  %v629_v4 = vmax.f32 %v597_v59, 0.0  ;;  %v595_v5 = vadd.f32 %v1159_v20, %v556_v60  ;;  %v561_v6 = vmul.f32 %v1014_v2, %v1154_v18 }
  0xee   : > { %805 = vst.msk [vmem:[%s1174_s6 + $0x68] sm:$0xf] %vm778_vm1, %v972_v62  ;;  %v970_v8 = vpack.c.bf16 %v642_v63, %v642_v63  ;;  %v645_v9 = vmax.f32 %v613_v0, 0.0  ;;  %v611_v10 = vadd.f32 %v1159_v20, %v572_v1  ;;  %v577_v11 = vmul.f32 %v1030_v7, %v1154_v18  ;;  %v461_v12 = vpop.f32.mrf.mxu0  ;;  %v525_v17 = vpop.f32.mrf.mxu1 }
  0xef   : > { %787 = vst.msk [vmem:[%s1174_s6 + $0x20] sm:$0xf] %vm778_vm1, %v954_v3  ;;  %v957_v13 = vpack.c.bf16 %v629_v4, %v629_v4  ;;  %v627_v14 = vmax.f32 %v595_v5, 0.0  ;;  %v600_v15 = vadd.f32 %v1159_v20, %v561_v6  ;;  %v559_v16 = vmul.f32 %v1154_v18, %v461_v12 }
  0xf0   : > { %803 = vst.msk [vmem:[%s1174_s6 + $0x60] sm:$0xf] %vm778_vm1, %v970_v8  ;;  %v973_v19 = vpack.c.bf16 %v645_v9, %v645_v9  ;;  %v643_v21 = vmax.f32 %v611_v10, 0.0  ;;  %v616_v22 = vadd.f32 %v1159_v20, %v577_v11  ;;  %v575_v23 = vmul.f32 %v1154_v18, %v525_v17  ;;  %v1015_v24 = vpop.f32.mrf.mxu0  ;;  %v1031_v29 = vpop.f32.mrf.mxu1 }
  0xf1   : > { %790 = vst.msk [vmem:[%s1174_s6 + $0x2c] sm:$0xf] %vm778_vm1, %v957_v13  ;;  %v955_v25 = vpack.c.bf16 %v627_v14, %v627_v14  ;;  %v632_v26 = vmax.f32 %v600_v15, 0.0  ;;  %v598_v27 = vadd.f32 %v1159_v20, %v559_v16  ;;  %v562_v28 = vmul.f32 %v1015_v24, %v1154_v18 }
  0xf2   : > { %806 = vst.msk [vmem:[%s1174_s6 + $0x6c] sm:$0xf] %vm778_vm1, %v973_v19  ;;  %v971_v30 = vpack.c.bf16 %v643_v21, %v643_v21  ;;  %v648_v31 = vmax.f32 %v616_v22, 0.0  ;;  %v614_v32 = vadd.f32 %v1159_v20, %v575_v23  ;;  %v578_v33 = vmul.f32 %v1031_v29, %v1154_v18  ;;  %v464_v34 = vpop.f32.mrf.mxu0  ;;  %v528_v39 = vpop.f32.mrf.mxu1 }
  0xf3   : > { %788 = vst.msk [vmem:[%s1174_s6 + $0x24] sm:$0xf] %vm778_vm1, %v955_v25  ;;  %v960_v35 = vpack.c.bf16 %v632_v26, %v632_v26  ;;  %v630_v36 = vmax.f32 %v598_v27, 0.0  ;;  %v601_v37 = vadd.f32 %v1159_v20, %v562_v28  ;;  %v560_v38 = vmul.f32 %v1154_v18, %v464_v34 }
  0xf4   : > { %804 = vst.msk [vmem:[%s1174_s6 + $0x64] sm:$0xf] %vm778_vm1, %v971_v30  ;;  %v976_v40 = vpack.c.bf16 %v648_v31, %v648_v31  ;;  %v646_v41 = vmax.f32 %v614_v32, 0.0  ;;  %v617_v42 = vadd.f32 %v1159_v20, %v578_v33  ;;  %v576_v43 = vmul.f32 %v1154_v18, %v528_v39 }
  0xf5   : > { %793 = vst.msk [vmem:[%s1174_s6 + $0x38] sm:$0xf] %vm778_vm1, %v960_v35  ;;  %v958_v44 = vpack.c.bf16 %v630_v36, %v630_v36  ;;  %v633_v45 = vmax.f32 %v601_v37, 0.0  ;;  %v599_v46 = vadd.f32 %v1159_v20, %v560_v38 }
  0xf6   : > { %809 = vst.msk [vmem:[%s1174_s6 + $0x78] sm:$0xf] %vm778_vm1, %v976_v40  ;;  %v974_v47 = vpack.c.bf16 %v646_v41, %v646_v41  ;;  %v649_v48 = vmax.f32 %v617_v42, 0.0  ;;  %v615_v49 = vadd.f32 %v1159_v20, %v576_v43 }
  0xf7   : > { %791 = vst.msk [vmem:[%s1174_s6 + $0x30] sm:$0xf] %vm778_vm1, %v958_v44  ;;  %v961_v50 = vpack.c.bf16 %v633_v45, %v633_v45  ;;  %v631_v51 = vmax.f32 %v599_v46, 0.0 }
  0xf8   : > { %807 = vst.msk [vmem:[%s1174_s6 + $0x70] sm:$0xf] %vm778_vm1, %v974_v47  ;;  %v977_v18 = vpack.c.bf16 %v649_v48, %v649_v48  ;;  %v647_v52 = vmax.f32 %v615_v49, 0.0 }
  0xf9   : > { %794 = vst.msk [vmem:[%s1174_s6 + $0x3c] sm:$0xf] %vm778_vm1, %v961_v50  ;;  %v959_v53 = vpack.c.bf16 %v631_v51, %v631_v51 }
  0xfa   : > { %810 = vst.msk [vmem:[%s1174_s6 + $0x7c] sm:$0xf] %vm778_vm1, %v977_v18  ;;  %v975_v54 = vpack.c.bf16 %v647_v52, %v647_v52 }
  0xfb   : > { %792 = vst.msk [vmem:[%s1174_s6 + $0x34] sm:$0xf] %vm778_vm1, %v959_v53 }
  0xfc   : > { %808 = vst.msk [vmem:[%s1174_s6 + $0x74] sm:$0xf] %vm778_vm1, %v975_v54 }
  0xfd PF: > { %s14_s15 = sadd.s32 1, %s1068_s15  }
  0xfe   : > { %p11_p4 = scmp.ge.s32.totalorder %s14_s15, 4  }
 0x100   :  { %13 = sbr.rel (!%p11_p4) target bundleno = 1 (0x1), region = 66 }

// kernel: net_forward.24
= control target key start
LH: loop header
LB: loop body
LE: loop exit
PB: predicated region body
PF: predicated region fallthrough
CT: control target
= control target key end

     0   :  { %s668_s15 = smov 0   ;;  %s754_s0 = inlined_call_operand.vmem [shape: bf16[128,144], index: 0, kind: input, shape index: {}]   ;;  %s755_s1 = inlined_call_operand.vmem [shape: bf16[144,48], index: 1, kind: input, shape index: {}]   ;;  %s756_s2 = inlined_call_operand.vmem [shape: f32[1,48], index: 2, kind: input, shape index: {}]   ;;  %s757_s3 = inlined_call_operand.vmem [shape: f32[1,48], index: 3, kind: input, shape index: {}]   ;;  %s758_s4 = inlined_call_operand.vmem [shape: bf16[128,48], index: 4, kind: output, shape index: {}]  }
   0x1 LB: > { %s534_s16 = sadd.s32 4294967295, %s640_s15   ;;  %p538_p0 = scmp.ge.s32.totalorder %s640_s15, 1  ;;  %s640_s15 = sphi %s668_s15, %s14_s15  }
   0x2   : > { %p164_p1 = scmp.lt.s32.totalorder %s640_s15, 3 }
   0x4   : > { %p165_p2 = pnand %p538_p0, %p164_p1 }
   0x5   : > { %s539_s19 = sshll.u32 (!%p165_p2), %s534_s16, 3 }
   0x6   : > { %168 = sbr.rel (%p165_p2) target bundleno = 262 (0x106), region = 36  ;;  %p192_p3 = scmp.lt.s32.totalorder (!%p165_p2), %s539_s19, 15 }
   0xb   : > { %v613_v0 = vld [vmem:[%s755_s1 + $0x38] sm:$0xff]   ;;  %v642_v1 = vmov 0   ;;  %v614_v2 = vld [vmem:[%s755_s1 + $0x30] sm:$0xff]   ;;  %s760_s19 = smov (!%p192_p3, %s539_s19), 15  ;;  %v615_v3 = vld [vmem:[%s755_s1 + $0x28] sm:$0xff]   ;;  %vm321_vm0 = vcmask 130048  }
   0xc   : > { %334 = vmatprep.subr.bf16.mxu0 %v642_v1  ;;  %586 = vmatprep.subr.bf16.mxu1 %v642_v1  ;;  %s577_s24 = sshll.u32 %s760_s19, 3  ;;  %v616_v4 = vld [vmem:[%s755_s1 + $0x20] sm:$0xff]   ;;  %v617_v7 = vld [vmem:[%s755_s1 + $0x18] sm:$0xff]   ;;  %v618_v8 = vld [vmem:[%s755_s1 + $0x10] sm:$0xff]   ;;  %s543_s20 = sshll.u32 %s760_s19, 2  ;;  %vm469_vm1 = vcmask 388096  }
   0xd   : > { %335 = vmatpush1.bf16.msra.mxu0 %v613_v0  ;;  %595 = vmatpush1.bf16.msra.mxu1 %v613_v0  ;;  %s691_s27 = scalar_lea.vmem %s754_s0, %s577_s24  ;;  %v619_v9 = vld [vmem:[%s755_s1 + $0x8] sm:$0xff]   ;;  %v620_v10 = vld [vmem:[%s755_s1] sm:$0xff]   ;;  %s733_s23 = scalar_lea.vmem %s758_s4, %s543_s20 }
   0xe   : > { %336 = vmatprep.subr.bf16.mxu0 %v642_v1  ;;  %587 = vmatprep.subr.bf16.mxu1 %v642_v1  ;;  %v624_v5 = vld [vmem:[%s691_s27 + $0x4] ss:$8 sps:$4 sm:$0xff]   ;;  %v622_v12 = vld [vmem:[%s691_s27] ss:$8 sps:$4 sm:$0xff]   ;;  %v628_v14 = vld [vmem:[%s691_s27 + $0x14] ss:$8 sps:$4 sm:$0xff]  }
   0xf   : > { %v627_v6 = vld [vmem:[%s691_s27 + $0x24] ss:$8 sps:$4 sm:$0xff]   ;;  %561 = vmatprep.mubr.msk.bf16.mxu0 %vm321_vm0, %v624_v5  ;;  %v625_v13 = vld [vmem:[%s691_s27 + $0x20] ss:$8 sps:$4 sm:$0xff]   ;;  %v630_v15 = vld [vmem:[%s691_s27 + $0x34] ss:$8 sps:$4 sm:$0xff]  }
  0x10   : > { %563 = vmatprep.mubr.msk.bf16.mxu1 %vm321_vm0, %v627_v6  ;;  %v621_v11 = vld [vmem:[%s755_s1 + $0x40] sm:$0xff]   ;;  %v632_v16 = vld [vmem:[%s691_s27 + $0x10] ss:$8 sps:$4 sm:$0xff]  }
  0x11   : > { %337 = vmatpush1.bf16.msra.mxu0 %v614_v2  ;;  %596 = vmatpush1.bf16.msra.mxu1 %v614_v2  ;;  %v633_v17 = vld [vmem:[%s691_s27 + $0x30] ss:$8 sps:$4 sm:$0xff]   ;;  %v565_v18 = vld [vmem:[%s756_s2] ss:$0 sm:$0xff] }
  0x12   : > { %338 = vmatprep.subr.bf16.mxu0 %v642_v1  ;;  %588 = vmatprep.subr.bf16.mxu1 %v642_v1  ;;  %v566_v20 = vld [vmem:[%s757_s3] ss:$0 sm:$0xff] }
  0x15   : > { %339 = vmatpush1.bf16.msra.mxu0 %v615_v3  ;;  %597 = vmatpush1.bf16.msra.mxu1 %v615_v3 }
  0x16   : > { %340 = vmatprep.subr.bf16.mxu0 %v642_v1  ;;  %589 = vmatprep.subr.bf16.mxu1 %v642_v1 }
  0x19   : > { %341 = vmatpush1.bf16.msra.mxu0 %v616_v4  ;;  %598 = vmatpush1.bf16.msra.mxu1 %v616_v4 }
  0x1a   : > { %342 = vmatprep.subr.bf16.mxu0 %v642_v1  ;;  %590 = vmatprep.subr.bf16.mxu1 %v642_v1 }
  0x1d   : > { %343 = vmatpush1.bf16.msra.mxu0 %v617_v7  ;;  %599 = vmatpush1.bf16.msra.mxu1 %v617_v7 }
  0x1e   : > { %344 = vmatprep.subr.bf16.mxu0 %v642_v1  ;;  %591 = vmatprep.subr.bf16.mxu1 %v642_v1 }
  0x21   : > { %345 = vmatpush1.bf16.msra.mxu0 %v618_v8  ;;  %600 = vmatpush1.bf16.msra.mxu1 %v618_v8 }
  0x22   : > { %346 = vmatprep.subr.bf16.mxu0 %v642_v1  ;;  %592 = vmatprep.subr.bf16.mxu1 %v642_v1 }
  0x25   : > { %347 = vmatpush1.bf16.msra.mxu0 %v619_v9  ;;  %601 = vmatpush1.bf16.msra.mxu1 %v619_v9 }
  0x26   : > { %348 = vmatprep.subr.bf16.mxu0 %v642_v1  ;;  %593 = vmatprep.subr.bf16.mxu1 %v642_v1 }
  0x29   : > { %349 = vmatpush1.bf16.msra.mxu0 %v620_v10  ;;  %602 = vmatpush1.bf16.msra.mxu1 %v620_v10 }
  0x2a   : > { %364 = vmatprep.subr.bf16.mxu0 %v642_v1  ;;  %594 = vmatprep.subr.bf16.mxu1 %v642_v1 }
  0x2d   : > { %365 = vmatpush2.bf16.msra.mxu0 %v621_v11  ;;  %603 = vmatpush2.bf16.msra.mxu1 %v621_v11 }
  0x30   : > { %367 = vmatmul.mubr.bf16.vlgmr.msra.gmra.mxu0 %v622_v12  ;;  %383 = vmatmul.mubr.bf16.vlgmr.msra.gmra.mxu1 %v625_v13 }
  0x31   : > { %562 = vmatprep.mubr.msk.bf16.mxu0 %vm321_vm0, %v628_v14  ;;  %564 = vmatprep.mubr.msk.bf16.mxu1 %vm321_vm0, %v630_v15 }
  0x38   : > { %375 = vmatmul.mubr.bf16.gmra.mxu0 %v632_v16  ;;  %391 = vmatmul.mubr.bf16.gmra.mxu1 %v633_v17 }
  0xf0   : > { %v368_v19 = vpop.f32.mrf.mxu0  ;;  %v384_v21 = vpop.f32.mrf.mxu1 }
  0xf1   : > { %v406_v22 = vmul.f32 %v565_v18, %v368_v19  ;;  %v410_v23 = vmul.f32 %v565_v18, %v384_v21 }
  0xf2   : > { %v370_v24 = vpop.f32.mrf.mxu0  ;;  %v386_v25 = vpop.f32.mrf.mxu1 }
  0xf3   : > { %v421_v26 = vadd.f32 %v566_v20, %v406_v22  ;;  %v425_v27 = vadd.f32 %v566_v20, %v410_v23 }
  0xf4   : > { %v371_v28 = vpop.f32.mrf.mxu0  ;;  %v387_v29 = vpop.f32.mrf.mxu1 }
  0xf5   : > { %v429_v30 = vmax.f32 %v421_v26, 0.0  ;;  %v433_v31 = vmax.f32 %v425_v27, 0.0  ;;  %v407_v32 = vmul.f32 %v565_v18, %v371_v28  ;;  %v411_v33 = vmul.f32 %v565_v18, %v387_v29 }
  0xf6   : > { %v373_v34 = vpop.f32.mrf.mxu0  ;;  %v389_v35 = vpop.f32.mrf.mxu1 }
  0xf7   : > { %v578_v36 = vpack.c.bf16 %v429_v30, %v429_v30  ;;  %v582_v37 = vpack.c.bf16 %v433_v31, %v433_v31  ;;  %v422_v38 = vadd.f32 %v566_v20, %v407_v32  ;;  %v426_v39 = vadd.f32 %v566_v20, %v411_v33 }
  0xf8   : > { %v376_v40 = vpop.f32.mrf.mxu0  ;;  %v392_v41 = vpop.f32.mrf.mxu1 }
  0xf9   : > { %470 = vst.msk [vmem:[%s733_s23] sm:$0xf] %vm469_vm1, %v578_v36  ;;  %474 = vst.msk [vmem:[%s733_s23 + $0x10] sm:$0xf] %vm469_vm1, %v582_v37  ;;  %v430_v42 = vmax.f32 %v422_v38, 0.0  ;;  %v434_v43 = vmax.f32 %v426_v39, 0.0  ;;  %v408_v44 = vmul.f32 %v565_v18, %v376_v40  ;;  %v412_v45 = vmul.f32 %v565_v18, %v392_v41 }
  0xfa   : > { %v378_v46 = vpop.f32.mrf.mxu0  ;;  %v394_v47 = vpop.f32.mrf.mxu1 }
  0xfb   : > { %v579_v48 = vpack.c.bf16 %v430_v42, %v430_v42  ;;  %v583_v49 = vpack.c.bf16 %v434_v43, %v434_v43  ;;  %v423_v50 = vadd.f32 %v566_v20, %v408_v44  ;;  %v427_v51 = vadd.f32 %v566_v20, %v412_v45 }
  0xfc   : > { %v379_v52 = vpop.f32.mrf.mxu0  ;;  %v395_v53 = vpop.f32.mrf.mxu1 }
  0xfd   : > { %471 = vst.msk [vmem:[%s733_s23 + $0x4] sm:$0xf] %vm469_vm1, %v579_v48  ;;  %475 = vst.msk [vmem:[%s733_s23 + $0x14] sm:$0xf] %vm469_vm1, %v583_v49  ;;  %v431_v54 = vmax.f32 %v423_v50, 0.0  ;;  %v435_v55 = vmax.f32 %v427_v51, 0.0  ;;  %v409_v56 = vmul.f32 %v565_v18, %v379_v52  ;;  %v413_v57 = vmul.f32 %v565_v18, %v395_v53 }
  0xfe   : > { %v381_v58 = vpop.f32.mrf.mxu0  ;;  %v397_v59 = vpop.f32.mrf.mxu1 }
  0xff   : > { %v580_v60 = vpack.c.bf16 %v431_v54, %v431_v54  ;;  %v584_v61 = vpack.c.bf16 %v435_v55, %v435_v55  ;;  %v424_v62 = vadd.f32 %v566_v20, %v409_v56  ;;  %v428_v63 = vadd.f32 %v566_v20, %v413_v57 }
 0x101   : > { %472 = vst.msk [vmem:[%s733_s23 + $0x8] sm:$0xf] %vm469_vm1, %v580_v60  ;;  %476 = vst.msk [vmem:[%s733_s23 + $0x18] sm:$0xf] %vm469_vm1, %v584_v61  ;;  %v432_v0 = vmax.f32 %v424_v62, 0.0  ;;  %v436_v1 = vmax.f32 %v428_v63, 0.0 }
 0x103   : > { %v581_v2 = vpack.c.bf16 %v432_v0, %v432_v0  ;;  %v585_v3 = vpack.c.bf16 %v436_v1, %v436_v1 }
 0x105   : > { %473 = vst.msk [vmem:[%s733_s23 + $0xc] sm:$0xf] %vm469_vm1, %v581_v2  ;;  %477 = vst.msk [vmem:[%s733_s23 + $0x1c] sm:$0xf] %vm469_vm1, %v585_v3 }
 0x106 PF: > { %s14_s15 = sadd.s32 1, %s640_s15  }
 0x107   : > { %p11_p4 = scmp.ge.s32.totalorder %s14_s15, 4  }
 0x109   :  { %13 = sbr.rel (!%p11_p4) target bundleno = 1 (0x1), region = 66 }

// kernel: net_forward.25
= control target key start
LH: loop header
LB: loop body
LE: loop exit
PB: predicated region body
PF: predicated region fallthrough
CT: control target
= control target key end

     0   :  { %s2641_s15 = smov 0   ;;  %s3273_s0 = inlined_call_operand.vmem [shape: s32[64,1], index: 0, kind: input, shape index: {}]   ;;  %s3274_s1 = inlined_call_operand.vmem [shape: bf16[2,64,64], index: 1, kind: input, shape index: {}]   ;;  %s3275_s2 = inlined_call_operand.vmem [shape: bf16[768,64], index: 2, kind: input, shape index: {}]   ;;  %s3276_s3 = inlined_call_operand.vmem [shape: f32[6,64], index: 3, kind: input, shape index: {}]   ;;  %s3277_s4 = inlined_call_operand.vmem [shape: bf16[2,64,64], index: 4, kind: output, shape index: {}]  }
   0x1 LB: > { %s2095_s16 = sadd.s32 4294967295, %s2613_s15   ;;  %p2099_p0 = scmp.ge.s32.totalorder %s2613_s15, 1  ;;  %s2613_s15 = sphi %s2641_s15, %s14_s15  }
   0x2   : > { %p162_p1 = scmp.lt.s32.totalorder %s2613_s15, 3 }
   0x4   : > { %p163_p2 = pnand %p2099_p0, %p162_p1 }
   0x5   : > { %p188_p3 = scmp.lt.s32.totalorder (!%p163_p2), %s2095_s16, 1 }
   0x6   : > { %166 = sbr.rel (%p163_p2) target bundleno = 938 (0x3aa), region = 36 }
   0xb   : > { %v2542_v0 = vld [vmem:[%s3275_s2 + $0x38] sm:$0xff]   ;;  %v2544_v2 = vld [vmem:[%s3275_s2 + $0x30] sm:$0xff]   ;;  %s3326_s16 = smov (!%p188_p3, %s2095_s16), 1  ;;  %v2546_v4 = vld [vmem:[%s3275_s2 + $0x28] sm:$0xff]   ;;  %v2615_v6 = vmov 0   ;;  %vm291_vm0 = vcmask 523264  }
   0xc   : > { %v2543_v1 = vld [vmem:[%s3275_s2 + $0x18] sm:$0xff]   ;;  %2339 = vmatprep.subr.bf16.mxu0 %v2542_v0  ;;  %v2545_v3 = vld [vmem:[%s3275_s2 + $0x10] sm:$0xff]   ;;  %s2233_s27 = sshll.u32 %s3326_s16, 5  ;;  %v2547_v5 = vld [vmem:[%s3275_s2 + $0x8] sm:$0xff]   ;;  %2541 = vset.pattern.permute.xlu1 %v2615_v6  ;;  %vm3278_vm1 = vcmask 1043456  }
   0xd   : > { %2355 = vmatprep.subr.bf16.mxu1 %v2543_v1  ;;  %2340 = vmatpush3.bf16.msra.mxu0 %v2542_v0  ;;  %s2675_s6 = scalar_lea.vmem %s3274_s1, %s2233_s27  ;;  %v2548_v7 = vld [vmem:[%s3275_s2 + $0x20] sm:$0xff]   ;;  %v2554_v18 = vld [vmem:[%s3275_s2 + $0x58] sm:$0xff]   ;;  %v2555_v24 = vld [vmem:[%s3275_s2 + $0x50] sm:$0xff]   ;;  %s3238_s11 = scalar_lea.vmem %s3277_s4, %s2233_s27 }
   0xe   : > { %2356 = vmatpush3.bf16.msra.mxu1 %v2543_v1  ;;  %2341 = vmatprep.subr.bf16.mxu0 %v2544_v2  ;;  %v201_v8 = vld [vmem:[%s2675_s6] sm:$0xf]  ;;  %v202_v9 = vld [vmem:[%s2675_s6 + $0x4] sm:$0xf]  ;;  %v203_v12 = vld [vmem:[%s2675_s6 + $0x8] sm:$0xf] }
   0xf   : > { %2357 = vmatprep.subr.bf16.mxu1 %v2545_v3  ;;  %2540 = vset.pattern.permute.xlu0 %v2615_v6  ;;  %v2549_v10 = vld [vmem:[%s3275_s2] sm:$0xff]   ;;  %v2108_v11 = vcombine.low %v201_v8, %v202_v9  ;;  %v2104_v13 = vcombine.low %v201_v8, %v201_v8  ;;  %v204_v14 = vld [vmem:[%s2675_s6 + $0xc] sm:$0xf]  ;;  %v205_v15 = vld [vmem:[%s2675_s6 + $0x10] sm:$0xf]  ;;  %v2707_v22 = vcombine.low %v202_v9, %v203_v12 }
  0x10   : > { %v2692_v16 = vld [vmem:[%s2675_s6 + $0x14] sm:$0xf]  ;;  %v2699_v19 = vld [vmem:[%s2675_s6 + $0x18] sm:$0xf]  ;;  %v2702_v20 = vld [vmem:[%s2675_s6 + $0x1c] sm:$0xf]  ;;  %v2109_v23 = vcombine.low %v203_v12, %v204_v14  ;;  %v2713_v26 = vcombine.low %v204_v14, %v205_v15 }
  0x11   : > { %2342 = vmatpush3.bf16.msra.mxu0 %v2544_v2  ;;  %2347 = vmatprep.mubr.msk.bf16.mxu0 %vm291_vm0, %v2108_v11  ;;  %v244_v17 = vsel %vm3278_vm1, 0, %v2104_v13  ;;  %v2128_v21 = vcombine.low %v2702_v20, %v2702_v20  ;;  %v2110_v25 = vcombine.low %v205_v15, %v2692_v16  ;;  %v211_v27 = vld [vmem:[%s3273_s0 + $0x10] sm:$0xff]  ;;  %v2111_v28 = vcombine.low %v2699_v19, %v2702_v20  ;;  %v209_v30 = vld [vmem:[%s3273_s0] sm:$0xff]  ;;  %v212_v31 = vld [vmem:[%s3273_s0 + $0x18] sm:$0xff] }
  0x12   : > { %2358 = vmatpush3.bf16.msra.mxu1 %v2545_v3  ;;  %2343 = vmatprep.subr.bf16.mxu0 %v2546_v4  ;;  %vm644_vm2 = vcmp.ge.s32.totalorder %v211_v27, 1  ;;  %v210_v32 = vld [vmem:[%s3273_s0 + $0x8] sm:$0xff]  ;;  %vm961_vm3 = vcmp.lt.s32.totalorder %v211_v27, 7  ;;  %vm642_vm4 = vcmp.ge.s32.totalorder %v209_v30, 1  ;;  %vm645_vm5 = vcmp.ge.s32.totalorder %v212_v31, 1  ;;  %v213_v35 = vld [vmem:[%s3273_s0 + $0x20] sm:$0xff] }
  0x13   : > { %2359 = vmatprep.subr.bf16.mxu1 %v2547_v5  ;;  %2363 = vmatprep.mubr.msk.bf16.mxu1 %vm291_vm0, %v244_v17  ;;  %v2721_v29 = vsel %vm3278_vm1, %v2128_v21, 0  ;;  %v652_v33 = vsel %vm644_vm2, 1, %v2615_v6  ;;  %vm643_vm6 = vcmp.ge.s32.totalorder %v210_v32, 1  ;;  %v214_v34 = vld [vmem:[%s3273_s0 + $0x28] sm:$0xff]  ;;  %v650_v36 = vsel %vm642_vm4, 1, %v2615_v6  ;;  %v216_v39 = vld [vmem:[%s3273_s0 + $0x38] sm:$0xff] }
  0x14   : > { %665 = vperm.xlu1 %2541, %v652_v33   ;;  %v653_v37 = vsel %vm645_vm5, 1, %v2615_v6  ;;  %v651_v38 = vsel %vm643_vm6, 1, %v2615_v6  ;;  %vm960_vm7 = vcmp.lt.s32.totalorder %v210_v32, 7  ;;  %v215_v40 = vld [vmem:[%s3273_s0 + $0x30] sm:$0xff]  ;;  %v2560_v41 = vld [vmem:[%s3275_s2 + $0x48] sm:$0xff]   ;;  %659 = vperm.xlu0 %2540, %v650_v36   ;;  %vm959_vm8 = vcmp.lt.s32.totalorder %v209_v30, 7 }
  0x15   : > { %2344 = vmatpush3.bf16.msra.mxu0 %v2546_v4  ;;  %v968_v42 = vsel %vm960_vm7, 1, %v2615_v6  ;;  %vm962_vm9 = vcmp.lt.s32.totalorder %v212_v31, 7  ;;  %v969_v43 = vsel %vm961_vm3, 1, %v2615_v6  ;;  %v967_v44 = vsel %vm959_vm8, 1, %v2615_v6  ;;  %v2561_v50 = vld [vmem:[%s3275_s2 + $0x40] sm:$0xff]   ;;  %v2563_v56 = vld [vmem:[%s3275_s2 + $0x98] sm:$0xff]  }
  0x16   : > { %2360 = vmatpush3.bf16.msra.mxu1 %v2547_v5  ;;  %2345 = vmatprep.subr.bf16.mxu0 %v2548_v7  ;;  %v970_v45 = vsel %vm962_vm9, 1, %v2615_v6  ;;  %vm647_vm10 = vcmp.ge.s32.totalorder %v214_v34, 1  ;;  %vm646_vm11 = vcmp.ge.s32.totalorder %v213_v35, 1  ;;  %vm649_vm12 = vcmp.ge.s32.totalorder %v216_v39, 1  ;;  %v2564_v57 = vld [vmem:[%s3275_s2 + $0x90] sm:$0xff]   ;;  %v2565_v58 = vld [vmem:[%s3275_s2 + $0x88] sm:$0xff]  }
  0x17   : > { %2361 = vmatprep.subr.bf16.mxu1 %v2549_v10  ;;  %v655_v46 = vsel %vm647_vm10, 1, %v2615_v6  ;;  %v654_v47 = vsel %vm646_vm11, 1, %v2615_v6  ;;  %vm648_vm13 = vcmp.ge.s32.totalorder %v215_v40, 1  ;;  %v657_v48 = vsel %vm649_vm12, 1, %v2615_v6  ;;  %v2566_v59 = vld [vmem:[%s3275_s2 + $0x78] sm:$0xff]   ;;  %v2567_v60 = vld [vmem:[%s3275_s2 + $0x80] sm:$0xff]  }
  0x18   : > { %668 = vperm.xlu1 %2541, %v653_v37   ;;  %v656_v49 = vsel %vm648_vm13, 1, %v2615_v6  ;;  %vm964_vm14 = vcmp.lt.s32.totalorder %v214_v34, 7  ;;  %vm963_vm15 = vcmp.lt.s32.totalorder %v213_v35, 7  ;;  %662 = vperm.xlu0 %2540, %v651_v38   ;;  %vm966_vm2 = vcmp.lt.s32.totalorder %v216_v39, 7  ;;  %v2568_v61 = vld [vmem:[%s3275_s2 + $0x70] sm:$0xff]   ;;  %v2569_v62 = vld [vmem:[%s3275_s2 + $0x68] sm:$0xff]  }
  0x19   : > { %2346 = vmatpush3.bf16.msra.mxu0 %v2548_v7  ;;  %v972_v51 = vsel %vm964_vm14, 1, %v2615_v6  ;;  %v971_v52 = vsel %vm963_vm15, 1, %v2615_v6  ;;  %vm965_vm3 = vcmp.lt.s32.totalorder %v215_v40, 7  ;;  %v2107_v53 = vcombine.low %v2692_v16, %v2699_v19  ;;  %v2808_v63 = vld [vmem:[%s3275_s2 + $0xb8] sm:$0xff]   ;;  %v2571_v0 = vld [vmem:[%s3275_s2 + $0x60] sm:$0xff]  }
  0x1a   : > { %2362 = vmatpush3.bf16.msra.mxu1 %v2549_v10  ;;  %2371 = vmatprep.subr.bf16.mxu0 %v2554_v18  ;;  %v974_v54 = vsel %vm966_vm2, 1, %v2615_v6  ;;  %v973_v55 = vsel %vm965_vm3, 1, %v2615_v6  ;;  %v2835_v31 = vld [vmem:[%s3276_s3] ss:$0 sm:$0xff]  ;;  %vm603_vm2 = vsmask.f32 256 }
  0x1b   : > { %2387 = vmatprep.subr.bf16.mxu1 %v2563_v56  ;;  %vm639_vm3 = vcmask 1040384  }
  0x1c   : > { %2348 = vmatmul.mubr.msk.bf16.vlgmr.msra.gmra.mxu0 %vm291_vm0, %v2109_v23  ;;  %979 = vperm.xlu1 %2541, %v968_v42  }
  0x1d   : > { %2364 = vmatmul.mubr.msk.bf16.vlgmr.msra.gmra.mxu1 %vm291_vm0, %v2707_v22  ;;  %2372 = vmatpush3.bf16.msra.mxu0 %v2554_v18 }
  0x1e   : > { %2373 = vmatprep.subr.bf16.mxu0 %v2555_v24  ;;  %2351 = vmatprep.mubr.msk.bf16.mxu0 %vm291_vm0, %v2110_v25 }
  0x1f   : > { %2367 = vmatprep.mubr.msk.bf16.mxu1 %vm291_vm0, %v2713_v26  ;;  %976 = vperm.xlu0 %2540, %v967_v44  }
  0x20   : > { %985 = vperm.xlu1 %2541, %v970_v45   ;;  %2388 = vmatpush3.bf16.msra.mxu1 %v2563_v56 }
  0x21   : > { %2374 = vmatpush3.bf16.msra.mxu0 %v2555_v24  ;;  %2389 = vmatprep.subr.bf16.mxu1 %v2564_v57 }
  0x22   : > { %2375 = vmatprep.subr.bf16.mxu0 %v2560_v41 }
  0x23   : > { %982 = vperm.xlu0 %2540, %v969_v43  }
  0x24   : > { %2352 = vmatmul.mubr.msk.bf16.gmra.mxu0 %vm291_vm0, %v2111_v28  ;;  %674 = vperm.xlu1 %2541, %v655_v46  }
  0x25   : > { %2368 = vmatmul.mubr.msk.bf16.gmra.mxu1 %vm291_vm0, %v2107_v53  ;;  %2376 = vmatpush3.bf16.msra.mxu0 %v2560_v41 }
  0x26   : > { %2377 = vmatprep.subr.bf16.mxu0 %v2561_v50  ;;  %2379 = vmatprep.mubr.msk.bf16.mxu0 %vm291_vm0, %v2707_v22 }
  0x27   : > { %671 = vperm.xlu0 %2540, %v654_v47   ;;  %2390 = vmatpush3.bf16.msra.mxu1 %v2564_v57 }
  0x28   : > { %680 = vperm.xlu1 %2541, %v657_v48   ;;  %2391 = vmatprep.subr.bf16.mxu1 %v2565_v58 }
  0x29   : > { %2378 = vmatpush3.bf16.msra.mxu0 %v2561_v50 }
  0x2a   : > { %2403 = vmatprep.subr.bf16.mxu0 %v2566_v59 }
  0x2b   : > { %677 = vperm.xlu0 %2540, %v656_v49   ;;  %2392 = vmatpush3.bf16.msra.mxu1 %v2565_v58 }
  0x2c   : > { %2380 = vmatmul.mubr.msk.bf16.vlgmr.msra.gmra.mxu0 %vm291_vm0, %v2713_v26  ;;  %991 = vperm.xlu1 %2541, %v972_v51  }
  0x2d   : > { %2383 = vmatprep.mubr.msk.bf16.mxu0 %vm291_vm0, %v2107_v53  ;;  %2404 = vmatpush3.bf16.msra.mxu0 %v2566_v59 }
  0x2e   : > { %2393 = vmatprep.subr.bf16.mxu1 %v2567_v60  ;;  %2405 = vmatprep.subr.bf16.mxu0 %v2568_v61 }
  0x2f   : > { %988 = vperm.xlu0 %2540, %v971_v52   ;;  %2394 = vmatpush3.bf16.msra.mxu1 %v2567_v60 }
  0x30   : > { %997 = vperm.xlu1 %2541, %v974_v54   ;;  %2419 = vmatprep.subr.bf16.mxu1 %v2808_v63 }
  0x31   : > { %2406 = vmatpush3.bf16.msra.mxu0 %v2568_v61 }
  0x32   : > { %2407 = vmatprep.subr.bf16.mxu0 %v2569_v62 }
  0x33   : > { %994 = vperm.xlu0 %2540, %v973_v55  }
  0x34   : > { %2384 = vmatmul.mubr.msk.bf16.gmra.mxu0 %vm291_vm0, %v2721_v29 }
  0x35   : > { %2408 = vmatpush3.bf16.msra.mxu0 %v2569_v62 }
  0x36   : > { %2409 = vmatprep.subr.bf16.mxu0 %v2571_v0 }
  0x39   : > { %2410 = vmatpush3.bf16.msra.mxu0 %v2571_v0 }
  0x8f   : > { %v666_v1 = vpop.permute.xlu1 %665  ;;  %v660_v2 = vpop.permute.xlu0 %659 }
  0x90   : > { %vm684_vm4 = vcmp.eq.s32.totalorder %v666_v1, 1  ;;  %vm682_vm5 = vcmp.eq.s32.totalorder %v660_v2, 1 }
  0x91   : > { %vm2822_vm7 = vmpackc.low %vm684_vm4, %vm684_vm4 }
  0x92   : > { %vm2828_vm9 = vmpackc.low %vm682_vm5, %vm682_vm5  ;;  %v700_v36 = vsel %vm2822_vm7, 65537, %v2615_v6  ;;  %vm940_vm7 = vsmask.f32 7424 }
  0x93   : > { %v669_v3 = vpop.permute.xlu1 %668  ;;  %v663_v5 = vpop.permute.xlu0 %662  ;;  %v698_v37 = vsel %vm2828_vm9, 65537, %v2615_v6 }
  0x94   : > { %vm685_vm6 = vcmp.eq.s32.totalorder %v669_v3, 1  ;;  %vm683_vm8 = vcmp.eq.s32.totalorder %v663_v5, 1 }
  0x95   : > { %vm693_vm11 = vmpackc.low %vm685_vm6, %vm685_vm6 }
  0x96   : > { %vm691_vm13 = vmpackc.low %vm683_vm8, %vm683_vm8  ;;  %v701_v38 = vsel %vm693_vm11, 65537, %v2615_v6 }
  0x97   : > { %v980_v9 = vpop.permute.xlu1 %979  ;;  %v699_v40 = vsel %vm691_vm13, 65537, %v2615_v6  ;;  %v2139_v52 = vcombine.low %v700_v36, %v701_v38  ;;  %vm2862_vm8 = vmand %vm639_vm3, %vm603_vm2 }
  0x98   : > { %vm1000_vm10 = vcmp.eq.s32.totalorder %v980_v9, 1  ;;  %v2138_v53 = vcombine.low %v698_v37, %v699_v40 }
  0x99   : > { %vm1008_vm14 = vmpackc.low %vm1000_vm10, %vm1000_vm10  ;;  %vm2889_vm3 = vcmp.ne.s16.totalorder %v2139_v52, 0 }
  0x9a   : > { %v977_v14 = vpop.permute.xlu0 %976  ;;  %v1016_v45 = vsel %vm1008_vm14, 65537, %v2615_v6  ;;  %vm2876_vm13 = vcmp.ne.s16.totalorder %v2138_v53, 0 }
  0x9b   : > { %v2814_v16 = vpop.permute.xlu1 %985  ;;  %vm999_vm12 = vcmp.eq.s32.totalorder %v977_v14, 1 }
  0x9c   : > { %vm1007_vm15 = vmpackc.low %vm999_vm12, %vm999_vm12  ;;  %vm1002_vm4 = vcmp.eq.s32.totalorder %v2814_v16, 1 }
  0x9d   : > { %v1015_v48 = vsel %vm1007_vm15, 65537, %v2615_v6  ;;  %vm2869_vm9 = vmpackc.low %vm1002_vm4, %vm1002_vm4 }
  0x9e   : > { %v2818_v20 = vpop.permute.xlu0 %982  ;;  %v2158_v61 = vcombine.low %v1015_v48, %v1016_v45 }
  0x9f   : > { %v2826_v25 = vpop.permute.xlu1 %674  ;;  %vm1001_vm5 = vcmp.eq.s32.totalorder %v2818_v20, 1 }
  0xa0   : > { %vm687_vm6 = vcmp.eq.s32.totalorder %v2826_v25, 1  ;;  %vm2883_vm14 = vmpackc.low %vm1001_vm5, %vm1001_vm5  ;;  %vm2906_vm5 = vcmp.ne.s16.totalorder %v2158_v61, 0 }
  0xa1   : > { %vm2896_vm4 = vmpackc.low %vm687_vm6, %vm687_vm6 }
  0xa2   : > { %v2837_v34 = vpop.permute.xlu0 %671 }
  0xa3   : > { %v2847_v42 = vpop.permute.xlu1 %680  ;;  %vm686_vm10 = vcmp.eq.s32.totalorder %v2837_v34, 1  ;;  %v2930_v34 = vsel %vm2883_vm14, 65537, %v2615_v6 }
  0xa4   : > { %vm689_vm11 = vcmp.eq.s32.totalorder %v2847_v42, 1  ;;  %vm2913_vm6 = vmpackc.low %vm686_vm10, %vm686_vm10  ;;  %v703_v42 = vsel %vm2896_vm4, 65537, %v2615_v6 }
  0xa5   : > { %vm2935_vm10 = vmpackc.low %vm689_vm11, %vm689_vm11 }
  0xa6   : > { %v678_v57 = vpop.permute.xlu0 %677  ;;  %v705_v52 = vsel %vm2935_vm10, 65537, %v2615_v6  ;;  %vm956_vm10 = vcmask 1047552  }
  0xa7   : > { %vm688_vm12 = vcmp.eq.s32.totalorder %v678_v57, 1 }
  0xdc   : > { %v2349_v4 = vpop.f32.mrf.mxu0 }
  0xdd   : > { %v2365_v7 = vpop.f32.mrf.mxu1 }
  0xde   : > { %v338_v8 = vpop.f32.mrf.mxu0  ;;  %v447_v24 = vadd.f32 %v2365_v7, %v2349_v4 }
  0xdf   : > { %v438_v10 = vpop.f32.mrf.mxu1 }
  0xe0   : > { %v2350_v11 = vpop.f32.mrf.mxu0  ;;  %v439_v28 = vadd.f32 %v438_v10, %v338_v8  ;;  %v992_v10 = vpop.permute.xlu1 %991 }
  0xe1   : > { %v2366_v12 = vpop.f32.mrf.mxu1  ;;  %vm1004_vm15 = vcmp.eq.s32.totalorder %v992_v10, 1 }
  0xe2   : > { %v341_v13 = vpop.f32.mrf.mxu0  ;;  %v450_v33 = vadd.f32 %v2366_v12, %v2350_v11  ;;  %vm2956_vm11 = vmpackc.low %vm1004_vm15, %vm1004_vm15 }
  0xe3   : > { %v441_v17 = vpop.f32.mrf.mxu1 }
  0xe4   : > { %v2353_v15 = vpop.f32.mrf.mxu0  ;;  %v442_v41 = vadd.f32 %v441_v17, %v341_v13 }
  0xe5   : > { %v2369_v21 = vpop.f32.mrf.mxu1 }
  0xe6   : > { %v354_v18 = vpop.f32.mrf.mxu0  ;;  %v463_v54 = vadd.f32 %v2369_v21, %v2353_v15 }
  0xe7   : > { %v454_v30 = vpop.f32.mrf.mxu1 }
  0xe8   : > { %v2816_v19 = vpop.f32.mrf.mxu0  ;;  %v455_v56 = vadd.f32 %v454_v30, %v354_v18 }
  0xe9   : > { %v2370_v46 = vpop.f32.mrf.mxu1 }
  0xea   : > { %v2820_v22 = vpop.f32.mrf.mxu0  ;;  %v466_v9 = vadd.f32 %v2370_v46, %v2816_v19 }
  0xeb   : > { %v457_v62 = vpop.f32.mrf.mxu1 }
  0xec   : > { %v2381_v27 = vpop.f32.mrf.mxu0  ;;  %v458_v14 = vadd.f32 %v457_v62, %v2820_v22 }
  0xed   : > { %v573_v29 = vadd.f32 %v2381_v27, %v447_v24  ;;  %v2572_v24 = vld [vmem:[%s3275_s2 + $0xb0] sm:$0xff]   ;;  %v989_v27 = vpop.permute.xlu0 %988 }
  0xee   : > { %v540_v32 = vpop.f32.mrf.mxu0  ;;  %vm1003_vm1 = vcmp.eq.s32.totalorder %v989_v27, 1 }
  0xef   : > { %v571_v35 = vadd.f32 %v540_v32, %v439_v28  ;;  %v585_v43 = vadd.f32 %v2835_v31, %v573_v29 }
  0xf0   : > { %v2382_v39 = vpop.f32.mrf.mxu0 }
  0xf1   : > { %v574_v44 = vadd.f32 %v2382_v39, %v450_v33  ;;  %v583_v49 = vadd.f32 %v2835_v31, %v571_v35  ;;  %v593_v58 = vmax.f32 %v585_v43, 0.0  ;;  %v2925_v33 = vsel %vm2869_vm9, 65537, %v2615_v6  ;;  %vm2944_vm9 = vmpackc.low %vm688_vm12, %vm688_vm12  ;;  %v995_v62 = vpop.permute.xlu0 %994 }
  0xf2   : > { %v543_v47 = vpop.f32.mrf.mxu0  ;;  %vm2965_vm12 = vmpackc.low %vm1003_vm1, %vm1003_vm1  ;;  %v2159_v10 = vcombine.low %v2930_v34, %v2925_v33  ;;  %vm1005_vm14 = vcmp.eq.s32.totalorder %v995_v62, 1 }
  0xf3   : > { %v586_v50 = vadd.f32 %v2835_v31, %v574_v44  ;;  %v572_v51 = vadd.f32 %v543_v47, %v442_v41  ;;  %v591_v2 = vmax.f32 %v583_v49, 0.0  ;;  %v1019_v61 = vsel %vm2965_vm12, 65537, %v2615_v6  ;;  %vm1013_vm4 = vmpackc.low %vm1005_vm14, %vm1005_vm14 }
  0xf4   : > { %v2385_v55 = vpop.f32.mrf.mxu0  ;;  %v1021_v37 = vsel %vm1013_vm4, 65537, %v2615_v6 }
  0xf5   : > { %v594_v59 = vmax.f32 %v586_v50, 0.0  ;;  %v584_v60 = vadd.f32 %v2835_v31, %v572_v51  ;;  %v577_v0 = vadd.f32 %v2385_v55, %v463_v54  ;;  %v702_v51 = vsel %vm2913_vm6, 65537, %v2615_v6 }
  0xf6   : > { %v556_v1 = vpop.f32.mrf.mxu0  ;;  %v704_v55 = vsel %vm2944_vm9, 65537, %v2615_v6  ;;  %vm3026_vm9 = vcmp.ne.s16.totalorder %v2159_v10, 0 }
  0xf7   : > { %v2858_v3 = vpack.c.bf16 %v594_v59, %v593_v58  ;;  %v592_v4 = vmax.f32 %v584_v60, 0.0  ;;  %v575_v5 = vadd.f32 %v556_v1, %v455_v56  ;;  %v589_v20 = vadd.f32 %v2835_v31, %v577_v0  ;;  %v998_v56 = vpop.permute.xlu1 %997 }
  0xf8   : > { %v2386_v11 = vpop.f32.mrf.mxu0  ;;  %v1020_v60 = vsel %vm2956_vm11, 65537, %v2615_v6  ;;  %vm1006_vm1 = vcmp.eq.s32.totalorder %v998_v56, 1 }
  0xf9   : > { %v612_v15 = vshrl.u32 %v2858_v3, 16  ;;  %v599_v16 = vpack.c.bf16 %v592_v4, %v591_v2  ;;  %v615_v19 = vshll.u32 %v2858_v3, 16  ;;  %v587_v21 = vadd.f32 %v2835_v31, %v575_v5  ;;  %v2574_v2 = vld [vmem:[%s3275_s2 + $0xa0] sm:$0xff]   ;;  %vm3013_vm15 = vmpackc.low %vm1006_vm1, %vm1006_vm1 }
  0xfa   : > { %v578_v22 = vadd.f32 %v2386_v11, %v466_v9  ;;  %v559_v23 = vpop.f32.mrf.mxu0  ;;  %v597_v44 = vmax.f32 %v589_v20, 0.0  ;;  %v2160_v20 = vcombine.low %v1019_v61, %v1020_v60  ;;  %vm3056_vm1 = vmand %vm956_vm10, %vm940_vm7 }
  0xfb   : > { %v2919_v28 = vrot.slane %v612_v15, 7  ;;  %v605_v29 = vshrl.u32 %v599_v16, 16  ;;  %v576_v30 = vadd.f32 %v559_v23, %v458_v14  ;;  %2395 = vmatprep.mubr.msk.bf16.mxu1 %vm291_vm0, %v599_v16  ;;  %v608_v32 = vshll.u32 %v599_v16, 16 }
  0xfc   : > { %v590_v36 = vadd.f32 %v2835_v31, %v578_v22  ;;  %2396 = vmatmul.mubr.msk.bf16.vlgmr.msra.gmra.mxu1 %vm291_vm0, %v2858_v3  ;;  %v595_v45 = vmax.f32 %v587_v21, 0.0  ;;  %v943_v50 = vrot.slane %v615_v19, 1  ;;  %v2140_v14 = vcombine.low %v702_v51, %v703_v42  ;;  %v2582_v51 = vld [vmem:[%s3275_s2 + $0xc0] sm:$0xff]  }
  0xfd   : > { %v617_v38 = vor.u32 %v615_v19, %v2919_v28  ;;  %v588_v39 = vadd.f32 %v2835_v31, %v576_v30  ;;  %2420 = vmatpush3.bf16.msra.mxu1 %v2808_v63  ;;  %v607_v40 = vrot.slane %v605_v29, 7  ;;  %v941_v41 = vrot.slane %v608_v32, 1  ;;  %v2573_v63 = vld [vmem:[%s3275_s2 + $0xa8] sm:$0xff]   ;;  %v2577_v31 = vld [vmem:[%s3275_s2 + $0xf0] sm:$0xff]  }
  0xfe   : > { %v598_v46 = vmax.f32 %v590_v36, 0.0  ;;  %2421 = vmatprep.subr.bf16.mxu1 %v2572_v24  ;;  %v2141_v19 = vcombine.low %v704_v55, %v705_v52  ;;  %v945_v21 = vor.u32 %v943_v50, %v612_v15  ;;  %vm3019_vm6 = vcmp.ne.s16.totalorder %v2140_v14, 0  ;;  %v3096_v52 = vld [vmem:[%s3275_s2 + $0x118] sm:$0xff]  }
  0xff   : > { %v596_v47 = vmax.f32 %v588_v39, 0.0  ;;  %v610_v48 = vor.u32 %v608_v32, %v607_v40  ;;  %v942_v49 = vor.u32 %v941_v41, %v605_v29  ;;  %v618_v54 = vsel %vm603_vm2, %v607_v40, %v617_v38 }
 0x100   : > { %v2975_v53 = vpack.c.bf16 %v598_v46, %v597_v44  ;;  %v723_v9 = vsel %vm2889_vm3, %v618_v54, 0  ;;  %vm3030_vm11 = vcmp.ne.s16.totalorder %v2141_v19, 0  ;;  %vm3034_vm12 = vcmp.ne.s16.totalorder %v2160_v20, 0  ;;  %v2575_v46 = vld [vmem:[%s3275_s2 + $0xf8] sm:$0xff]   ;;  %v2171_v20 = vld [vmem:[%s3276_s3 + $0x2] ss:$0 sm:$0xff] }
 0x101   : > { %v601_v57 = vpack.c.bf16 %v596_v47, %v595_v45  ;;  %2422 = vmatpush3.bf16.msra.mxu1 %v2572_v24  ;;  %v641_v58 = vsel %vm2862_vm8, 0, %v610_v48  ;;  %v944_v59 = vsel %vm940_vm7, %v942_v49, %v943_v50  ;;  %2435 = vmatprep.subr.bf16.mxu0 %v2575_v46  ;;  %v2578_v47 = vld [vmem:[%s3275_s2 + $0xd0] sm:$0xff]   ;;  %v2579_v48 = vld [vmem:[%s3275_s2 + $0xe8] sm:$0xff]   ;;  %v2581_v50 = vld [vmem:[%s3275_s2 + $0xe0] sm:$0xff]  }
 0x102   : > { %v628_v0 = vshrl.u32 %v2975_v53, 16  ;;  %v722_v1 = vsel %vm2876_vm13, %v641_v58, 0  ;;  %2423 = vmatprep.subr.bf16.mxu1 %v2573_v63  ;;  %v631_v4 = vshll.u32 %v2975_v53, 16  ;;  %v1039_v11 = vsel %vm2906_vm5, %v944_v59, 0  ;;  %v2580_v49 = vld [vmem:[%s3275_s2 + $0xc8] sm:$0xff]  }
 0x103   : > { %v620_v5 = vshrl.u32 %v601_v57, 16  ;;  %v623_v8 = vshll.u32 %v601_v57, 16  ;;  %2399 = vmatprep.mubr.msk.bf16.mxu1 %vm291_vm0, %v601_v57  ;;  %2411 = vmatprep.mubr.msk.bf16.mxu0 %vm291_vm0, %v722_v1  ;;  %v3216_v44 = vld [vmem:[%s3276_s3 + $0x4] ss:$0 sm:$0xff] }
 0x104   : > { %2400 = vmatmul.mubr.msk.bf16.gmra.mxu1 %vm291_vm0, %v2975_v53  ;;  %2412 = vmatmul.mubr.msk.bf16.vlgmr.msra.gmra.mxu0 %vm291_vm0, %v723_v9  ;;  %v630_v13 = vrot.slane %v628_v0, 7  ;;  %v949_v27 = vrot.slane %v631_v4, 1  ;;  %v2170_v9 = vld [vmem:[%s3276_s3 + $0x1] ss:$0 sm:$0xff] }
 0x105   : > { %v946_v16 = vrot.slane %v623_v8, 1  ;;  %2424 = vmatpush3.bf16.msra.mxu1 %v2573_v63  ;;  %2427 = vmatprep.mubr.msk.bf16.mxu1 %vm291_vm0, %v1039_v11  ;;  %v622_v18 = vrot.slane %v620_v5, 7  ;;  %v2576_v63 = vld [vmem:[%s3275_s2 + $0xd8] sm:$0xff]  }
 0x106   : > { %2425 = vmatprep.subr.bf16.mxu1 %v2574_v2  ;;  %v633_v22 = vor.u32 %v631_v4, %v630_v13  ;;  %v951_v41 = vor.u32 %v949_v27, %v628_v0  ;;  %2436 = vmatpush3.bf16.msra.mxu0 %v2575_v46 }
 0x107   : > { %v625_v24 = vor.u32 %v623_v8, %v622_v18  ;;  %v948_v25 = vor.u32 %v946_v16, %v620_v5  ;;  %v947_v30 = vsel %vm940_vm7, %v945_v21, %v946_v16  ;;  %2437 = vmatprep.subr.bf16.mxu0 %v2577_v31 }
 0x108   : > { %v634_v29 = vsel %vm603_vm2, %v622_v18, %v633_v22  ;;  %v1040_v39 = vsel %vm3026_vm9, %v947_v30, 0  ;;  %v958_v43 = vsel %vm3056_vm1, %v951_v41, 0 }
 0x109   : > { %2426 = vmatpush3.bf16.msra.mxu1 %v2574_v2  ;;  %v626_v3 = vsel %vm603_vm2, %v2919_v28, %v625_v24  ;;  %v950_v15 = vsel %vm940_vm7, %v948_v25, %v949_v27  ;;  %v1022_v28 = vsel %vm3013_vm15, 65537, %v2615_v6  ;;  %v725_v38 = vsel %vm3030_vm11, %v634_v29, 0 }
 0x10a   : > { %v724_v36 = vsel %vm3019_vm6, %v626_v3, 0  ;;  %v1041_v40 = vsel %vm3034_vm12, %v950_v15, 0  ;;  %v2161_v42 = vcombine.low %v1021_v37, %v1022_v28  ;;  %2451 = vmatprep.subr.bf16.mxu1 %v2576_v63  ;;  %2438 = vmatpush3.bf16.msra.mxu0 %v2577_v31  ;;  %vm3321_vm15 = vcmask 1043456  }
 0x10b   : > { %2415 = vmatprep.mubr.msk.bf16.mxu0 %vm291_vm0, %v724_v36  ;;  %2439 = vmatprep.subr.bf16.mxu0 %v2579_v48  ;;  %vm3322_vm4 = vmmov %vm3321_vm15 }
 0x10c   : > { %2416 = vmatmul.mubr.msk.bf16.gmra.mxu0 %vm291_vm0, %v725_v38  ;;  %2428 = vmatmul.mubr.msk.bf16.vlgmr.msra.gmra.mxu1 %vm291_vm0, %v1040_v39  ;;  %vm3062_vm14 = vcmp.ne.s16.totalorder %v2161_v42, 0  ;;  %vm3323_vm10 = vmmov %vm3322_vm4 }
 0x10d   : > { %2431 = vmatprep.mubr.msk.bf16.mxu1 %vm291_vm0, %v1041_v40  ;;  %v1042_v45 = vsel %vm3062_vm14, %v958_v43, 0  ;;  %2452 = vmatpush3.bf16.msra.mxu1 %v2576_v63 }
 0x10e   : > { %2453 = vmatprep.subr.bf16.mxu1 %v2578_v47  ;;  %2440 = vmatpush3.bf16.msra.mxu0 %v2579_v48 }
 0x10f   : > { %2441 = vmatprep.subr.bf16.mxu0 %v2581_v50 }
 0x111   : > { %2454 = vmatpush3.bf16.msra.mxu1 %v2578_v47 }
 0x112   : > { %2455 = vmatprep.subr.bf16.mxu1 %v2580_v49  ;;  %2442 = vmatpush3.bf16.msra.mxu0 %v2581_v50 }
 0x113   : > { %2467 = vmatprep.subr.bf16.mxu0 %v3096_v52 }
 0x114   : > { %2432 = vmatmul.mubr.msk.bf16.gmra.mxu1 %vm291_vm0, %v1042_v45 }
 0x115   : > { %2456 = vmatpush3.bf16.msra.mxu1 %v2580_v49 }
 0x116   : > { %2457 = vmatprep.subr.bf16.mxu1 %v2582_v51 }
 0x119   : > { %2458 = vmatpush3.bf16.msra.mxu1 %v2582_v51 }
 0x1bc   : > { %v2397_v53 = vpop.f32.mrf.mxu1 }
 0x1be   : > { %v808_v54 = vpop.f32.mrf.mxu1 }
 0x1c0   : > { %v2398_v55 = vpop.f32.mrf.mxu1 }
 0x1c2   : > { %v811_v56 = vpop.f32.mrf.mxu1 }
 0x1c4   : > { %v2401_v57 = vpop.f32.mrf.mxu1  ;;  %v2413_v58 = vpop.f32.mrf.mxu0 }
 0x1c5   : > { %v918_v2 = vadd.f32 %v2413_v58, %v2397_v53 }
 0x1c6   : > { %v824_v59 = vpop.f32.mrf.mxu1  ;;  %v909_v60 = vpop.f32.mrf.mxu0 }
 0x1c7   : > { %v910_v8 = vadd.f32 %v909_v60, %v808_v54 }
 0x1c8   : > { %v2402_v61 = vpop.f32.mrf.mxu1  ;;  %v2414_v62 = vpop.f32.mrf.mxu0 }
 0x1c9   : > { %v921_v14 = vadd.f32 %v2414_v62, %v2398_v55 }
 0x1ca   : > { %v827_v0 = vpop.f32.mrf.mxu1  ;;  %v912_v1 = vpop.f32.mrf.mxu0 }
 0x1cb   : > { %v913_v22 = vadd.f32 %v912_v1, %v811_v56 }
 0x1cc   : > { %v2417_v4 = vpop.f32.mrf.mxu0  ;;  %v2429_v5 = vpop.f32.mrf.mxu1 }
 0x1cd   : > { %v1154_v10 = vadd.f32 %v2429_v5, %v918_v2  ;;  %v934_v27 = vadd.f32 %v2417_v4, %v2401_v57 }
 0x1ce   : > { %v925_v11 = vpop.f32.mrf.mxu0  ;;  %v1121_v13 = vpop.f32.mrf.mxu1 }
 0x1cf   : > { %v1152_v16 = vadd.f32 %v1121_v13, %v910_v8  ;;  %v1166_v18 = vmul.f32 %v2170_v9, %v1154_v10  ;;  %v926_v36 = vadd.f32 %v925_v11, %v824_v59 }
 0x1d0   : > { %v2430_v19 = vpop.f32.mrf.mxu1  ;;  %v2418_v24 = vpop.f32.mrf.mxu0 }
 0x1d1   : > { %v1155_v21 = vadd.f32 %v2430_v19, %v921_v14  ;;  %v1164_v23 = vmul.f32 %v2170_v9, %v1152_v16  ;;  %v1178_v30 = vadd.f32 %v2171_v20, %v1166_v18  ;;  %v937_v42 = vadd.f32 %v2418_v24, %v2402_v61  ;;  %v2584_v61 = vld [vmem:[%s3275_s2 + $0x110] sm:$0xff]   ;;  %v2587_v24 = vld [vmem:[%s3275_s2 + $0x158] sm:$0xff]  }
 0x1d2   : > { %v1124_v25 = vpop.f32.mrf.mxu1  ;;  %v928_v39 = vpop.f32.mrf.mxu0  ;;  %2483 = vmatprep.subr.bf16.mxu1 %v2587_v24 }
 0x1d3   : > { %v1167_v29 = vmul.f32 %v2170_v9, %v1155_v21  ;;  %v1153_v3 = vadd.f32 %v1124_v25, %v913_v22  ;;  %v1176_v38 = vadd.f32 %v2171_v20, %v1164_v23  ;;  %v1186_v46 = vmax.f32 %v1178_v30, 0.0  ;;  %v2588_v25 = vld [vmem:[%s3275_s2 + $0x150] sm:$0xff]   ;;  %v2591_v30 = vld [vmem:[%s3275_s2 + $0x140] sm:$0xff]  }
 0x1d4   : > { %v2433_v15 = vpop.f32.mrf.mxu1  ;;  %v929_v48 = vadd.f32 %v928_v39, %v827_v0 }
 0x1d5   : > { %v1179_v28 = vadd.f32 %v2171_v20, %v1167_v29  ;;  %v1158_v37 = vadd.f32 %v2433_v15, %v934_v27  ;;  %v1165_v40 = vmul.f32 %v2170_v9, %v1153_v3  ;;  %v1184_v50 = vmax.f32 %v1176_v38, 0.0  ;;  %v2589_v27 = vld [vmem:[%s3275_s2 + $0x148] sm:$0xff]   ;;  %v2590_v29 = vld [vmem:[%s3275_s2 + $0x138] sm:$0xff]   ;;  %v2592_v3 = vld [vmem:[%s3275_s2 + $0x130] sm:$0xff]  }
 0x1d6   : > { %v1137_v41 = vpop.f32.mrf.mxu1  ;;  %v2593_v15 = vld [vmem:[%s3275_s2 + $0x128] sm:$0xff]  }
 0x1d7   : > { %v1187_v43 = vmax.f32 %v1179_v28, 0.0  ;;  %v1156_v45 = vadd.f32 %v1137_v41, %v926_v36  ;;  %v1177_v63 = vadd.f32 %v2171_v20, %v1165_v40  ;;  %v1170_v31 = vmul.f32 %v2170_v9, %v1158_v37  ;;  %v3156_v36 = vld [vmem:[%s3275_s2 + $0x178] sm:$0xff]   ;;  %v2595_v28 = vld [vmem:[%s3275_s2 + $0x120] sm:$0xff]  }
 0x1d8   : > { %v2434_v47 = vpop.f32.mrf.mxu1 }
 0x1d9   : > { %v1159_v49 = vadd.f32 %v2434_v47, %v937_v42  ;;  %v1193_v51 = vpack.c.bf16 %v1187_v43, %v1186_v46  ;;  %v1185_v53 = vmax.f32 %v1177_v63, 0.0  ;;  %v1168_v54 = vmul.f32 %v2170_v9, %v1156_v45 }
 0x1da   : > { %v1140_v55 = vpop.f32.mrf.mxu1  ;;  %v1182_v58 = vadd.f32 %v2171_v20, %v1170_v31 }
 0x1db   : > { %v1171_v56 = vmul.f32 %v2170_v9, %v1159_v49  ;;  %v1192_v57 = vpack.c.bf16 %v1185_v53, %v1184_v50  ;;  %v1157_v59 = vadd.f32 %v1140_v55, %v929_v48  ;;  %v1202_v62 = vrot.slane %v1193_v51, 4  ;;  %v2196_v55 = vld [vmem:[%s3276_s3 + $0x3] ss:$0 sm:$0xff] }
 0x1dc   : > { %v1180_v1 = vadd.f32 %v2171_v20, %v1168_v54  ;;  %v1190_v5 = vmax.f32 %v1182_v58, 0.0 }
 0x1dd   : > { %v1183_v60 = vadd.f32 %v2171_v20, %v1171_v56  ;;  %v1169_v2 = vmul.f32 %v2170_v9, %v1157_v59  ;;  %2443 = vmatprep.mubr.msk.bf16.mxu0 %vm291_vm0, %v1192_v57  ;;  %v1201_v0 = vrot.slane %v1192_v57, 4  ;;  %v2585_v9 = vld [vmem:[%s3275_s2 + $0x108] sm:$0xff]  }
 0x1de   : > { %2444 = vmatmul.mubr.msk.bf16.vlgmr.msra.gmra.mxu0 %vm291_vm0, %v1193_v51  ;;  %v1188_v13 = vmax.f32 %v1180_v1, 0.0 }
 0x1df   : > { %v1191_v4 = vmax.f32 %v1183_v60, 0.0  ;;  %v1181_v8 = vadd.f32 %v2171_v20, %v1169_v2  ;;  %2468 = vmatpush3.bf16.msra.mxu0 %v3096_v52  ;;  %v1209_v10 = vsel %vm3321_vm15, 0, %v1201_v0  ;;  %v1203_v11 = vsel %vm3322_vm4, %v1201_v0, %v1202_v62  ;;  %v2586_v52 = vld [vmem:[%s3275_s2 + $0x100] sm:$0xff]   ;;  %vm3324_vm15 = vmmov %vm3322_vm4 }
 0x1e0   : > { %2459 = vmatprep.mubr.msk.bf16.mxu1 %vm291_vm0, %v1209_v10  ;;  %2469 = vmatprep.subr.bf16.mxu0 %v2584_v61 }
 0x1e1   : > { %v1195_v14 = vpack.c.bf16 %v1191_v4, %v1190_v5  ;;  %v1189_v16 = vmax.f32 %v1181_v8, 0.0  ;;  %2460 = vmatmul.mubr.msk.bf16.vlgmr.msra.gmra.mxu1 %vm291_vm0, %v1203_v11 }
 0x1e2   : > { %2484 = vmatpush3.bf16.msra.mxu1 %v2587_v24 }
 0x1e3   : > { %v1194_v18 = vpack.c.bf16 %v1189_v16, %v1188_v13  ;;  %2470 = vmatpush3.bf16.msra.mxu0 %v2584_v61  ;;  %v1206_v20 = vrot.slane %v1195_v14, 4  ;;  %2485 = vmatprep.subr.bf16.mxu1 %v2588_v25 }
 0x1e4   : > { %2471 = vmatprep.subr.bf16.mxu0 %v2585_v9 }
 0x1e5   : > { %2447 = vmatprep.mubr.msk.bf16.mxu0 %vm291_vm0, %v1194_v18  ;;  %v1204_v19 = vrot.slane %v1194_v18, 4  ;;  %v1428_v23 = vsel %vm3322_vm4, %v1206_v20, 0 }
 0x1e6   : > { %2448 = vmatmul.mubr.msk.bf16.gmra.mxu0 %vm291_vm0, %v1195_v14  ;;  %2486 = vmatpush3.bf16.msra.mxu1 %v2588_v25 }
 0x1e7   : > { %2472 = vmatpush3.bf16.msra.mxu0 %v2585_v9  ;;  %2475 = vmatprep.mubr.msk.bf16.mxu0 %vm291_vm0, %v1203_v11  ;;  %v1205_v21 = vsel %vm3323_vm10, %v1202_v62, %v1204_v19  ;;  %v1207_v22 = vsel %vm3324_vm15, %v1204_v19, %v1206_v20 }
 0x1e8   : > { %2463 = vmatprep.mubr.msk.bf16.mxu1 %vm291_vm0, %v1205_v21  ;;  %2473 = vmatprep.subr.bf16.mxu0 %v2586_v52 }
 0x1e9   : > { %2464 = vmatmul.mubr.msk.bf16.gmra.mxu1 %vm291_vm0, %v1207_v22  ;;  %2487 = vmatprep.subr.bf16.mxu1 %v2589_v27 }
 0x1ea   : > { %2488 = vmatpush3.bf16.msra.mxu1 %v2589_v27 }
 0x1eb   : > { %2474 = vmatpush3.bf16.msra.mxu0 %v2586_v52  ;;  %2489 = vmatprep.subr.bf16.mxu1 %v2591_v30 }
 0x1ec   : > { %2499 = vmatprep.subr.bf16.mxu0 %v2590_v29 }
 0x1ee   : > { %2476 = vmatmul.mubr.msk.bf16.vlgmr.msra.gmra.mxu0 %vm291_vm0, %v1205_v21  ;;  %2490 = vmatpush3.bf16.msra.mxu1 %v2591_v30 }
 0x1ef   : > { %2479 = vmatprep.mubr.msk.bf16.mxu0 %vm291_vm0, %v1207_v22  ;;  %2500 = vmatpush3.bf16.msra.mxu0 %v2590_v29 }
 0x1f0   : > { %2501 = vmatprep.subr.bf16.mxu0 %v2592_v3  ;;  %2515 = vmatprep.subr.bf16.mxu1 %v3156_v36 }
 0x1f3   : > { %2502 = vmatpush3.bf16.msra.mxu0 %v2592_v3 }
 0x1f4   : > { %2503 = vmatprep.subr.bf16.mxu0 %v2593_v15 }
 0x1f6   : > { %2480 = vmatmul.mubr.msk.bf16.gmra.mxu0 %vm291_vm0, %v1428_v23 }
 0x1f7   : > { %2504 = vmatpush3.bf16.msra.mxu0 %v2593_v15 }
 0x1f8   : > { %2505 = vmatprep.subr.bf16.mxu0 %v2595_v28 }
 0x1fb   : > { %2506 = vmatpush3.bf16.msra.mxu0 %v2595_v28 }
 0x29e   : > { %v2445_v37 = vpop.f32.mrf.mxu0 }
 0x2a0   : > { %v1296_v38 = vpop.f32.mrf.mxu0 }
 0x2a1   : > { %v2461_v39 = vpop.f32.mrf.mxu1 }
 0x2a2   : > { %v2446_v40 = vpop.f32.mrf.mxu0  ;;  %v1405_v49 = vadd.f32 %v2461_v39, %v2445_v37 }
 0x2a3   : > { %v1396_v41 = vpop.f32.mrf.mxu1 }
 0x2a4   : > { %v1299_v42 = vpop.f32.mrf.mxu0  ;;  %v1397_v51 = vadd.f32 %v1396_v41, %v1296_v38  ;;  %v2596_v38 = vld [vmem:[%s3275_s2 + $0x170] sm:$0xff]  }
 0x2a5   : > { %v2462_v43 = vpop.f32.mrf.mxu1 }
 0x2a6   : > { %v2449_v45 = vpop.f32.mrf.mxu0  ;;  %v1408_v57 = vadd.f32 %v2462_v43, %v2446_v40 }
 0x2a7   : > { %v1399_v46 = vpop.f32.mrf.mxu1 }
 0x2a8   : > { %v1312_v63 = vpop.f32.mrf.mxu0  ;;  %v1400_v60 = vadd.f32 %v1399_v46, %v1299_v42 }
 0x2a9   : > { %v2465_v47 = vpop.f32.mrf.mxu1 }
 0x2aa   : > { %v2450_v31 = vpop.f32.mrf.mxu0  ;;  %v1421_v8 = vadd.f32 %v2465_v47, %v2449_v45 }
 0x2ab   : > { %v1412_v54 = vpop.f32.mrf.mxu1 }
 0x2ac   : > { %v1315_v48 = vpop.f32.mrf.mxu0  ;;  %v1413_v11 = vadd.f32 %v1412_v54, %v1312_v63 }
 0x2ad   : > { %v2466_v1 = vpop.f32.mrf.mxu1 }
 0x2ae   : > { %v2477_v50 = vpop.f32.mrf.mxu0  ;;  %v1424_v23 = vadd.f32 %v2466_v1, %v2450_v31 }
 0x2af   : > { %v1530_v53 = vadd.f32 %v2477_v50, %v1405_v49  ;;  %v1415_v16 = vpop.f32.mrf.mxu1  ;;  %v2597_v50 = vld [vmem:[%s3275_s2 + $0x168] sm:$0xff]  }
 0x2b0   : > { %v1497_v56 = vpop.f32.mrf.mxu0  ;;  %v1416_v25 = vadd.f32 %v1415_v16, %v1315_v48 }
 0x2b1   : > { %v1528_v58 = vadd.f32 %v1497_v56, %v1397_v51  ;;  %v1542_v61 = vadd.f32 %v2196_v55, %v1530_v53 }
 0x2b2   : > { %v2478_v59 = vpop.f32.mrf.mxu0 }
 0x2b3   : > { %v1531_v62 = vadd.f32 %v2478_v59, %v1408_v57  ;;  %v1540_v0 = vadd.f32 %v2196_v55, %v1528_v58  ;;  %v1550_v9 = vmax.f32 %v1542_v61, 0.0 }
 0x2b4   : > { %v1500_v2 = vpop.f32.mrf.mxu0 }
 0x2b5   : > { %v1543_v4 = vadd.f32 %v2196_v55, %v1531_v62  ;;  %v1529_v5 = vadd.f32 %v1500_v2, %v1400_v60  ;;  %v1548_v19 = vmax.f32 %v1540_v0, 0.0  ;;  %v2598_v62 = vld [vmem:[%s3275_s2 + $0x160] sm:$0xff]  }
 0x2b6   : > { %v2481_v10 = vpop.f32.mrf.mxu0 }
 0x2b7   : > { %v1551_v13 = vmax.f32 %v1543_v4, 0.0  ;;  %v1541_v14 = vadd.f32 %v2196_v55, %v1529_v5  ;;  %v1534_v18 = vadd.f32 %v2481_v10, %v1421_v8 }
 0x2b8   : > { %v1513_v52 = vpop.f32.mrf.mxu0 }
 0x2b9   : > { %v1557_v20 = vpack.c.bf16 %v1551_v13, %v1550_v9  ;;  %v1549_v21 = vmax.f32 %v1541_v14, 0.0  ;;  %v1532_v22 = vadd.f32 %v1513_v52, %v1413_v11  ;;  %v1546_v3 = vadd.f32 %v2196_v55, %v1534_v18 }
 0x2ba   : > { %v2482_v24 = vpop.f32.mrf.mxu0 }
 0x2bb   : > { %v1568_v27 = vshrl.u32 %v1557_v20, 16  ;;  %v1556_v29 = vpack.c.bf16 %v1549_v21, %v1548_v19  ;;  %v1571_v30 = vshll.u32 %v1557_v20, 16  ;;  %v1544_v15 = vadd.f32 %v2196_v55, %v1532_v22 }
 0x2bc   : > { %v1535_v28 = vadd.f32 %v2482_v24, %v1424_v23  ;;  %v1516_v37 = vpop.f32.mrf.mxu0  ;;  %v1554_v47 = vmax.f32 %v1546_v3, 0.0 }
 0x2bd   : > { %v1570_v39 = vrot.slane %v1568_v27, 7  ;;  %v1561_v40 = vshrl.u32 %v1556_v29, 16  ;;  %v1533_v41 = vadd.f32 %v1516_v37, %v1416_v25  ;;  %2491 = vmatprep.mubr.msk.bf16.mxu1 %vm291_vm0, %v1556_v29  ;;  %v1564_v42 = vshll.u32 %v1556_v29, 16 }
 0x2be   : > { %v1547_v43 = vadd.f32 %v2196_v55, %v1535_v28  ;;  %2492 = vmatmul.mubr.msk.bf16.vlgmr.msra.gmra.mxu1 %vm291_vm0, %v1557_v20  ;;  %v1552_v48 = vmax.f32 %v1544_v15, 0.0  ;;  %v1816_v56 = vrot.slane %v1571_v30, 1 }
 0x2bf   : > { %v1573_v45 = vor.u32 %v1571_v30, %v1570_v39  ;;  %v1545_v46 = vadd.f32 %v2196_v55, %v1533_v41  ;;  %2516 = vmatpush3.bf16.msra.mxu1 %v3156_v36  ;;  %v1563_v63 = vrot.slane %v1561_v40, 7  ;;  %v1814_v31 = vrot.slane %v1564_v42, 1 }
 0x2c0   : > { %v1555_v49 = vmax.f32 %v1547_v43, 0.0  ;;  %2517 = vmatprep.subr.bf16.mxu1 %v2596_v38  ;;  %v1818_v10 = vor.u32 %v1816_v56, %v1568_v27 }
 0x2c1   : > { %v1553_v51 = vmax.f32 %v1545_v46, 0.0  ;;  %v1566_v53 = vor.u32 %v1564_v42, %v1563_v63  ;;  %v1815_v54 = vor.u32 %v1814_v31, %v1561_v40  ;;  %v1574_v58 = vsel %vm603_vm2, %v1563_v63, %v1573_v45  ;;  %v3221_v42 = vld [vmem:[%s3276_s3 + $0x5] ss:$0 sm:$0xff]  ;;  %v2599_v31 = vld [vmem:[%s2675_s6 + $0x8] sm:$0xf] }
 0x2c2   : > { %v1559_v57 = vpack.c.bf16 %v1555_v49, %v1554_v47  ;;  %v1597_v7 = vsel %vm2889_vm3, %v1574_v58, 0  ;;  %v1977_v47 = vunpack.c.l.bf16 %v2599_v31 }
 0x2c3   : > { %v1558_v55 = vpack.c.bf16 %v1553_v51, %v1552_v48  ;;  %2518 = vmatpush3.bf16.msra.mxu1 %v2596_v38  ;;  %v1595_v36 = vsel %vm2862_vm8, 0, %v1566_v53  ;;  %v1817_v59 = vsel %vm940_vm7, %v1815_v54, %v1816_v56 }
 0x2c4   : > { %v1584_v60 = vshrl.u32 %v1559_v57, 16  ;;  %v1596_v61 = vsel %vm2876_vm13, %v1595_v36, 0  ;;  %2519 = vmatprep.subr.bf16.mxu1 %v2597_v50  ;;  %v1587_v1 = vshll.u32 %v1559_v57, 16  ;;  %v1830_v12 = vsel %vm2906_vm5, %v1817_v59, 0 }
 0x2c5   : > { %v1576_v2 = vshrl.u32 %v1558_v55, 16  ;;  %v1579_v0 = vshll.u32 %v1558_v55, 16  ;;  %2495 = vmatprep.mubr.msk.bf16.mxu1 %vm291_vm0, %v1558_v55  ;;  %2507 = vmatprep.mubr.msk.bf16.mxu0 %vm291_vm0, %v1596_v61  ;;  %v2601_v55 = vld [vmem:[%s2675_s6 + $0xc] sm:$0xf] }
 0x2c6   : > { %2496 = vmatmul.mubr.msk.bf16.gmra.mxu1 %vm291_vm0, %v1559_v57  ;;  %2508 = vmatmul.mubr.msk.bf16.vlgmr.msra.gmra.mxu0 %vm291_vm0, %v1597_v7  ;;  %v1586_v4 = vrot.slane %v1584_v60, 7  ;;  %v1822_v17 = vrot.slane %v1587_v1, 1  ;;  %v1978_v36 = vunpack.c.l.bf16 %v2601_v55 }
 0x2c7   : > { %v1819_v5 = vrot.slane %v1579_v0, 1  ;;  %2520 = vmatpush3.bf16.msra.mxu1 %v2597_v50  ;;  %2523 = vmatprep.mubr.msk.bf16.mxu1 %vm291_vm0, %v1830_v12  ;;  %v1578_v8 = vrot.slane %v1576_v2, 7  ;;  %v2600_v50 = vld [vmem:[%s2675_s6] sm:$0xf] }
 0x2c8   : > { %2521 = vmatprep.subr.bf16.mxu1 %v2598_v62  ;;  %v1589_v11 = vor.u32 %v1587_v1, %v1586_v4  ;;  %v1824_v22 = vor.u32 %v1822_v17, %v1584_v60  ;;  %v1975_v51 = vunpack.c.l.bf16 %v2600_v50 }
 0x2c9   : > { %v1581_v9 = vor.u32 %v1579_v0, %v1578_v8  ;;  %v1821_v13 = vor.u32 %v1819_v5, %v1576_v2  ;;  %v1820_v16 = vsel %vm940_vm7, %v1818_v10, %v1819_v5  ;;  %v2602_v2 = vld [vmem:[%s2675_s6 + $0x4] sm:$0xf] }
 0x2ca   : > { %v1590_v14 = vsel %vm603_vm2, %v1578_v8, %v1589_v11  ;;  %v1831_v20 = vsel %vm3026_vm9, %v1820_v16, 0  ;;  %v1829_v32 = vsel %vm3056_vm1, %v1824_v22, 0  ;;  %v1976_v0 = vunpack.c.l.bf16 %v2602_v2 }
 0x2cb   : > { %2522 = vmatpush3.bf16.msra.mxu1 %v2598_v62  ;;  %v1582_v26 = vsel %vm603_vm2, %v1570_v39, %v1581_v9  ;;  %v1823_v18 = vsel %vm940_vm7, %v1821_v13, %v1822_v17  ;;  %v1599_v19 = vsel %vm3030_vm11, %v1590_v14, 0  ;;  %v1833_v34 = vsel %vm3062_vm14, %v1829_v32, 0  ;;  %v2603_v14 = vld [vmem:[%s2675_s6 + $0x18] sm:$0xf] }
 0x2cc   : > { %v1598_v52 = vsel %vm3019_vm6, %v1582_v26, 0  ;;  %v1832_v21 = vsel %vm3034_vm12, %v1823_v18, 0  ;;  %v1981_v16 = vunpack.c.l.bf16 %v2603_v14 }
 0x2cd   : > { %2511 = vmatprep.mubr.msk.bf16.mxu0 %vm291_vm0, %v1598_v52 }
 0x2ce   : > { %2512 = vmatmul.mubr.msk.bf16.gmra.mxu0 %vm291_vm0, %v1599_v19  ;;  %2524 = vmatmul.mubr.msk.bf16.vlgmr.msra.gmra.mxu1 %vm291_vm0, %v1831_v20 }
 0x2cf   : > { %2527 = vmatprep.mubr.msk.bf16.mxu1 %vm291_vm0, %v1832_v21 }
 0x2d6   : > { %2528 = vmatmul.mubr.msk.bf16.gmra.mxu1 %vm291_vm0, %v1833_v34  ;;  %vm2031_vm0 = vcmask 519168  }
 0x37e   : > { %v2493_v33 = vpop.f32.mrf.mxu1 }
 0x380   : > { %v1682_v23 = vpop.f32.mrf.mxu1 }
 0x382   : > { %v2494_v24 = vpop.f32.mrf.mxu1 }
 0x384   : > { %v1685_v25 = vpop.f32.mrf.mxu1 }
 0x386   : > { %v2497_v27 = vpop.f32.mrf.mxu1  ;;  %v2509_v29 = vpop.f32.mrf.mxu0 }
 0x387   : > { %v1792_v6 = vadd.f32 %v2509_v29, %v2493_v33 }
 0x388   : > { %v1698_v30 = vpop.f32.mrf.mxu1  ;;  %v1783_v35 = vpop.f32.mrf.mxu0 }
 0x389   : > { %v1784_v40 = vadd.f32 %v1783_v35, %v1682_v23 }
 0x38a   : > { %v2498_v3 = vpop.f32.mrf.mxu1  ;;  %v2510_v15 = vpop.f32.mrf.mxu0 }
 0x38b   : > { %v1795_v46 = vadd.f32 %v2510_v15, %v2494_v24 }
 0x38c   : > { %v1701_v28 = vpop.f32.mrf.mxu1  ;;  %v1786_v37 = vpop.f32.mrf.mxu0 }
 0x38d   : > { %v1787_v58 = vadd.f32 %v1786_v37, %v1685_v25 }
 0x38e   : > { %v2513_v38 = vpop.f32.mrf.mxu0  ;;  %v2525_v39 = vpop.f32.mrf.mxu1 }
 0x38f   : > { %v1945_v41 = vadd.f32 %v2525_v39, %v1792_v6  ;;  %v1808_v60 = vadd.f32 %v2513_v38, %v2497_v27 }
 0x390   : > { %v1799_v43 = vpop.f32.mrf.mxu0  ;;  %v1912_v45 = vpop.f32.mrf.mxu1 }
 0x391   : > { %v1957_v63 = vmul.f32 %v3216_v44, %v1945_v41  ;;  %v1943_v48 = vadd.f32 %v1912_v45, %v1784_v40  ;;  %v1800_v9 = vadd.f32 %v1799_v43, %v1698_v30  ;;  %v2604_v30 = vld [vmem:[%s2675_s6 + $0x10] sm:$0xf] }
 0x392   : > { %v2526_v49 = vpop.f32.mrf.mxu1  ;;  %v2514_v56 = vpop.f32.mrf.mxu0  ;;  %v1979_v35 = vunpack.c.l.bf16 %v2604_v30 }
 0x393   : > { %v1969_v53 = vadd.f32 %v3221_v42, %v1957_v63  ;;  %v1955_v54 = vmul.f32 %v3216_v44, %v1943_v48  ;;  %v1946_v57 = vadd.f32 %v2526_v49, %v1795_v46  ;;  %v1811_v13 = vadd.f32 %v2514_v56, %v2498_v3  ;;  %v2605_v3 = vld [vmem:[%s2675_s6 + $0x1c] sm:$0xf]  ;;  %v2606_v63 = vld [vmem:[%s2675_s6 + $0x14] sm:$0xf] }
 0x394   : > { %v1915_v59 = vpop.f32.mrf.mxu1  ;;  %v1802_v10 = vpop.f32.mrf.mxu0  ;;  %v1982_v15 = vunpack.c.l.bf16 %v2605_v3  ;;  %v1980_v31 = vunpack.c.l.bf16 %v2606_v63 }
 0x395   : > { %v1985_v61 = vadd.f32 %v1977_v47, %v1969_v53  ;;  %v1967_v62 = vadd.f32 %v3221_v42, %v1955_v54  ;;  %v1958_v1 = vmul.f32 %v3216_v44, %v1946_v57  ;;  %v1944_v7 = vadd.f32 %v1915_v59, %v1787_v58 }
 0x396   : > { %v2529_v12 = vpop.f32.mrf.mxu1  ;;  %v1803_v21 = vadd.f32 %v1802_v10, %v1701_v28 }
 0x397   : > { %v1993_v4 = vmax.f32 %v1985_v61, 0.0  ;;  %v1983_v5 = vadd.f32 %v1975_v51, %v1967_v62  ;;  %v1970_v8 = vadd.f32 %v3221_v42, %v1958_v1  ;;  %v1949_v11 = vadd.f32 %v2529_v12, %v1808_v60 }
 0x398   : > { %v1956_v17 = vmul.f32 %v3216_v44, %v1944_v7  ;;  %v1928_v26 = vpop.f32.mrf.mxu1 }
 0x399   : > { %v2237_v18 = vpack.c.bf16 %v1993_v4, %v1993_v4  ;;  %v1991_v52 = vmax.f32 %v1983_v5, 0.0  ;;  %v1986_v19 = vadd.f32 %v1978_v36, %v1970_v8  ;;  %v1961_v20 = vmul.f32 %v3216_v44, %v1949_v11 }
 0x39a   : > { %v1968_v22 = vadd.f32 %v3221_v42, %v1956_v17  ;;  %v1947_v32 = vadd.f32 %v1928_v26, %v1800_v9  ;;  %v2530_v34 = vpop.f32.mrf.mxu1 }
 0x39b   : > { %2034 = vst.msk [vmem:[%s3238_s11 + $0x8] sm:$0xf] %vm2031_vm0, %v2237_v18  ;;  %v2235_v33 = vpack.c.bf16 %v1991_v52, %v1991_v52  ;;  %v1994_v23 = vmax.f32 %v1986_v19, 0.0  ;;  %v1973_v24 = vadd.f32 %v3221_v42, %v1961_v20  ;;  %v1950_v25 = vadd.f32 %v2530_v34, %v1811_v13 }
 0x39c   : > { %v1984_v27 = vadd.f32 %v1976_v0, %v1968_v22  ;;  %v1959_v29 = vmul.f32 %v3216_v44, %v1947_v32  ;;  %v1931_v28 = vpop.f32.mrf.mxu1 }
 0x39d   : > { %2032 = vst.msk [vmem:[%s3238_s11] sm:$0xf] %vm2031_vm0, %v2235_v33  ;;  %v2238_v37 = vpack.c.bf16 %v1994_v23, %v1994_v23  ;;  %v1989_v6 = vadd.f32 %v1981_v16, %v1973_v24  ;;  %v1962_v38 = vmul.f32 %v3216_v44, %v1950_v25  ;;  %v1948_v39 = vadd.f32 %v1931_v28, %v1803_v21 }
 0x39e   : > { %v1992_v40 = vmax.f32 %v1984_v27, 0.0  ;;  %v1971_v41 = vadd.f32 %v3221_v42, %v1959_v29 }
 0x39f   : > { %2035 = vst.msk [vmem:[%s3238_s11 + $0xc] sm:$0xf] %vm2031_vm0, %v2238_v37  ;;  %v1997_v43 = vmax.f32 %v1989_v6, 0.0  ;;  %v1974_v45 = vadd.f32 %v3221_v42, %v1962_v38  ;;  %v1960_v46 = vmul.f32 %v3216_v44, %v1948_v39 }
 0x3a0   : > { %v2236_v47 = vpack.c.bf16 %v1992_v40, %v1992_v40  ;;  %v1987_v48 = vadd.f32 %v1979_v35, %v1971_v41 }
 0x3a1   : > { %v2241_v49 = vpack.c.bf16 %v1997_v43, %v1997_v43  ;;  %v1990_v50 = vadd.f32 %v1982_v15, %v1974_v45  ;;  %v1972_v51 = vadd.f32 %v3221_v42, %v1960_v46 }
 0x3a2   : > { %2033 = vst.msk [vmem:[%s3238_s11 + $0x4] sm:$0xf] %vm2031_vm0, %v2236_v47  ;;  %v1995_v53 = vmax.f32 %v1987_v48, 0.0 }
 0x3a3   : > { %2038 = vst.msk [vmem:[%s3238_s11 + $0x18] sm:$0xf] %vm2031_vm0, %v2241_v49  ;;  %v1998_v54 = vmax.f32 %v1990_v50, 0.0  ;;  %v1988_v56 = vadd.f32 %v1980_v31, %v1972_v51 }
 0x3a4   : > { %v2239_v57 = vpack.c.bf16 %v1995_v53, %v1995_v53 }
 0x3a5   : > { %v2242_v44 = vpack.c.bf16 %v1998_v54, %v1998_v54  ;;  %v1996_v58 = vmax.f32 %v1988_v56, 0.0 }
 0x3a6   : > { %2036 = vst.msk [vmem:[%s3238_s11 + $0x10] sm:$0xf] %vm2031_vm0, %v2239_v57 }
 0x3a7   : > { %2039 = vst.msk [vmem:[%s3238_s11 + $0x1c] sm:$0xf] %vm2031_vm0, %v2242_v44  ;;  %v2240_v55 = vpack.c.bf16 %v1996_v58, %v1996_v58 }
 0x3a9   : > { %2037 = vst.msk [vmem:[%s3238_s11 + $0x14] sm:$0xf] %vm2031_vm0, %v2240_v55 }
 0x3aa PF: > { %s14_s15 = sadd.s32 1, %s2613_s15  }
 0x3ab   : > { %p11_p4 = scmp.ge.s32.totalorder %s14_s15, 4  }
 0x3ad   :  { %13 = sbr.rel (!%p11_p4) target bundleno = 1 (0x1), region = 66 }

// kernel: net_forward.30
= control target key start
LH: loop header
LB: loop body
LE: loop exit
PB: predicated region body
PF: predicated region fallthrough
CT: control target
= control target key end

     0   :  { %vm368_vm0 = vcmask 523264   ;;  %vm564_vm1 = vcmask 519168   ;;  %s936_s1 = inlined_call_operand.vmem [shape: bf16[576,64], index: 1, kind: input, shape index: {}]   ;;  %s937_s0 = inlined_call_operand.vmem [shape: bf16[32,576], index: 0, kind: input, shape index: {}]   ;;  %s938_s2 = inlined_call_operand.vmem [shape: f32[1,64], index: 2, kind: input, shape index: {}]   ;;  %s939_s3 = inlined_call_operand.vmem [shape: f32[1,64], index: 3, kind: input, shape index: {}]   ;;  %s940_s4 = inlined_call_operand.vmem [shape: bf16[32,64], index: 4, kind: output, shape index: {}]  }
   0x1   :  { %v705_v0 = vld [vmem:[%s936_s1 + $0x78] sm:$0xff]   ;;  %v709_v4 = vld [vmem:[%s936_s1 + $0x70] sm:$0xff]   ;;  %v713_v8 = vld [vmem:[%s936_s1 + $0x68] sm:$0xff]  }
   0x2   :  { %v706_v1 = vld [vmem:[%s936_s1 + $0xf8] sm:$0xff]   ;;  %631 = vmatprep.subr.bf16.mxu0 %v705_v0  ;;  %v710_v5 = vld [vmem:[%s936_s1 + $0xf0] sm:$0xff]   ;;  %v714_v9 = vld [vmem:[%s936_s1 + $0xe8] sm:$0xff]  }
   0x3   :  { %v707_v2 = vld [vmem:[%s936_s1 + $0x38] sm:$0xff]   ;;  %659 = vmatprep.subr.bf16.mxu1 %v706_v1  ;;  %v711_v6 = vld [vmem:[%s936_s1 + $0x30] sm:$0xff]   ;;  %v715_v10 = vld [vmem:[%s936_s1 + $0x28] sm:$0xff]  }
   0x4   :  { %v708_v3 = vld [vmem:[%s936_s1 + $0xb8] sm:$0xff]   ;;  %632 = vmatpush3.bf16.msra.mxu0 %v707_v2  ;;  %v712_v7 = vld [vmem:[%s936_s1 + $0xb0] sm:$0xff]   ;;  %v716_v11 = vld [vmem:[%s936_s1 + $0xa8] sm:$0xff]  }
   0x5   :  { %660 = vmatpush3.bf16.msra.mxu1 %v708_v3  ;;  %633 = vmatprep.subr.bf16.mxu0 %v709_v4  ;;  %v717_v12 = vld [vmem:[%s936_s1 + $0x60] sm:$0xff]   ;;  %v721_v16 = vld [vmem:[%s936_s1 + $0x58] sm:$0xff]   ;;  %v725_v20 = vld [vmem:[%s936_s1 + $0x50] sm:$0xff]  }
   0x6   :  { %661 = vmatprep.subr.bf16.mxu1 %v710_v5  ;;  %v718_v13 = vld [vmem:[%s936_s1 + $0xe0] sm:$0xff]   ;;  %v722_v17 = vld [vmem:[%s936_s1 + $0xd8] sm:$0xff]   ;;  %v726_v21 = vld [vmem:[%s936_s1 + $0xd0] sm:$0xff]  }
   0x7   :  { %v719_v14 = vld [vmem:[%s936_s1 + $0x20] sm:$0xff]   ;;  %v723_v18 = vld [vmem:[%s936_s1 + $0x18] sm:$0xff]   ;;  %v727_v22 = vld [vmem:[%s936_s1 + $0x10] sm:$0xff]  }
   0x8   :  { %634 = vmatpush3.bf16.msra.mxu0 %v711_v6  ;;  %v720_v15 = vld [vmem:[%s936_s1 + $0xa0] sm:$0xff]   ;;  %v724_v19 = vld [vmem:[%s936_s1 + $0x98] sm:$0xff]   ;;  %v728_v23 = vld [vmem:[%s936_s1 + $0x90] sm:$0xff]  }
   0x9   :  { %662 = vmatpush3.bf16.msra.mxu1 %v712_v7  ;;  %635 = vmatprep.subr.bf16.mxu0 %v713_v8  ;;  %v729_v24 = vld [vmem:[%s936_s1 + $0x48] sm:$0xff]   ;;  %v733_v28 = vld [vmem:[%s936_s1 + $0x40] sm:$0xff]   ;;  %v743_v36 = vld [vmem:[%s936_s1 + $0x118] sm:$0xff]  }
   0xa   :  { %663 = vmatprep.subr.bf16.mxu1 %v714_v9  ;;  %v730_v25 = vld [vmem:[%s936_s1 + $0xc8] sm:$0xff]   ;;  %v734_v29 = vld [vmem:[%s936_s1 + $0xc0] sm:$0xff]   ;;  %v744_v37 = vld [vmem:[%s936_s1 + $0x110] sm:$0xff]  }
   0xb   :  { %v731_v26 = vld [vmem:[%s936_s1 + $0x8] sm:$0xff]   ;;  %v735_v30 = vld [vmem:[%s936_s1] sm:$0xff]  }
   0xc   :  { %636 = vmatpush3.bf16.msra.mxu0 %v715_v10  ;;  %v732_v27 = vld [vmem:[%s936_s1 + $0x88] sm:$0xff]   ;;  %v736_v31 = vld [vmem:[%s936_s1 + $0x80] sm:$0xff]  }
   0xd   :  { %664 = vmatpush3.bf16.msra.mxu1 %v716_v11  ;;  %637 = vmatprep.subr.bf16.mxu0 %v717_v12  ;;  %v737_v32 = vld [vmem:[%s937_s0] ss:$20 sps:$4 sm:$0xff]   ;;  %v739_v33 = vld [vmem:[%s937_s0 + $0x4] ss:$20 sps:$4 sm:$0xff]   ;;  %v740_v34 = vld [vmem:[%s937_s0 + $0x8] ss:$20 sps:$4 sm:$0xff]  }
   0xe   :  { %665 = vmatprep.subr.bf16.mxu1 %v718_v13  ;;  %v742_v35 = vld [vmem:[%s937_s0 + $0xc] ss:$20 sps:$4 sm:$0xff]   ;;  %407 = vmatprep.mubr.bf16.mxu0 %v739_v33  ;;  %v747_v39 = vld [vmem:[%s937_s0 + $0x34] ss:$20 sps:$4 sm:$0xff]   ;;  %v750_v42 = vld [vmem:[%s937_s0 + $0x30] ss:$20 sps:$4 sm:$0xff]  }
   0xf   :  { %456 = vmatprep.mubr.bf16.mxu1 %v742_v35  ;;  %v745_v38 = vld [vmem:[%s937_s0 + $0x2c] ss:$20 sps:$4 sm:$0xff]   ;;  %v749_v40 = vld [vmem:[%s937_s0 + $0x28] ss:$20 sps:$4 sm:$0xff]   ;;  %v753_v43 = vld [vmem:[%s937_s0 + $0x10] ss:$20 sps:$4 sm:$0xff]  }
  0x10   :  { %638 = vmatpush3.bf16.msra.mxu0 %v719_v14  ;;  %v751_v41 = vld [vmem:[%s936_s1 + $0x108] sm:$0xff]   ;;  %v752_v44 = vld [vmem:[%s936_s1 + $0x100] sm:$0xff]  }
  0x11   :  { %666 = vmatpush3.bf16.msra.mxu1 %v720_v15  ;;  %639 = vmatprep.subr.bf16.mxu0 %v721_v16  ;;  %v754_v45 = vld [vmem:[%s937_s0 + $0x38] ss:$20 sps:$4 sm:$0xff]   ;;  %v621_v6 = vld [vmem:[%s938_s2] ss:$0 sm:$0xff] }
  0x12   :  { %667 = vmatprep.subr.bf16.mxu1 %v722_v17  ;;  %v622_v11 = vld [vmem:[%s939_s3] ss:$0 sm:$0xff] }
  0x14   :  { %640 = vmatpush3.bf16.msra.mxu0 %v723_v18 }
  0x15   :  { %668 = vmatpush3.bf16.msra.mxu1 %v724_v19  ;;  %641 = vmatprep.subr.bf16.mxu0 %v725_v20 }
  0x16   :  { %669 = vmatprep.subr.bf16.mxu1 %v726_v21 }
  0x18   :  { %642 = vmatpush3.bf16.msra.mxu0 %v727_v22 }
  0x19   :  { %670 = vmatpush3.bf16.msra.mxu1 %v728_v23  ;;  %643 = vmatprep.subr.bf16.mxu0 %v729_v24 }
  0x1a   :  { %671 = vmatprep.subr.bf16.mxu1 %v730_v25 }
  0x1c   :  { %644 = vmatpush3.bf16.msra.mxu0 %v731_v26 }
  0x1d   :  { %672 = vmatpush3.bf16.msra.mxu1 %v732_v27  ;;  %645 = vmatprep.subr.bf16.mxu0 %v733_v28 }
  0x1e   :  { %673 = vmatprep.subr.bf16.mxu1 %v734_v29 }
  0x20   :  { %646 = vmatpush3.bf16.msra.mxu0 %v735_v30 }
  0x21   :  { %674 = vmatpush3.bf16.msra.mxu1 %v736_v31  ;;  %693 = vmatprep.subr.bf16.mxu0 %v743_v36 }
  0x23   :  { %408 = vmatmul.mubr.bf16.vlgmr.msra.gmra.mxu0 %v737_v32 }
  0x24   :  { %457 = vmatmul.mubr.bf16.vlgmr.msra.gmra.mxu1 %v740_v34  ;;  %694 = vmatpush3.bf16.msra.mxu0 %v743_v36 }
  0x25   :  { %695 = vmatprep.subr.bf16.mxu0 %v744_v37  ;;  %415 = vmatprep.mubr.bf16.mxu0 %v745_v38 }
  0x26   :  { %464 = vmatprep.mubr.bf16.mxu1 %v747_v39 }
  0x28   :  { %696 = vmatpush3.bf16.msra.mxu0 %v744_v37 }
  0x29   :  { %697 = vmatprep.subr.bf16.mxu0 %v751_v41 }
  0x2b   :  { %416 = vmatmul.mubr.bf16.gmra.mxu0 %v749_v40 }
  0x2c   :  { %465 = vmatmul.mubr.bf16.gmra.mxu1 %v750_v42  ;;  %701 = vmatprep.mubr.msk.bf16.mxu0 %vm368_vm0, %v753_v43 }
  0x2d   :  { %698 = vmatpush3.bf16.msra.mxu0 %v751_v41 }
  0x2e   :  { %699 = vmatprep.subr.bf16.mxu0 %v752_v44 }
  0x31   :  { %700 = vmatpush3.bf16.msra.mxu0 %v752_v44 }
  0x34   :  { %702 = vmatmul.mubr.msk.bf16.vlgmr.msra.gmra.mxu0 %vm368_vm0, %v754_v45 }
  0xe3   :  { %v647_v46 = vpop.f32.mrf.mxu0 }
  0xe4   :  { %v675_v47 = vpop.f32.mrf.mxu1 }
  0xe5   :  { %v648_v48 = vpop.f32.mrf.mxu0 }
  0xe6   :  { %v676_v49 = vpop.f32.mrf.mxu1  ;;  %v649_v62 = vadd.f32 %v648_v48, %v647_v46 }
  0xe7   :  { %v650_v50 = vpop.f32.mrf.mxu0  ;;  %v677_v63 = vadd.f32 %v676_v49, %v675_v47 }
  0xe8   :  { %v678_v51 = vpop.f32.mrf.mxu1 }
  0xe9   :  { %v651_v52 = vpop.f32.mrf.mxu0  ;;  %v459_v10 = vadd.f32 %v677_v63, %v649_v62 }
  0xea   :  { %v679_v53 = vpop.f32.mrf.mxu1  ;;  %v652_v7 = vadd.f32 %v651_v52, %v650_v50 }
  0xeb   :  { %v653_v54 = vpop.f32.mrf.mxu0  ;;  %v680_v8 = vadd.f32 %v679_v53, %v678_v51 }
  0xec   :  { %v681_v55 = vpop.f32.mrf.mxu1 }
  0xed   :  { %v654_v56 = vpop.f32.mrf.mxu0  ;;  %v462_v20 = vadd.f32 %v680_v8, %v652_v7 }
  0xee   :  { %v682_v57 = vpop.f32.mrf.mxu1  ;;  %v655_v58 = vadd.f32 %v654_v56, %v653_v54 }
  0xef   :  { %v683_v59 = vadd.f32 %v682_v57, %v681_v55  ;;  %v656_v60 = vpop.f32.mrf.mxu0 }
  0xf0   :  { %v684_v61 = vpop.f32.mrf.mxu1 }
  0xf1   :  { %v657_v0 = vpop.f32.mrf.mxu0  ;;  %v467_v4 = vadd.f32 %v683_v59, %v655_v58 }
  0xf2   :  { %v685_v1 = vpop.f32.mrf.mxu1  ;;  %v658_v2 = vadd.f32 %v657_v0, %v656_v60 }
  0xf3   :  { %v686_v3 = vadd.f32 %v685_v1, %v684_v61 }
  0xf4   :  { %v703_v5 = vpop.f32.mrf.mxu0 }
  0xf5   :  { %v516_v9 = vadd.f32 %v703_v5, %v467_v4  ;;  %v470_v15 = vadd.f32 %v686_v3, %v658_v2 }
  0xf6   :  { %v507_v12 = vpop.f32.mrf.mxu0 }
  0xf7   :  { %v531_v13 = vmul.f32 %v621_v6, %v516_v9  ;;  %v508_v14 = vadd.f32 %v507_v12, %v459_v10 }
  0xf8   :  { %v704_v16 = vpop.f32.mrf.mxu0 }
  0xf9   :  { %v542_v17 = vadd.f32 %v622_v11, %v531_v13  ;;  %v529_v18 = vmul.f32 %v621_v6, %v508_v14  ;;  %v519_v19 = vadd.f32 %v704_v16, %v470_v15 }
  0xfa   :  { %v510_v21 = vpop.f32.mrf.mxu0 }
  0xfb   :  { %v546_v22 = vmax.f32 %v542_v17, 0.0  ;;  %v540_v23 = vadd.f32 %v622_v11, %v529_v18  ;;  %v532_v24 = vmul.f32 %v621_v6, %v519_v19  ;;  %v511_v25 = vadd.f32 %v510_v21, %v462_v20 }
  0xfd   :  { %v629_v26 = vpack.c.bf16 %v546_v22, %v546_v22  ;;  %v544_v27 = vmax.f32 %v540_v23, 0.0  ;;  %v543_v28 = vadd.f32 %v622_v11, %v532_v24  ;;  %v530_v29 = vmul.f32 %v621_v6, %v511_v25 }
  0xff   :  { %567 = vst.msk [vmem:[%s940_s4 + $0x8] sm:$0xf] %vm564_vm1, %v629_v26  ;;  %v627_v30 = vpack.c.bf16 %v544_v27, %v544_v27  ;;  %v547_v31 = vmax.f32 %v543_v28, 0.0  ;;  %v541_v32 = vadd.f32 %v622_v11, %v530_v29 }
 0x101   :  { %565 = vst.msk [vmem:[%s940_s4] sm:$0xf] %vm564_vm1, %v627_v30  ;;  %v630_v33 = vpack.c.bf16 %v547_v31, %v547_v31  ;;  %v545_v34 = vmax.f32 %v541_v32, 0.0 }
 0x103   :  { %568 = vst.msk [vmem:[%s940_s4 + $0xc] sm:$0xf] %vm564_vm1, %v630_v33  ;;  %v628_v35 = vpack.c.bf16 %v545_v34, %v545_v34 }
 0x105   :  { %566 = vst.msk [vmem:[%s940_s4 + $0x4] sm:$0xf] %vm564_vm1, %v628_v35 }

// kernel: net_forward.39
= control target key start
LH: loop header
LB: loop body
LE: loop exit
PB: predicated region body
PF: predicated region fallthrough
CT: control target
= control target key end

     0   :  { %s1157_s15 = smov 0   ;;  %s1408_s0 = inlined_call_operand.vmem [shape: s32[16,1], index: 0, kind: input, shape index: {}]   ;;  %s1409_s1 = inlined_call_operand.vmem [shape: bf16[2,16,128], index: 1, kind: input, shape index: {}]   ;;  %s1410_s2 = inlined_call_operand.vmem [shape: bf16[512,256], index: 2, kind: input, shape index: {}]   ;;  %s1411_s3 = inlined_call_operand.vmem [shape: f32[2,256], index: 3, kind: input, shape index: {}]   ;;  %s1412_s4 = inlined_call_operand.vmem [shape: bf16[2,16,256], index: 4, kind: output, shape index: {}]  }
   0x1 LB: > { %s929_s16 = sadd.s32 4294967295, %s1129_s15   ;;  %p933_p0 = scmp.ge.s32.totalorder %s1129_s15, 1  ;;  %s1129_s15 = sphi %s1157_s15, %s14_s15  }
   0x2   : > { %p162_p1 = scmp.lt.s32.totalorder %s1129_s15, 3 }
   0x4   : > { %p163_p2 = pnand %p933_p0, %p162_p1 }
   0x5   : > { %p188_p3 = scmp.lt.s32.totalorder (!%p163_p2), %s929_s16, 1 }
   0x6   : > { %166 = sbr.rel (%p163_p2) target bundleno = 392 (0x188), region = 36 }
   0xb   : > { %v203_v0 = vld [vmem:[%s1408_s0] sm:$0xff]  ;;  %v204_v1 = vld [vmem:[%s1408_s0 + $0x8] sm:$0xff]  ;;  %v1131_v2 = vmov 0   ;;  %v1026_v3 = vld [vmem:[%s1410_s2 + $0x74] ss:$8 sps:$4 sm:$0xff]   ;;  %s1416_s16 = smov (!%p188_p3, %s929_s16), 1 }
   0xc   : > { %1025 = vset.pattern.permute.xlu0 %v1131_v2  ;;  %vm238_vm0 = vcmp.lt.s32.totalorder %v203_v0, 3  ;;  %vm239_vm1 = vcmp.lt.s32.totalorder %v204_v1, 3  ;;  %511 = vmatprep.mubr.bf16.mxu1 %v1131_v2  ;;  %v1028_v5 = vld [vmem:[%s1410_s2 + $0x70] ss:$8 sps:$4 sm:$0xff]   ;;  %v1029_v6 = vld [vmem:[%s1410_s2 + $0x64] ss:$8 sps:$4 sm:$0xff]  }
   0xd   : > { %v240_v4 = vsel %vm238_vm0, 1, %v1131_v2  ;;  %387 = vmatprep.mubr.bf16.mxu0 %v1131_v2  ;;  %479 = vmatprep.subr.bf16.mxu1 %v1026_v3  ;;  %v241_v7 = vsel %vm239_vm1, 1, %v1131_v2  ;;  %v1031_v8 = vld [vmem:[%s1410_s2 + $0x60] ss:$8 sps:$4 sm:$0xff]   ;;  %v1032_v9 = vld [vmem:[%s1410_s2 + $0x54] ss:$8 sps:$4 sm:$0xff]  }
   0xe   : > { %243 = vperm.xlu0 %1025, %v240_v4   ;;  %480 = vmatpush1.bf16.msra.mxu1 %v1028_v5  ;;  %v1034_v10 = vld [vmem:[%s1410_s2 + $0x50] ss:$8 sps:$4 sm:$0xff]   ;;  %v1035_v11 = vld [vmem:[%s1410_s2 + $0x44] ss:$8 sps:$4 sm:$0xff]   ;;  %s1012_s9 = sshll.u32 %s1416_s16, 3  ;;  %vm234_vm2 = vcmask 1047552  }
   0xf   : > { %481 = vmatprep.subr.bf16.mxu1 %v1029_v6  ;;  %v1037_v12 = vld [vmem:[%s1410_s2 + $0x40] ss:$8 sps:$4 sm:$0xff]   ;;  %v1050_v13 = vld [vmem:[%s1410_s2 + $0xf4] ss:$8 sps:$4 sm:$0xff]   ;;  %v1052_v14 = vld [vmem:[%s1410_s2 + $0xf0] ss:$8 sps:$4 sm:$0xff]   ;;  %s1215_s22 = scalar_lea.vmem %s1409_s1, %s1012_s9 }
  0x10   : > { %v1038_v15 = vld [vmem:[%s1410_s2 + $0x34] ss:$8 sps:$4 sm:$0xff]   ;;  %v1040_v16 = vld [vmem:[%s1410_s2 + $0x30] ss:$8 sps:$4 sm:$0xff]   ;;  %355 = vmatprep.subr.bf16.mxu0 %v1050_v13  ;;  %v1057_v17 = vld [vmem:[%s1410_s2 + $0xe4] ss:$8 sps:$4 sm:$0xff]  }
  0x11   : > { %356 = vmatpush1.bf16.msra.mxu0 %v1052_v14  ;;  %v1059_v18 = vld [vmem:[%s1410_s2 + $0xe0] ss:$8 sps:$4 sm:$0xff]   ;;  %v1041_v19 = vld [vmem:[%s1410_s2 + $0x24] ss:$8 sps:$4 sm:$0xff]   ;;  %v1063_v20 = vld [vmem:[%s1410_s2 + $0xd4] ss:$8 sps:$4 sm:$0xff]  }
  0x12   : > { %246 = vperm.xlu0 %1025, %v241_v7   ;;  %482 = vmatpush1.bf16.msra.mxu1 %v1031_v8  ;;  %v1065_v21 = vld [vmem:[%s1410_s2 + $0xd0] ss:$8 sps:$4 sm:$0xff]   ;;  %v1043_v22 = vld [vmem:[%s1410_s2 + $0x20] ss:$8 sps:$4 sm:$0xff]   ;;  %v1044_v23 = vld [vmem:[%s1410_s2 + $0x14] ss:$8 sps:$4 sm:$0xff]  }
  0x13   : > { %483 = vmatprep.subr.bf16.mxu1 %v1032_v9  ;;  %357 = vmatprep.subr.bf16.mxu0 %v1057_v17  ;;  %v1069_v24 = vld [vmem:[%s1410_s2 + $0xc4] ss:$8 sps:$4 sm:$0xff]   ;;  %v1046_v25 = vld [vmem:[%s1410_s2 + $0x10] ss:$8 sps:$4 sm:$0xff]   ;;  %v1071_v26 = vld [vmem:[%s1410_s2 + $0xc0] ss:$8 sps:$4 sm:$0xff]  }
  0x14   : > { %v1075_v27 = vld [vmem:[%s1410_s2 + $0xb4] ss:$8 sps:$4 sm:$0xff]   ;;  %v1047_v28 = vld [vmem:[%s1410_s2 + $0x4] ss:$8 sps:$4 sm:$0xff]   ;;  %v1049_v29 = vld [vmem:[%s1410_s2] ss:$8 sps:$4 sm:$0xff]  }
  0x15   : > { %358 = vmatpush1.bf16.msra.mxu0 %v1059_v18  ;;  %v1077_v30 = vld [vmem:[%s1410_s2 + $0xb0] ss:$8 sps:$4 sm:$0xff]   ;;  %v1081_v31 = vld [vmem:[%s1410_s2 + $0xa4] ss:$8 sps:$4 sm:$0xff]   ;;  %v1055_v32 = vld [vmem:[%s1410_s2 + $0x1f4] ss:$8 sps:$4 sm:$0xff]  }
  0x16   : > { %484 = vmatpush1.bf16.msra.mxu1 %v1034_v10  ;;  %359 = vmatprep.subr.bf16.mxu0 %v1063_v20  ;;  %v1053_v33 = vld [vmem:[%s1410_s2 + $0x1f0] ss:$8 sps:$4 sm:$0xff]   ;;  %v1272_v34 = vld [vmem:[%s1215_s22] sm:$0xff]   ;;  %v1087_v36 = vld [vmem:[%s1410_s2 + $0x94] ss:$8 sps:$4 sm:$0xff]   ;;  %vm523_vm5 = vcmask 1045504  }
  0x17   : > { %485 = vmatprep.subr.bf16.mxu1 %v1035_v11  ;;  %v1083_v35 = vld [vmem:[%s1410_s2 + $0xa0] ss:$8 sps:$4 sm:$0xff]   ;;  %v1062_v37 = vld [vmem:[%s1410_s2 + $0x1e4] ss:$8 sps:$4 sm:$0xff]   ;;  %v1089_v38 = vld [vmem:[%s1410_s2 + $0x90] ss:$8 sps:$4 sm:$0xff]  }
  0x18   : > { %v1060_v39 = vld [vmem:[%s1410_s2 + $0x1e0] ss:$8 sps:$4 sm:$0xff]   ;;  %v1093_v40 = vld [vmem:[%s1410_s2 + $0x84] ss:$8 sps:$4 sm:$0xff]   ;;  %v1068_v41 = vld [vmem:[%s1410_s2 + $0x1d4] ss:$8 sps:$4 sm:$0xff]  }
  0x19   : > { %360 = vmatpush1.bf16.msra.mxu0 %v1065_v21  ;;  %v1095_v42 = vld [vmem:[%s1410_s2 + $0x80] ss:$8 sps:$4 sm:$0xff]   ;;  %v1066_v43 = vld [vmem:[%s1410_s2 + $0x1d0] ss:$8 sps:$4 sm:$0xff]   ;;  %v1101_v44 = vld [vmem:[%s1410_s2 + $0x174] ss:$8 sps:$4 sm:$0xff]  }
  0x1a   : > { %486 = vmatpush1.bf16.msra.mxu1 %v1037_v12  ;;  %361 = vmatprep.subr.bf16.mxu0 %v1069_v24  ;;  %v1074_v45 = vld [vmem:[%s1410_s2 + $0x1c4] ss:$8 sps:$4 sm:$0xff]   ;;  %v1072_v46 = vld [vmem:[%s1410_s2 + $0x1c0] ss:$8 sps:$4 sm:$0xff]   ;;  %v1080_v47 = vld [vmem:[%s1410_s2 + $0x1b4] ss:$8 sps:$4 sm:$0xff]  }
  0x1b   : > { %487 = vmatprep.subr.bf16.mxu1 %v1038_v15  ;;  %v1078_v48 = vld [vmem:[%s1410_s2 + $0x1b0] ss:$8 sps:$4 sm:$0xff]   ;;  %v1086_v49 = vld [vmem:[%s1410_s2 + $0x1a4] ss:$8 sps:$4 sm:$0xff]   ;;  %v1084_v50 = vld [vmem:[%s1410_s2 + $0x1a0] ss:$8 sps:$4 sm:$0xff]  }
  0x1c   : > { %v1092_v51 = vld [vmem:[%s1410_s2 + $0x194] ss:$8 sps:$4 sm:$0xff]   ;;  %v1090_v52 = vld [vmem:[%s1410_s2 + $0x190] ss:$8 sps:$4 sm:$0xff]   ;;  %v1098_v53 = vld [vmem:[%s1410_s2 + $0x184] ss:$8 sps:$4 sm:$0xff]  }
  0x1d   : > { %362 = vmatpush1.bf16.msra.mxu0 %v1071_v26  ;;  %v1096_v54 = vld [vmem:[%s1410_s2 + $0x180] ss:$8 sps:$4 sm:$0xff]   ;;  %v227_v55 = vshrl.u32 %v1272_v34, 16  ;;  %v229_v56 = vshll.u32 %v1272_v34, 16  ;;  %vm235_vm3 = vsmask.f32 7424  ;;  %v825_v26 = vlaneseq }
  0x1e   : > { %488 = vmatpush1.bf16.msra.mxu1 %v1040_v16  ;;  %363 = vmatprep.subr.bf16.mxu0 %v1075_v27  ;;  %vm676_vm6 = vsmask.f32 5376  ;;  %vm1338_vm7 = vmand %vm234_vm2, %vm235_vm3  ;;  %v1099_v5 = vld [vmem:[%s1410_s2 + $0x170] ss:$8 sps:$4 sm:$0xff]   ;;  %v1104_v8 = vld [vmem:[%s1410_s2 + $0x164] ss:$8 sps:$4 sm:$0xff]  }
  0x1f   : > { %489 = vmatprep.subr.bf16.mxu1 %v1041_v19  ;;  %v231_v58 = vrot.slane %v229_v56, 1  ;;  %v671_v59 = vrot.slane %v227_v55, 2  ;;  %v672_v60 = vrot.slane %v229_v56, 3  ;;  %vm677_vm10 = vmand %vm523_vm5, %vm676_vm6  ;;  %v1102_v9 = vld [vmem:[%s1410_s2 + $0x160] ss:$8 sps:$4 sm:$0xff]   ;;  %v522_v21 = vrot.slane %v1272_v34, 2 }
  0x20   : > { %v1107_v10 = vld [vmem:[%s1410_s2 + $0x154] ss:$8 sps:$4 sm:$0xff]   ;;  %v1105_v11 = vld [vmem:[%s1410_s2 + $0x150] ss:$8 sps:$4 sm:$0xff]   ;;  %v1110_v12 = vld [vmem:[%s1410_s2 + $0x144] ss:$8 sps:$4 sm:$0xff]  }
  0x21   : > { %364 = vmatpush1.bf16.msra.mxu0 %v1077_v30  ;;  %v232_v63 = vor.u32 %v231_v58, %v227_v55  ;;  %v673_v0 = vor.u32 %v672_v60, %v671_v59  ;;  %v1113_v13 = vld [vmem:[%s1410_s2 + $0x134] ss:$8 sps:$4 sm:$0xff]   ;;  %v1111_v14 = vld [vmem:[%s1410_s2 + $0x130] ss:$8 sps:$4 sm:$0xff]   ;;  %v1116_v15 = vld [vmem:[%s1410_s2 + $0x124] ss:$8 sps:$4 sm:$0xff]  }
  0x22   : > { %490 = vmatpush1.bf16.msra.mxu1 %v1043_v22  ;;  %365 = vmatprep.subr.bf16.mxu0 %v1081_v31  ;;  %v1114_v16 = vld [vmem:[%s1410_s2 + $0x120] ss:$8 sps:$4 sm:$0xff]   ;;  %v1119_v17 = vld [vmem:[%s1410_s2 + $0x114] ss:$8 sps:$4 sm:$0xff]   ;;  %v1117_v18 = vld [vmem:[%s1410_s2 + $0x110] ss:$8 sps:$4 sm:$0xff]  }
  0x23   : > { %491 = vmatprep.subr.bf16.mxu1 %v1044_v23  ;;  %v237_v6 = vsel %vm1338_vm7, %v232_v63, 0  ;;  %v678_v7 = vsel %vm677_vm10, %v673_v0, 0  ;;  %v1122_v19 = vld [vmem:[%s1410_s2 + $0x104] ss:$8 sps:$4 sm:$0xff]   ;;  %v1120_v20 = vld [vmem:[%s1410_s2 + $0x100] ss:$8 sps:$4 sm:$0xff]  }
  0x24   : > { %s1013_s12 = sshll.u32 %s1416_s16, 4 }
  0x25   : > { %366 = vmatpush1.bf16.msra.mxu0 %v1083_v35  ;;  %v823_v35 = vld [vmem:[%s1411_s3] ss:$2 sm:$0x3]  ;;  %s197_s17 = scalar_lea.vmem %s1412_s4, %s1013_s12 }
  0x26   : > { %492 = vmatpush1.bf16.msra.mxu1 %v1046_v25  ;;  %367 = vmatprep.subr.bf16.mxu0 %v1087_v36  ;;  %v1007_v36 = vld [vmem:[%s1411_s3 + $0x1] ss:$2 sm:$0x3] }
  0x27   : > { %493 = vmatprep.subr.bf16.mxu1 %v1047_v28 }
  0x29   : > { %368 = vmatpush1.bf16.msra.mxu0 %v1089_v38 }
  0x2a   : > { %494 = vmatpush1.bf16.msra.mxu1 %v1049_v29  ;;  %369 = vmatprep.subr.bf16.mxu0 %v1093_v40  ;;  %v826_v29 = vshrl.u32 %v825_v26, 7 }
  0x2b   : > { %776 = vmatprep.subr.bf16.mxu1 %v1055_v32 }
  0x2c   : > { %v827_v32 = vsub.s32 0, %v826_v29 }
  0x2d   : > { %512 = vmatmul.mubr.bf16.vlgmr.msra.gmra.mxu1 %v1272_v34  ;;  %370 = vmatpush1.bf16.msra.mxu0 %v1095_v42 }
  0x2e   : > { %777 = vmatpush1.bf16.msra.mxu1 %v1053_v33  ;;  %808 = vmatprep.mubr.bf16.mxu1 %v1131_v2  ;;  %v828_v42 = vrot.slane %v823_v35, %v827_v32 }
  0x2f   : > { %778 = vmatprep.subr.bf16.mxu1 %v1062_v37  ;;  %624 = vmatprep.subr.bf16.mxu0 %v1101_v44  ;;  %v831_v37 = vsub.s32 1, %v826_v29 }
  0x32   : > { %779 = vmatpush1.bf16.msra.mxu1 %v1060_v39 }
  0x33   : > { %780 = vmatprep.subr.bf16.mxu1 %v1068_v41 }
  0x36   : > { %781 = vmatpush1.bf16.msra.mxu1 %v1066_v43  ;;  %v845_v43 = vrot.slane %v1007_v36, %v827_v32 }
  0x37   : > { %782 = vmatprep.subr.bf16.mxu1 %v1074_v45 }
  0x3a   : > { %783 = vmatpush1.bf16.msra.mxu1 %v1072_v46 }
  0x3b   : > { %784 = vmatprep.subr.bf16.mxu1 %v1080_v47 }
  0x3e   : > { %785 = vmatpush1.bf16.msra.mxu1 %v1078_v48  ;;  %v832_v48 = vrot.slane %v823_v35, %v831_v37 }
  0x3f   : > { %786 = vmatprep.subr.bf16.mxu1 %v1086_v49 }
  0x42   : > { %787 = vmatpush1.bf16.msra.mxu1 %v1084_v50  ;;  %v849_v50 = vrot.slane %v1007_v36, %v831_v37 }
  0x43   : > { %788 = vmatprep.subr.bf16.mxu1 %v1092_v51 }
  0x46   : > { %789 = vmatpush1.bf16.msra.mxu1 %v1090_v52 }
  0x47   : > { %790 = vmatprep.subr.bf16.mxu1 %v1098_v53 }
  0x4a   : > { %791 = vmatpush1.bf16.msra.mxu1 %v1096_v54 }
  0x89   : > { %v244_v57 = vpop.permute.xlu0 %243 }
  0x8a   : > { %vm248_vm4 = vcmp.eq.s32.totalorder %v244_v57, 1 }
  0x8b   : > { %vm250_vm8 = vmpackc.low %vm248_vm4, %vm248_vm4 }
  0x8c   : > { %v252_v1 = vsel %vm250_vm8, 65537, %v1131_v2 }
  0x8d   : > { %v247_v62 = vpop.permute.xlu0 %246 }
  0x8e   : > { %vm249_vm9 = vcmp.eq.s32.totalorder %v247_v62, 1 }
  0x8f   : > { %vm251_vm11 = vmpackc.low %vm249_vm9, %vm249_vm9 }
  0x90   : > { %v253_v3 = vsel %vm251_vm11, 65537, %v1131_v2 }
  0x91   : > { %v939_v4 = vcombine.low %v252_v1, %v253_v3 }
  0x93   : > { %vm257_vm12 = vcmp.ne.s16.totalorder %v939_v4, 0 }
  0x94   : > { %956 = vmatmul.mubr.msk.bf16.vlgmr.msra.gmra.mxu0 %vm257_vm12, %v237_v6  ;;  %1006 = vmatmul.mubr.msk.bf16.vlgmr.msra.gmra.mxu1 %vm257_vm12, %v678_v7 }
  0x95   : > { %625 = vmatpush1.bf16.msra.mxu0 %v1099_v5  ;;  %656 = vmatprep.mubr.bf16.mxu0 %v1131_v2  ;;  %v1108_v2 = vld [vmem:[%s1410_s2 + $0x140] ss:$8 sps:$4 sm:$0xff]  }
  0x96   : > { %626 = vmatprep.subr.bf16.mxu0 %v1104_v8 }
  0x99   : > { %627 = vmatpush1.bf16.msra.mxu0 %v1102_v9 }
  0x9a   : > { %628 = vmatprep.subr.bf16.mxu0 %v1107_v10 }
  0x9d   : > { %629 = vmatpush1.bf16.msra.mxu0 %v1105_v11 }
  0x9e   : > { %630 = vmatprep.subr.bf16.mxu0 %v1110_v12 }
  0xa1   : > { %631 = vmatpush1.bf16.msra.mxu0 %v1108_v2 }
  0xa2   : > { %632 = vmatprep.subr.bf16.mxu0 %v1113_v13 }
  0xa5   : > { %633 = vmatpush1.bf16.msra.mxu0 %v1111_v14 }
  0xa6   : > { %634 = vmatprep.subr.bf16.mxu0 %v1116_v15 }
  0xa9   : > { %635 = vmatpush1.bf16.msra.mxu0 %v1114_v16 }
  0xaa   : > { %636 = vmatprep.subr.bf16.mxu0 %v1119_v17 }
  0xad   : > { %637 = vmatpush1.bf16.msra.mxu0 %v1117_v18 }
  0xae   : > { %638 = vmatprep.subr.bf16.mxu0 %v1122_v19 }
  0xb1   : > { %639 = vmatpush1.bf16.msra.mxu0 %v1120_v20 }
  0xb4   : > { %989 = vmatmul.mubr.msk.bf16.vlgmr.msra.gmra.mxu0 %vm523_vm5, %v522_v21 }
  0xed   : > { %v513_v22 = vpop.f32.mrf.mxu1 }
  0xef   : > { %v515_v23 = vpop.f32.mrf.mxu1 }
  0xf1   : > { %v517_v25 = vpop.f32.mrf.mxu1 }
  0xf3   : > { %v519_v28 = vpop.f32.mrf.mxu1 }
 0x154   : > { %v389_v24 = vpop.f32.mrf.mxu0  ;;  %v810_v31 = vpop.f32.mrf.mxu1 }
 0x155   : > { %v514_v34 = vadd.f32 %v513_v22, %v389_v24 }
 0x156   : > { %v391_v27 = vpop.f32.mrf.mxu0  ;;  %v812_v38 = vpop.f32.mrf.mxu1 }
 0x157   : > { %v516_v40 = vadd.f32 %v515_v23, %v391_v27 }
 0x158   : > { %v393_v30 = vpop.f32.mrf.mxu0  ;;  %v814_v49 = vpop.f32.mrf.mxu1 }
 0x159   : > { %v518_v45 = vadd.f32 %v517_v25, %v393_v30 }
 0x15a   : > { %v395_v33 = vpop.f32.mrf.mxu0  ;;  %v816_v61 = vpop.f32.mrf.mxu1 }
 0x15b   : > { %v520_v52 = vadd.f32 %v519_v28, %v395_v33 }
 0x174   : > { %v658_v39 = vpop.f32.mrf.mxu0 }
 0x175   : > { %v667_v41 = vadd.f32 %v658_v39, %v514_v34 }
 0x176   : > { %v660_v44 = vpop.f32.mrf.mxu0 }
 0x177   : > { %v819_v46 = vadd.f32 %v810_v31, %v667_v41  ;;  %v668_v47 = vadd.f32 %v660_v44, %v516_v40 }
 0x178   : > { %v662_v51 = vpop.f32.mrf.mxu0 }
 0x179   : > { %v835_v53 = vmul.f32 %v828_v42, %v819_v46  ;;  %v820_v54 = vadd.f32 %v812_v38, %v668_v47  ;;  %v669_v55 = vadd.f32 %v662_v51, %v518_v45 }
 0x17a   : > { %v664_v56 = vpop.f32.mrf.mxu0 }
 0x17b   : > { %v852_v57 = vadd.f32 %v845_v43, %v835_v53  ;;  %v836_v58 = vmul.f32 %v832_v48, %v820_v54  ;;  %v821_v59 = vadd.f32 %v814_v49, %v669_v55  ;;  %v670_v60 = vadd.f32 %v664_v56, %v520_v52 }
 0x17d   : > { %v853_v62 = vadd.f32 %v849_v50, %v836_v58  ;;  %v837_v63 = vmul.f32 %v828_v42, %v821_v59  ;;  %v822_v0 = vadd.f32 %v816_v61, %v670_v60  ;;  %v856_v1 = vmax.f32 %v852_v57, 0.0 }
 0x17f   : > { %v857_v3 = vmax.f32 %v853_v62, 0.0  ;;  %v854_v4 = vadd.f32 %v845_v43, %v837_v63  ;;  %v838_v5 = vmul.f32 %v832_v48, %v822_v0 }
 0x181   : > { %v1014_v6 = vpack.c.bf16 %v857_v3, %v856_v1  ;;  %v855_v7 = vadd.f32 %v849_v50, %v838_v5  ;;  %v858_v8 = vmax.f32 %v854_v4, 0.0 }
 0x183   : > { %872 = vst [vmem:[%s197_s17] sm:$0xff] %v1014_v6  ;;  %v859_v9 = vmax.f32 %v855_v7, 0.0 }
 0x185   : > { %v1015_v10 = vpack.c.bf16 %v859_v9, %v858_v8 }
 0x187   : > { %873 = vst [vmem:[%s197_s17 + $0x8] sm:$0xff] %v1015_v10 }
 0x188 PF: > { %s14_s15 = sadd.s32 1, %s1129_s15  }
 0x189   : > { %p11_p4 = scmp.ge.s32.totalorder %s14_s15, 4  }
 0x18b   :  { %13 = sbr.rel (!%p11_p4) target bundleno = 1 (0x1), region = 67 }

// kernel: net_forward.42
= control target key start
LH: loop header
LB: loop body
LE: loop exit
PB: predicated region body
PF: predicated region fallthrough
CT: control target
= control target key end

     0   :  { %s1225_s15 = smov 0   ;;  %s1469_s0 = inlined_call_operand.vmem [shape: s32[64,1], index: 0, kind: input, shape index: {}]   ;;  %s1470_s1 = inlined_call_operand.vmem [shape: bf16[2,64,64], index: 1, kind: input, shape index: {}]   ;;  %s1471_s2 = inlined_call_operand.vmem [shape: bf16[256,64], index: 2, kind: input, shape index: {}]   ;;  %s1472_s3 = inlined_call_operand.vmem [shape: f32[2,64], index: 3, kind: input, shape index: {}]   ;;  %s1473_s4 = inlined_call_operand.vmem [shape: bf16[2,64,64], index: 4, kind: output, shape index: {}]  }
   0x1 LB: > { %s985_s16 = sadd.s32 4294967295, %s1197_s15   ;;  %p989_p0 = scmp.ge.s32.totalorder %s1197_s15, 1  ;;  %s1197_s15 = sphi %s1225_s15, %s14_s15  }
   0x2   : > { %p162_p1 = scmp.lt.s32.totalorder %s1197_s15, 3 }
   0x4   : > { %p163_p2 = pnand %p989_p0, %p162_p1 }
   0x5   : > { %p188_p3 = scmp.lt.s32.totalorder (!%p163_p2), %s985_s16, 1 }
   0x6   : > { %166 = sbr.rel (%p163_p2) target bundleno = 387 (0x183), region = 36 }
   0xb   : > { %v211_v0 = vld [vmem:[%s1469_s0 + $0x10] sm:$0xff]  ;;  %v209_v1 = vld [vmem:[%s1469_s0] sm:$0xff]  ;;  %v212_v2 = vld [vmem:[%s1469_s0 + $0x18] sm:$0xff]  ;;  %v1199_v3 = vmov 0   ;;  %vm400_vm4 = vcmask 523264   ;;  %s1481_s16 = smov (!%p188_p3, %s985_s16), 1 }
   0xc   : > { %1166 = vset.pattern.permute.xlu1 %v1199_v3  ;;  %1165 = vset.pattern.permute.xlu0 %v1199_v3  ;;  %vm286_vm0 = vcmp.lt.s32.totalorder %v211_v0, 7  ;;  %vm284_vm1 = vcmp.lt.s32.totalorder %v209_v1, 7  ;;  %vm287_vm2 = vcmp.lt.s32.totalorder %v212_v2, 7  ;;  %v210_v4 = vld [vmem:[%s1469_s0 + $0x8] sm:$0xff]  ;;  %v213_v6 = vld [vmem:[%s1469_s0 + $0x20] sm:$0xff]  ;;  %v216_v9 = vld [vmem:[%s1469_s0 + $0x38] sm:$0xff] }
   0xd   : > { %v214_v5 = vld [vmem:[%s1469_s0 + $0x28] sm:$0xff]  ;;  %v294_v7 = vsel %vm286_vm0, 1, %v1199_v3  ;;  %v292_v8 = vsel %vm284_vm1, 1, %v1199_v3  ;;  %vm285_vm3 = vcmp.lt.s32.totalorder %v210_v4, 7  ;;  %v295_v10 = vsel %vm287_vm2, 1, %v1199_v3  ;;  %v215_v12 = vld [vmem:[%s1469_s0 + $0x30] sm:$0xff] }
   0xe   : > { %307 = vperm.xlu1 %1166, %v294_v7   ;;  %301 = vperm.xlu0 %1165, %v292_v8   ;;  %v293_v11 = vsel %vm285_vm3, 1, %v1199_v3  ;;  %vm289_vm5 = vcmp.lt.s32.totalorder %v214_v5, 7  ;;  %vm288_vm6 = vcmp.lt.s32.totalorder %v213_v6, 7  ;;  %vm291_vm7 = vcmp.lt.s32.totalorder %v216_v9, 7  ;;  %v1167_v13 = vld [vmem:[%s1471_s2 + $0x18] sm:$0xff]   ;;  %v1168_v14 = vld [vmem:[%s1471_s2 + $0x10] sm:$0xff]  }
   0xf   : > { %v297_v15 = vsel %vm289_vm5, 1, %v1199_v3  ;;  %v296_v16 = vsel %vm288_vm6, 1, %v1199_v3  ;;  %1108 = vmatprep.subr.bf16.mxu1 %v1167_v13  ;;  %v1169_v17 = vld [vmem:[%s1471_s2 + $0x8] sm:$0xff]   ;;  %s1050_s13 = sshll.u32 %s1481_s16, 5  ;;  %vm290_vm8 = vcmp.lt.s32.totalorder %v215_v12, 7  ;;  %v1171_v18 = vld [vmem:[%s1471_s2 + $0x38] sm:$0xff]  }
  0x10   : > { %1109 = vmatpush3.bf16.msra.mxu1 %v1167_v13  ;;  %s192_s20 = scalar_lea.vmem %s1470_s1, %s1050_s13  ;;  %v299_v22 = vsel %vm291_vm7, 1, %v1199_v3  ;;  %v298_v25 = vsel %vm290_vm8, 1, %v1199_v3  ;;  %1092 = vmatprep.subr.bf16.mxu0 %v1171_v18  ;;  %v1176_v26 = vld [vmem:[%s1471_s2 + $0x30] sm:$0xff]   ;;  %v1170_v28 = vld [vmem:[%s1471_s2] sm:$0xff]   ;;  %v1178_v29 = vld [vmem:[%s1471_s2 + $0x28] sm:$0xff]   ;;  %vm281_vm2 = vcmask 1047552   ;;  %s1443_s28 = scalar_lea.vmem %s1473_s4, %s1050_s13 }
  0x11   : > { %1110 = vmatprep.subr.bf16.mxu1 %v1168_v14  ;;  %v201_v19 = vld [vmem:[%s192_s20] sm:$0xf]  ;;  %v202_v20 = vld [vmem:[%s192_s20 + $0x4] sm:$0xf]  ;;  %v203_v21 = vld [vmem:[%s192_s20 + $0x8] sm:$0xf]  ;;  %1093 = vmatpush3.bf16.msra.mxu0 %v1171_v18 }
  0x12   : > { %310 = vperm.xlu1 %1166, %v295_v10   ;;  %304 = vperm.xlu0 %1165, %v293_v11   ;;  %v994_v23 = vcombine.low %v201_v19, %v202_v20  ;;  %v1291_v24 = vcombine.low %v202_v20, %v203_v21  ;;  %v204_v27 = vld [vmem:[%s192_s20 + $0xc] sm:$0xf]  ;;  %vm245_vm9 = vsmask.f32 7424  ;;  %v205_v30 = vld [vmem:[%s192_s20 + $0x10] sm:$0xf] }
  0x13   : > { %v206_v31 = vld [vmem:[%s192_s20 + $0x14] sm:$0xf]  ;;  %v207_v32 = vld [vmem:[%s192_s20 + $0x18] sm:$0xf]  ;;  %1094 = vmatprep.subr.bf16.mxu0 %v1176_v26  ;;  %v1307_v34 = vcombine.low %v204_v27, %v205_v30  ;;  %v208_v36 = vld [vmem:[%s192_s20 + $0x1c] sm:$0xf]  ;;  %v995_v39 = vcombine.low %v203_v21, %v204_v27 }
  0x14   : > { %1111 = vmatpush3.bf16.msra.mxu1 %v1168_v14  ;;  %1116 = vmatprep.mubr.msk.bf16.mxu1 %vm400_vm4, %v994_v23  ;;  %v1175_v33 = vld [vmem:[%s1471_s2 + $0x78] sm:$0xff]   ;;  %v1309_v35 = vcombine.low %v206_v31, %v207_v32  ;;  %v247_v37 = vshrl.u32 %v994_v23, 16  ;;  %v249_v38 = vshll.u32 %v994_v23, 16  ;;  %v1185_v43 = vld [vmem:[%s1471_s2 + $0x20] sm:$0xff]   ;;  %v996_v44 = vcombine.low %v205_v30, %v206_v31  ;;  %v1177_v47 = vld [vmem:[%s1471_s2 + $0x70] sm:$0xff]  }
  0x15   : > { %1112 = vmatprep.subr.bf16.mxu1 %v1169_v17  ;;  %1095 = vmatpush3.bf16.msra.mxu0 %v1176_v26  ;;  %v705_v40 = vshll.u32 %v1307_v34, 16  ;;  %v709_v41 = vshrl.u32 %v1307_v34, 16  ;;  %v1317_v45 = vcombine.low %v207_v32, %v208_v36  ;;  %v1319_v46 = vcombine.low %v208_v36, %v208_v36  ;;  %v1327_v52 = vld [vmem:[%s1471_s2 + $0x58] sm:$0xff]   ;;  %v1184_v10 = vld [vmem:[%s1471_s2 + $0x68] sm:$0xff]  }
  0x16   : > { %316 = vperm.xlu1 %1166, %v297_v15   ;;  %313 = vperm.xlu0 %1165, %v296_v16   ;;  %v712_v42 = vshll.u32 %v1309_v35, 16  ;;  %v251_v50 = vrot.slane %v249_v38, 1  ;;  %v254_v51 = vshll.u32 %v995_v39, 16  ;;  %v258_v53 = vshrl.u32 %v995_v39, 16  ;;  %v1186_v16 = vld [vmem:[%s1471_s2 + $0x60] sm:$0xff]  }
  0x17   : > { %1096 = vmatprep.subr.bf16.mxu0 %v1178_v29  ;;  %v707_v48 = vrot.slane %v705_v40, 1  ;;  %v699_v54 = vshrl.u32 %v1291_v24, 16  ;;  %v701_v55 = vshll.u32 %v1291_v24, 16  ;;  %v262_v56 = vshll.u32 %v996_v44, 16 }
  0x18   : > { %1113 = vmatpush3.bf16.msra.mxu1 %v1169_v17  ;;  %v714_v49 = vrot.slane %v712_v42, 1  ;;  %v252_v58 = vor.u32 %v251_v50, %v247_v37  ;;  %v256_v59 = vrot.slane %v254_v51, 1  ;;  %v266_v60 = vshrl.u32 %v996_v44, 16 }
  0x19   : > { %1114 = vmatprep.subr.bf16.mxu1 %v1170_v28  ;;  %v711_v57 = vor.u32 %v709_v41, %v707_v48  ;;  %1097 = vmatpush3.bf16.msra.mxu0 %v1178_v29  ;;  %v703_v61 = vrot.slane %v701_v55, 1  ;;  %v264_v62 = vrot.slane %v262_v56, 1  ;;  %v270_v63 = vshll.u32 %v1317_v45, 16  ;;  %v1189_v55 = vld [vmem:[%s1471_s2 + $0x48] sm:$0xff]  }
  0x1a   : > { %322 = vperm.xlu1 %1166, %v299_v22   ;;  %319 = vperm.xlu0 %1165, %v298_v25   ;;  %v716_v0 = vshrl.u32 %v1309_v35, 16  ;;  %v1338_v2 = vsel %vm245_vm9, %v252_v58, %v256_v59  ;;  %v260_v4 = vor.u32 %v258_v53, %v256_v59  ;;  %v719_v5 = vshll.u32 %v1319_v46, 16  ;;  %v1190_v59 = vld [vmem:[%s1471_s2 + $0x40] sm:$0xff]  }
  0x1b   : > { %1098 = vmatprep.subr.bf16.mxu0 %v1185_v43  ;;  %v1335_v1 = vsel %vm245_vm9, %v711_v57, %v714_v49  ;;  %v704_v6 = vor.u32 %v703_v61, %v699_v54  ;;  %v268_v7 = vor.u32 %v266_v60, %v264_v62  ;;  %v272_v8 = vrot.slane %v270_v63, 1 }
  0x1c   : > { %1115 = vmatpush3.bf16.msra.mxu1 %v1170_v28  ;;  %v718_v9 = vor.u32 %v716_v0, %v714_v49  ;;  %v1346_v11 = vsel %vm245_vm9, %v260_v4, %v264_v62  ;;  %v721_v12 = vrot.slane %v719_v5, 1  ;;  %v274_v23 = vshrl.u32 %v1317_v45, 16 }
  0x1d   : > { %1140 = vmatprep.subr.bf16.mxu1 %v1175_v33  ;;  %1099 = vmatpush3.bf16.msra.mxu0 %v1185_v43  ;;  %v708_v13 = vsel %vm245_vm9, %v704_v6, %v707_v48  ;;  %v1351_v14 = vsel %vm245_vm9, %v268_v7, %v272_v8  ;;  %v723_v31 = vshrl.u32 %v1319_v46, 16  ;;  %vm579_vm8 = vcmask 1043456   ;;  %v1188_v43 = vld [vmem:[%s1471_s2 + $0x50] sm:$0xff]  }
  0x1e   : > { %1124 = vmatprep.subr.bf16.mxu0 %v1327_v52  ;;  %v1354_v15 = vsel %vm245_vm9, %v718_v9, %v721_v12  ;;  %v582_v60 = vsel %vm579_vm8, %v1319_v46, 0 }
  0x1f   : > { %1117 = vmatmul.mubr.msk.bf16.vlgmr.msra.gmra.mxu1 %vm400_vm4, %v995_v39  ;;  %v725_v48 = vor.u32 %v723_v31, %v721_v12 }
  0x20   : > { %1141 = vmatpush3.bf16.msra.mxu1 %v1175_v33  ;;  %1120 = vmatprep.mubr.msk.bf16.mxu1 %vm400_vm4, %v996_v44  ;;  %v276_v44 = vor.u32 %v274_v23, %v272_v8 }
  0x21   : > { %1142 = vmatprep.subr.bf16.mxu1 %v1177_v47 }
  0x24   : > { %1143 = vmatpush3.bf16.msra.mxu1 %v1177_v47 }
  0x25   : > { %1144 = vmatprep.subr.bf16.mxu1 %v1184_v10 }
  0x27   : > { %1121 = vmatmul.mubr.msk.bf16.gmra.mxu1 %vm400_vm4, %v1317_v45 }
  0x28   : > { %1145 = vmatpush3.bf16.msra.mxu1 %v1184_v10 }
  0x29   : > { %1146 = vmatprep.subr.bf16.mxu1 %v1186_v16 }
  0x2c   : > { %1147 = vmatpush3.bf16.msra.mxu1 %v1186_v16 }
  0x89   : > { %v308_v17 = vpop.permute.xlu1 %307  ;;  %v302_v18 = vpop.permute.xlu0 %301 }
  0x8a   : > { %vm326_vm10 = vcmp.eq.s32.totalorder %v308_v17, 1  ;;  %vm324_vm11 = vcmp.eq.s32.totalorder %v302_v18, 1  ;;  %v1430_v18 = vld [vmem:[%s1472_s3] ss:$0 sm:$0xff] }
  0x8b   : > { %vm334_vm12 = vmpackc.low %vm326_vm10, %vm326_vm10  ;;  %vm731_vm10 = vsmask.f32 3328 }
  0x8c   : > { %vm332_vm13 = vmpackc.low %vm324_vm11, %vm324_vm11  ;;  %v342_v21 = vsel %vm334_vm12, 65537, %v1199_v3 }
  0x8d   : > { %v311_v19 = vpop.permute.xlu1 %310  ;;  %v305_v20 = vpop.permute.xlu0 %304  ;;  %v340_v25 = vsel %vm332_vm13, 65537, %v1199_v3  ;;  %vm1385_vm13 = vmand %vm281_vm2, %vm245_vm9 }
  0x8e   : > { %vm327_vm14 = vcmp.eq.s32.totalorder %v311_v19, 1  ;;  %vm325_vm15 = vcmp.eq.s32.totalorder %v305_v20, 1  ;;  %v283_v57 = vsel %vm1385_vm13, %v276_v44, 0 }
  0x8f   : > { %vm335_vm0 = vmpackc.low %vm327_vm14, %vm327_vm14 }
  0x90   : > { %v343_v22 = vsel %vm335_vm0, 65537, %v1199_v3  ;;  %vm333_vm1 = vmpackc.low %vm325_vm15, %vm325_vm15 }
  0x91   : > { %v999_v26 = vcombine.low %v342_v21, %v343_v22  ;;  %v341_v27 = vsel %vm333_vm1, 65537, %v1199_v3  ;;  %v317_v28 = vpop.permute.xlu1 %316  ;;  %v314_v29 = vpop.permute.xlu0 %313  ;;  %vm1393_vm0 = vmand %vm579_vm8, %vm731_vm10 }
  0x92   : > { %vm329_vm3 = vcmp.eq.s32.totalorder %v317_v28, 1  ;;  %vm328_vm5 = vcmp.eq.s32.totalorder %v314_v29, 1  ;;  %v998_v30 = vcombine.low %v340_v25, %v341_v27  ;;  %v1039_v25 = vld [vmem:[%s1472_s3 + $0x1] ss:$0 sm:$0xff] }
  0x93   : > { %vm1367_vm6 = vcmp.ne.s16.totalorder %v999_v26, 0  ;;  %vm337_vm7 = vmpackc.low %vm329_vm3, %vm329_vm3 }
  0x94   : > { %v735_v33 = vsel %vm1367_vm6, %v1335_v1, 0  ;;  %v345_v36 = vsel %vm337_vm7, 65537, %v1199_v3  ;;  %vm336_vm11 = vmpackc.low %vm328_vm5, %vm328_vm5  ;;  %vm360_vm12 = vcmp.ne.s16.totalorder %v998_v30, 0  ;;  %v365_v37 = vsel %vm1367_vm6, %v1346_v11, 0 }
  0x95   : > { %v344_v38 = vsel %vm336_vm11, 65537, %v1199_v3  ;;  %v323_v39 = vpop.permute.xlu1 %322  ;;  %v320_v40 = vpop.permute.xlu0 %319  ;;  %v364_v41 = vsel %vm360_vm12, %v1338_v2, 0  ;;  %v734_v42 = vsel %vm360_vm12, %v708_v13, 0 }
  0x96   : > { %v1000_v47 = vcombine.low %v344_v38, %v345_v36  ;;  %vm331_vm14 = vcmp.eq.s32.totalorder %v323_v39, 1  ;;  %vm330_vm15 = vcmp.eq.s32.totalorder %v320_v40, 1  ;;  %1100 = vmatprep.mubr.msk.bf16.mxu0 %vm400_vm4, %v364_v41  ;;  %1148 = vmatprep.mubr.msk.bf16.mxu1 %vm400_vm4, %v734_v42 }
  0x97   : > { %vm339_vm1 = vmpackc.low %vm331_vm14, %vm331_vm14  ;;  %1101 = vmatmul.mubr.msk.bf16.vlgmr.msra.gmra.mxu0 %vm400_vm4, %v365_v37  ;;  %1149 = vmatmul.mubr.msk.bf16.vlgmr.msra.gmra.mxu1 %vm400_vm4, %v735_v33 }
  0x98   : > { %vm362_vm9 = vcmp.ne.s16.totalorder %v1000_v47, 0  ;;  %v347_v50 = vsel %vm339_vm1, 65537, %v1199_v3  ;;  %vm338_vm2 = vmpackc.low %vm330_vm15, %vm330_vm15  ;;  %1125 = vmatpush3.bf16.msra.mxu0 %v1327_v52 }
  0x99   : > { %v346_v51 = vsel %vm338_vm2, 65537, %v1199_v3  ;;  %v366_v53 = vsel %vm362_vm9, %v1351_v14, 0  ;;  %1126 = vmatprep.subr.bf16.mxu0 %v1188_v43  ;;  %v736_v54 = vsel %vm362_vm9, %v1354_v15, 0  ;;  %v733_v3 = vsel %vm1393_vm0, %v725_v48, 0 }
  0x9a   : > { %v1001_v56 = vcombine.low %v346_v51, %v347_v50  ;;  %1104 = vmatprep.mubr.msk.bf16.mxu0 %vm400_vm4, %v366_v53  ;;  %1152 = vmatprep.mubr.msk.bf16.mxu1 %vm400_vm4, %v736_v54 }
  0x9c   : > { %vm363_vm3 = vcmp.ne.s16.totalorder %v1001_v56, 0  ;;  %1127 = vmatpush3.bf16.msra.mxu0 %v1188_v43 }
  0x9d   : > { %1128 = vmatprep.subr.bf16.mxu0 %v1189_v55  ;;  %v367_v52 = vsel %vm363_vm3, %v283_v57, 0  ;;  %v737_v58 = vsel %vm363_vm3, %v733_v3, 0 }
  0x9f   : > { %1105 = vmatmul.mubr.msk.bf16.gmra.mxu0 %vm400_vm4, %v367_v52  ;;  %1153 = vmatmul.mubr.msk.bf16.gmra.mxu1 %vm400_vm4, %v737_v58 }
  0xa0   : > { %1129 = vmatpush3.bf16.msra.mxu0 %v1189_v55  ;;  %1132 = vmatprep.mubr.msk.bf16.mxu0 %vm400_vm4, %v1291_v24 }
  0xa1   : > { %1130 = vmatprep.subr.bf16.mxu0 %v1190_v59 }
  0xa4   : > { %1131 = vmatpush3.bf16.msra.mxu0 %v1190_v59 }
  0xa7   : > { %1133 = vmatmul.mubr.msk.bf16.vlgmr.msra.gmra.mxu0 %vm400_vm4, %v1307_v34 }
  0xa8   : > { %1136 = vmatprep.mubr.msk.bf16.mxu0 %vm400_vm4, %v1309_v35 }
  0xaf   : > { %1137 = vmatmul.mubr.msk.bf16.gmra.mxu0 %vm400_vm4, %v582_v60  ;;  %vm921_vm4 = vcmask 519168  }
  0xdf   : > { %v1118_v61 = vpop.f32.mrf.mxu1 }
  0xe1   : > { %v544_v62 = vpop.f32.mrf.mxu1 }
  0xe3   : > { %v1119_v63 = vpop.f32.mrf.mxu1 }
  0xe5   : > { %v547_v0 = vpop.f32.mrf.mxu1 }
  0xe7   : > { %v1122_v1 = vpop.f32.mrf.mxu1 }
  0xe9   : > { %v560_v2 = vpop.f32.mrf.mxu1 }
  0xeb   : > { %v1123_v24 = vpop.f32.mrf.mxu1 }
  0xed   : > { %v563_v4 = vpop.f32.mrf.mxu1 }
 0x157   : > { %v1102_v5 = vpop.f32.mrf.mxu0  ;;  %v1150_v7 = vpop.f32.mrf.mxu1 }
 0x158   : > { %v553_v13 = vadd.f32 %v1118_v61, %v1102_v5 }
 0x159   : > { %v447_v6 = vpop.f32.mrf.mxu0  ;;  %v816_v9 = vpop.f32.mrf.mxu1 }
 0x15a   : > { %v545_v16 = vadd.f32 %v544_v62, %v447_v6 }
 0x15b   : > { %v1103_v34 = vpop.f32.mrf.mxu0  ;;  %v1151_v11 = vpop.f32.mrf.mxu1 }
 0x15c   : > { %v556_v20 = vadd.f32 %v1119_v63, %v1103_v34 }
 0x15d   : > { %v450_v8 = vpop.f32.mrf.mxu0  ;;  %v819_v14 = vpop.f32.mrf.mxu1 }
 0x15e   : > { %v548_v27 = vadd.f32 %v547_v0, %v450_v8 }
 0x15f   : > { %v1106_v35 = vpop.f32.mrf.mxu0  ;;  %v1154_v23 = vpop.f32.mrf.mxu1 }
 0x160   : > { %v569_v38 = vadd.f32 %v1122_v1, %v1106_v35 }
 0x161   : > { %v463_v10 = vpop.f32.mrf.mxu0  ;;  %v832_v39 = vpop.f32.mrf.mxu1 }
 0x162   : > { %v561_v45 = vadd.f32 %v560_v2, %v463_v10 }
 0x163   : > { %v1107_v46 = vpop.f32.mrf.mxu0  ;;  %v1155_v55 = vpop.f32.mrf.mxu1 }
 0x164   : > { %v572_v47 = vadd.f32 %v1123_v24, %v1107_v46 }
 0x165   : > { %v466_v12 = vpop.f32.mrf.mxu0  ;;  %v835_v5 = vpop.f32.mrf.mxu1 }
 0x166   : > { %v564_v56 = vadd.f32 %v563_v4, %v466_v12 }
 0x167   : > { %v1134_v15 = vpop.f32.mrf.mxu0 }
 0x168   : > { %v693_v17 = vadd.f32 %v1134_v15, %v553_v13 }
 0x169   : > { %v660_v19 = vpop.f32.mrf.mxu0 }
 0x16a   : > { %v849_v21 = vadd.f32 %v1150_v7, %v693_v17  ;;  %v691_v22 = vadd.f32 %v660_v19, %v545_v16 }
 0x16b   : > { %v1135_v26 = vpop.f32.mrf.mxu0 }
 0x16c   : > { %v862_v28 = vmul.f32 %v1430_v18, %v849_v21  ;;  %v847_v29 = vadd.f32 %v816_v9, %v691_v22  ;;  %v694_v30 = vadd.f32 %v1135_v26, %v556_v20 }
 0x16d   : > { %v663_v31 = vpop.f32.mrf.mxu0 }
 0x16e   : > { %v875_v32 = vadd.f32 %v1039_v25, %v862_v28  ;;  %v860_v33 = vmul.f32 %v1430_v18, %v847_v29  ;;  %v850_v36 = vadd.f32 %v1151_v11, %v694_v30  ;;  %v692_v37 = vadd.f32 %v663_v31, %v548_v27 }
 0x16f   : > { %v1138_v40 = vpop.f32.mrf.mxu0 }
 0x170   : > { %v883_v41 = vmax.f32 %v875_v32, 0.0  ;;  %v873_v42 = vadd.f32 %v1039_v25, %v860_v33  ;;  %v863_v43 = vmul.f32 %v1430_v18, %v850_v36  ;;  %v848_v44 = vadd.f32 %v819_v14, %v692_v37 }
 0x171   : > { %v697_v48 = vadd.f32 %v1138_v40, %v569_v38  ;;  %v676_v49 = vpop.f32.mrf.mxu0 }
 0x172   : > { %v1054_v50 = vpack.c.bf16 %v883_v41, %v883_v41  ;;  %v881_v51 = vmax.f32 %v873_v42, 0.0  ;;  %v876_v53 = vadd.f32 %v1039_v25, %v863_v43  ;;  %v861_v54 = vmul.f32 %v1430_v18, %v848_v44 }
 0x173   : > { %v853_v57 = vadd.f32 %v1154_v23, %v697_v48  ;;  %v695_v3 = vadd.f32 %v676_v49, %v561_v45  ;;  %v1139_v52 = vpop.f32.mrf.mxu0 }
 0x174   : > { %924 = vst.msk [vmem:[%s1443_s28 + $0x8] sm:$0xf] %vm921_vm4, %v1054_v50  ;;  %v1052_v58 = vpack.c.bf16 %v881_v51, %v881_v51  ;;  %v884_v59 = vmax.f32 %v876_v53, 0.0  ;;  %v874_v60 = vadd.f32 %v1039_v25, %v861_v54  ;;  %v698_v61 = vadd.f32 %v1139_v52, %v572_v47 }
 0x175   : > { %v866_v62 = vmul.f32 %v1430_v18, %v853_v57  ;;  %v851_v63 = vadd.f32 %v832_v39, %v695_v3  ;;  %v679_v0 = vpop.f32.mrf.mxu0 }
 0x176   : > { %922 = vst.msk [vmem:[%s1443_s28] sm:$0xf] %vm921_vm4, %v1052_v58  ;;  %v1055_v1 = vpack.c.bf16 %v884_v59, %v884_v59  ;;  %v882_v2 = vmax.f32 %v874_v60, 0.0  ;;  %v854_v24 = vadd.f32 %v1155_v55, %v698_v61  ;;  %v696_v4 = vadd.f32 %v679_v0, %v564_v56 }
 0x177   : > { %v879_v6 = vadd.f32 %v1039_v25, %v866_v62  ;;  %v864_v7 = vmul.f32 %v1430_v18, %v851_v63 }
 0x178   : > { %925 = vst.msk [vmem:[%s1443_s28 + $0xc] sm:$0xf] %vm921_vm4, %v1055_v1  ;;  %v1053_v34 = vpack.c.bf16 %v882_v2, %v882_v2  ;;  %v867_v8 = vmul.f32 %v1430_v18, %v854_v24  ;;  %v852_v9 = vadd.f32 %v835_v5, %v696_v4 }
 0x179   : > { %v887_v35 = vmax.f32 %v879_v6, 0.0  ;;  %v877_v10 = vadd.f32 %v1039_v25, %v864_v7 }
 0x17a   : > { %923 = vst.msk [vmem:[%s1443_s28 + $0x4] sm:$0xf] %vm921_vm4, %v1053_v34  ;;  %v880_v11 = vadd.f32 %v1039_v25, %v867_v8  ;;  %v865_v46 = vmul.f32 %v1430_v18, %v852_v9 }
 0x17b   : > { %v1058_v12 = vpack.c.bf16 %v887_v35, %v887_v35  ;;  %v885_v13 = vmax.f32 %v877_v10, 0.0 }
 0x17c   : > { %v888_v14 = vmax.f32 %v880_v11, 0.0  ;;  %v878_v15 = vadd.f32 %v1039_v25, %v865_v46 }
 0x17d   : > { %928 = vst.msk [vmem:[%s1443_s28 + $0x18] sm:$0xf] %vm921_vm4, %v1058_v12  ;;  %v1056_v16 = vpack.c.bf16 %v885_v13, %v885_v13 }
 0x17e   : > { %v1059_v17 = vpack.c.bf16 %v888_v14, %v888_v14  ;;  %v886_v19 = vmax.f32 %v878_v15, 0.0 }
 0x17f   : > { %926 = vst.msk [vmem:[%s1443_s28 + $0x10] sm:$0xf] %vm921_vm4, %v1056_v16 }
 0x180   : > { %929 = vst.msk [vmem:[%s1443_s28 + $0x1c] sm:$0xf] %vm921_vm4, %v1059_v17  ;;  %v1057_v20 = vpack.c.bf16 %v886_v19, %v886_v19 }
 0x182   : > { %927 = vst.msk [vmem:[%s1443_s28 + $0x14] sm:$0xf] %vm921_vm4, %v1057_v20 }
 0x183 PF: > { %s14_s15 = sadd.s32 1, %s1197_s15  }
 0x184   : > { %p11_p4 = scmp.ge.s32.totalorder %s14_s15, 4  }
 0x186   :  { %13 = sbr.rel (!%p11_p4) target bundleno = 1 (0x1), region = 66 }

// kernel: net_forward.32
= control target key start
LH: loop header
LB: loop body
LE: loop exit
PB: predicated region body
PF: predicated region fallthrough
CT: control target
= control target key end

     0   :  { %s1694_s15 = smov 0   ;;  %s2031_s0 = inlined_call_operand.vmem [shape: s32[16,1], index: 0, kind: input, shape index: {}]   ;;  %s2032_s1 = inlined_call_operand.vmem [shape: bf16[2,16,128], index: 1, kind: input, shape index: {}]   ;;  %s2033_s2 = inlined_call_operand.vmem [shape: bf16[1536,128], index: 2, kind: input, shape index: {}]   ;;  %s2034_s3 = inlined_call_operand.vmem [shape: f32[6,128], index: 3, kind: input, shape index: {}]   ;;  %s2035_s4 = inlined_call_operand.vmem [shape: bf16[2,16,128], index: 4, kind: output, shape index: {}]  }
   0x1 LB: > { %s1247_s16 = sadd.s32 4294967295, %s1664_s15   ;;  %p1251_p0 = scmp.ge.s32.totalorder %s1664_s15, 1  ;;  %s1664_s15 = sphi %s1694_s15, %s14_s15  }
   0x2   : > { %p162_p1 = scmp.lt.s32.totalorder %s1664_s15, 3 }
   0x4   : > { %p163_p2 = pnand %p1251_p0, %p162_p1 }
   0x5   : > { %p188_p3 = scmp.lt.s32.totalorder (!%p163_p2), %s1247_s16, 1 }
   0x6   : > { %166 = sbr.rel (%p163_p2) target bundleno = 931 (0x3a3), region = 36 }
   0xb   : > { %v1592_v0 = vld [vmem:[%s2033_s2 + $0x78] sm:$0xff]   ;;  %v1666_v1 = vmov 0.0   ;;  %v1594_v3 = vld [vmem:[%s2033_s2 + $0x70] sm:$0xff]   ;;  %vm1667_vm0 = vmmov 0   ;;  %v1596_v5 = vld [vmem:[%s2033_s2 + $0x68] sm:$0xff]   ;;  %s2037_s16 = smov (!%p188_p3, %s1247_s16), 1 }
   0xc   : > { %1419 = vmatprep.subr.bf16.mxu0 %v1666_v1  ;;  %1439 = vmatprep.subr.bf16.mxu1 %v1666_v1  ;;  %v1593_v2 = vld [vmem:[%s2033_s2 + $0x38] sm:$0xff]   ;;  %v1595_v4 = vld [vmem:[%s2033_s2 + $0x30] sm:$0xff]   ;;  %v1597_v6 = vld [vmem:[%s2033_s2 + $0x28] sm:$0xff]   ;;  %v1668_v7 = vmov 0   ;;  %s1338_s7 = sshll.u32 %s2037_s16, 3  ;;  %vm217_vm1 = vcmask 1041408  }
   0xd   : > { %1420 = vmatpush3.bf16.msra.mxu0 %v1592_v0  ;;  %1435 = vmatprep.mubr.msk.bf16.mxu0 %vm1667_vm0, %v1666_v1  ;;  %v1598_v8 = vld [vmem:[%s2033_s2 + $0x60] sm:$0xff]   ;;  %v1600_v10 = vld [vmem:[%s2033_s2 + $0x58] sm:$0xff]   ;;  %s192_s14 = scalar_lea.vmem %s2032_s1, %s1338_s7  ;;  %v1602_v12 = vld [vmem:[%s2033_s2 + $0x50] sm:$0xff]   ;;  %vm434_vm7 = vcmask 1045504   ;;  %vm562_vm12 = vcmask 1040384   ;;  %s197_s28 = scalar_lea.vmem %s2035_s4, %s1338_s7 }
   0xe   : > { %1440 = vmatpush3.bf16.msra.mxu1 %v1593_v2  ;;  %1421 = vmatprep.subr.bf16.mxu0 %v1666_v1  ;;  %v1599_v9 = vld [vmem:[%s2033_s2 + $0x20] sm:$0xff]   ;;  %v1601_v11 = vld [vmem:[%s2033_s2 + $0x18] sm:$0xff]   ;;  %v1603_v14 = vld [vmem:[%s2033_s2 + $0x10] sm:$0xff]   ;;  %vm563_vm13 = vsmask.f32 256 }
   0xf   : > { %1441 = vmatprep.subr.bf16.mxu1 %v1666_v1  ;;  %1455 = vmatprep.mubr.msk.bf16.mxu1 %vm1667_vm0, %v1666_v1  ;;  %v1759_v13 = vld [vmem:[%s192_s14] sm:$0xff]   ;;  %v1604_v15 = vld [vmem:[%s2033_s2 + $0x48] sm:$0xff]   ;;  %vm1273_vm6 = vmneg %vm217_vm1 }
  0x10   : > { %1590 = vset.pattern.permute.xlu0 %v1668_v7  ;;  %1591 = vset.pattern.permute.xlu1 %v1668_v7  ;;  %v1605_v16 = vld [vmem:[%s2033_s2 + $0x8] sm:$0xff]   ;;  %v1606_v17 = vld [vmem:[%s2033_s2 + $0x40] sm:$0xff]   ;;  %v216_v20 = vrot.slane %v1759_v13, 6  ;;  %v1609_v26 = vld [vmem:[%s2033_s2 + $0xb8] sm:$0xff]   ;;  %v433_v34 = vrot.slane %v1759_v13, 2 }
  0x11   : > { %1422 = vmatpush3.bf16.msra.mxu0 %v1594_v3  ;;  %v203_v18 = vld [vmem:[%s2031_s0] sm:$0xff]  ;;  %v204_v21 = vld [vmem:[%s2031_s0 + $0x8] sm:$0xff]  ;;  %v1610_v27 = vld [vmem:[%s2033_s2 + $0xb0] sm:$0xff]  }
  0x12   : > { %1442 = vmatpush3.bf16.msra.mxu1 %v1595_v4  ;;  %1423 = vmatprep.subr.bf16.mxu0 %v1666_v1  ;;  %v1607_v19 = vld [vmem:[%s2033_s2] sm:$0xff]   ;;  %vm566_vm2 = vcmp.ge.s32.totalorder %v203_v18, 1  ;;  %vm804_vm3 = vcmp.lt.s32.totalorder %v203_v18, 3  ;;  %vm567_vm4 = vcmp.ge.s32.totalorder %v204_v21, 1  ;;  %vm805_vm5 = vcmp.lt.s32.totalorder %v204_v21, 3  ;;  %v1611_v28 = vld [vmem:[%s2033_s2 + $0xa8] sm:$0xff]   ;;  %vm564_vm14 = vmand %vm562_vm12, %vm563_vm13 }
  0x13   : > { %1443 = vmatprep.subr.bf16.mxu1 %v1666_v1  ;;  %v568_v22 = vsel %vm566_vm2, 1, %v1668_v7  ;;  %v806_v23 = vsel %vm804_vm3, 1, %v1668_v7  ;;  %v569_v24 = vsel %vm567_vm4, 1, %v1668_v7  ;;  %v807_v25 = vsel %vm805_vm5, 1, %v1668_v7  ;;  %v1612_v29 = vld [vmem:[%s2033_s2 + $0xa0] sm:$0xff]   ;;  %v1613_v30 = vld [vmem:[%s2033_s2 + $0x98] sm:$0xff]  }
  0x14   : > { %571 = vperm.xlu0 %1590, %v568_v22   ;;  %809 = vperm.xlu1 %1591, %v806_v23   ;;  %v1614_v31 = vld [vmem:[%s2033_s2 + $0x90] sm:$0xff]   ;;  %v1615_v32 = vld [vmem:[%s2033_s2 + $0x88] sm:$0xff]   ;;  %v1616_v33 = vld [vmem:[%s2033_s2 + $0x80] sm:$0xff]   ;;  %vm800_vm5 = vcmask 1047552  }
  0x15   : > { %1424 = vmatpush3.bf16.msra.mxu0 %v1596_v5  ;;  %v1617_v35 = vld [vmem:[%s2033_s2 + $0x138] sm:$0xff]   ;;  %v1618_v37 = vld [vmem:[%s2033_s2 + $0x130] sm:$0xff]   ;;  %v1619_v39 = vld [vmem:[%s2033_s2 + $0x128] sm:$0xff]  }
  0x16   : > { %1444 = vmatpush3.bf16.msra.mxu1 %v1597_v6  ;;  %1425 = vmatprep.subr.bf16.mxu0 %v1666_v1  ;;  %v1620_v36 = vld [vmem:[%s2033_s2 + $0xf8] sm:$0xff]   ;;  %v1622_v38 = vld [vmem:[%s2033_s2 + $0xf0] sm:$0xff]   ;;  %v1624_v40 = vld [vmem:[%s2033_s2 + $0xe8] sm:$0xff]  }
  0x17   : > { %1445 = vmatprep.subr.bf16.mxu1 %v1666_v1  ;;  %v1621_v41 = vld [vmem:[%s2033_s2 + $0x120] sm:$0xff]   ;;  %v1623_v42 = vld [vmem:[%s2033_s2 + $0x118] sm:$0xff]   ;;  %v1625_v43 = vld [vmem:[%s2033_s2 + $0x110] sm:$0xff]  }
  0x18   : > { %574 = vperm.xlu0 %1590, %v569_v24   ;;  %812 = vperm.xlu1 %1591, %v807_v25   ;;  %v1626_v44 = vld [vmem:[%s2033_s2 + $0xe0] sm:$0xff]   ;;  %v1627_v45 = vld [vmem:[%s2033_s2 + $0x108] sm:$0xff]   ;;  %v1628_v46 = vld [vmem:[%s2033_s2 + $0xd8] sm:$0xff]  }
  0x19   : > { %1426 = vmatpush3.bf16.msra.mxu0 %v1598_v8  ;;  %v1629_v47 = vld [vmem:[%s2033_s2 + $0x100] sm:$0xff]   ;;  %v1630_v48 = vld [vmem:[%s2033_s2 + $0xd0] sm:$0xff]   ;;  %v1631_v49 = vld [vmem:[%s2033_s2 + $0xc8] sm:$0xff]  }
  0x1a   : > { %1446 = vmatpush3.bf16.msra.mxu1 %v1599_v9  ;;  %1427 = vmatprep.subr.bf16.mxu0 %v1666_v1  ;;  %v1633_v50 = vld [vmem:[%s2033_s2 + $0xc0] sm:$0xff]   ;;  %v1635_v23 = vld [vmem:[%s2033_s2 + $0x168] sm:$0xff]  }
  0x1b   : > { %1447 = vmatprep.subr.bf16.mxu1 %v1666_v1  ;;  %v1284_v0 = vld [vmem:[%s2034_s3] ss:$0 sm:$0xff] }
  0x1c   : > { %v1636_v25 = vld [vmem:[%s2033_s2 + $0x160] sm:$0xff]  }
  0x1d   : > { %1428 = vmatpush3.bf16.msra.mxu0 %v1600_v10 }
  0x1e   : > { %1448 = vmatpush3.bf16.msra.mxu1 %v1601_v11  ;;  %1429 = vmatprep.subr.bf16.mxu0 %v1666_v1 }
  0x1f   : > { %1449 = vmatprep.subr.bf16.mxu1 %v1666_v1 }
  0x21   : > { %1430 = vmatpush3.bf16.msra.mxu0 %v1602_v12 }
  0x22   : > { %1450 = vmatpush3.bf16.msra.mxu1 %v1603_v14  ;;  %1431 = vmatprep.subr.bf16.mxu0 %v1666_v1 }
  0x23   : > { %1451 = vmatprep.subr.bf16.mxu1 %v1666_v1 }
  0x25   : > { %1432 = vmatpush3.bf16.msra.mxu0 %v1604_v15  ;;  %v1632_v15 = vld [vmem:[%s2033_s2 + $0x178] sm:$0xff]  }
  0x26   : > { %1452 = vmatpush3.bf16.msra.mxu1 %v1605_v16  ;;  %1433 = vmatprep.subr.bf16.mxu0 %v1666_v1 }
  0x27   : > { %1453 = vmatprep.subr.bf16.mxu1 %v1666_v1 }
  0x29   : > { %1434 = vmatpush3.bf16.msra.mxu0 %v1606_v17 }
  0x2a   : > { %1454 = vmatpush3.bf16.msra.mxu1 %v1607_v19  ;;  %1459 = vmatprep.subr.bf16.mxu0 %v1666_v1  ;;  %v1634_v19 = vld [vmem:[%s2033_s2 + $0x170] sm:$0xff]  }
  0x2b   : > { %1479 = vmatprep.subr.bf16.mxu1 %v1666_v1 }
  0x2c   : > { %1436 = vmatmul.mubr.bf16.vlgmr.msra.gmra.mxu0 %v1759_v13 }
  0x2d   : > { %1456 = vmatmul.mubr.msk.bf16.vlgmr.msra.gmra.mxu1 %vm1273_vm6, %v216_v20  ;;  %1460 = vmatpush3.bf16.msra.mxu0 %v1609_v26  ;;  %vm801_vm6 = vsmask.f32 7424 }
  0x2e   : > { %1461 = vmatprep.subr.bf16.mxu0 %v1666_v1  ;;  %1475 = vmatprep.mubr.msk.bf16.mxu0 %vm1667_vm0, %v1666_v1 }
  0x2f   : > { %1495 = vmatprep.mubr.msk.bf16.mxu1 %vm1667_vm0, %v1666_v1  ;;  %1480 = vmatpush3.bf16.msra.mxu1 %v1617_v35 }
  0x30   : > { %1481 = vmatprep.subr.bf16.mxu1 %v1666_v1 }
  0x31   : > { %1462 = vmatpush3.bf16.msra.mxu0 %v1610_v27  ;;  %v1637_v27 = vld [vmem:[%s2033_s2 + $0x158] sm:$0xff]  }
  0x32   : > { %1463 = vmatprep.subr.bf16.mxu0 %v1666_v1 }
  0x33   : > { %1482 = vmatpush3.bf16.msra.mxu1 %v1618_v37 }
  0x34   : > { %1483 = vmatprep.subr.bf16.mxu1 %v1666_v1 }
  0x35   : > { %1464 = vmatpush3.bf16.msra.mxu0 %v1611_v28 }
  0x36   : > { %1465 = vmatprep.subr.bf16.mxu0 %v1666_v1 }
  0x37   : > { %1484 = vmatpush3.bf16.msra.mxu1 %v1619_v39  ;;  %v1643_v39 = vld [vmem:[%s2033_s2 + $0x1e8] sm:$0xff]  }
  0x38   : > { %1485 = vmatprep.subr.bf16.mxu1 %v1666_v1 }
  0x39   : > { %1466 = vmatpush3.bf16.msra.mxu0 %v1612_v29  ;;  %v1638_v29 = vld [vmem:[%s2033_s2 + $0x150] sm:$0xff]  }
  0x3a   : > { %1467 = vmatprep.subr.bf16.mxu0 %v1666_v1 }
  0x3b   : > { %1486 = vmatpush3.bf16.msra.mxu1 %v1621_v41  ;;  %v1645_v41 = vld [vmem:[%s2033_s2 + $0x1d8] sm:$0xff]  }
  0x3c   : > { %1487 = vmatprep.subr.bf16.mxu1 %v1666_v1 }
  0x3d   : > { %1468 = vmatpush3.bf16.msra.mxu0 %v1613_v30  ;;  %v1639_v30 = vld [vmem:[%s2033_s2 + $0x148] sm:$0xff]  }
  0x3e   : > { %1469 = vmatprep.subr.bf16.mxu0 %v1666_v1 }
  0x3f   : > { %1488 = vmatpush3.bf16.msra.mxu1 %v1623_v42  ;;  %v1646_v42 = vld [vmem:[%s2033_s2 + $0x1d0] sm:$0xff]  }
  0x40   : > { %1489 = vmatprep.subr.bf16.mxu1 %v1666_v1 }
  0x41   : > { %1470 = vmatpush3.bf16.msra.mxu0 %v1614_v31 }
  0x42   : > { %1471 = vmatprep.subr.bf16.mxu0 %v1666_v1 }
  0x43   : > { %1490 = vmatpush3.bf16.msra.mxu1 %v1625_v43  ;;  %v1647_v43 = vld [vmem:[%s2033_s2 + $0x1c8] sm:$0xff]  }
  0x44   : > { %1491 = vmatprep.subr.bf16.mxu1 %v1666_v1 }
  0x45   : > { %1472 = vmatpush3.bf16.msra.mxu0 %v1615_v32 }
  0x46   : > { %1473 = vmatprep.subr.bf16.mxu0 %v1666_v1 }
  0x47   : > { %1492 = vmatpush3.bf16.msra.mxu1 %v1627_v45  ;;  %v1649_v45 = vld [vmem:[%s2033_s2 + $0x2b8] sm:$0xff]  }
  0x48   : > { %1493 = vmatprep.subr.bf16.mxu1 %v1666_v1 }
  0x49   : > { %1474 = vmatpush3.bf16.msra.mxu0 %v1616_v33 }
  0x4a   : > { %1499 = vmatprep.subr.bf16.mxu0 %v1666_v1 }
  0x4b   : > { %1494 = vmatpush3.bf16.msra.mxu1 %v1629_v47  ;;  %v1651_v47 = vld [vmem:[%s2033_s2 + $0x2a8] sm:$0xff]  }
  0x4c   : > { %1476 = vmatmul.mubr.msk.bf16.vlgmr.msra.gmra.mxu0 %vm434_vm7, %v433_v34  ;;  %1519 = vmatprep.subr.bf16.mxu1 %v1666_v1  ;;  %v1640_v34 = vld [vmem:[%s2033_s2 + $0x140] sm:$0xff]   ;;  %vm802_vm7 = vmand %vm800_vm5, %vm801_vm6 }
  0x4d   : > { %1515 = vmatprep.mubr.msk.bf16.mxu0 %vm1667_vm0, %v1666_v1  ;;  %1500 = vmatpush3.bf16.msra.mxu0 %v1620_v36 }
  0x4e   : > { %1501 = vmatprep.subr.bf16.mxu0 %v1666_v1 }
  0x51   : > { %1502 = vmatpush3.bf16.msra.mxu0 %v1622_v38  ;;  %v1642_v38 = vld [vmem:[%s2033_s2 + $0x1f0] sm:$0xff]  }
  0x52   : > { %1503 = vmatprep.subr.bf16.mxu0 %v1666_v1 }
  0x55   : > { %1504 = vmatpush3.bf16.msra.mxu0 %v1624_v40  ;;  %v1644_v40 = vld [vmem:[%s2033_s2 + $0x1e0] sm:$0xff]  }
  0x56   : > { %1505 = vmatprep.subr.bf16.mxu0 %v1666_v1 }
  0x59   : > { %1506 = vmatpush3.bf16.msra.mxu0 %v1626_v44  ;;  %v1648_v44 = vld [vmem:[%s2033_s2 + $0x1c0] sm:$0xff]  }
  0x5a   : > { %1507 = vmatprep.subr.bf16.mxu0 %v1666_v1 }
  0x5d   : > { %1508 = vmatpush3.bf16.msra.mxu0 %v1628_v46  ;;  %v1650_v46 = vld [vmem:[%s2033_s2 + $0x2b0] sm:$0xff]  }
  0x5e   : > { %1509 = vmatprep.subr.bf16.mxu0 %v1666_v1 }
  0x61   : > { %1510 = vmatpush3.bf16.msra.mxu0 %v1630_v48  ;;  %v1652_v48 = vld [vmem:[%s2033_s2 + $0x2a0] sm:$0xff]  }
  0x62   : > { %1511 = vmatprep.subr.bf16.mxu0 %v1666_v1 }
  0x65   : > { %1512 = vmatpush3.bf16.msra.mxu0 %v1631_v49  ;;  %v1653_v49 = vld [vmem:[%s2033_s2 + $0x298] sm:$0xff]  }
  0x66   : > { %1513 = vmatprep.subr.bf16.mxu0 %v1666_v1 }
  0x69   : > { %1514 = vmatpush3.bf16.msra.mxu0 %v1633_v50 }
  0x6a   : > { %1539 = vmatprep.subr.bf16.mxu0 %v1666_v1 }
  0x8f   : > { %v572_v59 = vpop.permute.xlu0 %571  ;;  %v810_v26 = vpop.permute.xlu1 %809 }
  0x90   : > { %vm576_vm8 = vcmp.eq.s32.totalorder %v572_v59, 1  ;;  %vm814_vm1 = vcmp.eq.s32.totalorder %v810_v26, 1  ;;  %v1313_v59 = vld [vmem:[%s2034_s3 + $0x1] ss:$0 sm:$0xff] }
  0x91   : > { %vm578_vm10 = vmpackc.low %vm576_vm8, %vm576_vm8 }
  0x92   : > { %v580_v12 = vsel %vm578_vm10, 65537, %v1668_v7  ;;  %vm816_vm3 = vmpackc.low %vm814_vm1, %vm814_vm1 }
  0x93   : > { %v575_v63 = vpop.permute.xlu0 %574  ;;  %v813_v28 = vpop.permute.xlu1 %812  ;;  %v818_v32 = vsel %vm816_vm3, 65537, %v1668_v7 }
  0x94   : > { %vm577_vm9 = vcmp.eq.s32.totalorder %v575_v63, 1  ;;  %vm815_vm2 = vcmp.eq.s32.totalorder %v813_v28, 1 }
  0x95   : > { %vm579_vm11 = vmpackc.low %vm577_vm9, %vm577_vm9 }
  0x96   : > { %v581_v14 = vsel %vm579_vm11, 65537, %v1668_v7  ;;  %vm817_vm4 = vmpackc.low %vm815_vm2, %vm815_vm2 }
  0x97   : > { %v1285_v18 = vcombine.low %v580_v12, %v581_v14  ;;  %v819_v33 = vsel %vm817_vm4, 65537, %v1668_v7  ;;  %v1641_v7 = vld [vmem:[%s2033_s2 + $0x1f8] sm:$0xff]   ;;  %v1654_v14 = vld [vmem:[%s2033_s2 + $0x290] sm:$0xff]  }
  0x98   : > { %v1303_v35 = vcombine.low %v818_v32, %v819_v33 }
  0x99   : > { %vm585_vm15 = vcmp.ne.s16.totalorder %v1285_v18, 0 }
  0x9a   : > { %vm823_vm8 = vcmp.ne.s16.totalorder %v1303_v35, 0 }
  0xec   : > { %v337_v51 = vpop.f32.mrf.mxu0 }
  0xed   : > { %v426_v52 = vpop.f32.mrf.mxu1 }
  0xee   : > { %v1437_v53 = vpop.f32.mrf.mxu0  ;;  %v427_v60 = vadd.f32 %v426_v52, %v337_v51 }
  0xef   : > { %v1457_v54 = vpop.f32.mrf.mxu1 }
  0xf0   : > { %v340_v55 = vpop.f32.mrf.mxu0 }
  0xf1   : > { %v429_v56 = vpop.f32.mrf.mxu1 }
  0xf2   : > { %v1438_v57 = vpop.f32.mrf.mxu0  ;;  %v430_v3 = vadd.f32 %v429_v56, %v340_v55 }
  0xf3   : > { %v1458_v58 = vpop.f32.mrf.mxu1 }
 0x10c   : > { %v536_v61 = vpop.f32.mrf.mxu0 }
 0x10d   : > { %v543_v62 = vadd.f32 %v536_v61, %v427_v60 }
 0x10e   : > { %v1477_v2 = vpop.f32.mrf.mxu0 }
 0x10f   : > { %v549_v5 = vadd.f32 %v1284_v0, %v543_v62  ;;  %v1314_v2 = vld [vmem:[%s2034_s3 + $0x2] ss:$0 sm:$0xff] }
 0x110   : > { %v539_v4 = vpop.f32.mrf.mxu0 }
 0x111   : > { %v544_v6 = vadd.f32 %v539_v4, %v430_v3  ;;  %v551_v10 = vmax.f32 %v549_v5, 0.0 }
 0x112   : > { %v1478_v8 = vpop.f32.mrf.mxu0 }
 0x113   : > { %v550_v9 = vadd.f32 %v1284_v0, %v544_v6 }
 0x115   : > { %v552_v11 = vmax.f32 %v550_v9, 0.0 }
 0x117   : > { %v553_v16 = vpack.c.bf16 %v552_v11, %v551_v10 }
 0x119   : > { %v555_v17 = vshrl.u32 %v553_v16, 16  ;;  %1496 = vmatmul.mubr.bf16.vlgmr.msra.gmra.mxu1 %v553_v16  ;;  %v558_v20 = vshll.u32 %v553_v16, 16  ;;  %v1656_v16 = vld [vmem:[%s2033_s2 + $0x280] sm:$0xff]  }
 0x11a   : > { %1520 = vmatpush3.bf16.msra.mxu1 %v1632_v15  ;;  %1535 = vmatprep.mubr.msk.bf16.mxu1 %vm1667_vm0, %v1666_v1  ;;  %v1655_v15 = vld [vmem:[%s2033_s2 + $0x288] sm:$0xff]  }
 0x11b   : > { %1521 = vmatprep.subr.bf16.mxu1 %v1666_v1  ;;  %v557_v21 = vrot.slane %v555_v17, 7  ;;  %v797_v31 = vrot.slane %v558_v20, 1 }
 0x11d   : > { %v560_v22 = vor.u32 %v558_v20, %v557_v21  ;;  %v798_v36 = vor.u32 %v797_v31, %v555_v17  ;;  %v1315_v17 = vld [vmem:[%s2034_s3 + $0x3] ss:$0 sm:$0xff]  ;;  %v1176_v31 = vunpack.c.l.bf16 %v1759_v13 }
 0x11e   : > { %1522 = vmatpush3.bf16.msra.mxu1 %v1634_v19 }
 0x11f   : > { %v565_v24 = vsel %vm564_vm14, 0, %v560_v22  ;;  %1523 = vmatprep.subr.bf16.mxu1 %v1666_v1  ;;  %v803_v37 = vsel %vm802_vm7, %v798_v36, 0 }
 0x120   : > { %1516 = vmatmul.mubr.msk.bf16.vlgmr.msra.gmra.mxu0 %vm585_vm15, %v565_v24 }
 0x121   : > { %1555 = vmatprep.mubr.msk.bf16.mxu0 %vm1667_vm0, %v1666_v1  ;;  %1540 = vmatpush3.bf16.msra.mxu0 %v1641_v7 }
 0x122   : > { %1524 = vmatpush3.bf16.msra.mxu1 %v1635_v23  ;;  %1541 = vmatprep.subr.bf16.mxu0 %v1666_v1 }
 0x123   : > { %1525 = vmatprep.subr.bf16.mxu1 %v1666_v1 }
 0x125   : > { %1542 = vmatpush3.bf16.msra.mxu0 %v1642_v38 }
 0x126   : > { %1526 = vmatpush3.bf16.msra.mxu1 %v1636_v25  ;;  %1543 = vmatprep.subr.bf16.mxu0 %v1666_v1 }
 0x127   : > { %1527 = vmatprep.subr.bf16.mxu1 %v1666_v1 }
 0x129   : > { %1544 = vmatpush3.bf16.msra.mxu0 %v1643_v39 }
 0x12a   : > { %1528 = vmatpush3.bf16.msra.mxu1 %v1637_v27  ;;  %1545 = vmatprep.subr.bf16.mxu0 %v1666_v1  ;;  %v1333_v27 = vld [vmem:[%s2034_s3 + $0x5] ss:$0 sm:$0xff] }
 0x12b   : > { %1529 = vmatprep.subr.bf16.mxu1 %v1666_v1 }
 0x12d   : > { %1546 = vmatpush3.bf16.msra.mxu0 %v1644_v40 }
 0x12e   : > { %1530 = vmatpush3.bf16.msra.mxu1 %v1638_v29  ;;  %1547 = vmatprep.subr.bf16.mxu0 %v1666_v1 }
 0x12f   : > { %1531 = vmatprep.subr.bf16.mxu1 %v1666_v1 }
 0x131   : > { %1548 = vmatpush3.bf16.msra.mxu0 %v1645_v41 }
 0x132   : > { %1532 = vmatpush3.bf16.msra.mxu1 %v1639_v30  ;;  %1549 = vmatprep.subr.bf16.mxu0 %v1666_v1 }
 0x133   : > { %1533 = vmatprep.subr.bf16.mxu1 %v1666_v1 }
 0x135   : > { %1550 = vmatpush3.bf16.msra.mxu0 %v1646_v42 }
 0x136   : > { %1534 = vmatpush3.bf16.msra.mxu1 %v1640_v34  ;;  %1551 = vmatprep.subr.bf16.mxu0 %v1666_v1  ;;  %v1177_v34 = vunpack.c.h.bf16 %v1759_v13 }
 0x137   : > { %1559 = vmatprep.subr.bf16.mxu1 %v1666_v1 }
 0x139   : > { %1536 = vmatmul.mubr.msk.bf16.vlgmr.msra.gmra.mxu1 %vm823_vm8, %v803_v37  ;;  %1552 = vmatpush3.bf16.msra.mxu0 %v1647_v43 }
 0x13a   : > { %1575 = vmatprep.mubr.msk.bf16.mxu1 %vm1667_vm0, %v1666_v1  ;;  %1553 = vmatprep.subr.bf16.mxu0 %v1666_v1 }
 0x13b   : > { %1560 = vmatpush3.bf16.msra.mxu1 %v1649_v45 }
 0x13c   : > { %1561 = vmatprep.subr.bf16.mxu1 %v1666_v1 }
 0x13d   : > { %1554 = vmatpush3.bf16.msra.mxu0 %v1648_v44 }
 0x13f   : > { %1562 = vmatpush3.bf16.msra.mxu1 %v1650_v46 }
 0x140   : > { %1563 = vmatprep.subr.bf16.mxu1 %v1666_v1 }
 0x143   : > { %1564 = vmatpush3.bf16.msra.mxu1 %v1651_v47 }
 0x144   : > { %1565 = vmatprep.subr.bf16.mxu1 %v1666_v1 }
 0x147   : > { %1566 = vmatpush3.bf16.msra.mxu1 %v1652_v48 }
 0x148   : > { %1567 = vmatprep.subr.bf16.mxu1 %v1666_v1 }
 0x14b   : > { %1568 = vmatpush3.bf16.msra.mxu1 %v1653_v49 }
 0x14c   : > { %1569 = vmatprep.subr.bf16.mxu1 %v1666_v1 }
 0x14f   : > { %1570 = vmatpush3.bf16.msra.mxu1 %v1654_v14 }
 0x150   : > { %1571 = vmatprep.subr.bf16.mxu1 %v1666_v1 }
 0x153   : > { %1572 = vmatpush3.bf16.msra.mxu1 %v1655_v15 }
 0x154   : > { %1573 = vmatprep.subr.bf16.mxu1 %v1666_v1  ;;  %v1332_v1 = vld [vmem:[%s2034_s3 + $0x4] ss:$0 sm:$0xff] }
 0x157   : > { %1574 = vmatpush3.bf16.msra.mxu1 %v1656_v16 }
 0x1d9   : > { %v701_v50 = vpop.f32.mrf.mxu1 }
 0x1db   : > { %v1497_v51 = vpop.f32.mrf.mxu1 }
 0x1dd   : > { %v704_v52 = vpop.f32.mrf.mxu1 }
 0x1df   : > { %v1498_v53 = vpop.f32.mrf.mxu1 }
 0x1e0   : > { %v790_v54 = vpop.f32.mrf.mxu0 }
 0x1e1   : > { %v791_v58 = vadd.f32 %v790_v54, %v701_v50 }
 0x1e2   : > { %v1517_v55 = vpop.f32.mrf.mxu0 }
 0x1e4   : > { %v793_v56 = vpop.f32.mrf.mxu0 }
 0x1e5   : > { %v794_v63 = vadd.f32 %v793_v56, %v704_v52 }
 0x1e6   : > { %v1518_v57 = vpop.f32.mrf.mxu0 }
 0x1f9   : > { %v923_v60 = vpop.f32.mrf.mxu1 }
 0x1fa   : > { %v930_v61 = vadd.f32 %v923_v60, %v791_v58 }
 0x1fb   : > { %v1537_v62 = vpop.f32.mrf.mxu1 }
 0x1fc   : > { %v936_v0 = vmul.f32 %v1313_v59, %v930_v61 }
 0x1fd   : > { %v926_v3 = vpop.f32.mrf.mxu1 }
 0x1fe   : > { %v931_v4 = vadd.f32 %v926_v3, %v794_v63  ;;  %v942_v6 = vadd.f32 %v1314_v2, %v936_v0 }
 0x1ff   : > { %v1538_v5 = vpop.f32.mrf.mxu1 }
 0x200   : > { %v937_v8 = vmul.f32 %v1313_v59, %v931_v4  ;;  %v944_v10 = vmax.f32 %v942_v6, 0.0 }
 0x202   : > { %v943_v9 = vadd.f32 %v1314_v2, %v937_v8 }
 0x204   : > { %v945_v11 = vmax.f32 %v943_v9, 0.0 }
 0x206   : > { %v946_v12 = vpack.c.bf16 %v945_v11, %v944_v10 }
 0x208   : > { %1556 = vmatmul.mubr.bf16.vlgmr.msra.gmra.mxu0 %v946_v12 }
 0x2c8   : > { %v1049_v18 = vpop.f32.mrf.mxu0 }
 0x2c9   : > { %v1050_v20 = vadd.f32 %v1315_v17, %v1049_v18 }
 0x2ca   : > { %v1557_v19 = vpop.f32.mrf.mxu0 }
 0x2cb   : > { %v1056_v24 = vmax.f32 %v1050_v20, 0.0 }
 0x2cc   : > { %v1052_v21 = vpop.f32.mrf.mxu0 }
 0x2cd   : > { %v1053_v22 = vadd.f32 %v1315_v17, %v1052_v21 }
 0x2ce   : > { %v1558_v23 = vpop.f32.mrf.mxu0 }
 0x2cf   : > { %v1057_v25 = vmax.f32 %v1053_v22, 0.0 }
 0x2d1   : > { %v1058_v26 = vpack.c.bf16 %v1057_v25, %v1056_v24 }
 0x2d3   : > { %1576 = vmatmul.mubr.bf16.vlgmr.msra.gmra.mxu1 %v1058_v26 }
 0x393   : > { %v1157_v28 = vpop.f32.mrf.mxu1 }
 0x394   : > { %v1168_v29 = vmul.f32 %v1332_v1, %v1157_v28 }
 0x395   : > { %v1577_v30 = vpop.f32.mrf.mxu1 }
 0x396   : > { %v1174_v32 = vadd.f32 %v1333_v27, %v1168_v29 }
 0x397   : > { %v1160_v33 = vpop.f32.mrf.mxu1 }
 0x398   : > { %v1169_v35 = vmul.f32 %v1332_v1, %v1160_v33  ;;  %v1178_v37 = vadd.f32 %v1176_v31, %v1174_v32 }
 0x399   : > { %v1578_v36 = vpop.f32.mrf.mxu1 }
 0x39a   : > { %v1175_v7 = vadd.f32 %v1333_v27, %v1169_v35  ;;  %v1180_v39 = vmax.f32 %v1178_v37, 0.0 }
 0x39c   : > { %v1179_v38 = vadd.f32 %v1177_v34, %v1175_v7 }
 0x39e   : > { %v1181_v40 = vmax.f32 %v1179_v38, 0.0 }
 0x3a0   : > { %v1345_v41 = vpack.c.bf16 %v1181_v40, %v1180_v39 }
 0x3a2   : > { %1346 = vst [vmem:[%s197_s28] sm:$0xff] %v1345_v41  }
 0x3a3 PF: > { %s14_s15 = sadd.s32 1, %s1664_s15  }
 0x3a4   : > { %p11_p4 = scmp.ge.s32.totalorder %s14_s15, 4  }
 0x3a6   :  { %13 = sbr.rel (!%p11_p4) target bundleno = 1 (0x1), region = 66 }

// kernel: net_forward.31
= control target key start
LH: loop header
LB: loop body
LE: loop exit
PB: predicated region body
PF: predicated region fallthrough
CT: control target
= control target key end

     0   :  { %s2369_s15 = smov 0   ;;  %s2859_s0 = inlined_call_operand.vmem [shape: s32[16,1], index: 0, kind: input, shape index: {}]   ;;  %s2860_s1 = inlined_call_operand.vmem [shape: bf16[2,16,128], index: 1, kind: input, shape index: {}]   ;;  %s2861_s2 = inlined_call_operand.vmem [shape: bf16[1536,128], index: 2, kind: input, shape index: {}]   ;;  %s2862_s3 = inlined_call_operand.vmem [shape: f32[6,128], index: 3, kind: input, shape index: {}]   ;;  %s2863_s4 = inlined_call_operand.vmem [shape: bf16[2,16,128], index: 4, kind: output, shape index: {}]  }
   0x1 LB: > { %s1734_s16 = sadd.s32 4294967295, %s2339_s15   ;;  %p1738_p0 = scmp.ge.s32.totalorder %s2339_s15, 1  ;;  %s2339_s15 = sphi %s2369_s15, %s14_s15  }
   0x2   : > { %p162_p1 = scmp.lt.s32.totalorder %s2339_s15, 3 }
   0x4   : > { %p163_p2 = pnand %p1738_p0, %p162_p1 }
   0x5   : > { %p188_p3 = scmp.lt.s32.totalorder (!%p163_p2), %s1734_s16, 1 }
   0x6   : > { %166 = sbr.rel (%p163_p2) target bundleno = 999 (0x3e7), region = 36 }
   0xb   : > { %v2234_v0 = vld [vmem:[%s2861_s2 + $0x78] sm:$0xff]   ;;  %v2341_v1 = vmov 0.0   ;;  %v2236_v3 = vld [vmem:[%s2861_s2 + $0x70] sm:$0xff]   ;;  %vm2342_vm0 = vmmov 0   ;;  %v2238_v5 = vld [vmem:[%s2861_s2 + $0x68] sm:$0xff]   ;;  %v2343_v7 = vmov 0  }
   0xc   : > { %1981 = vmatprep.subr.bf16.mxu0 %v2341_v1  ;;  %2001 = vmatprep.subr.bf16.mxu1 %v2341_v1  ;;  %v2235_v2 = vld [vmem:[%s2861_s2 + $0x38] sm:$0xff]   ;;  %v2237_v4 = vld [vmem:[%s2861_s2 + $0x30] sm:$0xff]   ;;  %v2239_v6 = vld [vmem:[%s2861_s2 + $0x28] sm:$0xff]   ;;  %s2865_s16 = smov (!%p188_p3, %s1734_s16), 1  ;;  %vm217_vm1 = vcmask 1041408   ;;  %vm434_vm11 = vcmask 1045504  }
   0xd   : > { %1982 = vmatpush3.bf16.msra.mxu0 %v2234_v0  ;;  %1997 = vmatprep.mubr.msk.bf16.mxu0 %vm2342_vm0, %v2341_v1  ;;  %v2240_v8 = vld [vmem:[%s2861_s2 + $0x60] sm:$0xff]   ;;  %s1864_s7 = sshll.u32 %s2865_s16, 3  ;;  %v2242_v10 = vld [vmem:[%s2861_s2 + $0x58] sm:$0xff]   ;;  %v2244_v12 = vld [vmem:[%s2861_s2 + $0x50] sm:$0xff]  }
   0xe   : > { %2002 = vmatpush3.bf16.msra.mxu1 %v2235_v2  ;;  %1983 = vmatprep.subr.bf16.mxu0 %v2341_v1  ;;  %v2241_v9 = vld [vmem:[%s2861_s2 + $0x20] sm:$0xff]   ;;  %v2243_v11 = vld [vmem:[%s2861_s2 + $0x18] sm:$0xff]   ;;  %s2431_s14 = scalar_lea.vmem %s2860_s1, %s1864_s7  ;;  %v2245_v13 = vld [vmem:[%s2861_s2 + $0x10] sm:$0xff]   ;;  %s197_s5 = scalar_lea.vmem %s2863_s4, %s1864_s7 }
   0xf   : > { %2003 = vmatprep.subr.bf16.mxu1 %v2341_v1  ;;  %2017 = vmatprep.mubr.msk.bf16.mxu1 %vm2342_vm0, %v2341_v1  ;;  %v2441_v14 = vld [vmem:[%s2431_s14] sm:$0xff]   ;;  %v2246_v15 = vld [vmem:[%s2861_s2 + $0x48] sm:$0xff]   ;;  %v2251_v26 = vld [vmem:[%s2861_s2 + $0xb8] sm:$0xff]  }
  0x10   : > { %2232 = vset.pattern.permute.xlu0 %v2343_v7  ;;  %2233 = vset.pattern.permute.xlu1 %v2343_v7  ;;  %v2247_v16 = vld [vmem:[%s2861_s2 + $0x8] sm:$0xff]   ;;  %v2248_v17 = vld [vmem:[%s2861_s2 + $0x40] sm:$0xff]   ;;  %v433_v23 = vrot.slane %v2441_v14, 2  ;;  %v216_v24 = vrot.slane %v2441_v14, 6  ;;  %vm1760_vm10 = vmneg %vm217_vm1  ;;  %vm562_vm1 = vcmask 1040384  }
  0x11   : > { %1984 = vmatpush3.bf16.msra.mxu0 %v2236_v3  ;;  %v203_v18 = vld [vmem:[%s2859_s0] sm:$0xff]  ;;  %v204_v20 = vld [vmem:[%s2859_s0 + $0x8] sm:$0xff]  ;;  %v2252_v32 = vld [vmem:[%s2861_s2 + $0xb0] sm:$0xff]  }
  0x12   : > { %2004 = vmatpush3.bf16.msra.mxu1 %v2237_v4  ;;  %1985 = vmatprep.subr.bf16.mxu0 %v2341_v1  ;;  %v2249_v19 = vld [vmem:[%s2861_s2] sm:$0xff]   ;;  %vm566_vm2 = vcmp.ge.s32.totalorder %v203_v18, 1  ;;  %vm804_vm3 = vcmp.lt.s32.totalorder %v203_v18, 3  ;;  %vm1287_vm4 = vcmp.ge.s32.totalorder %v203_v18, 2  ;;  %vm1523_vm5 = vcmp.lt.s32.totalorder %v203_v18, 2  ;;  %v2253_v33 = vld [vmem:[%s2861_s2 + $0xa8] sm:$0xff]  }
  0x13   : > { %2005 = vmatprep.subr.bf16.mxu1 %v2341_v1  ;;  %v568_v21 = vsel %vm566_vm2, 1, %v2343_v7  ;;  %vm567_vm6 = vcmp.ge.s32.totalorder %v204_v20, 1  ;;  %v806_v22 = vsel %vm804_vm3, 1, %v2343_v7  ;;  %vm805_vm7 = vcmp.lt.s32.totalorder %v204_v20, 3  ;;  %v2254_v34 = vld [vmem:[%s2861_s2 + $0xa0] sm:$0xff]   ;;  %v2255_v35 = vld [vmem:[%s2861_s2 + $0x98] sm:$0xff]  }
  0x14   : > { %v569_v25 = vsel %vm567_vm6, 1, %v2343_v7  ;;  %vm1288_vm8 = vcmp.ge.s32.totalorder %v204_v20, 2  ;;  %571 = vperm.xlu0 %2232, %v568_v21   ;;  %v807_v27 = vsel %vm805_vm7, 1, %v2343_v7  ;;  %v1289_v29 = vsel %vm1287_vm4, 1, %v2343_v7  ;;  %809 = vperm.xlu1 %2233, %v806_v22   ;;  %v2256_v36 = vld [vmem:[%s2861_s2 + $0x90] sm:$0xff]   ;;  %v2257_v37 = vld [vmem:[%s2861_s2 + $0x88] sm:$0xff]  }
  0x15   : > { %1986 = vmatpush3.bf16.msra.mxu0 %v2238_v5  ;;  %v1290_v28 = vsel %vm1288_vm8, 1, %v2343_v7  ;;  %vm1524_vm9 = vcmp.lt.s32.totalorder %v204_v20, 2  ;;  %v1525_v31 = vsel %vm1523_vm5, 1, %v2343_v7  ;;  %v2258_v38 = vld [vmem:[%s2861_s2 + $0x80] sm:$0xff]   ;;  %v2259_v39 = vld [vmem:[%s2861_s2 + $0x138] sm:$0xff]   ;;  %v2260_v41 = vld [vmem:[%s2861_s2 + $0x130] sm:$0xff]  }
  0x16   : > { %2006 = vmatpush3.bf16.msra.mxu1 %v2239_v6  ;;  %1987 = vmatprep.subr.bf16.mxu0 %v2341_v1  ;;  %v1526_v30 = vsel %vm1524_vm9, 1, %v2343_v7  ;;  %v2262_v40 = vld [vmem:[%s2861_s2 + $0xf8] sm:$0xff]   ;;  %v2264_v42 = vld [vmem:[%s2861_s2 + $0xf0] sm:$0xff]   ;;  %v2261_v43 = vld [vmem:[%s2861_s2 + $0x128] sm:$0xff]   ;;  %vm563_vm2 = vsmask.f32 256 }
  0x17   : > { %2007 = vmatprep.subr.bf16.mxu1 %v2341_v1  ;;  %v2266_v44 = vld [vmem:[%s2861_s2 + $0xe8] sm:$0xff]   ;;  %v2263_v45 = vld [vmem:[%s2861_s2 + $0x120] sm:$0xff]   ;;  %v2265_v46 = vld [vmem:[%s2861_s2 + $0x118] sm:$0xff]   ;;  %vm800_vm9 = vcmask 1047552  }
  0x18   : > { %574 = vperm.xlu0 %2232, %v569_v25   ;;  %812 = vperm.xlu1 %2233, %v807_v27   ;;  %v2267_v47 = vld [vmem:[%s2861_s2 + $0x110] sm:$0xff]   ;;  %v2268_v48 = vld [vmem:[%s2861_s2 + $0xe0] sm:$0xff]   ;;  %v2269_v49 = vld [vmem:[%s2861_s2 + $0x108] sm:$0xff]  }
  0x19   : > { %1988 = vmatpush3.bf16.msra.mxu0 %v2240_v8  ;;  %v2270_v50 = vld [vmem:[%s2861_s2 + $0xd8] sm:$0xff]   ;;  %v2271_v51 = vld [vmem:[%s2861_s2 + $0x100] sm:$0xff]   ;;  %v2272_v52 = vld [vmem:[%s2861_s2 + $0xd0] sm:$0xff]  }
  0x1a   : > { %2008 = vmatpush3.bf16.msra.mxu1 %v2241_v9  ;;  %1989 = vmatprep.subr.bf16.mxu0 %v2341_v1  ;;  %v2273_v53 = vld [vmem:[%s2861_s2 + $0xc8] sm:$0xff]   ;;  %v2275_v54 = vld [vmem:[%s2861_s2 + $0xc0] sm:$0xff]   ;;  %v2274_v18 = vld [vmem:[%s2861_s2 + $0x178] sm:$0xff]  }
  0x1b   : > { %2009 = vmatprep.subr.bf16.mxu1 %v2341_v1  ;;  %v1771_v5 = vld [vmem:[%s2862_s3] ss:$0 sm:$0xff]  ;;  %v2276_v22 = vld [vmem:[%s2861_s2 + $0x170] sm:$0xff]   ;;  %vm564_vm3 = vmand %vm562_vm1, %vm563_vm2 }
  0x1c   : > { %1292 = vperm.xlu0 %2232, %v1289_v29   ;;  %1295 = vperm.xlu1 %2233, %v1290_v28   ;;  %v2278_v28 = vld [vmem:[%s2861_s2 + $0x160] sm:$0xff]  }
  0x1d   : > { %1990 = vmatpush3.bf16.msra.mxu0 %v2242_v10 }
  0x1e   : > { %2010 = vmatpush3.bf16.msra.mxu1 %v2243_v11  ;;  %1991 = vmatprep.subr.bf16.mxu0 %v2341_v1 }
  0x1f   : > { %2011 = vmatprep.subr.bf16.mxu1 %v2341_v1 }
  0x20   : > { %1528 = vperm.xlu0 %2232, %v1525_v31   ;;  %1531 = vperm.xlu1 %2233, %v1526_v30   ;;  %v2279_v30 = vld [vmem:[%s2861_s2 + $0x158] sm:$0xff]  }
  0x21   : > { %1992 = vmatpush3.bf16.msra.mxu0 %v2244_v12 }
  0x22   : > { %2012 = vmatpush3.bf16.msra.mxu1 %v2245_v13  ;;  %1993 = vmatprep.subr.bf16.mxu0 %v2341_v1 }
  0x23   : > { %2013 = vmatprep.subr.bf16.mxu1 %v2341_v1 }
  0x25   : > { %1994 = vmatpush3.bf16.msra.mxu0 %v2246_v15 }
  0x26   : > { %2014 = vmatpush3.bf16.msra.mxu1 %v2247_v16  ;;  %1995 = vmatprep.subr.bf16.mxu0 %v2341_v1 }
  0x27   : > { %2015 = vmatprep.subr.bf16.mxu1 %v2341_v1 }
  0x29   : > { %1996 = vmatpush3.bf16.msra.mxu0 %v2248_v17 }
  0x2a   : > { %2016 = vmatpush3.bf16.msra.mxu1 %v2249_v19  ;;  %2021 = vmatprep.subr.bf16.mxu0 %v2341_v1 }
  0x2b   : > { %2041 = vmatprep.subr.bf16.mxu1 %v2341_v1 }
  0x2c   : > { %1998 = vmatmul.mubr.bf16.vlgmr.msra.gmra.mxu0 %v2441_v14 }
  0x2d   : > { %2018 = vmatmul.mubr.msk.bf16.vlgmr.msra.gmra.mxu1 %vm1760_vm10, %v216_v24  ;;  %2022 = vmatpush3.bf16.msra.mxu0 %v2251_v26  ;;  %v2277_v26 = vld [vmem:[%s2861_s2 + $0x168] sm:$0xff]   ;;  %vm801_vm10 = vsmask.f32 7424 }
  0x2e   : > { %2023 = vmatprep.subr.bf16.mxu0 %v2341_v1  ;;  %2037 = vmatprep.mubr.msk.bf16.mxu0 %vm2342_vm0, %v2341_v1 }
  0x2f   : > { %2057 = vmatprep.mubr.msk.bf16.mxu1 %vm2342_vm0, %v2341_v1  ;;  %2042 = vmatpush3.bf16.msra.mxu1 %v2259_v39 }
  0x30   : > { %2043 = vmatprep.subr.bf16.mxu1 %v2341_v1 }
  0x31   : > { %2024 = vmatpush3.bf16.msra.mxu0 %v2252_v32  ;;  %v2280_v32 = vld [vmem:[%s2861_s2 + $0x150] sm:$0xff]  }
  0x32   : > { %2025 = vmatprep.subr.bf16.mxu0 %v2341_v1 }
  0x33   : > { %2044 = vmatpush3.bf16.msra.mxu1 %v2260_v41  ;;  %v2283_v41 = vld [vmem:[%s2861_s2 + $0x1f8] sm:$0xff]  }
  0x34   : > { %2045 = vmatprep.subr.bf16.mxu1 %v2341_v1 }
  0x35   : > { %2026 = vmatpush3.bf16.msra.mxu0 %v2253_v33  ;;  %v2281_v33 = vld [vmem:[%s2861_s2 + $0x148] sm:$0xff]  }
  0x36   : > { %2027 = vmatprep.subr.bf16.mxu0 %v2341_v1 }
  0x37   : > { %2046 = vmatpush3.bf16.msra.mxu1 %v2261_v43  ;;  %v2285_v43 = vld [vmem:[%s2861_s2 + $0x1f0] sm:$0xff]  }
  0x38   : > { %2047 = vmatprep.subr.bf16.mxu1 %v2341_v1 }
  0x39   : > { %2028 = vmatpush3.bf16.msra.mxu0 %v2254_v34 }
  0x3a   : > { %2029 = vmatprep.subr.bf16.mxu0 %v2341_v1 }
  0x3b   : > { %2048 = vmatpush3.bf16.msra.mxu1 %v2263_v45  ;;  %v2287_v45 = vld [vmem:[%s2861_s2 + $0x1e8] sm:$0xff]  }
  0x3c   : > { %2049 = vmatprep.subr.bf16.mxu1 %v2341_v1 }
  0x3d   : > { %2030 = vmatpush3.bf16.msra.mxu0 %v2255_v35 }
  0x3e   : > { %2031 = vmatprep.subr.bf16.mxu0 %v2341_v1 }
  0x3f   : > { %2050 = vmatpush3.bf16.msra.mxu1 %v2265_v46  ;;  %v2288_v46 = vld [vmem:[%s2861_s2 + $0x1a8] sm:$0xff]  }
  0x40   : > { %2051 = vmatprep.subr.bf16.mxu1 %v2341_v1 }
  0x41   : > { %2032 = vmatpush3.bf16.msra.mxu0 %v2256_v36 }
  0x42   : > { %2033 = vmatprep.subr.bf16.mxu0 %v2341_v1 }
  0x43   : > { %2052 = vmatpush3.bf16.msra.mxu1 %v2267_v47  ;;  %v2289_v47 = vld [vmem:[%s2861_s2 + $0x1e0] sm:$0xff]  }
  0x44   : > { %2053 = vmatprep.subr.bf16.mxu1 %v2341_v1 }
  0x45   : > { %2034 = vmatpush3.bf16.msra.mxu0 %v2257_v37  ;;  %v2282_v37 = vld [vmem:[%s2861_s2 + $0x140] sm:$0xff]  }
  0x46   : > { %2035 = vmatprep.subr.bf16.mxu0 %v2341_v1 }
  0x47   : > { %2054 = vmatpush3.bf16.msra.mxu1 %v2269_v49  ;;  %v2291_v49 = vld [vmem:[%s2861_s2 + $0x1d8] sm:$0xff]  }
  0x48   : > { %2055 = vmatprep.subr.bf16.mxu1 %v2341_v1 }
  0x49   : > { %2036 = vmatpush3.bf16.msra.mxu0 %v2258_v38 }
  0x4a   : > { %2061 = vmatprep.subr.bf16.mxu0 %v2341_v1 }
  0x4b   : > { %2056 = vmatpush3.bf16.msra.mxu1 %v2271_v51  ;;  %v2293_v51 = vld [vmem:[%s2861_s2 + $0x1d0] sm:$0xff]  }
  0x4c   : > { %2038 = vmatmul.mubr.msk.bf16.vlgmr.msra.gmra.mxu0 %vm434_vm11, %v433_v23  ;;  %2081 = vmatprep.subr.bf16.mxu1 %v2341_v1  ;;  %vm802_vm11 = vmand %vm800_vm9, %vm801_vm10 }
  0x4d   : > { %2077 = vmatprep.mubr.msk.bf16.mxu0 %vm2342_vm0, %v2341_v1  ;;  %2062 = vmatpush3.bf16.msra.mxu0 %v2262_v40 }
  0x4e   : > { %2063 = vmatprep.subr.bf16.mxu0 %v2341_v1 }
  0x51   : > { %2064 = vmatpush3.bf16.msra.mxu0 %v2264_v42  ;;  %v2284_v42 = vld [vmem:[%s2861_s2 + $0x1b8] sm:$0xff]  }
  0x52   : > { %2065 = vmatprep.subr.bf16.mxu0 %v2341_v1 }
  0x55   : > { %2066 = vmatpush3.bf16.msra.mxu0 %v2266_v44  ;;  %v2286_v44 = vld [vmem:[%s2861_s2 + $0x1b0] sm:$0xff]  }
  0x56   : > { %2067 = vmatprep.subr.bf16.mxu0 %v2341_v1 }
  0x59   : > { %2068 = vmatpush3.bf16.msra.mxu0 %v2268_v48  ;;  %v2290_v48 = vld [vmem:[%s2861_s2 + $0x1a0] sm:$0xff]  }
  0x5a   : > { %2069 = vmatprep.subr.bf16.mxu0 %v2341_v1 }
  0x5d   : > { %2070 = vmatpush3.bf16.msra.mxu0 %v2270_v50  ;;  %v2292_v50 = vld [vmem:[%s2861_s2 + $0x198] sm:$0xff]  }
  0x5e   : > { %2071 = vmatprep.subr.bf16.mxu0 %v2341_v1 }
  0x61   : > { %2072 = vmatpush3.bf16.msra.mxu0 %v2272_v52  ;;  %v2294_v52 = vld [vmem:[%s2861_s2 + $0x190] sm:$0xff]  }
  0x62   : > { %2073 = vmatprep.subr.bf16.mxu0 %v2341_v1 }
  0x65   : > { %2074 = vmatpush3.bf16.msra.mxu0 %v2273_v53  ;;  %v2295_v53 = vld [vmem:[%s2861_s2 + $0x1c8] sm:$0xff]  }
  0x66   : > { %2075 = vmatprep.subr.bf16.mxu0 %v2341_v1 }
  0x69   : > { %2076 = vmatpush3.bf16.msra.mxu0 %v2275_v54  ;;  %v2296_v54 = vld [vmem:[%s2861_s2 + $0x188] sm:$0xff]  }
  0x6a   : > { %2101 = vmatprep.subr.bf16.mxu0 %v2341_v1 }
  0x8f   : > { %v572_v63 = vpop.permute.xlu0 %571  ;;  %v810_v29 = vpop.permute.xlu1 %809 }
  0x90   : > { %vm576_vm12 = vcmp.eq.s32.totalorder %v572_v63, 1  ;;  %vm814_vm5 = vcmp.eq.s32.totalorder %v810_v29, 1  ;;  %v2307_v29 = vld [vmem:[%s2861_s2 + $0x2b8] sm:$0xff]  }
  0x91   : > { %vm578_vm14 = vmpackc.low %vm576_vm12, %vm576_vm12 }
  0x92   : > { %v580_v16 = vsel %vm578_vm14, 65537, %v2343_v7  ;;  %vm816_vm7 = vmpackc.low %vm814_vm5, %vm814_vm5 }
  0x93   : > { %v575_v4 = vpop.permute.xlu0 %574  ;;  %v813_v31 = vpop.permute.xlu1 %812  ;;  %v818_v35 = vsel %vm816_vm7, 65537, %v2343_v7 }
  0x94   : > { %vm577_vm13 = vcmp.eq.s32.totalorder %v575_v4, 1  ;;  %vm815_vm6 = vcmp.eq.s32.totalorder %v813_v31, 1  ;;  %v2308_v31 = vld [vmem:[%s2861_s2 + $0x2b0] sm:$0xff]  }
  0x95   : > { %vm579_vm15 = vmpackc.low %vm577_vm13, %vm577_vm13  ;;  %vm949_vm13 = vcmask 1043456  }
  0x96   : > { %v581_v17 = vsel %vm579_vm15, 65537, %v2343_v7  ;;  %vm817_vm8 = vmpackc.low %vm815_vm6, %vm815_vm6 }
  0x97   : > { %v1772_v21 = vcombine.low %v580_v16, %v581_v17  ;;  %v819_v36 = vsel %vm817_vm8, 65537, %v2343_v7  ;;  %vm1818_vm14 = vmneg %vm949_vm13  ;;  %vm1519_vm8 = vcmask 1046528  }
  0x98   : > { %v1790_v38 = vcombine.low %v818_v35, %v819_v36  ;;  %v2312_v35 = vld [vmem:[%s2861_s2 + $0x2a0] sm:$0xff]  }
  0x99   : > { %vm585_vm4 = vcmp.ne.s16.totalorder %v1772_v21, 0  ;;  %v2315_v36 = vld [vmem:[%s2861_s2 + $0x260] sm:$0xff]  }
  0x9a   : > { %vm823_vm12 = vcmp.ne.s16.totalorder %v1790_v38, 0  ;;  %v2316_v38 = vld [vmem:[%s2861_s2 + $0x290] sm:$0xff]  }
  0xec   : > { %v337_v55 = vpop.f32.mrf.mxu0 }
  0xed   : > { %v426_v56 = vpop.f32.mrf.mxu1 }
  0xee   : > { %v1999_v57 = vpop.f32.mrf.mxu0  ;;  %v427_v0 = vadd.f32 %v426_v56, %v337_v55  ;;  %v2297_v55 = vld [vmem:[%s2861_s2 + $0x1c0] sm:$0xff]  }
  0xef   : > { %v2019_v58 = vpop.f32.mrf.mxu1  ;;  %v2298_v56 = vld [vmem:[%s2861_s2 + $0x180] sm:$0xff]  }
  0xf0   : > { %v340_v59 = vpop.f32.mrf.mxu0 }
  0xf1   : > { %v429_v60 = vpop.f32.mrf.mxu1 }
  0xf2   : > { %v2000_v61 = vpop.f32.mrf.mxu0  ;;  %v430_v8 = vadd.f32 %v429_v60, %v340_v59 }
  0xf3   : > { %v2020_v62 = vpop.f32.mrf.mxu1 }
 0x10c   : > { %v536_v2 = vpop.f32.mrf.mxu0 }
 0x10d   : > { %v543_v3 = vadd.f32 %v536_v2, %v427_v0 }
 0x10e   : > { %v2039_v6 = vpop.f32.mrf.mxu0 }
 0x10f   : > { %v549_v10 = vadd.f32 %v1771_v5, %v543_v3  ;;  %v1800_v3 = vld [vmem:[%s2862_s3 + $0x1] ss:$0 sm:$0xff] }
 0x110   : > { %v539_v9 = vpop.f32.mrf.mxu0 }
 0x111   : > { %v544_v11 = vadd.f32 %v539_v9, %v430_v8  ;;  %v551_v14 = vmax.f32 %v549_v10, 0.0  ;;  %v1801_v10 = vld [vmem:[%s2862_s3 + $0x2] ss:$0 sm:$0xff] }
 0x112   : > { %v2040_v12 = vpop.f32.mrf.mxu0 }
 0x113   : > { %v550_v13 = vadd.f32 %v1771_v5, %v544_v11 }
 0x115   : > { %v552_v15 = vmax.f32 %v550_v13, 0.0 }
 0x117   : > { %v553_v19 = vpack.c.bf16 %v552_v15, %v551_v14 }
 0x119   : > { %v555_v20 = vshrl.u32 %v553_v19, 16  ;;  %2058 = vmatmul.mubr.bf16.vlgmr.msra.gmra.mxu1 %v553_v19  ;;  %v558_v23 = vshll.u32 %v553_v19, 16  ;;  %v2299_v19 = vld [vmem:[%s2861_s2 + $0x238] sm:$0xff]  }
 0x11a   : > { %2082 = vmatpush3.bf16.msra.mxu1 %v2274_v18  ;;  %2097 = vmatprep.mubr.msk.bf16.mxu1 %vm2342_vm0, %v2341_v1 }
 0x11b   : > { %2083 = vmatprep.subr.bf16.mxu1 %v2341_v1  ;;  %v557_v24 = vrot.slane %v555_v20, 7  ;;  %v797_v34 = vrot.slane %v558_v23, 1 }
 0x11d   : > { %v560_v25 = vor.u32 %v558_v23, %v557_v24  ;;  %v798_v39 = vor.u32 %v797_v34, %v555_v20  ;;  %v2301_v23 = vld [vmem:[%s2861_s2 + $0x228] sm:$0xff]   ;;  %v2302_v24 = vld [vmem:[%s2861_s2 + $0x220] sm:$0xff]  }
 0x11e   : > { %2084 = vmatpush3.bf16.msra.mxu1 %v2276_v22  ;;  %v2300_v22 = vld [vmem:[%s2861_s2 + $0x230] sm:$0xff]   ;;  %v2313_v34 = vld [vmem:[%s2861_s2 + $0x268] sm:$0xff]  }
 0x11f   : > { %v565_v27 = vsel %vm564_vm3, 0, %v560_v25  ;;  %2085 = vmatprep.subr.bf16.mxu1 %v2341_v1  ;;  %v803_v40 = vsel %vm802_vm11, %v798_v39, 0  ;;  %v2303_v25 = vld [vmem:[%s2861_s2 + $0x218] sm:$0xff]  }
 0x120   : > { %2078 = vmatmul.mubr.msk.bf16.vlgmr.msra.gmra.mxu0 %vm585_vm4, %v565_v27  ;;  %v2305_v27 = vld [vmem:[%s2861_s2 + $0x208] sm:$0xff]   ;;  %v2317_v39 = vld [vmem:[%s2861_s2 + $0x258] sm:$0xff]  }
 0x121   : > { %2117 = vmatprep.mubr.msk.bf16.mxu0 %vm2342_vm0, %v2341_v1  ;;  %2102 = vmatpush3.bf16.msra.mxu0 %v2283_v41  ;;  %v2319_v41 = vld [vmem:[%s2861_s2 + $0x250] sm:$0xff]  }
 0x122   : > { %2086 = vmatpush3.bf16.msra.mxu1 %v2277_v26  ;;  %2103 = vmatprep.subr.bf16.mxu0 %v2341_v1  ;;  %v2304_v26 = vld [vmem:[%s2861_s2 + $0x210] sm:$0xff]  }
 0x123   : > { %2087 = vmatprep.subr.bf16.mxu1 %v2341_v1 }
 0x125   : > { %2104 = vmatpush3.bf16.msra.mxu0 %v2285_v43  ;;  %v2321_v43 = vld [vmem:[%s2861_s2 + $0x248] sm:$0xff]  }
 0x126   : > { %2088 = vmatpush3.bf16.msra.mxu1 %v2278_v28  ;;  %2105 = vmatprep.subr.bf16.mxu0 %v2341_v1  ;;  %v2306_v28 = vld [vmem:[%s2861_s2 + $0x200] sm:$0xff]  }
 0x127   : > { %2089 = vmatprep.subr.bf16.mxu1 %v2341_v1 }
 0x129   : > { %2106 = vmatpush3.bf16.msra.mxu0 %v2287_v45 }
 0x12a   : > { %2090 = vmatpush3.bf16.msra.mxu1 %v2279_v30  ;;  %2107 = vmatprep.subr.bf16.mxu0 %v2341_v1  ;;  %v2309_v30 = vld [vmem:[%s2861_s2 + $0x278] sm:$0xff]  }
 0x12b   : > { %2091 = vmatprep.subr.bf16.mxu1 %v2341_v1 }
 0x12d   : > { %2108 = vmatpush3.bf16.msra.mxu0 %v2289_v47 }
 0x12e   : > { %2092 = vmatpush3.bf16.msra.mxu1 %v2280_v32  ;;  %2109 = vmatprep.subr.bf16.mxu0 %v2341_v1  ;;  %v2311_v32 = vld [vmem:[%s2861_s2 + $0x270] sm:$0xff]  }
 0x12f   : > { %2093 = vmatprep.subr.bf16.mxu1 %v2341_v1 }
 0x131   : > { %2110 = vmatpush3.bf16.msra.mxu0 %v2291_v49 }
 0x132   : > { %2094 = vmatpush3.bf16.msra.mxu1 %v2281_v33  ;;  %2111 = vmatprep.subr.bf16.mxu0 %v2341_v1  ;;  %v2310_v33 = vld [vmem:[%s2861_s2 + $0x2a8] sm:$0xff]  }
 0x133   : > { %2095 = vmatprep.subr.bf16.mxu1 %v2341_v1 }
 0x135   : > { %2112 = vmatpush3.bf16.msra.mxu0 %v2293_v51 }
 0x136   : > { %2096 = vmatpush3.bf16.msra.mxu1 %v2282_v37  ;;  %2113 = vmatprep.subr.bf16.mxu0 %v2341_v1  ;;  %v2314_v37 = vld [vmem:[%s2861_s2 + $0x298] sm:$0xff]  }
 0x137   : > { %2121 = vmatprep.subr.bf16.mxu1 %v2341_v1 }
 0x139   : > { %2098 = vmatmul.mubr.msk.bf16.vlgmr.msra.gmra.mxu1 %vm823_vm12, %v803_v40  ;;  %2114 = vmatpush3.bf16.msra.mxu0 %v2295_v53  ;;  %v2318_v40 = vld [vmem:[%s2861_s2 + $0x288] sm:$0xff]  }
 0x13a   : > { %2137 = vmatprep.mubr.msk.bf16.mxu1 %vm2342_vm0, %v2341_v1  ;;  %2122 = vmatpush3.bf16.msra.mxu1 %v2284_v42  ;;  %v2320_v42 = vld [vmem:[%s2861_s2 + $0x280] sm:$0xff]  }
 0x13b   : > { %2123 = vmatprep.subr.bf16.mxu1 %v2341_v1  ;;  %2115 = vmatprep.subr.bf16.mxu0 %v2341_v1 }
 0x13d   : > { %2116 = vmatpush3.bf16.msra.mxu0 %v2297_v55 }
 0x13e   : > { %2124 = vmatpush3.bf16.msra.mxu1 %v2286_v44  ;;  %2141 = vmatprep.subr.bf16.mxu0 %v2341_v1  ;;  %v2322_v44 = vld [vmem:[%s2861_s2 + $0x240] sm:$0xff]  }
 0x13f   : > { %2125 = vmatprep.subr.bf16.mxu1 %v2341_v1 }
 0x142   : > { %2126 = vmatpush3.bf16.msra.mxu1 %v2288_v46 }
 0x143   : > { %2127 = vmatprep.subr.bf16.mxu1 %v2341_v1 }
 0x146   : > { %2128 = vmatpush3.bf16.msra.mxu1 %v2290_v48 }
 0x147   : > { %2129 = vmatprep.subr.bf16.mxu1 %v2341_v1 }
 0x14a   : > { %2130 = vmatpush3.bf16.msra.mxu1 %v2292_v50 }
 0x14b   : > { %2131 = vmatprep.subr.bf16.mxu1 %v2341_v1 }
 0x14e   : > { %2132 = vmatpush3.bf16.msra.mxu1 %v2294_v52 }
 0x14f   : > { %2133 = vmatprep.subr.bf16.mxu1 %v2341_v1 }
 0x152   : > { %2134 = vmatpush3.bf16.msra.mxu1 %v2296_v54  ;;  %v1293_v54 = vpop.permute.xlu0 %1292 }
 0x153   : > { %2135 = vmatprep.subr.bf16.mxu1 %v2341_v1  ;;  %vm1297_vm15 = vcmp.eq.s32.totalorder %v1293_v54, 1 }
 0x154   : > { %vm1299_vm3 = vmpackc.low %vm1297_vm15, %vm1297_vm15 }
 0x156   : > { %2136 = vmatpush3.bf16.msra.mxu1 %v2298_v56  ;;  %v1296_v56 = vpop.permute.xlu1 %1295 }
 0x157   : > { %2161 = vmatprep.subr.bf16.mxu1 %v2341_v1  ;;  %vm1298_vm2 = vcmp.eq.s32.totalorder %v1296_v56, 1 }
 0x158   : > { %vm1300_vm4 = vmpackc.low %vm1298_vm2, %vm1298_vm2 }
 0x1d9   : > { %v701_v57 = vpop.f32.mrf.mxu1 }
 0x1db   : > { %v2059_v58 = vpop.f32.mrf.mxu1 }
 0x1dc   : > { %v1829_v58 = vld [vmem:[%s2862_s3 + $0x3] ss:$0 sm:$0xff] }
 0x1dd   : > { %v704_v59 = vpop.f32.mrf.mxu1 }
 0x1df   : > { %v2060_v60 = vpop.f32.mrf.mxu1 }
 0x1e0   : > { %v790_v61 = vpop.f32.mrf.mxu0 }
 0x1e1   : > { %v791_v2 = vadd.f32 %v790_v61, %v701_v57 }
 0x1e2   : > { %v2079_v62 = vpop.f32.mrf.mxu0 }
 0x1e4   : > { %v793_v63 = vpop.f32.mrf.mxu0 }
 0x1e5   : > { %v794_v8 = vadd.f32 %v793_v63, %v704_v59 }
 0x1e6   : > { %v2080_v0 = vpop.f32.mrf.mxu0 }
 0x1f9   : > { %v923_v4 = vpop.f32.mrf.mxu1 }
 0x1fa   : > { %v930_v5 = vadd.f32 %v923_v4, %v791_v2  ;;  %v1301_v4 = vsel %vm1299_vm3, 65537, %v2343_v7 }
 0x1fb   : > { %v2099_v6 = vpop.f32.mrf.mxu1 }
 0x1fc   : > { %v936_v9 = vmul.f32 %v1800_v3, %v930_v5 }
 0x1fd   : > { %v926_v11 = vpop.f32.mrf.mxu1 }
 0x1fe   : > { %v931_v12 = vadd.f32 %v926_v11, %v794_v8  ;;  %v942_v14 = vadd.f32 %v1801_v10, %v936_v9  ;;  %v2323_v8 = vld [vmem:[%s2861_s2 + $0x2f8] sm:$0xff]  }
 0x1ff   : > { %v2100_v13 = vpop.f32.mrf.mxu1 }
 0x200   : > { %v937_v15 = vmul.f32 %v1800_v3, %v931_v12  ;;  %v944_v17 = vmax.f32 %v942_v14, 0.0  ;;  %v1302_v3 = vsel %vm1300_vm4, 65537, %v2343_v7  ;;  %v2324_v12 = vld [vmem:[%s2861_s2 + $0x2f0] sm:$0xff]   ;;  %v2325_v14 = vld [vmem:[%s2861_s2 + $0x2e8] sm:$0xff]  }
 0x201   : > { %v1830_v9 = vcombine.low %v1301_v4, %v1302_v3 }
 0x202   : > { %v943_v16 = vadd.f32 %v1801_v10, %v937_v15  ;;  %v2326_v15 = vld [vmem:[%s2861_s2 + $0x2e0] sm:$0xff]  }
 0x203   : > { %vm1306_vm5 = vcmp.ne.s16.totalorder %v1830_v9, 0 }
 0x204   : > { %v945_v18 = vmax.f32 %v943_v16, 0.0  ;;  %v2327_v16 = vld [vmem:[%s2861_s2 + $0x2d8] sm:$0xff]  }
 0x206   : > { %v946_v20 = vpack.c.bf16 %v945_v18, %v944_v17  ;;  %v1529_v17 = vpop.permute.xlu0 %1528  ;;  %v1532_v18 = vpop.permute.xlu1 %1531 }
 0x208   : > { %v948_v21 = vrot.slane %v946_v20, 4  ;;  %2118 = vmatmul.mubr.bf16.vlgmr.msra.gmra.mxu0 %v946_v20  ;;  %v2329_v20 = vld [vmem:[%s2861_s2 + $0x2c8] sm:$0xff]  }
 0x209   : > { %2142 = vmatpush3.bf16.msra.mxu0 %v2299_v19  ;;  %2157 = vmatprep.mubr.msk.bf16.mxu0 %vm2342_vm0, %v2341_v1  ;;  %v2328_v19 = vld [vmem:[%s2861_s2 + $0x2d0] sm:$0xff]  }
 0x20a   : > { %2138 = vmatmul.mubr.msk.bf16.vlgmr.msra.gmra.mxu1 %vm1818_vm14, %v948_v21  ;;  %2143 = vmatprep.subr.bf16.mxu0 %v2341_v1 }
 0x20b   : > { %2177 = vmatprep.mubr.msk.bf16.mxu1 %vm2342_vm0, %v2341_v1  ;;  %2162 = vmatpush3.bf16.msra.mxu1 %v2307_v29 }
 0x20c   : > { %2163 = vmatprep.subr.bf16.mxu1 %v2341_v1 }
 0x20d   : > { %2144 = vmatpush3.bf16.msra.mxu0 %v2300_v22 }
 0x20e   : > { %2145 = vmatprep.subr.bf16.mxu0 %v2341_v1 }
 0x20f   : > { %2164 = vmatpush3.bf16.msra.mxu1 %v2308_v31 }
 0x210   : > { %2165 = vmatprep.subr.bf16.mxu1 %v2341_v1 }
 0x211   : > { %2146 = vmatpush3.bf16.msra.mxu0 %v2301_v23  ;;  %v2330_v23 = vld [vmem:[%s2861_s2 + $0x2c0] sm:$0xff]  }
 0x212   : > { %2147 = vmatprep.subr.bf16.mxu0 %v2341_v1 }
 0x213   : > { %2166 = vmatpush3.bf16.msra.mxu1 %v2310_v33 }
 0x214   : > { %2167 = vmatprep.subr.bf16.mxu1 %v2341_v1 }
 0x215   : > { %2148 = vmatpush3.bf16.msra.mxu0 %v2302_v24 }
 0x216   : > { %2149 = vmatprep.subr.bf16.mxu0 %v2341_v1 }
 0x217   : > { %2168 = vmatpush3.bf16.msra.mxu1 %v2312_v35 }
 0x218   : > { %2169 = vmatprep.subr.bf16.mxu1 %v2341_v1 }
 0x219   : > { %2150 = vmatpush3.bf16.msra.mxu0 %v2303_v25 }
 0x21a   : > { %2151 = vmatprep.subr.bf16.mxu0 %v2341_v1 }
 0x21b   : > { %2170 = vmatpush3.bf16.msra.mxu1 %v2314_v37  ;;  %v1859_v37 = vld [vmem:[%s2862_s3 + $0x5] ss:$0 sm:$0xff] }
 0x21c   : > { %2171 = vmatprep.subr.bf16.mxu1 %v2341_v1 }
 0x21d   : > { %2152 = vmatpush3.bf16.msra.mxu0 %v2304_v26 }
 0x21e   : > { %2153 = vmatprep.subr.bf16.mxu0 %v2341_v1 }
 0x21f   : > { %2172 = vmatpush3.bf16.msra.mxu1 %v2316_v38 }
 0x220   : > { %2173 = vmatprep.subr.bf16.mxu1 %v2341_v1 }
 0x221   : > { %2154 = vmatpush3.bf16.msra.mxu0 %v2305_v27 }
 0x222   : > { %2155 = vmatprep.subr.bf16.mxu0 %v2341_v1 }
 0x223   : > { %2174 = vmatpush3.bf16.msra.mxu1 %v2318_v40 }
 0x224   : > { %2175 = vmatprep.subr.bf16.mxu1 %v2341_v1 }
 0x225   : > { %2156 = vmatpush3.bf16.msra.mxu0 %v2306_v28 }
 0x226   : > { %2181 = vmatprep.subr.bf16.mxu0 %v2341_v1 }
 0x227   : > { %2176 = vmatpush3.bf16.msra.mxu1 %v2320_v42  ;;  %v2332_v42 = vld [vmem:[%s2431_s14] sm:$0xff]  }
 0x228   : > { %2158 = vmatmul.mubr.msk.bf16.vlgmr.msra.gmra.mxu0 %vm949_vm13, %v948_v21  ;;  %2201 = vmatprep.subr.bf16.mxu1 %v2341_v1 }
 0x229   : > { %2197 = vmatprep.mubr.msk.bf16.mxu0 %vm2342_vm0, %v2341_v1  ;;  %2182 = vmatpush3.bf16.msra.mxu0 %v2309_v30 }
 0x22a   : > { %2183 = vmatprep.subr.bf16.mxu0 %v2341_v1 }
 0x22d   : > { %2184 = vmatpush3.bf16.msra.mxu0 %v2311_v32 }
 0x22e   : > { %2185 = vmatprep.subr.bf16.mxu0 %v2341_v1 }
 0x231   : > { %2186 = vmatpush3.bf16.msra.mxu0 %v2313_v34 }
 0x232   : > { %2187 = vmatprep.subr.bf16.mxu0 %v2341_v1 }
 0x235   : > { %2188 = vmatpush3.bf16.msra.mxu0 %v2315_v36 }
 0x236   : > { %2189 = vmatprep.subr.bf16.mxu0 %v2341_v1 }
 0x239   : > { %2190 = vmatpush3.bf16.msra.mxu0 %v2317_v39 }
 0x23a   : > { %2191 = vmatprep.subr.bf16.mxu0 %v2341_v1 }
 0x23d   : > { %2192 = vmatpush3.bf16.msra.mxu0 %v2319_v41 }
 0x23e   : > { %2193 = vmatprep.subr.bf16.mxu0 %v2341_v1 }
 0x241   : > { %2194 = vmatpush3.bf16.msra.mxu0 %v2321_v43  ;;  %v1663_v43 = vunpack.c.l.bf16 %v2332_v42 }
 0x242   : > { %2195 = vmatprep.subr.bf16.mxu0 %v2341_v1 }
 0x245   : > { %2196 = vmatpush3.bf16.msra.mxu0 %v2322_v44 }
 0x2c8   : > { %v1067_v45 = vpop.f32.mrf.mxu0 }
 0x2ca   : > { %v2119_v46 = vpop.f32.mrf.mxu0  ;;  %v1156_v47 = vpop.f32.mrf.mxu1 }
 0x2cb   : > { %v1157_v53 = vadd.f32 %v1156_v47, %v1067_v45  ;;  %v1664_v47 = vunpack.c.h.bf16 %v2332_v42 }
 0x2cc   : > { %v1070_v48 = vpop.f32.mrf.mxu0  ;;  %v2139_v49 = vpop.f32.mrf.mxu1 }
 0x2ce   : > { %v2120_v50 = vpop.f32.mrf.mxu0  ;;  %v1159_v51 = vpop.f32.mrf.mxu1 }
 0x2cf   : > { %v1160_v60 = vadd.f32 %v1159_v51, %v1070_v48 }
 0x2d0   : > { %v2140_v52 = vpop.f32.mrf.mxu1 }
 0x2e8   : > { %v1263_v55 = vpop.f32.mrf.mxu0 }
 0x2e9   : > { %v1270_v57 = vadd.f32 %v1263_v55, %v1157_v53 }
 0x2ea   : > { %v2159_v59 = vpop.f32.mrf.mxu0 }
 0x2eb   : > { %v1276_v62 = vadd.f32 %v1829_v58, %v1270_v57 }
 0x2ec   : > { %v1266_v61 = vpop.f32.mrf.mxu0 }
 0x2ed   : > { %v1271_v63 = vadd.f32 %v1266_v61, %v1160_v60  ;;  %v1278_v5 = vmax.f32 %v1276_v62, 0.0 }
 0x2ee   : > { %v2160_v0 = vpop.f32.mrf.mxu0 }
 0x2ef   : > { %v1277_v2 = vadd.f32 %v1829_v58, %v1271_v63 }
 0x2f1   : > { %v1279_v6 = vmax.f32 %v1277_v2, 0.0 }
 0x2f3   : > { %v1280_v10 = vpack.c.bf16 %v1279_v6, %v1278_v5 }
 0x2f5   : > { %2178 = vmatmul.mubr.bf16.vlgmr.msra.gmra.mxu1 %v1280_v10  ;;  %v1282_v11 = vrot.slane %v1280_v10, 7  ;;  %v1518_v25 = vrot.slane %v1280_v10, 1 }
 0x2f6   : > { %2202 = vmatpush3.bf16.msra.mxu1 %v2323_v8  ;;  %2217 = vmatprep.mubr.msk.bf16.mxu1 %vm2342_vm0, %v2341_v1  ;;  %vm1533_vm0 = vcmp.eq.s32.totalorder %v1529_v17, 1 }
 0x2f7   : > { %v1285_v13 = vsel %vm562_vm1, 0, %v1282_v11  ;;  %2203 = vmatprep.subr.bf16.mxu1 %v2341_v1  ;;  %vm1534_vm1 = vcmp.eq.s32.totalorder %v1532_v18, 1  ;;  %vm1535_vm6 = vmpackc.low %vm1533_vm0, %vm1533_vm0  ;;  %v1521_v26 = vsel %vm1519_vm8, %v1518_v25, 0 }
 0x2f8   : > { %2198 = vmatmul.mubr.msk.bf16.vlgmr.msra.gmra.mxu0 %vm1306_vm5, %v1285_v13  ;;  %vm1536_vm7 = vmpackc.low %vm1534_vm1, %vm1534_vm1  ;;  %v1537_v22 = vsel %vm1535_vm6, 65537, %v2343_v7 }
 0x2f9   : > { %v1538_v21 = vsel %vm1536_vm7, 65537, %v2343_v7 }
 0x2fa   : > { %2204 = vmatpush3.bf16.msra.mxu1 %v2324_v12  ;;  %v1848_v24 = vcombine.low %v1537_v22, %v1538_v21 }
 0x2fb   : > { %2205 = vmatprep.subr.bf16.mxu1 %v2341_v1 }
 0x2fc   : > { %vm1542_vm9 = vcmp.ne.s16.totalorder %v1848_v24, 0 }
 0x2fe   : > { %2206 = vmatpush3.bf16.msra.mxu1 %v2325_v14 }
 0x2ff   : > { %2207 = vmatprep.subr.bf16.mxu1 %v2341_v1 }
 0x302   : > { %2208 = vmatpush3.bf16.msra.mxu1 %v2326_v15 }
 0x303   : > { %2209 = vmatprep.subr.bf16.mxu1 %v2341_v1 }
 0x306   : > { %2210 = vmatpush3.bf16.msra.mxu1 %v2327_v16 }
 0x307   : > { %2211 = vmatprep.subr.bf16.mxu1 %v2341_v1 }
 0x30a   : > { %2212 = vmatpush3.bf16.msra.mxu1 %v2328_v19 }
 0x30b   : > { %2213 = vmatprep.subr.bf16.mxu1 %v2341_v1 }
 0x30e   : > { %2214 = vmatpush3.bf16.msra.mxu1 %v2329_v20 }
 0x30f   : > { %2215 = vmatprep.subr.bf16.mxu1 %v2341_v1  ;;  %v1858_v1 = vld [vmem:[%s2862_s3 + $0x4] ss:$0 sm:$0xff] }
 0x312   : > { %2216 = vmatpush3.bf16.msra.mxu1 %v2330_v23 }
 0x315   : > { %2218 = vmatmul.mubr.msk.bf16.vlgmr.msra.gmra.mxu1 %vm1542_vm9, %v1521_v26 }
 0x3b5   : > { %v1422_v27 = vpop.f32.mrf.mxu1 }
 0x3b7   : > { %v2179_v28 = vpop.f32.mrf.mxu1 }
 0x3b8   : > { %v1511_v29 = vpop.f32.mrf.mxu0 }
 0x3b9   : > { %v1425_v30 = vpop.f32.mrf.mxu1  ;;  %v1512_v34 = vadd.f32 %v1511_v29, %v1422_v27 }
 0x3ba   : > { %v2199_v7 = vpop.f32.mrf.mxu0 }
 0x3bb   : > { %v2180_v31 = vpop.f32.mrf.mxu1 }
 0x3bc   : > { %v1514_v32 = vpop.f32.mrf.mxu0 }
 0x3bd   : > { %v1515_v39 = vadd.f32 %v1514_v32, %v1425_v30 }
 0x3be   : > { %v2200_v33 = vpop.f32.mrf.mxu0 }
 0x3d5   : > { %v1642_v35 = vpop.f32.mrf.mxu1 }
 0x3d6   : > { %v1649_v36 = vadd.f32 %v1642_v35, %v1512_v34 }
 0x3d7   : > { %v2219_v38 = vpop.f32.mrf.mxu1 }
 0x3d8   : > { %v1655_v40 = vmul.f32 %v1858_v1, %v1649_v36 }
 0x3d9   : > { %v1645_v41 = vpop.f32.mrf.mxu1 }
 0x3da   : > { %v1661_v44 = vadd.f32 %v1859_v37, %v1655_v40  ;;  %v1650_v45 = vadd.f32 %v1645_v41, %v1515_v39 }
 0x3db   : > { %v2220_v46 = vpop.f32.mrf.mxu1 }
 0x3dc   : > { %v1656_v48 = vmul.f32 %v1858_v1, %v1650_v45  ;;  %v1665_v49 = vadd.f32 %v1663_v43, %v1661_v44 }
 0x3de   : > { %v1662_v50 = vadd.f32 %v1859_v37, %v1656_v48  ;;  %v1667_v52 = vmax.f32 %v1665_v49, 0.0 }
 0x3e0   : > { %v1666_v51 = vadd.f32 %v1664_v47, %v1662_v50 }
 0x3e2   : > { %v1668_v53 = vmax.f32 %v1666_v51, 0.0 }
 0x3e4   : > { %v1871_v54 = vpack.c.bf16 %v1668_v53, %v1667_v52 }
 0x3e6   : > { %1872 = vst [vmem:[%s197_s5] sm:$0xff] %v1871_v54  }
 0x3e7 PF: > { %s14_s15 = sadd.s32 1, %s2339_s15  }
 0x3e8   : > { %p11_p4 = scmp.ge.s32.totalorder %s14_s15, 4  }
 0x3ea   :  { %13 = sbr.rel (!%p11_p4) target bundleno = 1 (0x1), region = 66 }

// kernel: net_forward.45
= control target key start
LH: loop header
LB: loop body
LE: loop exit
PB: predicated region body
PF: predicated region fallthrough
CT: control target
= control target key end

     0   :  { %s1042_s15 = smov 0   ;;  %s1243_s0 = inlined_call_operand.vmem [shape: s32[256,1], index: 0, kind: input, shape index: {}]   ;;  %s1244_s1 = inlined_call_operand.vmem [shape: bf16[2,256,16], index: 1, kind: input, shape index: {}]   ;;  %s1245_s2 = inlined_call_operand.vmem [shape: bf16[16,32], index: 2, kind: input, shape index: {}]   ;;  %s1246_s3 = inlined_call_operand.vmem [shape: f32[2,32], index: 3, kind: input, shape index: {}]   ;;  %s1247_s4 = inlined_call_operand.vmem [shape: bf16[2,256,32], index: 4, kind: output, shape index: {}]  }
   0x1 LB: > { %s819_s0 = sadd.s32 4294967295, %s1015_s15   ;;  %p823_p0 = scmp.ge.s32.totalorder %s1015_s15, 1  ;;  %s1015_s15 = sphi %s1042_s15, %s14_s15  }
   0x2   : > { %p162_p1 = scmp.lt.s32.totalorder %s1015_s15, 3 }
   0x4   : > { %p163_p2 = pnand %p823_p0, %p162_p1 }
   0x5   : > { %p188_p3 = scmp.lt.s32.totalorder (!%p163_p2), %s819_s0, 1 }
   0x6   : > { %166 = sbr.rel (%p163_p2) target bundleno = 247 (0xf7), region = 36 }
   0xb   : > { %v992_v0 = vld [vmem:[%s1245_s2] sm:$0xff]   ;;  %s1249_s0 = smov (!%p188_p3, %s819_s0), 1  ;;  %vm319_vm0 = vcmask 130048   ;;  %vm731_vm1 = vcmask 257024  }
   0xc   : > { %948 = vmatprep.subr.bf16.mxu0 %v992_v0  ;;  %982 = vmatprep.subr.bf16.mxu1 %v992_v0  ;;  %s897_s18 = sshll.u32 %s1249_s0, 7  ;;  %v1098_v17 = vld [vmem:[%s1246_s3] ss:$0 sm:$0xff]  ;;  %v1103_v19 = vld [vmem:[%s1246_s3 + $0x1] ss:$0 sm:$0xff] }
   0xd   : > { %949 = vmatpush3.bf16.msra.mxu0 %v992_v0  ;;  %983 = vmatpush3.bf16.msra.mxu1 %v992_v0  ;;  %s1061_s21 = scalar_lea.vmem %s1244_s1, %s897_s18  ;;  %s1114_s28 = scalar_lea.vmem %s1247_s4, %s897_s18 }
   0xe   : > { %v993_v1 = vld [vmem:[%s1061_s21] sm:$0xff]   ;;  %v995_v3 = vld [vmem:[%s1061_s21 + $0x8] sm:$0xff]   ;;  %v997_v5 = vld [vmem:[%s1061_s21 + $0x10] sm:$0xff]  }
   0xf   : > { %v994_v2 = vld [vmem:[%s1061_s21 + $0x40] sm:$0xff]   ;;  %950 = vmatprep.mubr.msk.bf16.mxu0 %vm319_vm0, %v993_v1  ;;  %v996_v4 = vld [vmem:[%s1061_s21 + $0x48] sm:$0xff]   ;;  %v998_v6 = vld [vmem:[%s1061_s21 + $0x50] sm:$0xff]  }
  0x10   : > { %966 = vmatprep.mubr.msk.bf16.mxu1 %vm319_vm0, %v994_v2  ;;  %951 = vmatmul.mubr.msk.bf16.vlgmr.msra.gmra.mxu0 %vm319_vm0, %v995_v3  ;;  %v999_v7 = vld [vmem:[%s1061_s21 + $0x18] sm:$0xff]   ;;  %v1001_v9 = vld [vmem:[%s1061_s21 + $0x20] sm:$0xff]   ;;  %v1003_v11 = vld [vmem:[%s1061_s21 + $0x28] sm:$0xff]  }
  0x11   : > { %967 = vmatmul.mubr.msk.bf16.vlgmr.msra.gmra.mxu1 %vm319_vm0, %v996_v4  ;;  %954 = vmatprep.mubr.msk.bf16.mxu0 %vm319_vm0, %v997_v5  ;;  %v1000_v8 = vld [vmem:[%s1061_s21 + $0x58] sm:$0xff]   ;;  %v1002_v10 = vld [vmem:[%s1061_s21 + $0x60] sm:$0xff]   ;;  %v1004_v12 = vld [vmem:[%s1061_s21 + $0x68] sm:$0xff]  }
  0x12   : > { %970 = vmatprep.mubr.msk.bf16.mxu1 %vm319_vm0, %v998_v6  ;;  %v1005_v13 = vld [vmem:[%s1061_s21 + $0x30] sm:$0xff]   ;;  %v1007_v15 = vld [vmem:[%s1061_s21 + $0x38] sm:$0xff]  }
  0x13   : > { %v1006_v14 = vld [vmem:[%s1061_s21 + $0x70] sm:$0xff]   ;;  %v1008_v16 = vld [vmem:[%s1061_s21 + $0x78] sm:$0xff]  }
  0x18   : > { %955 = vmatmul.mubr.msk.bf16.gmra.mxu0 %vm319_vm0, %v999_v7 }
  0x19   : > { %971 = vmatmul.mubr.msk.bf16.gmra.mxu1 %vm319_vm0, %v1000_v8  ;;  %958 = vmatprep.mubr.msk.bf16.mxu0 %vm319_vm0, %v1001_v9 }
  0x1a   : > { %974 = vmatprep.mubr.msk.bf16.mxu1 %vm319_vm0, %v1002_v10 }
  0x20   : > { %959 = vmatmul.mubr.msk.bf16.gmra.mxu0 %vm319_vm0, %v1003_v11 }
  0x21   : > { %975 = vmatmul.mubr.msk.bf16.gmra.mxu1 %vm319_vm0, %v1004_v12  ;;  %962 = vmatprep.mubr.msk.bf16.mxu0 %vm319_vm0, %v1005_v13 }
  0x22   : > { %978 = vmatprep.mubr.msk.bf16.mxu1 %vm319_vm0, %v1006_v14 }
  0x28   : > { %963 = vmatmul.mubr.msk.bf16.gmra.mxu0 %vm319_vm0, %v1007_v15 }
  0x29   : > { %979 = vmatmul.mubr.msk.bf16.gmra.mxu1 %vm319_vm0, %v1008_v16 }
  0xd0   : > { %v952_v18 = vpop.f32.mrf.mxu0 }
  0xd1   : > { %v536_v20 = vmul.f32 %v952_v18, %v1098_v17  ;;  %v968_v21 = vpop.f32.mrf.mxu1 }
  0xd2   : > { %v552_v22 = vmul.f32 %v968_v21, %v1098_v17  ;;  %v402_v23 = vpop.f32.mrf.mxu0 }
  0xd3   : > { %v573_v24 = vadd.f32 %v1103_v19, %v536_v20  ;;  %v534_v25 = vmul.f32 %v1098_v17, %v402_v23  ;;  %v466_v26 = vpop.f32.mrf.mxu1 }
  0xd4   : > { %v589_v27 = vadd.f32 %v1103_v19, %v552_v22  ;;  %v550_v28 = vmul.f32 %v1098_v17, %v466_v26  ;;  %v953_v29 = vpop.f32.mrf.mxu0 }
  0xd5   : > { %v901_v30 = vpack.c.bf16 %v573_v24, %v573_v24  ;;  %v571_v31 = vadd.f32 %v1103_v19, %v534_v25  ;;  %v537_v32 = vmul.f32 %v953_v29, %v1098_v17  ;;  %v969_v33 = vpop.f32.mrf.mxu1 }
  0xd6   : > { %v917_v34 = vpack.c.bf16 %v589_v27, %v589_v27  ;;  %v587_v35 = vadd.f32 %v1103_v19, %v550_v28  ;;  %v553_v36 = vmul.f32 %v969_v33, %v1098_v17  ;;  %v405_v37 = vpop.f32.mrf.mxu0 }
  0xd7   : > { %734 = vst.msk [vmem:[%s1114_s28 + $0x8] sm:$0xf] %vm731_vm1, %v901_v30  ;;  %v899_v38 = vpack.c.bf16 %v571_v31, %v571_v31  ;;  %v574_v39 = vadd.f32 %v1103_v19, %v537_v32  ;;  %v535_v40 = vmul.f32 %v1098_v17, %v405_v37  ;;  %v469_v41 = vpop.f32.mrf.mxu1 }
  0xd8   : > { %750 = vst.msk [vmem:[%s1114_s28 + $0x48] sm:$0xf] %vm731_vm1, %v917_v34  ;;  %v915_v42 = vpack.c.bf16 %v587_v35, %v587_v35  ;;  %v590_v43 = vadd.f32 %v1103_v19, %v553_v36  ;;  %v551_v44 = vmul.f32 %v1098_v17, %v469_v41  ;;  %v956_v45 = vpop.f32.mrf.mxu0 }
  0xd9   : > { %732 = vst.msk [vmem:[%s1114_s28] sm:$0xf] %vm731_vm1, %v899_v38  ;;  %v902_v46 = vpack.c.bf16 %v574_v39, %v574_v39  ;;  %v572_v47 = vadd.f32 %v1103_v19, %v535_v40  ;;  %v540_v48 = vmul.f32 %v956_v45, %v1098_v17  ;;  %v972_v49 = vpop.f32.mrf.mxu1 }
  0xda   : > { %748 = vst.msk [vmem:[%s1114_s28 + $0x40] sm:$0xf] %vm731_vm1, %v915_v42  ;;  %v918_v50 = vpack.c.bf16 %v590_v43, %v590_v43  ;;  %v588_v51 = vadd.f32 %v1103_v19, %v551_v44  ;;  %v556_v52 = vmul.f32 %v972_v49, %v1098_v17  ;;  %v418_v53 = vpop.f32.mrf.mxu0 }
  0xdb   : > { %735 = vst.msk [vmem:[%s1114_s28 + $0xc] sm:$0xf] %vm731_vm1, %v902_v46  ;;  %v900_v54 = vpack.c.bf16 %v572_v47, %v572_v47  ;;  %v577_v55 = vadd.f32 %v1103_v19, %v540_v48  ;;  %v538_v56 = vmul.f32 %v1098_v17, %v418_v53  ;;  %v482_v57 = vpop.f32.mrf.mxu1 }
  0xdc   : > { %751 = vst.msk [vmem:[%s1114_s28 + $0x4c] sm:$0xf] %vm731_vm1, %v918_v50  ;;  %v916_v58 = vpack.c.bf16 %v588_v51, %v588_v51  ;;  %v593_v59 = vadd.f32 %v1103_v19, %v556_v52  ;;  %v554_v60 = vmul.f32 %v1098_v17, %v482_v57  ;;  %v957_v61 = vpop.f32.mrf.mxu0 }
  0xdd   : > { %733 = vst.msk [vmem:[%s1114_s28 + $0x4] sm:$0xf] %vm731_vm1, %v900_v54  ;;  %v905_v62 = vpack.c.bf16 %v577_v55, %v577_v55  ;;  %v575_v63 = vadd.f32 %v1103_v19, %v538_v56  ;;  %v541_v0 = vmul.f32 %v957_v61, %v1098_v17  ;;  %v973_v1 = vpop.f32.mrf.mxu1 }
  0xde   : > { %749 = vst.msk [vmem:[%s1114_s28 + $0x44] sm:$0xf] %vm731_vm1, %v916_v58  ;;  %v921_v2 = vpack.c.bf16 %v593_v59, %v593_v59  ;;  %v591_v3 = vadd.f32 %v1103_v19, %v554_v60  ;;  %v557_v4 = vmul.f32 %v973_v1, %v1098_v17  ;;  %v421_v5 = vpop.f32.mrf.mxu0 }
  0xdf   : > { %738 = vst.msk [vmem:[%s1114_s28 + $0x18] sm:$0xf] %vm731_vm1, %v905_v62  ;;  %v903_v6 = vpack.c.bf16 %v575_v63, %v575_v63  ;;  %v578_v7 = vadd.f32 %v1103_v19, %v541_v0  ;;  %v539_v8 = vmul.f32 %v1098_v17, %v421_v5  ;;  %v485_v9 = vpop.f32.mrf.mxu1 }
  0xe0   : > { %754 = vst.msk [vmem:[%s1114_s28 + $0x58] sm:$0xf] %vm731_vm1, %v921_v2  ;;  %v919_v10 = vpack.c.bf16 %v591_v3, %v591_v3  ;;  %v594_v11 = vadd.f32 %v1103_v19, %v557_v4  ;;  %v555_v12 = vmul.f32 %v1098_v17, %v485_v9  ;;  %v960_v13 = vpop.f32.mrf.mxu0 }
  0xe1   : > { %736 = vst.msk [vmem:[%s1114_s28 + $0x10] sm:$0xf] %vm731_vm1, %v903_v6  ;;  %v906_v14 = vpack.c.bf16 %v578_v7, %v578_v7  ;;  %v576_v15 = vadd.f32 %v1103_v19, %v539_v8  ;;  %v544_v16 = vmul.f32 %v960_v13, %v1098_v17  ;;  %v976_v18 = vpop.f32.mrf.mxu1 }
  0xe2   : > { %752 = vst.msk [vmem:[%s1114_s28 + $0x50] sm:$0xf] %vm731_vm1, %v919_v10  ;;  %v922_v20 = vpack.c.bf16 %v594_v11, %v594_v11  ;;  %v592_v21 = vadd.f32 %v1103_v19, %v555_v12  ;;  %v560_v22 = vmul.f32 %v976_v18, %v1098_v17  ;;  %v434_v23 = vpop.f32.mrf.mxu0 }
  0xe3   : > { %739 = vst.msk [vmem:[%s1114_s28 + $0x1c] sm:$0xf] %vm731_vm1, %v906_v14  ;;  %v904_v24 = vpack.c.bf16 %v576_v15, %v576_v15  ;;  %v581_v25 = vadd.f32 %v1103_v19, %v544_v16  ;;  %v542_v26 = vmul.f32 %v1098_v17, %v434_v23  ;;  %v498_v27 = vpop.f32.mrf.mxu1 }
  0xe4   : > { %755 = vst.msk [vmem:[%s1114_s28 + $0x5c] sm:$0xf] %vm731_vm1, %v922_v20  ;;  %v920_v28 = vpack.c.bf16 %v592_v21, %v592_v21  ;;  %v597_v29 = vadd.f32 %v1103_v19, %v560_v22  ;;  %v558_v30 = vmul.f32 %v1098_v17, %v498_v27  ;;  %v961_v31 = vpop.f32.mrf.mxu0 }
  0xe5   : > { %737 = vst.msk [vmem:[%s1114_s28 + $0x14] sm:$0xf] %vm731_vm1, %v904_v24  ;;  %v909_v32 = vpack.c.bf16 %v581_v25, %v581_v25  ;;  %v579_v33 = vadd.f32 %v1103_v19, %v542_v26  ;;  %v545_v34 = vmul.f32 %v961_v31, %v1098_v17  ;;  %v977_v35 = vpop.f32.mrf.mxu1 }
  0xe6   : > { %753 = vst.msk [vmem:[%s1114_s28 + $0x54] sm:$0xf] %vm731_vm1, %v920_v28  ;;  %v925_v36 = vpack.c.bf16 %v597_v29, %v597_v29  ;;  %v595_v37 = vadd.f32 %v1103_v19, %v558_v30  ;;  %v561_v38 = vmul.f32 %v977_v35, %v1098_v17  ;;  %v437_v39 = vpop.f32.mrf.mxu0 }
  0xe7   : > { %742 = vst.msk [vmem:[%s1114_s28 + $0x28] sm:$0xf] %vm731_vm1, %v909_v32  ;;  %v907_v40 = vpack.c.bf16 %v579_v33, %v579_v33  ;;  %v582_v41 = vadd.f32 %v1103_v19, %v545_v34  ;;  %v543_v42 = vmul.f32 %v1098_v17, %v437_v39  ;;  %v501_v43 = vpop.f32.mrf.mxu1 }
  0xe8   : > { %758 = vst.msk [vmem:[%s1114_s28 + $0x68] sm:$0xf] %vm731_vm1, %v925_v36  ;;  %v923_v44 = vpack.c.bf16 %v595_v37, %v595_v37  ;;  %v598_v45 = vadd.f32 %v1103_v19, %v561_v38  ;;  %v559_v46 = vmul.f32 %v1098_v17, %v501_v43  ;;  %v964_v47 = vpop.f32.mrf.mxu0 }
  0xe9   : > { %740 = vst.msk [vmem:[%s1114_s28 + $0x20] sm:$0xf] %vm731_vm1, %v907_v40  ;;  %v910_v48 = vpack.c.bf16 %v582_v41, %v582_v41  ;;  %v580_v49 = vadd.f32 %v1103_v19, %v543_v42  ;;  %v548_v50 = vmul.f32 %v964_v47, %v1098_v17  ;;  %v980_v51 = vpop.f32.mrf.mxu1 }
  0xea   : > { %756 = vst.msk [vmem:[%s1114_s28 + $0x60] sm:$0xf] %vm731_vm1, %v923_v44  ;;  %v926_v52 = vpack.c.bf16 %v598_v45, %v598_v45  ;;  %v596_v53 = vadd.f32 %v1103_v19, %v559_v46  ;;  %v564_v54 = vmul.f32 %v980_v51, %v1098_v17  ;;  %v450_v55 = vpop.f32.mrf.mxu0 }
  0xeb   : > { %743 = vst.msk [vmem:[%s1114_s28 + $0x2c] sm:$0xf] %vm731_vm1, %v910_v48  ;;  %v908_v56 = vpack.c.bf16 %v580_v49, %v580_v49  ;;  %v585_v57 = vadd.f32 %v1103_v19, %v548_v50  ;;  %v546_v58 = vmul.f32 %v1098_v17, %v450_v55  ;;  %v514_v59 = vpop.f32.mrf.mxu1 }
  0xec   : > { %759 = vst.msk [vmem:[%s1114_s28 + $0x6c] sm:$0xf] %vm731_vm1, %v926_v52  ;;  %v924_v60 = vpack.c.bf16 %v596_v53, %v596_v53  ;;  %v601_v61 = vadd.f32 %v1103_v19, %v564_v54  ;;  %v562_v62 = vmul.f32 %v1098_v17, %v514_v59  ;;  %v965_v63 = vpop.f32.mrf.mxu0 }
  0xed   : > { %741 = vst.msk [vmem:[%s1114_s28 + $0x24] sm:$0xf] %vm731_vm1, %v908_v56  ;;  %v913_v0 = vpack.c.bf16 %v585_v57, %v585_v57  ;;  %v583_v1 = vadd.f32 %v1103_v19, %v546_v58  ;;  %v549_v2 = vmul.f32 %v965_v63, %v1098_v17  ;;  %v981_v3 = vpop.f32.mrf.mxu1 }
  0xee   : > { %757 = vst.msk [vmem:[%s1114_s28 + $0x64] sm:$0xf] %vm731_vm1, %v924_v60  ;;  %v929_v4 = vpack.c.bf16 %v601_v61, %v601_v61  ;;  %v599_v5 = vadd.f32 %v1103_v19, %v562_v62  ;;  %v565_v6 = vmul.f32 %v981_v3, %v1098_v17  ;;  %v453_v7 = vpop.f32.mrf.mxu0 }
  0xef   : > { %746 = vst.msk [vmem:[%s1114_s28 + $0x38] sm:$0xf] %vm731_vm1, %v913_v0  ;;  %v911_v8 = vpack.c.bf16 %v583_v1, %v583_v1  ;;  %v586_v9 = vadd.f32 %v1103_v19, %v549_v2  ;;  %v547_v10 = vmul.f32 %v1098_v17, %v453_v7  ;;  %v517_v11 = vpop.f32.mrf.mxu1 }
  0xf0   : > { %762 = vst.msk [vmem:[%s1114_s28 + $0x78] sm:$0xf] %vm731_vm1, %v929_v4  ;;  %v927_v12 = vpack.c.bf16 %v599_v5, %v599_v5  ;;  %v602_v13 = vadd.f32 %v1103_v19, %v565_v6  ;;  %v563_v14 = vmul.f32 %v1098_v17, %v517_v11 }
  0xf1   : > { %744 = vst.msk [vmem:[%s1114_s28 + $0x30] sm:$0xf] %vm731_vm1, %v911_v8  ;;  %v914_v15 = vpack.c.bf16 %v586_v9, %v586_v9  ;;  %v584_v16 = vadd.f32 %v1103_v19, %v547_v10 }
  0xf2   : > { %760 = vst.msk [vmem:[%s1114_s28 + $0x70] sm:$0xf] %vm731_vm1, %v927_v12  ;;  %v930_v18 = vpack.c.bf16 %v602_v13, %v602_v13  ;;  %v600_v20 = vadd.f32 %v1103_v19, %v563_v14 }
  0xf3   : > { %747 = vst.msk [vmem:[%s1114_s28 + $0x3c] sm:$0xf] %vm731_vm1, %v914_v15  ;;  %v912_v21 = vpack.c.bf16 %v584_v16, %v584_v16 }
  0xf4   : > { %763 = vst.msk [vmem:[%s1114_s28 + $0x7c] sm:$0xf] %vm731_vm1, %v930_v18  ;;  %v928_v22 = vpack.c.bf16 %v600_v20, %v600_v20 }
  0xf5   : > { %745 = vst.msk [vmem:[%s1114_s28 + $0x34] sm:$0xf] %vm731_vm1, %v912_v21 }
  0xf6   : > { %761 = vst.msk [vmem:[%s1114_s28 + $0x74] sm:$0xf] %vm731_vm1, %v928_v22 }
  0xf7 PF: > { %s14_s15 = sadd.s32 1, %s1015_s15  }
  0xf8   : > { %p11_p4 = scmp.ge.s32.totalorder %s14_s15, 4  }
  0xfa   :  { %13 = sbr.rel (!%p11_p4) target bundleno = 1 (0x1), region = 66 }

// kernel: net_forward.43
= control target key start
LH: loop header
LB: loop body
LE: loop exit
PB: predicated region body
PF: predicated region fallthrough
CT: control target
= control target key end

     0   :  { %s5709_s15 = smov 0   ;;  %s8500_s0 = inlined_call_operand.vmem [shape: s32[256,1], index: 0, kind: input, shape index: {}]   ;;  %s8501_s1 = inlined_call_operand.vmem [shape: bf16[2,256,16], index: 1, kind: input, shape index: {}]   ;;  %s8502_s2 = inlined_call_operand.vmem [shape: bf16[192,16], index: 2, kind: input, shape index: {}]   ;;  %s8503_s3 = inlined_call_operand.vmem [shape: f32[6,16], index: 3, kind: input, shape index: {}]   ;;  %s8504_s4 = inlined_call_operand.vmem [shape: bf16[2,256,16], index: 4, kind: output, shape index: {}]  }
   0x1 LB: > { %s4661_s16 = sadd.s32 4294967295, %s5681_s15   ;;  %p4665_p0 = scmp.ge.s32.totalorder %s5681_s15, 1  ;;  %s5681_s15 = sphi %s5709_s15, %s14_s15  }
   0x2   : > { %p162_p1 = scmp.lt.s32.totalorder %s5681_s15, 3 }
   0x4   : > { %p163_p2 = pnand %p4665_p0, %p162_p1 }
   0x6   : > { %166 = sbr.rel (%p163_p2) target bundleno = 1188 (0x4a4), region = 36 }
   0xb   : > { %v5615_v0 = vld [vmem:[%s8502_s2 + $0x8] sm:$0xff]   ;;  %p188_p3 = scmp.lt.s32.totalorder %s4661_s16, 1  ;;  %v5616_v1 = vld [vmem:[%s8502_s2] sm:$0xff]   ;;  %v5618_v2 = vld [vmem:[%s8502_s2 + $0x10] sm:$0xff]   ;;  %v8505_v5 = vmov 0   ;;  %vm8528_vm2 = vcmask 130048  }
   0xc   : > { %5196 = vmatprep.subr.bf16.mxu0 %v5615_v0  ;;  %5230 = vmatprep.subr.bf16.mxu1 %v5616_v1  ;;  %v235_v3 = vld [vmem:[%s8500_s0 + $0x10] sm:$0xff]  ;;  %v233_v4 = vld [vmem:[%s8500_s0] sm:$0xff]  ;;  %v236_v6 = vld [vmem:[%s8500_s0 + $0x18] sm:$0xff] }
   0xd   : > { %s9157_s16 = smov (!%p188_p3, %s4661_s16), 1  ;;  %5197 = vmatpush3.bf16.msra.mxu0 %v5615_v0  ;;  %5231 = vmatpush3.bf16.msra.mxu1 %v5616_v1  ;;  %vm1175_vm0 = vcmp.ge.s32.totalorder %v235_v3, 1  ;;  %vm1173_vm1 = vcmp.ge.s32.totalorder %v233_v4, 1  ;;  %v234_v7 = vld [vmem:[%s8500_s0 + $0x8] sm:$0xff]  ;;  %vm1176_vm3 = vcmp.ge.s32.totalorder %v236_v6, 1  ;;  %vm1994_vm6 = vcmp.lt.s32.totalorder %v233_v4, 15 }
   0xe   : > { %s4958_s27 = sshll.u32 %s9157_s16, 7  ;;  %5232 = vmatprep.mubr.bf16.mxu1 %v8505_v5  ;;  %5264 = vmatprep.subr.bf16.mxu0 %v5618_v2  ;;  %v1207_v8 = vsel %vm1175_vm0, 1, %v8505_v5  ;;  %v1205_v9 = vsel %vm1173_vm1, 1, %v8505_v5  ;;  %vm1174_vm4 = vcmp.ge.s32.totalorder %v234_v7, 1  ;;  %v1208_v13 = vsel %vm1176_vm3, 1, %v8505_v5  ;;  %v238_v19 = vld [vmem:[%s8500_s0 + $0x28] sm:$0xff] }
   0xf   : > { %s5747_s8 = scalar_lea.vmem %s8501_s1, %s4958_s27  ;;  %5614 = vset.pattern.permute.xlu1 %v8505_v5  ;;  %5613 = vset.pattern.permute.xlu0 %v8505_v5  ;;  %v1206_v14 = vsel %vm1174_vm4, 1, %v8505_v5  ;;  %vm1995_vm5 = vcmp.lt.s32.totalorder %v234_v7, 15  ;;  %v2026_v18 = vsel %vm1994_vm6, 1, %v8505_v5  ;;  %vm1997_vm7 = vcmp.lt.s32.totalorder %v236_v6, 15  ;;  %v237_v20 = vld [vmem:[%s8500_s0 + $0x20] sm:$0xff]  ;;  %v240_v24 = vld [vmem:[%s8500_s0 + $0x38] sm:$0xff]  ;;  %s8289_s9 = scalar_lea.vmem %s8504_s4, %s4958_s27 }
  0x10   : > { %v201_v10 = vld [vmem:[%s5747_s8] sm:$0xff]   ;;  %v5754_v11 = vld [vmem:[%s5747_s8 + $0x8] sm:$0xff]   ;;  %v5757_v12 = vld [vmem:[%s5747_s8 + $0x10] sm:$0xff]   ;;  %1244 = vperm.xlu1 %5614, %v1207_v8   ;;  %1238 = vperm.xlu0 %5613, %v1205_v9   ;;  %v2027_v17 = vsel %vm1995_vm5, 1, %v8505_v5  ;;  %vm1996_vm8 = vcmp.lt.s32.totalorder %v235_v3, 15  ;;  %v2029_v21 = vsel %vm1997_vm7, 1, %v8505_v5 }
  0x11   : > { %5198 = vmatprep.mubr.msk.bf16.mxu0 %vm8528_vm2, %v201_v10  ;;  %5233 = vmatmul.mubr.msk.bf16.vlgmr.msra.gmra.mxu1 %vm8528_vm2, %v201_v10  ;;  %v5771_v15 = vld [vmem:[%s5747_s8 + $0x18] sm:$0xff]   ;;  %v5774_v16 = vld [vmem:[%s5747_s8 + $0x20] sm:$0xff]   ;;  %v2028_v22 = vsel %vm1996_vm8, 1, %v8505_v5  ;;  %vm1178_vm9 = vcmp.ge.s32.totalorder %v238_v19, 1  ;;  %vm1177_vm10 = vcmp.ge.s32.totalorder %v237_v20, 1  ;;  %v5795_v23 = vld [vmem:[%s5747_s8 + $0x28] sm:$0xff]  }
  0x12   : > { %5199 = vmatmul.mubr.msk.bf16.vlgmr.msra.gmra.mxu0 %vm8528_vm2, %v5754_v11  ;;  %5236 = vmatprep.mubr.msk.bf16.mxu1 %vm8528_vm2, %v5754_v11  ;;  %v239_v25 = vld [vmem:[%s8500_s0 + $0x30] sm:$0xff]  ;;  %v1210_v27 = vsel %vm1178_vm9, 1, %v8505_v5  ;;  %v1209_v28 = vsel %vm1177_vm10, 1, %v8505_v5  ;;  %vm1180_vm11 = vcmp.ge.s32.totalorder %v240_v24, 1  ;;  %vm1999_vm13 = vcmp.lt.s32.totalorder %v238_v19, 15  ;;  %v5819_v31 = vld [vmem:[%s5747_s8 + $0x38] sm:$0xff]  }
  0x13   : > { %5265 = vmatpush3.bf16.msra.mxu0 %v5618_v2  ;;  %5202 = vmatprep.mubr.msk.bf16.mxu0 %vm8528_vm2, %v5757_v12  ;;  %v5804_v26 = vld [vmem:[%s5747_s8 + $0x30] sm:$0xff]   ;;  %vm1179_vm12 = vcmp.ge.s32.totalorder %v239_v25, 1  ;;  %v1212_v29 = vsel %vm1180_vm11, 1, %v8505_v5  ;;  %vm1998_vm14 = vcmp.lt.s32.totalorder %v237_v20, 15  ;;  %v5822_v32 = vld [vmem:[%s5747_s8 + $0x40] sm:$0xff]   ;;  %v2031_v33 = vsel %vm1999_vm13, 1, %v8505_v5 }
  0x14   : > { %1247 = vperm.xlu1 %5614, %v1208_v13   ;;  %1241 = vperm.xlu0 %5613, %v1206_v14   ;;  %v1211_v30 = vsel %vm1179_vm12, 1, %v8505_v5  ;;  %v2030_v34 = vsel %vm1998_vm14, 1, %v8505_v5  ;;  %vm2001_vm15 = vcmp.lt.s32.totalorder %v240_v24, 15  ;;  %vm2000_vm0 = vcmp.lt.s32.totalorder %v239_v25, 15  ;;  %v242_v35 = vld [vmem:[%s8500_s0 + $0x48] sm:$0xff]  ;;  %v241_v36 = vld [vmem:[%s8500_s0 + $0x40] sm:$0xff] }
  0x15   : > { %v2033_v37 = vsel %vm2001_vm15, 1, %v8505_v5  ;;  %v2032_v38 = vsel %vm2000_vm0, 1, %v8505_v5  ;;  %v5841_v39 = vld [vmem:[%s5747_s8 + $0x48] sm:$0xff]   ;;  %vm1182_vm1 = vcmp.ge.s32.totalorder %v242_v35, 1  ;;  %vm1181_vm3 = vcmp.ge.s32.totalorder %v241_v36, 1  ;;  %v244_v40 = vld [vmem:[%s8500_s0 + $0x58] sm:$0xff] }
  0x16   : > { %v243_v41 = vld [vmem:[%s8500_s0 + $0x50] sm:$0xff]  ;;  %v1214_v43 = vsel %vm1182_vm1, 1, %v8505_v5  ;;  %v1213_v44 = vsel %vm1181_vm3, 1, %v8505_v5  ;;  %vm1184_vm4 = vcmp.ge.s32.totalorder %v244_v40, 1  ;;  %vm2003_vm6 = vcmp.lt.s32.totalorder %v242_v35, 15  ;;  %v5867_v47 = vld [vmem:[%s5747_s8 + $0x58] sm:$0xff]  }
  0x17   : > { %v5852_v42 = vld [vmem:[%s5747_s8 + $0x50] sm:$0xff]   ;;  %vm1183_vm5 = vcmp.ge.s32.totalorder %v243_v41, 1  ;;  %v1216_v45 = vsel %vm1184_vm4, 1, %v8505_v5  ;;  %vm2002_vm7 = vcmp.lt.s32.totalorder %v241_v36, 15  ;;  %v5870_v48 = vld [vmem:[%s5747_s8 + $0x60] sm:$0xff]   ;;  %v2035_v49 = vsel %vm2003_vm6, 1, %v8505_v5 }
  0x18   : > { %2062 = vperm.xlu1 %5614, %v2027_v17   ;;  %2059 = vperm.xlu0 %5613, %v2026_v18   ;;  %v1215_v46 = vsel %vm1183_vm5, 1, %v8505_v5  ;;  %v2034_v50 = vsel %vm2002_vm7, 1, %v8505_v5  ;;  %vm2005_vm8 = vcmp.lt.s32.totalorder %v244_v40, 15  ;;  %vm2004_vm9 = vcmp.lt.s32.totalorder %v243_v41, 15  ;;  %v246_v51 = vld [vmem:[%s8500_s0 + $0x68] sm:$0xff]  ;;  %v245_v52 = vld [vmem:[%s8500_s0 + $0x60] sm:$0xff] }
  0x19   : > { %5237 = vmatmul.mubr.msk.bf16.gmra.mxu1 %vm8528_vm2, %v5757_v12  ;;  %v2037_v53 = vsel %vm2005_vm8, 1, %v8505_v5  ;;  %v2036_v54 = vsel %vm2004_vm9, 1, %v8505_v5  ;;  %vm1186_vm10 = vcmp.ge.s32.totalorder %v246_v51, 1  ;;  %vm1185_vm11 = vcmp.ge.s32.totalorder %v245_v52, 1  ;;  %v5891_v55 = vld [vmem:[%s5747_s8 + $0x68] sm:$0xff]   ;;  %v248_v56 = vld [vmem:[%s8500_s0 + $0x78] sm:$0xff] }
  0x1a   : > { %5203 = vmatmul.mubr.msk.bf16.gmra.mxu0 %vm8528_vm2, %v5771_v15  ;;  %5240 = vmatprep.mubr.msk.bf16.mxu1 %vm8528_vm2, %v5771_v15  ;;  %v247_v57 = vld [vmem:[%s8500_s0 + $0x70] sm:$0xff]  ;;  %v1218_v59 = vsel %vm1186_vm10, 1, %v8505_v5  ;;  %v1217_v60 = vsel %vm1185_vm11, 1, %v8505_v5  ;;  %vm1188_vm12 = vcmp.ge.s32.totalorder %v248_v56, 1  ;;  %vm2007_vm14 = vcmp.lt.s32.totalorder %v246_v51, 15  ;;  %v5915_v63 = vld [vmem:[%s5747_s8 + $0x78] sm:$0xff]  }
  0x1b   : > { %5206 = vmatprep.mubr.msk.bf16.mxu0 %vm8528_vm2, %v5774_v16  ;;  %v5900_v58 = vld [vmem:[%s5747_s8 + $0x70] sm:$0xff]   ;;  %vm1187_vm13 = vcmp.ge.s32.totalorder %v247_v57, 1  ;;  %v1220_v61 = vsel %vm1188_vm12, 1, %v8505_v5  ;;  %vm2006_vm15 = vcmp.lt.s32.totalorder %v245_v52, 15  ;;  %v2039_v0 = vsel %vm2007_vm14, 1, %v8505_v5  ;;  %v250_v2 = vld [vmem:[%s8500_s0 + $0x88] sm:$0xff] }
  0x1c   : > { %2068 = vperm.xlu1 %5614, %v2029_v21   ;;  %2065 = vperm.xlu0 %5613, %v2028_v22   ;;  %v1219_v62 = vsel %vm1187_vm13, 1, %v8505_v5  ;;  %v2038_v1 = vsel %vm2006_vm15, 1, %v8505_v5  ;;  %vm2009_vm0 = vcmp.lt.s32.totalorder %v248_v56, 15  ;;  %vm2008_vm1 = vcmp.lt.s32.totalorder %v247_v57, 15  ;;  %v249_v3 = vld [vmem:[%s8500_s0 + $0x80] sm:$0xff]  ;;  %v252_v7 = vld [vmem:[%s8500_s0 + $0x98] sm:$0xff] }
  0x1d   : > { %v2041_v4 = vsel %vm2009_vm0, 1, %v8505_v5  ;;  %v2040_v6 = vsel %vm2008_vm1, 1, %v8505_v5  ;;  %vm1190_vm3 = vcmp.ge.s32.totalorder %v250_v2, 1  ;;  %vm1189_vm4 = vcmp.ge.s32.totalorder %v249_v3, 1  ;;  %v251_v8 = vld [vmem:[%s8500_s0 + $0x90] sm:$0xff]  ;;  %v254_v18 = vld [vmem:[%s8500_s0 + $0xa8] sm:$0xff] }
  0x1e   : > { %v1222_v9 = vsel %vm1190_vm3, 1, %v8505_v5  ;;  %v1221_v10 = vsel %vm1189_vm4, 1, %v8505_v5  ;;  %vm1192_vm5 = vcmp.ge.s32.totalorder %v252_v7, 1  ;;  %vm1191_vm6 = vcmp.ge.s32.totalorder %v251_v8, 1  ;;  %v256_v20 = vld [vmem:[%s8500_s0 + $0xb8] sm:$0xff]  ;;  %v255_v21 = vld [vmem:[%s8500_s0 + $0xb0] sm:$0xff] }
  0x1f   : > { %v1223_v13 = vsel %vm1191_vm6, 1, %v8505_v5  ;;  %vm2011_vm7 = vcmp.lt.s32.totalorder %v250_v2, 15  ;;  %vm2010_vm8 = vcmp.lt.s32.totalorder %v249_v3, 15  ;;  %vm2013_vm9 = vcmp.lt.s32.totalorder %v252_v7, 15  ;;  %v5634_v25 = vld [vmem:[%s8502_s2 + $0x20] sm:$0xff]   ;;  %v262_v40 = vld [vmem:[%s8500_s0 + $0xe8] sm:$0xff] }
  0x20   : > { %1253 = vperm.xlu1 %5614, %v1210_v27   ;;  %1250 = vperm.xlu0 %5613, %v1209_v28   ;;  %v2043_v14 = vsel %vm2011_vm7, 1, %v8505_v5  ;;  %v2042_v17 = vsel %vm2010_vm8, 1, %v8505_v5  ;;  %vm2012_vm10 = vcmp.lt.s32.totalorder %v251_v8, 15  ;;  %vm1194_vm11 = vcmp.ge.s32.totalorder %v254_v18, 1  ;;  %v261_v41 = vld [vmem:[%s8500_s0 + $0xe0] sm:$0xff] }
  0x21   : > { %5241 = vmatmul.mubr.msk.bf16.gmra.mxu1 %vm8528_vm2, %v5774_v16  ;;  %v2044_v19 = vsel %vm2012_vm10, 1, %v8505_v5  ;;  %v1226_v22 = vsel %vm1194_vm11, 1, %v8505_v5  ;;  %vm1196_vm13 = vcmp.ge.s32.totalorder %v256_v20, 1  ;;  %vm1195_vm14 = vcmp.ge.s32.totalorder %v255_v21, 1  ;;  %5298 = vmatprep.subr.bf16.mxu1 %v5634_v25 }
  0x22   : > { %5207 = vmatmul.mubr.msk.bf16.gmra.mxu0 %vm8528_vm2, %v5795_v23  ;;  %5244 = vmatprep.mubr.msk.bf16.mxu1 %vm8528_vm2, %v5795_v23  ;;  %vm2015_vm15 = vcmp.lt.s32.totalorder %v254_v18, 15  ;;  %vm2017_vm1 = vcmp.lt.s32.totalorder %v256_v20, 15  ;;  %vm2016_vm3 = vcmp.lt.s32.totalorder %v255_v21, 15 }
  0x23   : > { %5210 = vmatprep.mubr.msk.bf16.mxu0 %vm8528_vm2, %v5804_v26  ;;  %v2047_v27 = vsel %vm2015_vm15, 1, %v8505_v5  ;;  %5299 = vmatpush3.bf16.msra.mxu1 %v5634_v25 }
  0x24   : > { %1259 = vperm.xlu1 %5614, %v1212_v29   ;;  %1256 = vperm.xlu0 %5613, %v1211_v30   ;;  %v258_v29 = vld [vmem:[%s8500_s0 + $0xc8] sm:$0xff]  ;;  %v2049_v30 = vsel %vm2017_vm1, 1, %v8505_v5  ;;  %vm2022_vm1 = vcmp.lt.s32.totalorder %v261_v41, 15 }
  0x25   : > { %vm1198_vm4 = vcmp.ge.s32.totalorder %v258_v29, 1  ;;  %vm2019_vm8 = vcmp.lt.s32.totalorder %v258_v29, 15  ;;  %v2054_v51 = vsel %vm2022_vm1, 1, %v8505_v5 }
  0x26   : > { %v1230_v35 = vsel %vm1198_vm4, 1, %v8505_v5 }
  0x28   : > { %2074 = vperm.xlu1 %5614, %v2031_v33   ;;  %2071 = vperm.xlu0 %5613, %v2030_v34   ;;  %v260_v33 = vld [vmem:[%s8500_s0 + $0xd8] sm:$0xff]  ;;  %v259_v34 = vld [vmem:[%s8500_s0 + $0xd0] sm:$0xff] }
  0x29   : > { %5245 = vmatmul.mubr.msk.bf16.gmra.mxu1 %vm8528_vm2, %v5804_v26  ;;  %vm1200_vm6 = vcmp.ge.s32.totalorder %v260_v33, 1  ;;  %vm1199_vm7 = vcmp.ge.s32.totalorder %v259_v34, 1  ;;  %vm2021_vm10 = vcmp.lt.s32.totalorder %v260_v33, 15  ;;  %vm2020_vm11 = vcmp.lt.s32.totalorder %v259_v34, 15 }
  0x2a   : > { %5211 = vmatmul.mubr.msk.bf16.gmra.mxu0 %vm8528_vm2, %v5819_v31  ;;  %5248 = vmatprep.mubr.msk.bf16.mxu1 %vm8528_vm2, %v5819_v31 }
  0x2b   : > { %5214 = vmatprep.mubr.msk.bf16.mxu0 %vm8528_vm2, %v5822_v32 }
  0x2c   : > { %2080 = vperm.xlu1 %5614, %v2033_v37   ;;  %2077 = vperm.xlu0 %5613, %v2032_v38   ;;  %v1231_v37 = vsel %vm1199_vm7, 1, %v8505_v5  ;;  %v2051_v38 = vsel %vm2019_vm8, 1, %v8505_v5 }
  0x30   : > { %1265 = vperm.xlu1 %5614, %v1214_v43   ;;  %1262 = vperm.xlu0 %5613, %v1213_v44   ;;  %v2052_v43 = vsel %vm2020_vm11, 1, %v8505_v5  ;;  %v264_v44 = vld [vmem:[%s8500_s0 + $0xf8] sm:$0xff] }
  0x31   : > { %5249 = vmatmul.mubr.msk.bf16.gmra.mxu1 %vm8528_vm2, %v5822_v32 }
  0x32   : > { %5215 = vmatmul.mubr.msk.bf16.gmra.mxu0 %vm8528_vm2, %v5841_v39  ;;  %5252 = vmatprep.mubr.msk.bf16.mxu1 %vm8528_vm2, %v5841_v39 }
  0x33   : > { %5218 = vmatprep.mubr.msk.bf16.mxu0 %vm8528_vm2, %v5852_v42 }
  0x34   : > { %1271 = vperm.xlu1 %5614, %v1216_v45   ;;  %1268 = vperm.xlu0 %5613, %v1215_v46   ;;  %v263_v45 = vld [vmem:[%s8500_s0 + $0xf0] sm:$0xff] }
  0x35   : > { %vm1203_vm15 = vcmp.ge.s32.totalorder %v263_v45, 1  ;;  %vm2024_vm4 = vcmp.lt.s32.totalorder %v263_v45, 15 }
  0x38   : > { %2086 = vperm.xlu1 %5614, %v2035_v49   ;;  %2083 = vperm.xlu0 %5613, %v2034_v50   ;;  %v1235_v49 = vsel %vm1203_vm15, 1, %v8505_v5 }
  0x39   : > { %5253 = vmatmul.mubr.msk.bf16.gmra.mxu1 %vm8528_vm2, %v5852_v42 }
  0x3a   : > { %5219 = vmatmul.mubr.msk.bf16.gmra.mxu0 %vm8528_vm2, %v5867_v47  ;;  %5256 = vmatprep.mubr.msk.bf16.mxu1 %vm8528_vm2, %v5867_v47 }
  0x3b   : > { %5222 = vmatprep.mubr.msk.bf16.mxu0 %vm8528_vm2, %v5870_v48 }
  0x3c   : > { %2092 = vperm.xlu1 %5614, %v2037_v53   ;;  %2089 = vperm.xlu0 %5613, %v2036_v54   ;;  %v2056_v54 = vsel %vm2024_vm4, 1, %v8505_v5 }
  0x40   : > { %1277 = vperm.xlu1 %5614, %v1218_v59   ;;  %1274 = vperm.xlu0 %5613, %v1217_v60  }
  0x41   : > { %5257 = vmatmul.mubr.msk.bf16.gmra.mxu1 %vm8528_vm2, %v5870_v48 }
  0x42   : > { %5223 = vmatmul.mubr.msk.bf16.gmra.mxu0 %vm8528_vm2, %v5891_v55  ;;  %5260 = vmatprep.mubr.msk.bf16.mxu1 %vm8528_vm2, %v5891_v55 }
  0x43   : > { %5226 = vmatprep.mubr.msk.bf16.mxu0 %vm8528_vm2, %v5900_v58 }
  0x44   : > { %1283 = vperm.xlu1 %5614, %v1220_v61   ;;  %1280 = vperm.xlu0 %5613, %v1219_v62  }
  0x48   : > { %2098 = vperm.xlu1 %5614, %v2039_v0   ;;  %2095 = vperm.xlu0 %5613, %v2038_v1  }
  0x49   : > { %5261 = vmatmul.mubr.msk.bf16.gmra.mxu1 %vm8528_vm2, %v5900_v58 }
  0x4a   : > { %5227 = vmatmul.mubr.msk.bf16.gmra.mxu0 %vm8528_vm2, %v5915_v63 }
  0x4b   : > { %5266 = vmatprep.mubr.msk.bf16.mxu0 %vm8528_vm2, %v5754_v11  ;;  %v1224_v11 = vsel %vm1192_vm5, 1, %v8505_v5 }
  0x4c   : > { %2104 = vperm.xlu1 %5614, %v2041_v4   ;;  %2101 = vperm.xlu0 %5613, %v2040_v6  }
  0x50   : > { %1289 = vperm.xlu1 %5614, %v1222_v9   ;;  %1286 = vperm.xlu0 %5613, %v1221_v10  }
  0x52   : > { %5267 = vmatmul.mubr.msk.bf16.vlgmr.msra.gmra.mxu0 %vm8528_vm2, %v5757_v12  ;;  %v253_v12 = vld [vmem:[%s8500_s0 + $0xa0] sm:$0xff] }
  0x53   : > { %5270 = vmatprep.mubr.msk.bf16.mxu0 %vm8528_vm2, %v5771_v15  ;;  %v2045_v15 = vsel %vm2013_vm9, 1, %v8505_v5  ;;  %vm1193_vm12 = vcmp.ge.s32.totalorder %v253_v12, 1  ;;  %vm2014_vm0 = vcmp.lt.s32.totalorder %v253_v12, 15 }
  0x54   : > { %1295 = vperm.xlu1 %5614, %v1224_v11   ;;  %1292 = vperm.xlu0 %5613, %v1223_v13   ;;  %v1225_v24 = vsel %vm1193_vm12, 1, %v8505_v5  ;;  %v2046_v28 = vsel %vm2014_vm0, 1, %v8505_v5  ;;  %vm1202_vm12 = vcmp.ge.s32.totalorder %v262_v40, 1  ;;  %vm2023_vm0 = vcmp.lt.s32.totalorder %v262_v40, 15  ;;  %v5635_v11 = vld [vmem:[%s8502_s2 + $0x18] sm:$0xff]  }
  0x55   : > { %v1234_v46 = vsel %vm1202_vm12, 1, %v8505_v5  ;;  %v2055_v50 = vsel %vm2023_vm0, 1, %v8505_v5  ;;  %5332 = vmatprep.subr.bf16.mxu0 %v5635_v11 }
  0x56   : > { %5333 = vmatpush3.bf16.msra.mxu0 %v5635_v11 }
  0x58   : > { %2110 = vperm.xlu1 %5614, %v2043_v14   ;;  %2107 = vperm.xlu0 %5613, %v2042_v17  }
  0x5a   : > { %5271 = vmatmul.mubr.msk.bf16.gmra.mxu0 %vm8528_vm2, %v5774_v16  ;;  %v1228_v16 = vsel %vm1196_vm13, 1, %v8505_v5  ;;  %vm1201_vm13 = vcmp.ge.s32.totalorder %v261_v41, 1 }
  0x5b   : > { %5274 = vmatprep.mubr.msk.bf16.mxu0 %vm8528_vm2, %v5795_v23  ;;  %v1227_v23 = vsel %vm1195_vm14, 1, %v8505_v5  ;;  %vm1204_vm14 = vcmp.ge.s32.totalorder %v264_v44, 1 }
  0x5c   : > { %2116 = vperm.xlu1 %5614, %v2045_v15   ;;  %2113 = vperm.xlu0 %5613, %v2044_v19  }
  0x60   : > { %1301 = vperm.xlu1 %5614, %v1226_v22   ;;  %1298 = vperm.xlu0 %5613, %v1225_v24   ;;  %v6095_v22 = vld [vmem:[%s8502_s2 + $0x28] sm:$0xff]  }
  0x61   : > { %8613 = vst [vmem:[#allocation10_spill] sm:$0xff] %v6095_v22  ;;  %5366 = vmatprep.subr.bf16.mxu1 %v6095_v22 }
  0x62   : > { %5275 = vmatmul.mubr.msk.bf16.gmra.mxu0 %vm8528_vm2, %v5804_v26  ;;  %v257_v26 = vld [vmem:[%s8500_s0 + $0xc0] sm:$0xff] }
  0x63   : > { %5278 = vmatprep.mubr.msk.bf16.mxu0 %vm8528_vm2, %v5819_v31  ;;  %v2048_v31 = vsel %vm2016_vm3, 1, %v8505_v5  ;;  %vm1197_vm5 = vcmp.ge.s32.totalorder %v257_v26, 1  ;;  %vm2018_vm9 = vcmp.lt.s32.totalorder %v257_v26, 15  ;;  %vm2025_vm3 = vcmp.lt.s32.totalorder %v264_v44, 15 }
  0x64   : > { %1307 = vperm.xlu1 %5614, %v1228_v16   ;;  %1304 = vperm.xlu0 %5613, %v1227_v23   ;;  %v1229_v36 = vsel %vm1197_vm5, 1, %v8505_v5  ;;  %v2057_v53 = vsel %vm2025_vm3, 1, %v8505_v5 }
  0x68   : > { %2122 = vperm.xlu1 %5614, %v2047_v27   ;;  %2119 = vperm.xlu0 %5613, %v2046_v28  }
  0x6a   : > { %5279 = vmatmul.mubr.msk.bf16.gmra.mxu0 %vm8528_vm2, %v5822_v32  ;;  %v1232_v32 = vsel %vm1200_vm6, 1, %v8505_v5 }
  0x6b   : > { %5282 = vmatprep.mubr.msk.bf16.mxu0 %vm8528_vm2, %v5841_v39  ;;  %v2050_v39 = vsel %vm2018_vm9, 1, %v8505_v5 }
  0x6c   : > { %2128 = vperm.xlu1 %5614, %v2049_v30   ;;  %2125 = vperm.xlu0 %5613, %v2048_v31  }
  0x70   : > { %1313 = vperm.xlu1 %5614, %v1230_v35   ;;  %1310 = vperm.xlu0 %5613, %v1229_v36  }
  0x72   : > { %5283 = vmatmul.mubr.msk.bf16.gmra.mxu0 %vm8528_vm2, %v5852_v42  ;;  %v2053_v42 = vsel %vm2021_vm10, 1, %v8505_v5 }
  0x73   : > { %5286 = vmatprep.mubr.msk.bf16.mxu0 %vm8528_vm2, %v5867_v47  ;;  %v1233_v47 = vsel %vm1201_vm13, 1, %v8505_v5 }
  0x74   : > { %1319 = vperm.xlu1 %5614, %v1232_v32   ;;  %1316 = vperm.xlu0 %5613, %v1231_v37  }
  0x78   : > { %2134 = vperm.xlu1 %5614, %v2051_v38   ;;  %2131 = vperm.xlu0 %5613, %v2050_v39  }
  0x7a   : > { %5287 = vmatmul.mubr.msk.bf16.gmra.mxu0 %vm8528_vm2, %v5870_v48  ;;  %v1236_v48 = vsel %vm1204_vm14, 1, %v8505_v5 }
  0x7b   : > { %5290 = vmatprep.mubr.msk.bf16.mxu0 %vm8528_vm2, %v5891_v55 }
  0x7c   : > { %2140 = vperm.xlu1 %5614, %v2053_v42   ;;  %2137 = vperm.xlu0 %5613, %v2052_v43  }
  0x80   : > { %1325 = vperm.xlu1 %5614, %v1234_v46   ;;  %1322 = vperm.xlu0 %5613, %v1233_v47  }
  0x82   : > { %5291 = vmatmul.mubr.msk.bf16.gmra.mxu0 %vm8528_vm2, %v5900_v58 }
  0x83   : > { %5294 = vmatprep.mubr.msk.bf16.mxu0 %vm8528_vm2, %v5915_v63 }
  0x84   : > { %1331 = vperm.xlu1 %5614, %v1236_v48   ;;  %1328 = vperm.xlu0 %5613, %v1235_v49  }
  0x88   : > { %2146 = vperm.xlu1 %5614, %v2055_v50   ;;  %2143 = vperm.xlu0 %5613, %v2054_v51  }
  0x8a   : > { %5295 = vmatmul.mubr.bf16.gmra.mxu0 %v8505_v5 }
  0x8b   : > { %v6036_v52 = vpop.permute.xlu1 %1244  ;;  %v6041_v55 = vpop.permute.xlu0 %1238 }
  0x8c   : > { %2152 = vperm.xlu1 %5614, %v2057_v53   ;;  %2149 = vperm.xlu0 %5613, %v2056_v54  }
  0x8f   : > { %v6043_v56 = vpop.permute.xlu1 %1247  ;;  %v6045_v57 = vpop.permute.xlu0 %1241 }
  0x93   : > { %v2063_v58 = vpop.permute.xlu1 %2062  ;;  %v2060_v59 = vpop.permute.xlu0 %2059 }
  0x94   : > { %vm2155_vm5 = vcmp.eq.s32.totalorder %v2063_v58, 1  ;;  %vm2154_vm6 = vcmp.eq.s32.totalorder %v2060_v59, 1 }
  0x95   : > { %vm2187_vm7 = vmpackc.low %vm2155_vm5, %vm2155_vm5 }
  0x96   : > { %v6048_v60 = vsel %vm2187_vm7, 65537, %v8505_v5  ;;  %vm2186_vm8 = vmpackc.low %vm2154_vm6, %vm2154_vm6 }
  0x97   : > { %8605 = vst [vmem:[#allocation2_spill] sm:$0xff] %v6048_v60  ;;  %v6051_v61 = vsel %vm2186_vm8, 65537, %v8505_v5  ;;  %v2069_v62 = vpop.permute.xlu1 %2068  ;;  %v2066_v63 = vpop.permute.xlu0 %2065 }
  0x98   : > { %8606 = vst [vmem:[#allocation3_spill] sm:$0xff] %v6051_v61  ;;  %vm2157_vm9 = vcmp.eq.s32.totalorder %v2069_v62, 1  ;;  %vm2156_vm10 = vcmp.eq.s32.totalorder %v2066_v63, 1 }
  0x99   : > { %vm2189_vm11 = vmpackc.low %vm2157_vm9, %vm2157_vm9 }
  0x9a   : > { %v6056_v1 = vsel %vm2189_vm11, 65537, %v8505_v5  ;;  %vm2188_vm12 = vmpackc.low %vm2156_vm10, %vm2156_vm10 }
  0x9b   : > { %8607 = vst [vmem:[#allocation4_spill] sm:$0xff] %v6056_v1  ;;  %v6059_v2 = vsel %vm2188_vm12, 65537, %v8505_v5  ;;  %v6061_v3 = vpop.permute.xlu1 %1253  ;;  %v6063_v4 = vpop.permute.xlu0 %1250 }
  0x9c   : > { %8608 = vst [vmem:[#allocation5_spill] sm:$0xff] %v6059_v2 }
  0x9f   : > { %v6067_v7 = vpop.permute.xlu1 %1259  ;;  %v6069_v8 = vpop.permute.xlu0 %1256 }
  0xa3   : > { %v2075_v9 = vpop.permute.xlu1 %2074  ;;  %v2072_v10 = vpop.permute.xlu0 %2071 }
  0xa4   : > { %vm2159_vm13 = vcmp.eq.s32.totalorder %v2075_v9, 1  ;;  %vm2158_vm14 = vcmp.eq.s32.totalorder %v2072_v10, 1 }
  0xa5   : > { %vm2191_vm15 = vmpackc.low %vm2159_vm13, %vm2159_vm13 }
  0xa6   : > { %v6075_v13 = vsel %vm2191_vm15, 65537, %v8505_v5  ;;  %vm2190_vm0 = vmpackc.low %vm2158_vm14, %vm2158_vm14 }
  0xa7   : > { %8609 = vst [vmem:[#allocation6_spill] sm:$0xff] %v6075_v13  ;;  %v6078_v14 = vsel %vm2190_vm0, 65537, %v8505_v5  ;;  %v2081_v17 = vpop.permute.xlu1 %2080  ;;  %v2078_v18 = vpop.permute.xlu0 %2077 }
  0xa8   : > { %8610 = vst [vmem:[#allocation7_spill] sm:$0xff] %v6078_v14  ;;  %vm2161_vm1 = vcmp.eq.s32.totalorder %v2081_v17, 1  ;;  %vm2160_vm3 = vcmp.eq.s32.totalorder %v2078_v18, 1 }
  0xa9   : > { %vm2193_vm4 = vmpackc.low %vm2161_vm1, %vm2161_vm1 }
  0xaa   : > { %v6083_v15 = vsel %vm2193_vm4, 65537, %v8505_v5  ;;  %vm2192_vm5 = vmpackc.low %vm2160_vm3, %vm2160_vm3 }
  0xab   : > { %8611 = vst [vmem:[#allocation8_spill] sm:$0xff] %v6083_v15  ;;  %v6086_v19 = vsel %vm2192_vm5, 65537, %v8505_v5  ;;  %v6088_v20 = vpop.permute.xlu1 %1265  ;;  %v6090_v21 = vpop.permute.xlu0 %1262 }
  0xac   : > { %8612 = vst [vmem:[#allocation9_spill] sm:$0xff] %v6086_v19 }
  0xaf   : > { %v6100_v16 = vpop.permute.xlu1 %1271  ;;  %v6102_v23 = vpop.permute.xlu0 %1268 }
  0xb3   : > { %v2087_v25 = vpop.permute.xlu1 %2086  ;;  %v2084_v27 = vpop.permute.xlu0 %2083 }
  0xb4   : > { %vm2163_vm6 = vcmp.eq.s32.totalorder %v2087_v25, 1  ;;  %vm2162_vm7 = vcmp.eq.s32.totalorder %v2084_v27, 1 }
  0xb5   : > { %vm2195_vm8 = vmpackc.low %vm2163_vm6, %vm2163_vm6 }
  0xb6   : > { %v6105_v28 = vsel %vm2195_vm8, 65537, %v8505_v5  ;;  %vm2194_vm9 = vmpackc.low %vm2162_vm7, %vm2162_vm7 }
  0xb7   : > { %8614 = vst [vmem:[#allocation11_spill] sm:$0xff] %v6105_v28  ;;  %v6108_v29 = vsel %vm2194_vm9, 65537, %v8505_v5  ;;  %v2093_v26 = vpop.permute.xlu1 %2092  ;;  %v2090_v30 = vpop.permute.xlu0 %2089 }
  0xb8   : > { %8615 = vst [vmem:[#allocation12_spill] sm:$0xff] %v6108_v29  ;;  %vm2165_vm10 = vcmp.eq.s32.totalorder %v2093_v26, 1  ;;  %vm2164_vm11 = vcmp.eq.s32.totalorder %v2090_v30, 1 }
  0xb9   : > { %vm2197_vm12 = vmpackc.low %vm2165_vm10, %vm2165_vm10 }
  0xba   : > { %v6113_v33 = vsel %vm2197_vm12, 65537, %v8505_v5  ;;  %vm2196_vm13 = vmpackc.low %vm2164_vm11, %vm2164_vm11 }
  0xbb   : > { %8616 = vst [vmem:[#allocation13_spill] sm:$0xff] %v6113_v33  ;;  %v6116_v34 = vsel %vm2196_vm13, 65537, %v8505_v5  ;;  %v6118_v35 = vpop.permute.xlu1 %1277  ;;  %v6120_v36 = vpop.permute.xlu0 %1274 }
  0xbc   : > { %8617 = vst [vmem:[#allocation14_spill] sm:$0xff] %v6116_v34  ;;  %vm1346_vm2 = vcmp.eq.s32.totalorder %v6118_v35, 1 }
  0xbf   : > { %v6124_v37 = vpop.permute.xlu1 %1283  ;;  %v6126_v38 = vpop.permute.xlu0 %1280 }
  0xc3   : > { %v2099_v39 = vpop.permute.xlu1 %2098  ;;  %v2096_v40 = vpop.permute.xlu0 %2095 }
  0xc4   : > { %vm2167_vm14 = vcmp.eq.s32.totalorder %v2099_v39, 1  ;;  %vm2166_vm15 = vcmp.eq.s32.totalorder %v2096_v40, 1 }
  0xc5   : > { %vm2199_vm0 = vmpackc.low %vm2167_vm14, %vm2167_vm14 }
  0xc6   : > { %v6129_v41 = vsel %vm2199_vm0, 65537, %v8505_v5  ;;  %vm2198_vm1 = vmpackc.low %vm2166_vm15, %vm2166_vm15  ;;  %vm1335_vm15 = vcmp.eq.s32.totalorder %v6036_v52, 1  ;;  %vm1333_vm0 = vcmp.eq.s32.totalorder %v6041_v55, 1 }
  0xc7   : > { %8618 = vst [vmem:[#allocation15_spill] sm:$0xff] %v6129_v41  ;;  %v6132_v42 = vsel %vm2198_vm1, 65537, %v8505_v5  ;;  %v2105_v43 = vpop.permute.xlu1 %2104  ;;  %v2102_v44 = vpop.permute.xlu0 %2101  ;;  %vm1336_vm1 = vcmp.eq.s32.totalorder %v6043_v56, 1 }
  0xc8   : > { %8619 = vst [vmem:[#allocation16_spill] sm:$0xff] %v6132_v42  ;;  %vm2169_vm3 = vcmp.eq.s32.totalorder %v2105_v43, 1  ;;  %vm2168_vm4 = vcmp.eq.s32.totalorder %v2102_v44, 1 }
  0xc9   : > { %vm2201_vm5 = vmpackc.low %vm2169_vm3, %vm2169_vm3 }
  0xca   : > { %v6137_v46 = vsel %vm2201_vm5, 65537, %v8505_v5  ;;  %vm2200_vm6 = vmpackc.low %vm2168_vm4, %vm2168_vm4  ;;  %vm1334_vm4 = vcmp.eq.s32.totalorder %v6045_v57, 1 }
  0xcb   : > { %8620 = vst [vmem:[#allocation17_spill] sm:$0xff] %v6137_v46  ;;  %v6140_v47 = vsel %vm2200_vm6, 65537, %v8505_v5  ;;  %v6142_v48 = vpop.permute.xlu1 %1289  ;;  %v6144_v49 = vpop.permute.xlu0 %1286  ;;  %vm6257_vm3 = vmpackc.low %vm1335_vm15, %vm1335_vm15  ;;  %vm1338_vm6 = vcmp.eq.s32.totalorder %v6061_v3, 1 }
  0xcc   : > { %8621 = vst [vmem:[#allocation18_spill] sm:$0xff] %v6140_v47  ;;  %vm6264_vm5 = vmpackc.low %vm1333_vm0, %vm1333_vm0 }
  0xcf   : > { %v6148_v51 = vpop.permute.xlu1 %1295  ;;  %v6150_v53 = vpop.permute.xlu0 %1292 }
  0xd1   : > { %v6152_v54 = vpop.f32.mrf.mxu1 }
  0xd2   : > { %v6154_v58 = vpop.f32.mrf.mxu0 }
  0xd3   : > { %v6156_v59 = vpop.f32.mrf.mxu1  ;;  %v2111_v62 = vpop.permute.xlu1 %2110 }
  0xd4   : > { %v6158_v63 = vpop.f32.mrf.mxu0  ;;  %vm2171_vm7 = vcmp.eq.s32.totalorder %v2111_v62, 1  ;;  %v2108_v9 = vpop.permute.xlu0 %2107 }
  0xd5   : > { %v6160_v10 = vpop.f32.mrf.mxu1  ;;  %vm2203_vm8 = vmpackc.low %vm2171_vm7, %vm2171_vm7  ;;  %vm2170_vm9 = vcmp.eq.s32.totalorder %v2108_v9, 1  ;;  %vm1337_vm7 = vcmp.eq.s32.totalorder %v6063_v4, 1 }
  0xd6   : > { %v6162_v11 = vpop.f32.mrf.mxu0  ;;  %v6165_v17 = vsel %vm2203_vm8, 65537, %v8505_v5  ;;  %vm2202_vm10 = vmpackc.low %vm2170_vm9, %vm2170_vm9  ;;  %vm1340_vm8 = vcmp.eq.s32.totalorder %v6067_v7, 1 }
  0xd7   : > { %8622 = vst [vmem:[#allocation19_spill] sm:$0xff] %v6165_v17  ;;  %v6167_v18 = vpop.f32.mrf.mxu1  ;;  %v6170_v25 = vsel %vm2202_vm10, 65537, %v8505_v5  ;;  %v2117_v27 = vpop.permute.xlu1 %2116  ;;  %vm6273_vm9 = vmpackc.low %vm1336_vm1, %vm1336_vm1  ;;  %vm1339_vm10 = vcmp.eq.s32.totalorder %v6069_v8, 1  ;;  %vm1344_vm1 = vcmp.eq.s32.totalorder %v6100_v16, 1 }
  0xd8   : > { %8623 = vst [vmem:[#allocation20_spill] sm:$0xff] %v6170_v25  ;;  %v6172_v26 = vpop.f32.mrf.mxu0  ;;  %vm2173_vm11 = vcmp.eq.s32.totalorder %v2117_v27, 1  ;;  %v2114_v39 = vpop.permute.xlu0 %2113  ;;  %vm6290_vm15 = vmpackc.low %vm1337_vm7, %vm1337_vm7  ;;  %vm1343_vm7 = vcmp.eq.s32.totalorder %v6102_v23, 1  ;;  %v8662_v23 = vmov 0 }
  0xd9   : > { %v6176_v40 = vpop.f32.mrf.mxu1  ;;  %vm2205_vm12 = vmpackc.low %vm2173_vm11, %vm2173_vm11  ;;  %vm2172_vm13 = vcmp.eq.s32.totalorder %v2114_v39, 1  ;;  %vm1342_vm11 = vcmp.eq.s32.totalorder %v6088_v20, 1 }
  0xda   : > { %v6178_v43 = vpop.f32.mrf.mxu0  ;;  %v6181_v44 = vsel %vm2205_vm12, 65537, %v8505_v5  ;;  %vm2204_vm14 = vmpackc.low %vm2172_vm13, %vm2172_vm13  ;;  %vm1341_vm13 = vcmp.eq.s32.totalorder %v6090_v21, 1  ;;  %v8652_v21 = vmov 0 }
  0xdb   : > { %8624 = vst [vmem:[#allocation21_spill] sm:$0xff] %v6181_v44  ;;  %v6183_v62 = vpop.f32.mrf.mxu1  ;;  %v6186_v9 = vsel %vm2204_vm14, 65537, %v8505_v5  ;;  %v6210_v5 = vpop.permute.xlu1 %1301  ;;  %vm6279_vm12 = vmpackc.low %vm1334_vm4, %vm1334_vm4 }
  0xdc   : > { %8625 = vst [vmem:[#allocation22_spill] sm:$0xff] %v6186_v9  ;;  %v6188_v50 = vpop.f32.mrf.mxu0  ;;  %v6214_v44 = vpop.permute.xlu0 %1298  ;;  %vm6286_vm14 = vmpackc.low %vm1338_vm6, %vm1338_vm6 }
  0xdd   : > { %v6192_v30 = vpop.f32.mrf.mxu1  ;;  %vm6294_vm0 = vmpackc.low %vm1340_vm8, %vm1340_vm8 }
  0xde   : > { %v6194_v45 = vpop.f32.mrf.mxu0  ;;  %vm6303_vm4 = vmpackc.low %vm1339_vm10, %vm1339_vm10 }
  0xdf   : > { %v6196_v39 = vpop.f32.mrf.mxu1  ;;  %v6222_v46 = vpop.permute.xlu1 %1307  ;;  %v8653_v21 = vsel %vm6303_vm4, 4294967295, %v8652_v21  ;;  %vm6307_vm6 = vmpackc.low %vm1342_vm11, %vm1342_vm11  ;;  %vm1345_vm11 = vcmp.eq.s32.totalorder %v6120_v36, 1  ;;  %vm1348_vm4 = vcmp.eq.s32.totalorder %v6124_v37, 1 }
  0xe0   : > { %v6198_v32 = vpop.f32.mrf.mxu0  ;;  %v6224_v47 = vpop.permute.xlu0 %1304  ;;  %vm6316_vm8 = vmpackc.low %vm1341_vm13, %vm1341_vm13 }
  0xe1   : > { %v6202_v24 = vpop.f32.mrf.mxu1  ;;  %vm6321_vm10 = vmpackc.low %vm1344_vm1, %vm1344_vm1  ;;  %vm1347_vm1 = vcmp.eq.s32.totalorder %v6126_v38, 1 }
  0xe2   : > { %v6200_v31 = vpop.f32.mrf.mxu0  ;;  %vm6335_vm13 = vmpackc.low %vm1346_vm2, %vm1346_vm2 }
  0xe3   : > { %v6208_v0 = vpop.f32.mrf.mxu1  ;;  %v6236_v29 = vpop.permute.xlu1 %2122  ;;  %vm6369_vm2 = vmpackc.low %vm1348_vm4, %vm1348_vm4  ;;  %vm1351_vm4 = vcmp.eq.s32.totalorder %v6150_v53, 1 }
  0xe4   : > { %v6204_v12 = vpop.f32.mrf.mxu0  ;;  %8627 = vst [vmem:[#allocation24_spill] sm:$0xff] %v6236_v29  ;;  %v6238_v15 = vpop.permute.xlu0 %2119 }
  0xe5   : > { %v6218_v17 = vpop.f32.mrf.mxu1  ;;  %8628 = vst [vmem:[#allocation25_spill] sm:$0xff] %v6238_v15 }
  0xe6   : > { %v6206_v6 = vpop.f32.mrf.mxu0 }
  0xe7   : > { %v6228_v42 = vpop.f32.mrf.mxu1  ;;  %v6250_v2 = vpop.permute.xlu1 %2128 }
  0xe8   : > { %v6212_v27 = vpop.f32.mrf.mxu0  ;;  %8632 = vst [vmem:[#allocation29_spill] sm:$0xff] %v6250_v2  ;;  %v6253_v60 = vpop.permute.xlu0 %2125  ;;  %v8654_v2 = vmov 0 }
  0xe9   : > { %v6234_v28 = vpop.f32.mrf.mxu1  ;;  %8633 = vst [vmem:[#allocation30_spill] sm:$0xff] %v6253_v60  ;;  %v8655_v2 = vsel %vm6307_vm6, 4294967295, %v8654_v2  ;;  %vm6328_vm6 = vmpackc.low %vm1343_vm7, %vm1343_vm7 }
  0xea   : > { %v6216_v9 = vpop.f32.mrf.mxu0  ;;  %v8663_v23 = vsel %vm6328_vm6, 4294967295, %v8662_v23  ;;  %vm6347_vm7 = vmpackc.low %vm1345_vm11, %vm1345_vm11  ;;  %vm1350_vm6 = vcmp.eq.s32.totalorder %v6142_v48, 1 }
  0xeb   : > { %v6244_v14 = vpop.f32.mrf.mxu1  ;;  %v6301_v60 = vpop.permute.xlu1 %1313 }
  0xec   : > { %v6220_v25 = vpop.f32.mrf.mxu0  ;;  %v6312_v22 = vpop.permute.xlu0 %1310 }
  0xed   : > { %v6262_v61 = vpop.f32.mrf.mxu1 }
  0xee   : > { %v6226_v41 = vpop.f32.mrf.mxu0 }
  0xef   : > { %v6299_v20 = vpop.f32.mrf.mxu1  ;;  %v6352_v37 = vpop.permute.xlu1 %1319 }
  0xf0   : > { %v6230_v33 = vpop.f32.mrf.mxu0  ;;  %8651 = vst [vmem:[#allocation34_spill] sm:$0xff] %v6299_v20  ;;  %v6374_v48 = vpop.permute.xlu0 %1316 }
  0xf2   : > { %v6232_v34 = vpop.f32.mrf.mxu0 }
  0xf3   : > { %8626 = vst [vmem:[#allocation23_spill] sm:$0xff] %v6232_v34 }
  0xf4   : > { %v6240_v19 = vpop.f32.mrf.mxu0 }
  0xf5   : > { %8629 = vst [vmem:[#allocation26_spill] sm:$0xff] %v6240_v19 }
  0xf6   : > { %v6242_v13 = vpop.f32.mrf.mxu0 }
  0xf7   : > { %8630 = vst [vmem:[#allocation27_spill] sm:$0xff] %v6242_v13  ;;  %v8668_v13 = vmov 0  }
  0xf8   : > { %v6247_v1 = vpop.f32.mrf.mxu0  ;;  %v6345_v36 = vsel %vm6257_vm3, 65537, %v8668_v13  ;;  %v6357_v19 = vsel %vm6264_vm5, 65537, %v8668_v13  ;;  %v6362_v38 = vsel %vm6273_vm9, 65537, %v8668_v13  ;;  %v6367_v15 = vsel %vm6279_vm12, 65537, %v8668_v13  ;;  %vm6378_vm5 = vmpackc.low %vm1347_vm1, %vm1347_vm1 }
  0xf9   : > { %8631 = vst [vmem:[#allocation28_spill] sm:$0xff] %v6247_v1  ;;  %8669 = vst [vmem:[#allocation39_spill] sm:$0xff] %v6345_v36  ;;  %vm1349_vm3 = vcmp.eq.s32.totalorder %v6144_v49, 1  ;;  %vm1352_vm9 = vcmp.eq.s32.totalorder %v6148_v51, 1  ;;  %v6403_v51 = vsel %vm6286_vm14, 65537, %v8668_v13  ;;  %v6408_v53 = vsel %vm6290_vm15, 65537, %v8668_v13 }
  0xfa   : > { %v6255_v29 = vpop.f32.mrf.mxu0  ;;  %8672 = vst [vmem:[#allocation40_spill] sm:$0xff] %v6357_v19  ;;  %8673 = vst [vmem:[#allocation41_spill] sm:$0xff] %v6362_v38  ;;  %v6413_v49 = vsel %vm6294_vm0, 65537, %v8668_v13  ;;  %vm1354_vm1 = vcmp.eq.s32.totalorder %v6210_v5, 1  ;;  %vm8688_vm14 = vnez %v8653_v21  ;;  %vm8689_vm15 = vnez %v8655_v2  ;;  %v6444_v21 = vpop.permute.xlu1 %2134 }
  0xfb   : > { %8634 = vst [vmem:[#allocation31_spill] sm:$0xff] %v6255_v29  ;;  %8674 = vst [vmem:[#allocation42_spill] sm:$0xff] %v6367_v15  ;;  %v6425_v4 = vsel %vm8688_vm14, 65537, %v8668_v13  ;;  %v6430_v7 = vsel %vm8689_vm15, 65537, %v8668_v13  ;;  %v6435_v8 = vsel %vm6316_vm8, 65537, %v8668_v13  ;;  %v6449_v2 = vsel %vm6321_vm10, 65537, %v8668_v13  ;;  %v6462_v38 = vpop.permute.xlu0 %2131 }
  0xfc   : > { %v6271_v55 = vpop.f32.mrf.mxu0  ;;  %vm6385_vm12 = vmpackc.low %vm1350_vm6, %vm1350_vm6  ;;  %8692 = vst [vmem:[#allocation46_spill] sm:$0xff] %v6444_v21  ;;  %v6459_v19 = vsel %vm6335_vm13, 65537, %v8668_v13  ;;  %vm1356_vm8 = vcmp.eq.s32.totalorder %v6222_v46, 1  ;;  %v6479_v1 = vsel %vm6378_vm5, 65537, %v8668_v13  ;;  %vm1355_vm13 = vcmp.eq.s32.totalorder %v6224_v47, 1 }
  0xfd   : > { %8639 = vst [vmem:[#allocation32_spill] sm:$0xff] %v6271_v55  ;;  %vm6396_vm11 = vmpackc.low %vm1349_vm3, %vm1349_vm3  ;;  %vm1353_vm3 = vcmp.eq.s32.totalorder %v6214_v44, 1  ;;  %v6469_v55 = vsel %vm6347_vm7, 65537, %v8668_v13  ;;  %vm1358_vm5 = vcmp.eq.s32.totalorder %v6301_v60, 1  ;;  %v623_v60 = vadd.f32 %v6152_v54, %v6154_v58 }
  0xfe   : > { %v6284_v3 = vpop.f32.mrf.mxu0  ;;  %vm6415_vm6 = vmpackc.low %vm1352_vm9, %vm1352_vm9  ;;  %vm8693_vm9 = vnez %v8663_v23  ;;  %8694 = vst [vmem:[#allocation47_spill] sm:$0xff] %v6462_v38  ;;  %v6474_v23 = vsel %vm6369_vm2, 65537, %v8668_v13  ;;  %v6557_v47 = vpop.permute.xlu1 %2140  ;;  %v631_v44 = vadd.f32 %v6183_v62, %v6188_v50  ;;  %v6605_v46 = vadd.f32 %v6192_v30, %v6194_v45 }
  0xff   : > { %8644 = vst [vmem:[#allocation33_spill] sm:$0xff] %v6284_v3  ;;  %vm6437_vm0 = vmpackc.low %vm1351_vm4, %vm1351_vm4  ;;  %v6454_v16 = vsel %vm8693_vm9, 65537, %v8668_v13  ;;  %v6502_v5 = vsel %vm6415_vm6, 65537, %v8668_v13  ;;  %vm1357_vm4 = vcmp.eq.s32.totalorder %v6312_v22, 1  ;;  %v6621_v50 = vadd.f32 %v6196_v39, %v6198_v32 }
 0x100   : > { %v6314_v3 = vpop.f32.mrf.mxu0  ;;  %vm6484_vm10 = vmpackc.low %vm1354_vm1, %vm1354_vm1  ;;  %8706 = vst [vmem:[#allocation51_spill] sm:$0xff] %v6557_v47  ;;  %vm1359_vm1 = vcmp.eq.s32.totalorder %v6374_v48, 1  ;;  %v6625_v45 = vadd.f32 %v6202_v24, %v6200_v31  ;;  %v6638_v32 = vadd.f32 %v6218_v17, %v6206_v6  ;;  %v6642_v24 = vadd.f32 %v6228_v42, %v6212_v27  ;;  %v8727_v30 = vld [vmem:[#allocation28_spill] sm:$0xff] }
 0x101   : > { %8656 = vst [vmem:[#allocation35_spill] sm:$0xff] %v6314_v3  ;;  %v6333_v3 = vpop.f32.mrf.mxu1  ;;  %vm6512_vm7 = vmpackc.low %vm1353_vm3, %vm1353_vm3  ;;  %v6659_v27 = vadd.f32 %v6234_v28, %v6216_v9  ;;  %v6673_v28 = vadd.f32 %v6244_v14, %v6220_v25  ;;  %v6677_v9 = vadd.f32 %v6262_v61, %v6226_v41 }
 0x102   : > { %v6326_v29 = vpop.f32.mrf.mxu0  ;;  %8664 = vst [vmem:[#allocation37_spill] sm:$0xff] %v6333_v3  ;;  %v6497_v3 = vsel %vm6396_vm11, 65537, %v8668_v13  ;;  %vm6527_vm2 = vmpackc.low %vm1356_vm8, %vm1356_vm8  ;;  %vm1360_vm11 = vcmp.eq.s32.totalorder %v6352_v37, 1  ;;  %v6569_v54 = vsel %vm6512_vm7, 65537, %v8668_v13  ;;  %vm8545_vm8 = vsmask.f32 256 }
 0x103   : > { %8661 = vst [vmem:[#allocation36_spill] sm:$0xff] %v6326_v29  ;;  %v6383_v56 = vpop.f32.mrf.mxu1  ;;  %v6492_v29 = vsel %vm6385_vm12, 65537, %v8668_v13  ;;  %vm6543_vm12 = vmpackc.low %vm1355_vm13, %vm1355_vm13 }
 0x104   : > { %v6340_v35 = vpop.f32.mrf.mxu0  ;;  %vm6571_vm6 = vmpackc.low %vm1358_vm5, %vm1358_vm5  ;;  %v6588_v38 = vsel %vm6543_vm12, 65537, %v8668_v13  ;;  %vm8544_vm5 = vsmask.f32 7424 }
 0x105   : > { %8667 = vst [vmem:[#allocation38_spill] sm:$0xff] %v6340_v35  ;;  %v6507_v35 = vsel %vm6437_vm0, 65537, %v8668_v13  ;;  %8711 = vst [vmem:[#allocation54_spill] sm:$0xff] %v6588_v38  ;;  %v6649_v39 = vsel %vm6571_vm6, 65537, %v8668_v13  ;;  %v8756_v38 = vmov 0 }
 0x106   : > { %v6376_v52 = vpop.f32.mrf.mxu0  ;;  %vm6593_vm14 = vmpackc.low %vm1357_vm4, %vm1357_vm4  ;;  %8716 = vst [vmem:[#allocation55_spill] sm:$0xff] %v6649_v39 }
 0x107   : > { %8677 = vst [vmem:[#allocation43_spill] sm:$0xff] %v6376_v52  ;;  %v6576_v52 = vpop.permute.xlu0 %2137  ;;  %vm6610_vm15 = vmpackc.low %vm1360_vm11, %vm1360_vm11  ;;  %vm8745_vm11 = vcmask 130048  }
 0x108   : > { %v6390_v34 = vpop.f32.mrf.mxu0  ;;  %8709 = vst [vmem:[#allocation52_spill] sm:$0xff] %v6576_v52  ;;  %vm1391_vm0 = vmpackc.low %vm1359_vm1, %vm1359_vm1  ;;  %v6664_v37 = vsel %vm6610_vm15, 65537, %v8668_v13 }
 0x109   : > { %8682 = vst [vmem:[#allocation44_spill] sm:$0xff] %v6390_v34  ;;  %8718 = vst [vmem:[#allocation57_spill] sm:$0xff] %v6664_v37  ;;  %v6667_v48 = vsel %vm1391_vm0, 65537, %v8668_v13  ;;  %v8746_v37 = vld [vmem:[#allocation33_spill] sm:$0xff] }
 0x10a   : > { %v6420_v34 = vpop.f32.mrf.mxu0  ;;  %8719 = vst [vmem:[#allocation58_spill] sm:$0xff] %v6667_v48  ;;  %vm8748_vm6 = vmmov %vm8745_vm11 }
 0x10b   : > { %8687 = vst [vmem:[#allocation45_spill] sm:$0xff] %v6420_v34  ;;  %v6442_v34 = vpop.f32.mrf.mxu1 }
 0x10c   : > { %v6464_v21 = vpop.f32.mrf.mxu0 }
 0x10d   : > { %8695 = vst [vmem:[#allocation48_spill] sm:$0xff] %v6464_v21  ;;  %v6531_v36 = vpop.f32.mrf.mxu1  ;;  %v615_v21 = vadd.f32 %v6156_v59, %v6158_v63  ;;  %v626_v59 = vadd.f32 %v6160_v10, %v6162_v11  ;;  %v6583_v63 = vsel %vm6527_vm2, 65537, %v8668_v13  ;;  %v618_v10 = vadd.f32 %v6167_v18, %v6172_v26  ;;  %v6617_v18 = vld [vmem:[%s8503_s3] ss:$0 sm:$0xff] }
 0x10e   : > { %v6516_v20 = vpop.f32.mrf.mxu0  ;;  %8710 = vst [vmem:[#allocation53_spill] sm:$0xff] %v6583_v63  ;;  %v639_v11 = vadd.f32 %v6176_v40, %v6178_v43  ;;  %v6634_v43 = vadd.f32 %v6208_v0, %v6204_v12  ;;  %v6654_v0 = vsel %vm6593_vm14, 65537, %v8668_v13  ;;  %v1326_v12 = vpop.permute.xlu1 %1325 }
 0x10f   : > { %8700 = vst [vmem:[#allocation49_spill] sm:$0xff] %v6516_v20  ;;  %v5254_v52 = vpop.f32.mrf.mxu1  ;;  %8717 = vst [vmem:[#allocation56_spill] sm:$0xff] %v6654_v0  ;;  %vm1362_vm3 = vcmp.eq.s32.totalorder %v1326_v12, 1  ;;  %v8738_v12 = vld [vmem:[#allocation40_spill] sm:$0xff] }
 0x110   : > { %v6548_v20 = vpop.f32.mrf.mxu0  ;;  %vm6691_vm13 = vmpackc.low %vm1362_vm3, %vm1362_vm3 }
 0x111   : > { %8705 = vst [vmem:[#allocation50_spill] sm:$0xff] %v6548_v20  ;;  %v6564_v20 = vsel %vm6484_vm10, 65537, %v8668_v13  ;;  %v694_v6 = vpop.f32.mrf.mxu1  ;;  %vm1170_vm10 = vcmask 1040384   ;;  %vm8763_vm3 = vmmov %vm8748_vm6 }
 0x112   : > { %v5268_v15 = vpop.f32.mrf.mxu0  ;;  %vm6778_vm14 = vmand %vm1170_vm10, %vm8545_vm8 }
 0x113   : > { %v912_v47 = vadd.f32 %v5268_v15, %v623_v60  ;;  %v5255_v14 = vpop.f32.mrf.mxu1  ;;  %vm8765_vm10 = vmmov %vm8763_vm3 }
 0x114   : > { %v783_v26 = vpop.f32.mrf.mxu0 }
 0x115   : > { %v910_v40 = vadd.f32 %v783_v26, %v615_v21  ;;  %v948_v17 = vadd.f32 %v6617_v18, %v912_v47  ;;  %v1323_v21 = vpop.permute.xlu0 %1322 }
 0x116   : > { %v5269_v62 = vpop.f32.mrf.mxu0  ;;  %vm1361_vm9 = vcmp.eq.s32.totalorder %v1323_v21, 1  ;;  %v1332_v21 = vpop.permute.xlu1 %1331 }
 0x117   : > { %v913_v42 = vadd.f32 %v5269_v62, %v626_v59  ;;  %v946_v60 = vadd.f32 %v6617_v18, %v910_v40  ;;  %v8720_v59 = vld [vmem:[#allocation34_spill] sm:$0xff]  ;;  %v8721_v40 = vld [vmem:[#allocation23_spill] sm:$0xff]  ;;  %v980_v41 = vmax.f32 %v948_v17, 0.0  ;;  %vm1393_vm7 = vmpackc.low %vm1361_vm9, %vm1361_vm9  ;;  %vm1364_vm2 = vcmp.eq.s32.totalorder %v1332_v21, 1 }
 0x118   : > { %v786_v15 = vpop.f32.mrf.mxu0  ;;  %v6681_v57 = vadd.f32 %v8720_v59, %v6230_v33  ;;  %v8726_v59 = vld [vmem:[#allocation27_spill] sm:$0xff]  ;;  %vm6766_vm1 = vmpackc.low %vm1364_vm2, %vm1364_vm2 }
 0x119   : > { %v949_v47 = vadd.f32 %v6617_v18, %v913_v42  ;;  %v911_v58 = vadd.f32 %v786_v15, %v618_v10  ;;  %v8722_v10 = vld [vmem:[#allocation37_spill] sm:$0xff]  ;;  %v8725_v42 = vld [vmem:[#allocation26_spill] sm:$0xff]  ;;  %v6702_v22 = vadd.f32 %v6442_v34, %v8726_v59  ;;  %v978_v17 = vmax.f32 %v946_v60, 0.0  ;;  %v8729_v59 = vld [vmem:[#allocation32_spill] sm:$0xff] }
 0x11a   : > { %v5272_v26 = vpop.f32.mrf.mxu0  ;;  %v6687_v62 = vadd.f32 %v8722_v10, %v8721_v40  ;;  %v6698_v15 = vadd.f32 %v6383_v56, %v8725_v42  ;;  %v6712_v56 = vadd.f32 %v6531_v36, %v8727_v30  ;;  %v8728_v42 = vld [vmem:[#allocation31_spill] sm:$0xff]  ;;  %v6718_v39 = vadd.f32 %v694_v6, %v8729_v59  ;;  %v8739_v36 = vld [vmem:[#allocation42_spill] sm:$0xff]  ;;  %vm8764_vm9 = vmmov %vm8763_vm3 }
 0x11b   : > { %v981_v33 = vmax.f32 %v949_v47, 0.0  ;;  %v947_v25 = vadd.f32 %v6617_v18, %v911_v58  ;;  %v916_v40 = vadd.f32 %v5272_v26, %v639_v11  ;;  %v6715_v34 = vadd.f32 %v5254_v52, %v8728_v42  ;;  %v697_v26 = vpop.f32.mrf.mxu1  ;;  %v8732_v52 = vld [vmem:[#allocation39_spill] sm:$0xff] }
 0x11c   : > { %v799_v10 = vpop.f32.mrf.mxu0  ;;  %v6723_v11 = vsel %vm6691_vm13, 65537, %v8668_v13  ;;  %vm8767_vm13 = vmmov %vm8763_vm3 }
 0x11d   : > { %v6708_v47 = vpack.c.bf16 %v981_v33, %v980_v41  ;;  %v979_v58 = vmax.f32 %v947_v25, 0.0  ;;  %v914_v31 = vadd.f32 %v799_v10, %v631_v44  ;;  %8730 = vst [vmem:[#allocation34_spill] sm:$0xff] %v6723_v11  ;;  %v6726_v44 = vsel %vm1393_vm7, 65537, %v8668_v13  ;;  %v8733_v41 = vld [vmem:[#allocation41_spill] sm:$0xff] }
 0x11e   : > { %v5273_v60 = vpop.f32.mrf.mxu0  ;;  %8731 = vst [vmem:[#allocation23_spill] sm:$0xff] %v6726_v44  ;;  %v8734_v6 = vcombine.low %v8732_v52, %v8733_v41  ;;  %v8735_v33 = vmov 0  ;;  %v952_v25 = vadd.f32 %v6617_v18, %v916_v40 }
 0x11f   : > { %v1010_v30 = vpack.c.bf16 %v979_v58, %v978_v17  ;;  %v1038_v61 = vshll.u32 %v6708_v47, 16  ;;  %v950_v10 = vadd.f32 %v6617_v18, %v914_v31  ;;  %v917_v42 = vadd.f32 %v5273_v60, %v6605_v46  ;;  %v8747_v60 = vld [vmem:[#allocation35_spill] sm:$0xff] }
 0x120   : > { %vm6732_vm12 = vcmp.ne.s16.totalorder %v8734_v6, 0  ;;  %v802_v59 = vpop.f32.mrf.mxu0  ;;  %v8740_v17 = vcombine.low %v8738_v12, %v8739_v36  ;;  %v8741_v58 = vmov 0  ;;  %v8744_v52 = vshrl.u32 %v6708_v47, 16 }
 0x121   : > { %v8736_v33 = vsel %vm6732_vm12, 4294967295, %v8735_v33  ;;  %v915_v6 = vadd.f32 %v802_v59, %v6621_v50  ;;  %5300 = vmatprep.mubr.msk.bf16.mxu1 %vm8745_vm11, %v1010_v30  ;;  %v1028_v40 = vshrl.u32 %v1010_v30, 16  ;;  %v1031_v31 = vshll.u32 %v1010_v30, 16  ;;  %v8751_v30 = vld [vmem:[#allocation10_spill] sm:$0xff]  ;;  %vm8778_vm11 = vmmov %vm8763_vm3 }
 0x122   : > { %8737 = vst [vmem:[#allocation37_spill] sm:$0xff] %v8736_v33  ;;  %vm6743_vm4 = vcmp.ne.s16.totalorder %v8740_v17, 0  ;;  %v6749_v41 = vrot.slane %v8744_v52, 7  ;;  %v6754_v46 = vadd.f32 %v5255_v14, %v8746_v37  ;;  %v6757_v48 = vadd.f32 %v697_v26, %v8747_v60  ;;  %v5276_v17 = vpop.f32.mrf.mxu0  ;;  %5301 = vmatmul.mubr.msk.bf16.vlgmr.msra.gmra.mxu1 %vm8748_vm6, %v6708_v47  ;;  %vm8779_vm6 = vmmov %vm8763_vm3 }
 0x123   : > { %v8742_v58 = vsel %vm6743_vm4, 4294967295, %v8741_v58  ;;  %v953_v36 = vadd.f32 %v6617_v18, %v917_v42  ;;  %v951_v14 = vadd.f32 %v6617_v18, %v915_v6  ;;  %v920_v26 = vadd.f32 %v5276_v17, %v6625_v45  ;;  %5367 = vmatpush3.bf16.msra.mxu1 %v8751_v30  ;;  %v5258_v45 = vpop.f32.mrf.mxu1 }
 0x124   : > { %8743 = vst [vmem:[#allocation26_spill] sm:$0xff] %v8742_v58  ;;  %v1040_v37 = vor.u32 %v1038_v61, %v6749_v41  ;;  %v1030_v59 = vrot.slane %v1028_v40, 7  ;;  %v984_v42 = vmax.f32 %v952_v25, 0.0  ;;  %v982_v52 = vmax.f32 %v950_v10, 0.0  ;;  %v815_v12 = vpop.f32.mrf.mxu0 }
 0x125   : > { %v985_v60 = vmax.f32 %v953_v36, 0.0  ;;  %v1928_v11 = vrot.slane %v1031_v31, 1  ;;  %v983_v21 = vmax.f32 %v951_v14, 0.0  ;;  %v956_v44 = vadd.f32 %v6617_v18, %v920_v26 }
 0x126   : > { %v918_v0 = vadd.f32 %v815_v12, %v6634_v43  ;;  %v1033_v63 = vor.u32 %v1031_v31, %v1030_v59  ;;  %v8752_v6 = vmov 0  ;;  %v6785_v25 = vsel %vm6766_vm1, 65537, %v8668_v13  ;;  %v5277_v36 = vpop.f32.mrf.mxu0  ;;  %vm8780_vm1 = vmmov %vm8763_vm3 }
 0x127   : > { %v8753_v6 = vsel %vm6778_vm14, 4294967295, %v8752_v6  ;;  %v6787_v10 = vpack.c.bf16 %v985_v60, %v984_v42  ;;  %v1041_v17 = vsel %vm8545_vm8, %v1030_v59, %v1040_v37  ;;  %v1929_v14 = vor.u32 %v1928_v11, %v1028_v40  ;;  %v710_v40 = vpop.f32.mrf.mxu1 }
 0x128   : > { %8754 = vst [vmem:[#allocation27_spill] sm:$0xff] %v8753_v6  ;;  %v1012_v43 = vpack.c.bf16 %v983_v21, %v982_v52  ;;  %v988_v31 = vmax.f32 %v956_v44, 0.0  ;;  %v921_v12 = vadd.f32 %v5277_v36, %v6638_v32  ;;  %v1930_v26 = vrot.slane %v1038_v61, 1  ;;  %v818_v37 = vpop.f32.mrf.mxu0 }
 0x129   : > { %v8755_v30 = vcombine.low %v6408_v53, %v6403_v51  ;;  %v8541_v50 = vshrl.u32 %v6787_v10, 16  ;;  %v1054_v42 = vshll.u32 %v6787_v10, 16  ;;  %v954_v60 = vadd.f32 %v6617_v18, %v918_v0 }
 0x12a   : > { %v1172_v11 = vsel %vm6778_vm14, 0, %v1033_v63  ;;  %v8759_v32 = vcombine.low %v6425_v4, %v6413_v49  ;;  %v8760_v44 = vmov 0  ;;  %v1043_v51 = vshrl.u32 %v1012_v43, 16  ;;  %5304 = vmatprep.mubr.msk.bf16.mxu1 %vm8763_vm3, %v1012_v43  ;;  %v5280_v49 = vpop.f32.mrf.mxu0  ;;  %vm8782_vm3 = vmmov %vm8780_vm1 }
 0x12b   : > { %vm6794_vm15 = vcmp.ne.s16.totalorder %v8755_v30, 0  ;;  %v1046_v53 = vshll.u32 %v1012_v43, 16  ;;  %v957_v61 = vadd.f32 %v6617_v18, %v921_v12  ;;  %v1494_v0 = vsel %vm6732_vm12, %v1041_v17, 0  ;;  %5305 = vmatmul.mubr.msk.bf16.gmra.mxu1 %vm8764_vm9, %v6787_v10  ;;  %v8766_v43 = vld [vmem:[#allocation36_spill] sm:$0xff] }
 0x12c   : > { %v8757_v38 = vsel %vm6794_vm15, 4294967295, %v8756_v38  ;;  %vm6806_vm0 = vcmp.ne.s16.totalorder %v8759_v32, 0  ;;  %v919_v59 = vadd.f32 %v818_v37, %v6642_v24  ;;  %v1493_v63 = vsel %vm6743_vm4, %v1172_v11, 0  ;;  %v831_v37 = vpop.f32.mrf.mxu0 }
 0x12d   : > { %8758 = vst [vmem:[#allocation28_spill] sm:$0xff] %v8757_v38  ;;  %v8761_v44 = vsel %vm6806_vm0, 4294967295, %v8760_v44  ;;  %v6821_v4 = vrot.slane %v8541_v50, 7  ;;  %v6824_v52 = vsel %vm8544_vm5, %v1929_v14, %v1930_v26  ;;  %v1933_v21 = vrot.slane %v1046_v53, 1  ;;  %5334 = vmatprep.mubr.msk.bf16.mxu0 %vm8765_vm10, %v1493_v63  ;;  %v8769_v50 = vld [vmem:[#allocation38_spill] sm:$0xff] }
 0x12e   : > { %8762 = vst [vmem:[#allocation31_spill] sm:$0xff] %v8761_v44  ;;  %v989_v36 = vmax.f32 %v957_v61, 0.0  ;;  %v924_v24 = vadd.f32 %v5280_v49, %v6659_v27  ;;  %v1045_v17 = vrot.slane %v1043_v51, 7  ;;  %v6829_v12 = vadd.f32 %v5258_v45, %v8766_v43  ;;  %5335 = vmatmul.mubr.msk.bf16.vlgmr.msra.gmra.mxu0 %vm8767_vm13, %v1494_v0  ;;  %v5281_v58 = vpop.f32.mrf.mxu0  ;;  %vm8792_vm13 = vmmov %vm8780_vm1  ;;  %v7488_v44 = vld [vmem:[%s8503_s3 + $0x2] ss:$0 sm:$0xff] }
 0x12f   : > { %v955_v30 = vadd.f32 %v6617_v18, %v919_v59  ;;  %v1056_v11 = vor.u32 %v1054_v42, %v6821_v4  ;;  %v8768_v14 = vshrl.u32 %v6708_v47, 16  ;;  %v6837_v61 = vadd.f32 %v710_v40, %v8769_v50 }
 0x130   : > { %v6839_v63 = vpack.c.bf16 %v989_v36, %v988_v31  ;;  %v922_v27 = vadd.f32 %v831_v37, %v6673_v28  ;;  %v1048_v49 = vor.u32 %v1046_v53, %v1045_v17  ;;  %v986_v45 = vmax.f32 %v954_v60, 0.0  ;;  %v834_v36 = vpop.f32.mrf.mxu0 }
 0x131   : > { %v1932_v32 = vor.u32 %v1930_v26, %v8768_v14  ;;  %v987_v43 = vmax.f32 %v955_v30, 0.0  ;;  %v1057_v59 = vsel %vm8545_vm8, %v1045_v17, %v1056_v11  ;;  %v960_v47 = vadd.f32 %v6617_v18, %v924_v24 }
 0x132   : > { %v1067_v33 = vshrl.u32 %v6839_v63, 16  ;;  %v1935_v26 = vor.u32 %v1933_v21, %v1043_v51  ;;  %v1936_v50 = vrot.slane %v1054_v42, 1  ;;  %v8770_v31 = vcombine.low %v6454_v16, %v6449_v2  ;;  %v5259_v2 = vpop.f32.mrf.mxu1 }
 0x133   : > { %v6844_v0 = vsel %vm8544_vm5, %v1932_v32, %v1933_v21  ;;  %v8771_v28 = vmov 0  ;;  %v1070_v60 = vshll.u32 %v6839_v63, 16  ;;  %v6856_v53 = vpack.c.bf16 %v987_v43, %v986_v45  ;;  %v8781_v32 = vld [vmem:[#allocation43_spill] sm:$0xff] }
 0x134   : > { %vm6851_vm7 = vcmp.ne.s16.totalorder %v8770_v31, 0  ;;  %v925_v40 = vadd.f32 %v5281_v58, %v6677_v9  ;;  %v1049_v17 = vsel %vm8545_vm8, %v6749_v41, %v1048_v49  ;;  %v8774_v42 = vcombine.low %v6435_v8, %v6430_v7  ;;  %v5284_v41 = vpop.f32.mrf.mxu0 }
 0x135   : > { %v8772_v28 = vsel %vm6851_vm7, 4294967295, %v8771_v28  ;;  %v8775_v51 = vmov 0  ;;  %v958_v16 = vadd.f32 %v6617_v18, %v922_v27  ;;  %v923_v21 = vadd.f32 %v834_v36, %v6681_v57  ;;  %5308 = vmatprep.mubr.msk.bf16.mxu1 %vm8778_vm11, %v6856_v53  ;;  %v713_v36 = vpop.f32.mrf.mxu1  ;;  %vm8793_vm11 = vmmov %vm8780_vm1 }
 0x136   : > { %8773 = vst [vmem:[#allocation32_spill] sm:$0xff] %v8772_v28  ;;  %vm6864_vm2 = vcmp.ne.s16.totalorder %v8774_v42, 0  ;;  %v1495_v24 = vsel %vm6794_vm15, %v1049_v17, 0  ;;  %v6874_v9 = vrot.slane %v1067_v33, 7  ;;  %v1059_v58 = vshrl.u32 %v6856_v53, 16  ;;  %5309 = vmatmul.mubr.msk.bf16.gmra.mxu1 %vm8780_vm1, %v6839_v63  ;;  %v847_v43 = vpop.f32.mrf.mxu0 }
 0x137   : > { %v8776_v51 = vsel %vm6864_vm2, 4294967295, %v8775_v51  ;;  %v1062_v7 = vshll.u32 %v6856_v53, 16  ;;  %v961_v8 = vadd.f32 %v6617_v18, %v925_v40  ;;  %5338 = vmatprep.mubr.msk.bf16.mxu0 %vm8779_vm6, %v1495_v24  ;;  %v1496_v57 = vsel %vm6806_vm0, %v1057_v59, 0  ;;  %vm8794_vm6 = vmmov %vm8780_vm1 }
 0x138   : > { %8777 = vst [vmem:[#allocation39_spill] sm:$0xff] %v8776_v51  ;;  %v959_v30 = vadd.f32 %v6617_v18, %v923_v21  ;;  %v928_v37 = vadd.f32 %v5284_v41, %v6687_v62  ;;  %v1072_v11 = vor.u32 %v1070_v60, %v6874_v9  ;;  %v6890_v14 = vsel %vm8544_vm5, %v1935_v26, %v1936_v50  ;;  %v5285_v26 = vpop.f32.mrf.mxu0 }
 0x139   : > { %v6893_v27 = vadd.f32 %v5259_v2, %v8781_v32  ;;  %v992_v49 = vmax.f32 %v960_v47, 0.0  ;;  %v993_v45 = vmax.f32 %v961_v8, 0.0  ;;  %5339 = vmatmul.mubr.msk.bf16.gmra.mxu0 %vm8782_vm3, %v1496_v57  ;;  %v1061_v59 = vrot.slane %v1059_v58, 7 }
 0x13a   : > { %v990_v31 = vmax.f32 %v958_v16, 0.0  ;;  %v991_v53 = vmax.f32 %v959_v30, 0.0  ;;  %v964_v62 = vadd.f32 %v6617_v18, %v928_v37  ;;  %v926_v40 = vadd.f32 %v847_v43, %v6698_v15 }
 0x13b   : > { %v6898_v17 = vpack.c.bf16 %v993_v45, %v992_v49  ;;  %v1064_v42 = vor.u32 %v1062_v7, %v1061_v59  ;;  %v1073_v2 = vsel %vm8545_vm8, %v1061_v59, %v1072_v11  ;;  %v1939_v21 = vrot.slane %v1062_v7, 1  ;;  %v850_v11 = vpop.f32.mrf.mxu0 }
 0x13c   : > { %v6901_v47 = vpack.c.bf16 %v991_v53, %v990_v31  ;;  %v929_v24 = vadd.f32 %v5285_v26, %v6702_v22  ;;  %v8783_v8 = vshrl.u32 %v6787_v10, 16  ;;  %v1942_v41 = vrot.slane %v1070_v60, 1 }
 0x13d   : > { %v8784_v57 = vcombine.low %v6469_v55, %v6459_v19  ;;  %v8785_v15 = vmov 0  ;;  %v1083_v30 = vshrl.u32 %v6898_v17, 16  ;;  %v996_v37 = vmax.f32 %v964_v62, 0.0  ;;  %v8795_v62 = vld [vmem:[#allocation44_spill] sm:$0xff] }
 0x13e   : > { %v1938_v16 = vor.u32 %v1936_v50, %v8783_v8  ;;  %v962_v7 = vadd.f32 %v6617_v18, %v926_v40  ;;  %v1065_v22 = vsel %vm8545_vm8, %v6821_v4, %v1064_v42  ;;  %v8788_v10 = vcombine.low %v6479_v1, %v6474_v23  ;;  %5312 = vmatprep.mubr.msk.bf16.mxu1 %vm8792_vm13, %v6901_v47  ;;  %v5262_v4 = vpop.f32.mrf.mxu1  ;;  %v5288_v1 = vpop.f32.mrf.mxu0 }
 0x13f   : > { %vm6909_vm9 = vcmp.ne.s16.totalorder %v8784_v57, 0  ;;  %v8789_v50 = vmov 0  ;;  %v1086_v19 = vshll.u32 %v6898_v17, 16  ;;  %v1075_v55 = vshrl.u32 %v6901_v47, 16  ;;  %5313 = vmatmul.mubr.msk.bf16.gmra.mxu1 %vm8794_vm6, %v6898_v17  ;;  %vm8806_vm6 = vmmov %vm8780_vm1 }
 0x140   : > { %v8786_v15 = vsel %vm6909_vm9, 4294967295, %v8785_v15  ;;  %vm6920_vm10 = vcmp.ne.s16.totalorder %v8788_v10, 0  ;;  %v965_v60 = vadd.f32 %v6617_v18, %v929_v24  ;;  %v1498_v32 = vsel %vm6851_vm7, %v1073_v2, 0  ;;  %v863_v42 = vpop.f32.mrf.mxu0 }
 0x141   : > { %8787 = vst [vmem:[#allocation41_spill] sm:$0xff] %v8786_v15  ;;  %v8790_v50 = vsel %vm6920_vm10, 4294967295, %v8789_v50  ;;  %v927_v49 = vadd.f32 %v850_v11, %v6712_v56  ;;  %v1497_v23 = vsel %vm6864_vm2, %v1065_v22, 0  ;;  %v6936_v45 = vrot.slane %v1083_v30, 7 }
 0x142   : > { %8791 = vst [vmem:[#allocation40_spill] sm:$0xff] %v8790_v50  ;;  %v6939_v43 = vsel %vm8544_vm5, %v1938_v16, %v1939_v21  ;;  %v1078_v59 = vshll.u32 %v6901_v47, 16  ;;  %v997_v31 = vmax.f32 %v965_v60, 0.0  ;;  %5342 = vmatprep.mubr.msk.bf16.mxu0 %vm8793_vm11, %v1497_v23  ;;  %v932_v53 = vadd.f32 %v5288_v1, %v6715_v34  ;;  %v8796_v34 = vld [vmem:[#allocation45_spill] sm:$0xff]  ;;  %v5289_v10 = vpop.f32.mrf.mxu0  ;;  %vm8805_vm11 = vmmov %vm8780_vm1 }
 0x143   : > { %v1077_v56 = vrot.slane %v1075_v55, 7  ;;  %v6949_v40 = vadd.f32 %v713_v36, %v8795_v62  ;;  %v963_v26 = vadd.f32 %v6617_v18, %v927_v49  ;;  %5343 = vmatmul.mubr.msk.bf16.gmra.mxu0 %vm8780_vm1, %v1498_v32  ;;  %v1088_v2 = vor.u32 %v1086_v19, %v6936_v45 }
 0x144   : > { %v1941_v24 = vor.u32 %v1939_v21, %v1059_v58  ;;  %v6957_v8 = vadd.f32 %v5262_v4, %v8796_v34  ;;  %v6959_v16 = vpack.c.bf16 %v997_v31, %v996_v37  ;;  %v930_v57 = vadd.f32 %v863_v42, %v6718_v39  ;;  %v866_v31 = vpop.f32.mrf.mxu0 }
 0x145   : > { %v1080_v11 = vor.u32 %v1078_v59, %v1077_v56  ;;  %v994_v36 = vmax.f32 %v962_v7, 0.0  ;;  %v995_v22 = vmax.f32 %v963_v26, 0.0  ;;  %v1089_v60 = vsel %vm8545_vm8, %v1077_v56, %v1088_v2 }
 0x146   : > { %v6964_v32 = vsel %vm8544_vm5, %v1941_v24, %v1942_v41  ;;  %v1099_v49 = vshrl.u32 %v6959_v16, 16  ;;  %v968_v58 = vadd.f32 %v6617_v18, %v932_v53  ;;  %v1944_v21 = vor.u32 %v1942_v41, %v1067_v33  ;;  %v5292_v56 = vpop.f32.mrf.mxu0  ;;  %v8807_v24 = vld [vmem:[#allocation48_spill] sm:$0xff] }
 0x147   : > { %v1945_v37 = vrot.slane %v1078_v59, 1  ;;  %v8797_v39 = vcombine.low %v6507_v35, %v6502_v5  ;;  %v8798_v7 = vmov 0  ;;  %v1102_v4 = vshll.u32 %v6959_v16, 16  ;;  %v726_v5 = vpop.f32.mrf.mxu1 }
 0x148   : > { %v6978_v23 = vpack.c.bf16 %v995_v22, %v994_v36  ;;  %v933_v1 = vadd.f32 %v5289_v10, %v6754_v46  ;;  %v1081_v53 = vsel %vm8545_vm8, %v6874_v9, %v1080_v11  ;;  %v8801_v33 = vcombine.low %v6497_v3, %v6492_v29  ;;  %v879_v36 = vpop.f32.mrf.mxu0 }
 0x149   : > { %vm6973_vm3 = vcmp.ne.s16.totalorder %v8797_v39, 0  ;;  %v8802_v63 = vmov 0  ;;  %v966_v35 = vadd.f32 %v6617_v18, %v930_v57  ;;  %v931_v41 = vadd.f32 %v866_v31, %v6757_v48 }
 0x14a   : > { %v8799_v7 = vsel %vm6973_vm3, 4294967295, %v8798_v7  ;;  %vm6986_vm13 = vcmp.ne.s16.totalorder %v8801_v33, 0  ;;  %v1499_v59 = vsel %vm6909_vm9, %v1081_v53, 0  ;;  %v6996_v46 = vrot.slane %v1099_v49, 7  ;;  %5316 = vmatprep.mubr.msk.bf16.mxu1 %vm8805_vm11, %v6978_v23  ;;  %vm8808_vm11 = vmmov %vm8780_vm1  ;;  %v7027_v33 = vpop.permute.xlu0 %1328 }
 0x14b   : > { %8800 = vst [vmem:[#allocation42_spill] sm:$0xff] %v8799_v7  ;;  %v8803_v63 = vsel %vm6986_vm13, 4294967295, %v8802_v63  ;;  %v1091_v9 = vshrl.u32 %v6978_v23, 16  ;;  %v1094_v29 = vshll.u32 %v6978_v23, 16  ;;  %v969_v3 = vadd.f32 %v6617_v18, %v933_v1  ;;  %5346 = vmatprep.mubr.msk.bf16.mxu0 %vm8806_vm6, %v1499_v59  ;;  %5317 = vmatmul.mubr.msk.bf16.gmra.mxu1 %vm8780_vm1, %v6959_v16  ;;  %v8833_v23 = vld [vmem:[#allocation3_spill] sm:$0xff] }
 0x14c   : > { %8804 = vst [vmem:[#allocation33_spill] sm:$0xff] %v8803_v63  ;;  %v1500_v48 = vsel %vm6920_vm10, %v1089_v60, 0  ;;  %v967_v62 = vadd.f32 %v6617_v18, %v931_v41  ;;  %v936_v26 = vadd.f32 %v5292_v56, %v6829_v12  ;;  %v1104_v42 = vor.u32 %v1102_v4, %v6996_v46  ;;  %v5263_v56 = vpop.f32.mrf.mxu1 }
 0x14d   : > { %v7014_v2 = vsel %vm8544_vm5, %v1944_v21, %v1945_v37  ;;  %v727_v34 = vadd.f32 %v726_v5, %v8807_v24  ;;  %v1000_v57 = vmax.f32 %v968_v58, 0.0  ;;  %v1001_v11 = vmax.f32 %v969_v3, 0.0  ;;  %5347 = vmatmul.mubr.msk.bf16.gmra.mxu0 %vm8808_vm11, %v1500_v48  ;;  %v5293_v21 = vpop.f32.mrf.mxu0  ;;  %vm8813_vm11 = vmmov %vm8780_vm1 }
 0x14e   : > { %v1093_v12 = vrot.slane %v1091_v9, 7  ;;  %v998_v22 = vmax.f32 %v966_v35, 0.0  ;;  %v999_v10 = vmax.f32 %v967_v62, 0.0  ;;  %v972_v60 = vadd.f32 %v6617_v18, %v936_v26  ;;  %v8814_v62 = vld [vmem:[#allocation54_spill] sm:$0xff]  ;;  %v8815_v26 = vld [vmem:[#allocation53_spill] sm:$0xff] }
 0x14f   : > { %v934_v39 = vadd.f32 %v879_v36, %v6837_v61  ;;  %v7022_v1 = vpack.c.bf16 %v1001_v11, %v1000_v57  ;;  %v1947_v58 = vor.u32 %v1945_v37, %v1075_v55  ;;  %v937_v35 = vadd.f32 %v5293_v21, %v6893_v27  ;;  %v882_v48 = vpop.f32.mrf.mxu0 }
 0x150   : > { %v1096_v31 = vor.u32 %v1094_v29, %v1093_v12  ;;  %v1105_v53 = vsel %vm8545_vm8, %v1093_v12, %v1104_v42  ;;  %v7029_v5 = vpack.c.bf16 %v999_v10, %v998_v22  ;;  %v1948_v41 = vrot.slane %v1086_v19, 1 }
 0x151   : > { %v1951_v59 = vrot.slane %v1094_v29, 1  ;;  %v8809_v61 = vcombine.low %v6569_v54, %v6564_v20  ;;  %v8810_v3 = vmov 0  ;;  %v1115_v47 = vshrl.u32 %v7022_v1, 16  ;;  %v5296_v11 = vpop.f32.mrf.mxu0 }
 0x152   : > { %v1004_v55 = vmax.f32 %v972_v60, 0.0  ;;  %v970_v37 = vadd.f32 %v6617_v18, %v934_v39  ;;  %v1097_v27 = vsel %vm8545_vm8, %v6936_v45, %v1096_v31  ;;  %v1118_v19 = vshll.u32 %v7022_v1, 16  ;;  %5320 = vmatprep.mubr.msk.bf16.mxu1 %vm8813_vm11, %v7029_v5  ;;  %vm8821_vm8 = vmmov %vm8780_vm1  ;;  %v8822_v39 = vld [vmem:[#allocation49_spill] sm:$0xff]  ;;  %v729_v31 = vpop.f32.mrf.mxu1 }
 0x153   : > { %vm7037_vm6 = vcmp.ne.s16.totalorder %v8809_v61, 0  ;;  %v1107_v20 = vshrl.u32 %v7029_v5, 16  ;;  %v973_v54 = vadd.f32 %v6617_v18, %v937_v35  ;;  %v1502_v29 = vsel %vm6973_vm3, %v1105_v53, 0  ;;  %5321 = vmatmul.mubr.msk.bf16.gmra.mxu1 %vm8821_vm8, %v7022_v1 }
 0x154   : > { %v8811_v3 = vsel %vm7037_vm6, 4294967295, %v8810_v3  ;;  %v8816_v42 = vcombine.low %v8814_v62, %v8815_v26  ;;  %v8817_v24 = vmov 0  ;;  %v935_v45 = vadd.f32 %v882_v48, %v6949_v40 }
 0x155   : > { %8812 = vst [vmem:[#allocation35_spill] sm:$0xff] %v8811_v3  ;;  %v1501_v57 = vsel %vm6986_vm13, %v1097_v27, 0  ;;  %v7065_v36 = vrot.slane %v1115_v47, 7  ;;  %vm8820_vm11 = vsmask.f32 7424  ;;  %v1110_v22 = vshll.u32 %v7029_v5, 16 }
 0x156   : > { %vm7056_vm5 = vcmp.ne.s16.totalorder %v8816_v42, 0  ;;  %v7068_v12 = vsel %vm8820_vm11, %v1947_v58, %v1948_v41  ;;  %v1005_v10 = vmax.f32 %v973_v54, 0.0  ;;  %5350 = vmatprep.mubr.msk.bf16.mxu0 %vm8780_vm1, %v1501_v57  ;;  %v940_v60 = vadd.f32 %v5296_v11, %v6957_v8  ;;  %vm8823_vm11 = vmmov %vm8780_vm1  ;;  %v895_v58 = vpop.f32.mrf.mxu0 }
 0x157   : > { %v8818_v24 = vsel %vm7056_vm5, 4294967295, %v8817_v24  ;;  %v1109_v40 = vrot.slane %v1107_v20, 7  ;;  %v738_v21 = vadd.f32 %v5263_v56, %v8822_v39  ;;  %v971_v53 = vadd.f32 %v6617_v18, %v935_v45  ;;  %5351 = vmatmul.mubr.msk.bf16.gmra.mxu0 %vm8823_vm11, %v1502_v29  ;;  %v8826_v45 = vld [vmem:[#allocation50_spill] sm:$0xff] }
 0x158   : > { %8819 = vst [vmem:[#allocation10_spill] sm:$0xff] %v8818_v24  ;;  %v1120_v35 = vor.u32 %v1118_v19, %v7065_v36  ;;  %v1950_v8 = vor.u32 %v1948_v41, %v1083_v30  ;;  %v1002_v61 = vmax.f32 %v970_v37, 0.0  ;;  %v7085_v48 = vpack.c.bf16 %v1005_v10, %v1004_v55  ;;  %v5297_v26 = vpop.f32.mrf.mxu0  ;;  %v8828_v41 = vld [vmem:[#allocation55_spill] sm:$0xff] }
 0x159   : > { %v938_v27 = vadd.f32 %v895_v58, %v727_v34  ;;  %v1112_v54 = vor.u32 %v1110_v22, %v1109_v40  ;;  %v1003_v62 = vmax.f32 %v971_v53, 0.0  ;;  %v976_v56 = vadd.f32 %v6617_v18, %v940_v60  ;;  %v8827_v34 = vld [vmem:[#allocation56_spill] sm:$0xff] }
 0x15a   : > { %vm8824_vm8 = vsmask.f32 256  ;;  %vm8825_vm1 = vsmask.f32 7424  ;;  %v730_v57 = vadd.f32 %v729_v31, %v8826_v45  ;;  %v1131_v11 = vshrl.u32 %v7085_v48, 16  ;;  %v898_v39 = vpop.f32.mrf.mxu0 }
 0x15b   : > { %v1121_v42 = vsel %vm8824_vm8, %v1109_v40, %v1120_v35  ;;  %v7090_v29 = vsel %vm8825_vm1, %v1950_v8, %v1951_v59  ;;  %v1953_v17 = vor.u32 %v1951_v59, %v1091_v9  ;;  %v1954_v30 = vrot.slane %v1102_v4, 1  ;;  %v8834_v9 = vld [vmem:[#allocation2_spill] sm:$0xff] }
 0x15c   : > { %v8829_v55 = vcombine.low %v8827_v34, %v8828_v41  ;;  %v8830_v37 = vmov 0  ;;  %v1134_v10 = vshll.u32 %v7085_v48, 16  ;;  %v1022_v60 = vpack.c.bf16 %v1003_v62, %v1002_v61  ;;  %v8839_v61 = vld [vmem:[#allocation58_spill] sm:$0xff] }
 0x15d   : > { %v941_v40 = vadd.f32 %v5297_v26, %v738_v21  ;;  %v1113_v31 = vsel %vm8824_vm8, %v6996_v46, %v1112_v54  ;;  %v8835_v59 = vcombine.low %v8833_v23, %v8834_v9  ;;  %v8836_v4 = vmov 0  ;;  %v8840_v21 = vld [vmem:[#allocation57_spill] sm:$0xff] }
 0x15e   : > { %vm7101_vm11 = vcmp.ne.s16.totalorder %v8829_v55, 0  ;;  %v974_v53 = vadd.f32 %v6617_v18, %v938_v27  ;;  %v939_v58 = vadd.f32 %v898_v39, %v730_v57  ;;  %v1503_v35 = vsel %vm7037_vm6, %v1113_v31, 0 }
 0x15f   : > { %v8831_v37 = vsel %vm7101_vm11, 4294967295, %v8830_v37  ;;  %vm7111_vm1 = vcmp.ne.s16.totalorder %v8835_v59, 0  ;;  %v1133_v8 = vrot.slane %v1131_v11, 7  ;;  %v8841_v62 = vcombine.low %v8839_v61, %v8840_v21 }
 0x160   : > { %8832 = vst [vmem:[#allocation36_spill] sm:$0xff] %v8831_v37  ;;  %v8837_v4 = vsel %vm7111_vm1, 4294967295, %v8836_v4  ;;  %v8842_v26 = vmov 0  ;;  %v1123_v46 = vshrl.u32 %v1022_v60, 16  ;;  %v1126_v54 = vshll.u32 %v1022_v60, 16 }
 0x161   : > { %8838 = vst [vmem:[#allocation38_spill] sm:$0xff] %v8837_v4  ;;  %vm7121_vm13 = vcmp.ne.s16.totalorder %v8841_v62, 0  ;;  %v1008_v45 = vmax.f32 %v976_v56, 0.0  ;;  %v977_v34 = vadd.f32 %v6617_v18, %v941_v40  ;;  %vm8845_vm8 = vcmask 130048   ;;  %v7480_v37 = vld [vmem:[%s8503_s3 + $0x1] ss:$0 sm:$0xff] }
 0x162   : > { %v8843_v26 = vsel %vm7121_vm13, 4294967295, %v8842_v26  ;;  %5324 = vmatprep.mubr.msk.bf16.mxu1 %vm8845_vm8, %v1022_v60  ;;  %vm8846_vm3 = vmmov %vm8845_vm8  ;;  %v975_v27 = vadd.f32 %v6617_v18, %v939_v58  ;;  %v1504_v57 = vsel %vm7056_vm5, %v1121_v42, 0  ;;  %v1136_v41 = vor.u32 %v1134_v10, %v1133_v8 }
 0x163   : > { %8844 = vst [vmem:[#allocation43_spill] sm:$0xff] %v8843_v26  ;;  %5354 = vmatprep.mubr.msk.bf16.mxu0 %vm8846_vm3, %v1503_v35  ;;  %vm8847_vm6 = vmmov %vm8846_vm3  ;;  %vm8848_vm10 = vsmask.f32 7424  ;;  %vm8849_vm9 = vcmp.eq.s32.totalorder %v7027_v33, 1  ;;  %v1009_v56 = vmax.f32 %v977_v34, 0.0  ;;  %v1125_v60 = vrot.slane %v1123_v46, 7 }
 0x164   : > { %5325 = vmatmul.mubr.msk.bf16.gmra.mxu1 %vm8847_vm6, %v7085_v48  ;;  %v7134_v55 = vsel %vm8848_vm10, %v1953_v17, %v1954_v30  ;;  %vm1395_vm2 = vmpackc.low %vm8849_vm9, %vm8849_vm9  ;;  %v1956_v18 = vor.u32 %v1954_v30, %v1099_v49  ;;  %v1957_v40 = vrot.slane %v1110_v22, 1  ;;  %v1006_v48 = vmax.f32 %v974_v53, 0.0 }
 0x165   : > { %vm8850_vm8 = vmmov %vm8846_vm3  ;;  %v1007_v39 = vmax.f32 %v975_v27, 0.0  ;;  %v1960_v42 = vrot.slane %v1118_v19, 1  ;;  %v1963_v31 = vrot.slane %v1126_v54, 1  ;;  %v7144_v17 = vpack.c.bf16 %v1009_v56, %v1008_v45 }
 0x166   : > { %5355 = vmatmul.mubr.msk.bf16.gmra.mxu0 %vm8850_vm8, %v1504_v57  ;;  %v1128_v23 = vor.u32 %v1126_v54, %v1125_v60  ;;  %vm8851_vm10 = vsmask.f32 256  ;;  %vm8852_vm9 = vsmask.f32 7424  ;;  %v1427_v59 = vsel %vm1395_vm2, 65537, %v8668_v13  ;;  %vm8855_vm8 = vmmov %vm8847_vm6 }
 0x167   : > { %v1137_v33 = vsel %vm8851_vm10, %v1125_v60, %v1136_v41  ;;  %v7148_v9 = vsel %vm8852_vm9, %v1956_v18, %v1957_v40  ;;  %v1024_v58 = vpack.c.bf16 %v1007_v39, %v1006_v48  ;;  %v1959_v16 = vor.u32 %v1957_v40, %v1107_v20  ;;  %vm8853_vm3 = vmmov %vm8851_vm10  ;;  %v8862_v60 = vld [vmem:[#allocation23_spill] sm:$0xff]  ;;  %v8863_v18 = vld [vmem:[#allocation34_spill] sm:$0xff] }
 0x168   : > { %v1966_v49 = vrot.slane %v1134_v10, 1  ;;  %v1147_v22 = vshrl.u32 %v7144_v17, 16  ;;  %v1150_v19 = vshll.u32 %v7144_v17, 16  ;;  %v1129_v30 = vsel %vm8853_vm3, %v7065_v36, %v1128_v23  ;;  %vm8854_vm2 = vmmov %vm8852_vm9  ;;  %v8870_v23 = vld [vmem:[#allocation5_spill] sm:$0xff] }
 0x169   : > { %v1962_v53 = vor.u32 %v1960_v42, %v1115_v47  ;;  %v1139_v35 = vshrl.u32 %v1024_v58, 16  ;;  %v1142_v61 = vshll.u32 %v1024_v58, 16  ;;  %5328 = vmatprep.mubr.msk.bf16.mxu1 %vm8847_vm6, %v1024_v58  ;;  %v1505_v21 = vsel %vm7101_vm11, %v1129_v30, 0  ;;  %vm8856_vm10 = vmmov %vm8854_vm2  ;;  %v8877_v58 = vld [vmem:[#allocation7_spill] sm:$0xff] }
 0x16a   : > { %v7163_v5 = vsel %vm8854_vm2, %v1959_v16, %v1960_v42  ;;  %5358 = vmatprep.mubr.msk.bf16.mxu0 %vm8855_vm8, %v1505_v21  ;;  %v2314_v20 = vsel %vm7111_vm1, %v6824_v52, 0  ;;  %v1149_v1 = vrot.slane %v1147_v22, 7  ;;  %v1965_v36 = vor.u32 %v1963_v31, %v1123_v46  ;;  %vm8857_vm9 = vmmov %vm8847_vm6  ;;  %v8878_v16 = vld [vmem:[#allocation6_spill] sm:$0xff]  ;;  %v8890_v21 = vld [vmem:[#allocation8_spill] sm:$0xff] }
 0x16b   : > { %v7172_v47 = vsel %vm8856_vm10, %v1962_v53, %v1963_v31  ;;  %v1506_v10 = vsel %vm7121_vm13, %v1137_v33, 0  ;;  %v1141_v62 = vrot.slane %v1139_v35, 7  ;;  %v1968_v54 = vor.u32 %v1966_v49, %v1131_v11  ;;  %vm8858_vm3 = vmmov %vm8847_vm6 }
 0x16c   : > { %5329 = vmatmul.mubr.msk.bf16.gmra.mxu1 %vm8857_vm9, %v7144_v17  ;;  %v1969_v45 = vrot.slane %v1142_v61, 1  ;;  %vm8859_vm6 = vmmov %vm8858_vm3  ;;  %v1152_v52 = vor.u32 %v1150_v19, %v1149_v1  ;;  %v7181_v34 = vsel %vm8854_vm2, %v1965_v36, %v1966_v49  ;;  %v7186_v41 = vrot.slane %v1150_v19, 1  ;;  %v8896_v36 = vld [vmem:[#allocation11_spill] sm:$0xff] }
 0x16d   : > { %5368 = vmatprep.mubr.msk.bf16.mxu1 %vm8859_vm6, %v2314_v20  ;;  %v1144_v27 = vor.u32 %v1142_v61, %v1141_v62  ;;  %vm8860_vm8 = vmmov %vm8854_vm2  ;;  %v4751_v56 = vcombine.low %v1427_v59, %v6785_v25  ;;  %vm8861_vm10 = vsmask.f32 256  ;;  %v8864_v40 = vcombine.low %v8862_v60, %v8863_v18  ;;  %v8871_v25 = vld [vmem:[#allocation4_spill] sm:$0xff]  ;;  %v8889_v61 = vld [vmem:[#allocation9_spill] sm:$0xff] }
 0x16e   : > { %5359 = vmatmul.mubr.msk.bf16.gmra.mxu0 %vm8858_vm3, %v1506_v10  ;;  %v7184_v46 = vsel %vm8860_vm8, %v1968_v54, %v1969_v45  ;;  %v1971_v57 = vor.u32 %v1969_v45, %v1139_v35  ;;  %v1153_v11 = vsel %vm8861_vm10, %v1141_v62, %v1152_v52  ;;  %v8865_v48 = vmov 0  ;;  %vm8868_vm3 = vmmov %vm8861_vm10  ;;  %v8902_v45 = vld [vmem:[#allocation14_spill] sm:$0xff]  ;;  %v8903_v52 = vld [vmem:[#allocation13_spill] sm:$0xff] }
 0x16f   : > { %vm7193_vm9 = vcmp.ne.s16.totalorder %v8864_v40, 0  ;;  %v1145_v39 = vsel %vm8868_vm3, %v1133_v8, %v1144_v27  ;;  %vm8869_vm6 = vmmov %vm8854_vm2  ;;  %v8872_v33 = vcombine.low %v8870_v23, %v8871_v25  ;;  %v8873_v59 = vmov 0  ;;  %v8914_v18 = vld [vmem:[#allocation24_spill] sm:$0xff]  ;;  %v8918_v23 = vld [vmem:[#allocation17_spill] sm:$0xff] }
 0x170   : > { %v8866_v48 = vsel %vm7193_vm9, 4294967295, %v8865_v48  ;;  %v7200_v42 = vsel %vm8869_vm6, %v1971_v57, %v7186_v41  ;;  %v1507_v31 = vsel %vm7193_vm9, %v1145_v39, 0  ;;  %vm8876_vm8 = vcmask 130048   ;;  %v8915_v39 = vld [vmem:[#allocation25_spill] sm:$0xff] }
 0x171   : > { %8867 = vst [vmem:[#allocation44_spill] sm:$0xff] %v8866_v48  ;;  %vm7207_vm2 = vcmp.ne.s16.totalorder %v8872_v33, 0  ;;  %5362 = vmatprep.mubr.msk.bf16.mxu0 %vm8876_vm8, %v1507_v31  ;;  %v8879_v49 = vcombine.low %v8877_v58, %v8878_v16  ;;  %v8880_v8 = vmov 0  ;;  %vm7219_vm3 = vcmp.ne.s16.totalorder %v4751_v56, 0  ;;  %vm8886_vm6 = vmmov %vm8876_vm8  ;;  %v8908_v56 = vld [vmem:[#allocation16_spill] sm:$0xff]  ;;  %v5637_v31 = vld [vmem:[%s8502_s2 + $0x38] sm:$0xff]  }
 0x172   : > { %v8874_v59 = vsel %vm7207_vm2, 4294967295, %v8873_v59  ;;  %v8883_v19 = vmov 0  ;;  %v2315_v30 = vsel %vm7207_vm2, %v6844_v0, 0  ;;  %v1508_v53 = vsel %vm7219_vm3, %v1153_v11, 0  ;;  %vm8887_vm8 = vmmov %vm8886_vm6  ;;  %v8895_v0 = vld [vmem:[#allocation12_spill] sm:$0xff]  ;;  %v8909_v11 = vld [vmem:[#allocation15_spill] sm:$0xff]  ;;  %5400 = vmatprep.subr.bf16.mxu0 %v5637_v31 }
 0x173   : > { %8875 = vst [vmem:[#allocation45_spill] sm:$0xff] %v8874_v59  ;;  %vm7215_vm10 = vcmp.ne.s16.totalorder %v8879_v49, 0  ;;  %v8884_v19 = vsel %vm7219_vm3, 4294967295, %v8883_v19  ;;  %vm8888_vm9 = vmmov %vm8886_vm6  ;;  %v8891_v20 = vcombine.low %v8889_v61, %v8890_v21  ;;  %v8892_v1 = vmov 0  ;;  %5401 = vmatpush3.bf16.msra.mxu0 %v5637_v31  ;;  %v8924_v58 = vld [vmem:[#allocation19_spill] sm:$0xff]  ;;  %v8930_v21 = vld [vmem:[#allocation30_spill] sm:$0xff] }
 0x174   : > { %v8881_v8 = vsel %vm7215_vm10, 4294967295, %v8880_v8  ;;  %8885 = vst [vmem:[#allocation54_spill] sm:$0xff] %v8884_v19  ;;  %5369 = vmatmul.mubr.msk.bf16.vlgmr.msra.gmra.mxu1 %vm8886_vm6, %v2315_v30  ;;  %v2316_v35 = vsel %vm7215_vm10, %v6890_v14, 0  ;;  %v8897_v10 = vcombine.low %v8895_v0, %v8896_v36  ;;  %v8898_v62 = vmov 0  ;;  %v8932_v0 = vld [vmem:[#allocation46_spill] sm:$0xff] }
 0x175   : > { %8882 = vst [vmem:[#allocation48_spill] sm:$0xff] %v8881_v8  ;;  %5372 = vmatprep.mubr.msk.bf16.mxu1 %vm8888_vm9, %v2316_v35  ;;  %vm7237_vm13 = vcmp.ne.s16.totalorder %v8891_v20, 0  ;;  %vm8901_vm9 = vmmov %vm8886_vm6  ;;  %v8904_v27 = vcombine.low %v8902_v45, %v8903_v52  ;;  %v8905_v57 = vmov 0  ;;  %v8910_v60 = vcombine.low %v8908_v56, %v8909_v11  ;;  %v8929_v35 = vld [vmem:[#allocation29_spill] sm:$0xff]  ;;  %v8944_v56 = vld [vmem:[#allocation51_spill] sm:$0xff]  ;;  %v2147_v11 = vpop.permute.xlu1 %2146 }
 0x176   : > { %5363 = vmatmul.mubr.msk.bf16.gmra.mxu0 %vm8887_vm8, %v1508_v53  ;;  %v8893_v1 = vsel %vm7237_vm13, 4294967295, %v8892_v1  ;;  %vm7244_vm3 = vcmp.ne.s16.totalorder %v8897_v10, 0  ;;  %v2317_v14 = vsel %vm7237_vm13, %v6939_v43, 0  ;;  %v8911_v43 = vmov 0  ;;  %vm8916_vm13 = vmmov %vm8901_vm9  ;;  %v8934_v10 = vld [vmem:[#allocation47_spill] sm:$0xff] }
 0x177   : > { %8894 = vst [vmem:[#allocation53_spill] sm:$0xff] %v8893_v1  ;;  %v8899_v62 = vsel %vm7244_vm3, 4294967295, %v8898_v62  ;;  %v2318_v54 = vsel %vm7244_vm3, %v6964_v32, 0  ;;  %vm7259_vm8 = vcmp.ne.s16.totalorder %v8904_v27, 0  ;;  %vm7266_vm10 = vcmp.ne.s16.totalorder %v8910_v60, 0 }
 0x178   : > { %8900 = vst [vmem:[#allocation49_spill] sm:$0xff] %v8899_v62  ;;  %v8906_v57 = vsel %vm7259_vm8, 4294967295, %v8905_v57  ;;  %v8912_v43 = vsel %vm7266_vm10, 4294967295, %v8911_v43  ;;  %v2319_v32 = vsel %vm7259_vm8, %v7014_v2, 0  ;;  %v2320_v40 = vsel %vm7266_vm10, %v7068_v12, 0  ;;  %v8917_v2 = vld [vmem:[#allocation18_spill] sm:$0xff] }
 0x179   : > { %8907 = vst [vmem:[#allocation50_spill] sm:$0xff] %v8906_v57  ;;  %8913 = vst [vmem:[#allocation56_spill] sm:$0xff] %v8912_v43  ;;  %vm2174_vm3 = vcmp.eq.s32.totalorder %v8915_v39, 1  ;;  %v8919_v25 = vcombine.low %v8917_v2, %v8918_v23  ;;  %v8920_v33 = vmov 0  ;;  %v8923_v12 = vld [vmem:[#allocation20_spill] sm:$0xff]  ;;  %v8926_v49 = vmov 0  ;;  %v2144_v39 = vpop.permute.xlu0 %2143  ;;  %v2153_v23 = vpop.permute.xlu1 %2152 }
 0x17a   : > { %vm2206_vm1 = vmpackc.low %vm2174_vm3, %vm2174_vm3  ;;  %v8925_v16 = vcombine.low %v8923_v12, %v8924_v58  ;;  %vm2176_vm3 = vcmp.eq.s32.totalorder %v8930_v21, 1  ;;  %vm2179_vm8 = vcmp.eq.s32.totalorder %v8932_v0, 1  ;;  %v8938_v45 = vmov 0 }
 0x17b   : > { %v2238_v53 = vsel %vm2206_vm1, 65537, %v8668_v13  ;;  %vm2208_vm5 = vmpackc.low %vm2176_vm3, %vm2176_vm3  ;;  %v8951_v58 = vmov 0  ;;  %v8958_v0 = vmov 0 }
 0x17c   : > { %5373 = vmatmul.mubr.msk.bf16.gmra.mxu1 %vm8886_vm6, %v2317_v14  ;;  %vm2175_vm6 = vcmp.eq.s32.totalorder %v8914_v18, 1  ;;  %vm7293_vm10 = vcmp.ne.s16.totalorder %v8925_v16, 0  ;;  %vm2211_vm7 = vmpackc.low %vm2179_vm8, %vm2179_vm8  ;;  %v8936_v14 = vld [vmem:[#allocation21_spill] sm:$0xff]  ;;  %v2240_v27 = vsel %vm2208_vm5, 65537, %v8668_v13  ;;  %vm2183_vm5 = vcmp.eq.s32.totalorder %v2147_v11, 1 }
 0x17d   : > { %5376 = vmatprep.mubr.msk.bf16.mxu1 %vm8901_vm9, %v2318_v54  ;;  %vm2207_vm2 = vmpackc.low %vm2175_vm6, %vm2175_vm6  ;;  %v8927_v49 = vsel %vm7293_vm10, 4294967295, %v8926_v49  ;;  %vm8931_vm6 = vcmask 130048   ;;  %v2322_v20 = vsel %vm7293_vm10, %v7134_v55, 0  ;;  %v8941_v55 = vmov 0  ;;  %v2150_v12 = vpop.permute.xlu0 %2149 }
 0x17e   : > { %8928 = vst [vmem:[#allocation3_spill] sm:$0xff] %v8927_v49  ;;  %v2239_v30 = vsel %vm2207_vm2, 65537, %v8668_v13  ;;  %vm8933_vm11 = vmmov %vm8931_vm6  ;;  %vm2178_vm2 = vcmp.eq.s32.totalorder %v8934_v10, 1 }
 0x17f   : > { %v4796_v36 = vcombine.low %v2238_v53, %v2239_v30  ;;  %vm2210_vm0 = vmpackc.low %vm2178_vm2, %vm2178_vm2  ;;  %vm2182_vm2 = vcmp.eq.s32.totalorder %v2144_v39, 1 }
 0x180   : > { %v2242_v18 = vsel %vm2210_vm0, 65537, %v8668_v13  ;;  %vm2214_vm10 = vmpackc.low %vm2182_vm2, %vm2182_vm2 }
 0x184   : > { %5377 = vmatmul.mubr.msk.bf16.gmra.mxu1 %vm8901_vm9, %v2319_v32  ;;  %vm7286_vm9 = vcmp.ne.s16.totalorder %v8919_v25, 0  ;;  %v2243_v32 = vsel %vm2211_vm7, 65537, %v8668_v13  ;;  %vm2215_vm7 = vmpackc.low %vm2183_vm5, %vm2183_vm5  ;;  %v8948_v25 = vmov 0  ;;  %vm2184_vm5 = vcmp.eq.s32.totalorder %v2150_v12, 1 }
 0x185   : > { %5380 = vmatprep.mubr.msk.bf16.mxu1 %vm8916_vm13, %v2320_v40  ;;  %v8921_v33 = vsel %vm7286_vm9, 4294967295, %v8920_v33  ;;  %vm2177_vm13 = vcmp.eq.s32.totalorder %v8929_v35, 1  ;;  %v2321_v61 = vsel %vm7286_vm9, %v7090_v29, 0  ;;  %v8935_v29 = vld [vmem:[#allocation22_spill] sm:$0xff]  ;;  %v8945_v40 = vld [vmem:[#allocation52_spill] sm:$0xff]  ;;  %v2247_v53 = vsel %vm2215_vm7, 65537, %v8668_v13 }
 0x186   : > { %8922 = vst [vmem:[#allocation55_spill] sm:$0xff] %v8921_v33  ;;  %vm2209_vm1 = vmpackc.low %vm2177_vm13, %vm2177_vm13  ;;  %v8937_v54 = vcombine.low %v8935_v29, %v8936_v14  ;;  %vm2180_vm8 = vcmp.eq.s32.totalorder %v8945_v40, 1  ;;  %vm8946_vm13 = vcmask 130048   ;;  %v2246_v35 = vsel %vm2214_vm10, 65537, %v8668_v13 }
 0x187   : > { %v2241_v52 = vsel %vm2209_vm1, 65537, %v8668_v13  ;;  %vm8947_vm3 = vmmov %vm8946_vm13  ;;  %vm1991_vm7 = vcmask 1047552   ;;  %v1974_v14 = vor.u32 %v7186_v41, %v1147_v22  ;;  %v5638_v22 = vld [vmem:[%s8502_s2 + $0x30] sm:$0xff]   ;;  %v7398_v41 = vld [vmem:[%s8502_s2 + $0x40] sm:$0xff]  }
 0x188   : > { %vm7314_vm9 = vcmp.ne.s16.totalorder %v8937_v54, 0  ;;  %v4797_v2 = vcombine.low %v2240_v27, %v2241_v52  ;;  %v8964_v54 = vmov 0  ;;  %v8967_v27 = vmov 0  ;;  %5434 = vmatprep.subr.bf16.mxu1 %v5638_v22  ;;  %5468 = vmatprep.subr.bf16.mxu0 %v7398_v41 }
 0x189   : > { %v8939_v45 = vsel %vm7314_vm9, 4294967295, %v8938_v45  ;;  %v2323_v60 = vsel %vm7314_vm9, %v7148_v9, 0  ;;  %v4798_v9 = vcombine.low %v2242_v18, %v2243_v32  ;;  %vm2212_vm9 = vmpackc.low %vm2180_vm8, %vm2180_vm8  ;;  %5435 = vmatpush3.bf16.msra.mxu1 %v5638_v22 }
 0x18a   : > { %8940 = vst [vmem:[#allocation2_spill] sm:$0xff] %v8939_v45  ;;  %vm7336_vm0 = vcmp.ne.s16.totalorder %v4797_v2, 0  ;;  %v2244_v16 = vsel %vm2212_vm9, 65537, %v8668_v13  ;;  %vm8954_vm8 = vmmov %vm8947_vm3 }
 0x18b   : > { %v8949_v25 = vsel %vm7336_vm0, 4294967295, %v8948_v25  ;;  %v2325_v30 = vsel %vm7336_vm0, %v7172_v47, 0  ;;  %v8955_v47 = vmov 0 }
 0x18c   : > { %5381 = vmatmul.mubr.msk.bf16.gmra.mxu1 %vm8931_vm6, %v2321_v61  ;;  %vm7318_vm6 = vcmp.ne.s16.totalorder %v4796_v36, 0  ;;  %8950 = vst [vmem:[#allocation57_spill] sm:$0xff] %v8949_v25 }
 0x18d   : > { %5384 = vmatprep.mubr.msk.bf16.mxu1 %vm8933_vm11, %v2322_v20  ;;  %v8942_v55 = vsel %vm7318_vm6, 4294967295, %v8941_v55  ;;  %vm2181_vm11 = vcmp.eq.s32.totalorder %v8944_v56, 1  ;;  %v2324_v31 = vsel %vm7318_vm6, %v7163_v5, 0  ;;  %v4800_v20 = vcombine.low %v2246_v35, %v2247_v53 }
 0x18e   : > { %8943 = vst [vmem:[#allocation58_spill] sm:$0xff] %v8942_v55  ;;  %vm2213_vm1 = vmpackc.low %vm2181_vm11, %vm2181_vm11  ;;  %vm2185_vm11 = vcmp.eq.s32.totalorder %v2153_v23, 1 }
 0x18f   : > { %v2245_v5 = vsel %vm2213_vm1, 65537, %v8668_v13  ;;  %vm2217_vm9 = vmpackc.low %vm2185_vm11, %vm2185_vm11  ;;  %vm7360_vm10 = vcmp.ne.s16.totalorder %v4800_v20, 0 }
 0x190   : > { %v4799_v21 = vcombine.low %v2244_v16, %v2245_v5  ;;  %vm2216_vm1 = vmpackc.low %vm2184_vm5, %vm2184_vm5  ;;  %v8959_v0 = vsel %vm7360_vm10, 4294967295, %v8958_v0  ;;  %v2249_v36 = vsel %vm2217_vm9, 65537, %v8668_v13  ;;  %v2328_v29 = vsel %vm7360_vm10, %v7200_v42, 0 }
 0x191   : > { %8960 = vst [vmem:[#allocation5_spill] sm:$0xff] %v8959_v0  ;;  %vm8962_vm11 = vmmov %vm8947_vm3  ;;  %vm8963_vm5 = vsmask.f32 7424 }
 0x192   : > { %vm7356_vm2 = vcmp.ne.s16.totalorder %v4799_v21, 0 }
 0x193   : > { %v8956_v47 = vsel %vm7356_vm2, 4294967295, %v8955_v47  ;;  %v2327_v10 = vsel %vm7356_vm2, %v7184_v46, 0 }
 0x194   : > { %5385 = vmatmul.mubr.msk.bf16.gmra.mxu1 %vm8946_vm13, %v2323_v60  ;;  %vm7340_vm13 = vcmp.ne.s16.totalorder %v4798_v9, 0  ;;  %8957 = vst [vmem:[#allocation34_spill] sm:$0xff] %v8956_v47 }
 0x195   : > { %5388 = vmatprep.mubr.msk.bf16.mxu1 %vm8947_vm3, %v2324_v31  ;;  %v8952_v58 = vsel %vm7340_vm13, 4294967295, %v8951_v58  ;;  %v2326_v61 = vsel %vm7340_vm13, %v7181_v34, 0  ;;  %v2248_v34 = vsel %vm2216_vm1, 65537, %v8668_v13 }
 0x196   : > { %8953 = vst [vmem:[#allocation23_spill] sm:$0xff] %v8952_v58  ;;  %v4801_v52 = vcombine.low %v2248_v34, %v2249_v36 }
 0x198   : > { %vm7384_vm9 = vcmp.ne.s16.totalorder %v4801_v52, 0 }
 0x199   : > { %v8968_v27 = vsel %vm7384_vm9, 4294967295, %v8967_v27 }
 0x19a   : > { %8969 = vst [vmem:[#allocation7_spill] sm:$0xff] %v8968_v27 }
 0x19c   : > { %5389 = vmatmul.mubr.msk.bf16.gmra.mxu1 %vm8954_vm8, %v2325_v30  ;;  %vm8961_vm8 = vmmov %vm8947_vm3 }
 0x19d   : > { %5392 = vmatprep.mubr.msk.bf16.mxu1 %vm8947_vm3, %v2326_v61  ;;  %vm7378_vm3 = vmand %vm1991_vm7, %vm8963_vm5 }
 0x19e   : > { %v8965_v54 = vsel %vm7378_vm3, 4294967295, %v8964_v54  ;;  %v1993_v46 = vsel %vm7378_vm3, %v1974_v14, 0  ;;  %vm8970_vm1 = vmmov %vm8961_vm8 }
 0x19f   : > { %8966 = vst [vmem:[#allocation4_spill] sm:$0xff] %v8965_v54  ;;  %v2329_v17 = vsel %vm7384_vm9, %v1993_v46, 0  ;;  %vm8971_vm7 = vmmov %vm8970_vm1 }
 0x1a0   : > { %vm8974_vm5 = vmmov %vm8970_vm1 }
 0x1a1   : > { %vm8995_vm9 = vmmov %vm8970_vm1 }
 0x1a2   : > { %vm8996_vm3 = vmmov %vm8970_vm1 }
 0x1a3   : > { %vm9000_vm10 = vmmov %vm8970_vm1 }
 0x1a4   : > { %5393 = vmatmul.mubr.msk.bf16.gmra.mxu1 %vm8961_vm8, %v2327_v10  ;;  %vm8972_vm8 = vmmov %vm8970_vm1 }
 0x1a5   : > { %5396 = vmatprep.mubr.msk.bf16.mxu1 %vm8962_vm11, %v2328_v29  ;;  %vm8973_vm11 = vmmov %vm8970_vm1 }
 0x1ac   : > { %5397 = vmatmul.mubr.msk.bf16.gmra.mxu1 %vm8970_vm1, %v2329_v17 }
 0x1ad   : > { %5436 = vmatprep.mubr.bf16.mxu1 %v8668_v13 }
 0x1e2   : > { %v5302_v42 = vpop.f32.mrf.mxu1 }
 0x1e4   : > { %v1585_v56 = vpop.f32.mrf.mxu1 }
 0x1e6   : > { %v5303_v11 = vpop.f32.mrf.mxu1 }
 0x1e8   : > { %v1588_v60 = vpop.f32.mrf.mxu1 }
 0x1eb   : > { %v5306_v32 = vpop.f32.mrf.mxu1 }
 0x1ed   : > { %v7401_v40 = vpop.f32.mrf.mxu1 }
 0x1ee   : > { %v5336_v18 = vpop.f32.mrf.mxu0 }
 0x1ef   : > { %v7403_v31 = vpop.f32.mrf.mxu1  ;;  %v1809_v4 = vadd.f32 %v5336_v18, %v5302_v42 }
 0x1f0   : > { %v1800_v39 = vpop.f32.mrf.mxu0 }
 0x1f1   : > { %v7405_v9 = vpop.f32.mrf.mxu1  ;;  %v1801_v3 = vadd.f32 %v1800_v39, %v1585_v56 }
 0x1f2   : > { %v5337_v2 = vpop.f32.mrf.mxu0 }
 0x1f3   : > { %v1812_v15 = vadd.f32 %v5337_v2, %v5303_v11 }
 0x1f4   : > { %v1803_v23 = vpop.f32.mrf.mxu0 }
 0x1f5   : > { %v1804_v18 = vadd.f32 %v1803_v23, %v1588_v60 }
 0x1f6   : > { %v7407_v12 = vpop.f32.mrf.mxu1 }
 0x1f8   : > { %v7409_v16 = vpop.f32.mrf.mxu1 }
 0x1f9   : > { %v5340_v5 = vpop.f32.mrf.mxu0 }
 0x1fa   : > { %v7411_v53 = vpop.f32.mrf.mxu1 }
 0x1fb   : > { %v1816_v30 = vpop.f32.mrf.mxu0 }
 0x1fc   : > { %v7415_v61 = vpop.f32.mrf.mxu1 }
 0x1fd   : > { %v7413_v35 = vpop.f32.mrf.mxu0 }
 0x1ff   : > { %v7417_v21 = vpop.f32.mrf.mxu1  ;;  %v7419_v20 = vpop.f32.mrf.mxu0 }
 0x201   : > { %v7421_v36 = vpop.f32.mrf.mxu1 }
 0x203   : > { %v7423_v34 = vpop.f32.mrf.mxu1  ;;  %v7425_v10 = vpop.f32.mrf.mxu0 }
 0x205   : > { %v7427_v29 = vpop.f32.mrf.mxu1  ;;  %v7431_v52 = vpop.f32.mrf.mxu0 }
 0x207   : > { %v7437_v22 = vpop.f32.mrf.mxu0 }
 0x209   : > { %v7443_v0 = vpop.f32.mrf.mxu0 }
 0x20b   : > { %v7429_v14 = vpop.f32.mrf.mxu1 }
 0x20d   : > { %v7433_v46 = vpop.f32.mrf.mxu1  ;;  %v7449_v25 = vpop.f32.mrf.mxu0 }
 0x20f   : > { %v7435_v17 = vpop.f32.mrf.mxu1  ;;  %v7455_v49 = vpop.f32.mrf.mxu0 }
 0x211   : > { %v7439_v27 = vpop.f32.mrf.mxu1  ;;  %v7461_v57 = vpop.f32.mrf.mxu0 }
 0x213   : > { %v7441_v54 = vpop.f32.mrf.mxu1  ;;  %v7467_v8 = vpop.f32.mrf.mxu0 }
 0x215   : > { %v7445_v47 = vpop.f32.mrf.mxu1 }
 0x217   : > { %v7447_v58 = vpop.f32.mrf.mxu1  ;;  %v7473_v48 = vpop.f32.mrf.mxu0 }
 0x219   : > { %v7451_v55 = vpop.f32.mrf.mxu1  ;;  %v7482_v7 = vpop.f32.mrf.mxu0 }
 0x21b   : > { %v7491_v13 = vpop.f32.mrf.mxu0 }
 0x224   : > { %v7453_v45 = vpop.f32.mrf.mxu1 }
 0x226   : > { %v7457_v33 = vpop.f32.mrf.mxu1 }
 0x228   : > { %v7459_v43 = vpop.f32.mrf.mxu1 }
 0x22a   : > { %v7463_v62 = vpop.f32.mrf.mxu1 }
 0x22c   : > { %v7465_v1 = vpop.f32.mrf.mxu1 }
 0x22e   : > { %v7469_v19 = vpop.f32.mrf.mxu1 }
 0x230   : > { %v7471_v59 = vpop.f32.mrf.mxu1 }
 0x232   : > { %v7475_v26 = vpop.f32.mrf.mxu1 }
 0x234   : > { %v5370_v24 = vpop.f32.mrf.mxu1 }
 0x235   : > { %v2549_v63 = vadd.f32 %v5370_v24, %v1809_v4  ;;  %v1825_v4 = vadd.f32 %v5340_v5, %v5306_v32 }
 0x236   : > { %v2420_v50 = vpop.f32.mrf.mxu1 }
 0x237   : > { %v2585_v51 = vmul.f32 %v7480_v37, %v2549_v63  ;;  %v2547_v28 = vadd.f32 %v2420_v50, %v1801_v3  ;;  %v1817_v50 = vadd.f32 %v1816_v30, %v7401_v40 }
 0x238   : > { %v5371_v42 = vpop.f32.mrf.mxu1 }
 0x239   : > { %v2583_v38 = vmul.f32 %v7480_v37, %v2547_v28  ;;  %v2550_v6 = vadd.f32 %v5371_v42, %v1812_v15  ;;  %v2621_v56 = vadd.f32 %v7488_v44, %v2585_v51  ;;  %v7499_v15 = vpop.f32.mrf.mxu0 }
 0x23a   : > { %v2423_v24 = vpop.f32.mrf.mxu1 }
 0x23b   : > { %v2586_v11 = vmul.f32 %v7480_v37, %v2550_v6  ;;  %v2548_v63 = vadd.f32 %v2423_v24, %v1804_v18  ;;  %v2619_v39 = vadd.f32 %v7488_v44, %v2583_v38  ;;  %v2653_v42 = vmax.f32 %v2621_v56, 0.0 }
 0x23c   : > { %v5374_v3 = vpop.f32.mrf.mxu1  ;;  %v1828_v6 = vadd.f32 %v7413_v35, %v7403_v31  ;;  %v1820_v38 = vadd.f32 %v7419_v20, %v7405_v9  ;;  %v1833_v20 = vadd.f32 %v7431_v52, %v7409_v16  ;;  %v1844_v16 = vadd.f32 %v7437_v22, %v7411_v53 }
 0x23d   : > { %v2622_v2 = vadd.f32 %v7488_v44, %v2586_v11  ;;  %v2584_v60 = vmul.f32 %v7480_v37, %v2548_v63  ;;  %v2553_v28 = vadd.f32 %v5374_v3, %v1825_v4  ;;  %v2651_v18 = vmax.f32 %v2619_v39, 0.0  ;;  %v7509_v11 = vpop.f32.mrf.mxu0 }
 0x23e   : > { %v2436_v23 = vpop.f32.mrf.mxu1 }
 0x23f   : > { %v2654_v32 = vmax.f32 %v2622_v2, 0.0  ;;  %v2620_v51 = vadd.f32 %v7488_v44, %v2584_v60  ;;  %v2551_v5 = vadd.f32 %v2436_v23, %v1817_v50  ;;  %v2589_v40 = vmul.f32 %v7480_v37, %v2553_v28  ;;  %v7521_v23 = vpop.f32.mrf.mxu0 }
 0x240   : > { %v5375_v30 = vpop.f32.mrf.mxu1  ;;  %v1841_v50 = vadd.f32 %v7425_v10, %v7407_v12 }
 0x241   : > { %v7507_v24 = vpack.c.bf16 %v2654_v32, %v2653_v42  ;;  %v2652_v4 = vmax.f32 %v2620_v51, 0.0  ;;  %v2587_v56 = vmul.f32 %v7480_v37, %v2551_v5  ;;  %v2554_v63 = vadd.f32 %v5375_v30, %v1828_v6 }
 0x242   : > { %v2439_v3 = vpop.f32.mrf.mxu1  ;;  %v2625_v2 = vadd.f32 %v7488_v44, %v2589_v40  ;;  %v1836_v30 = vadd.f32 %v7443_v0, %v7415_v61  ;;  %v1849_v0 = vadd.f32 %v7455_v49, %v7421_v36 }
 0x243   : > { %v2552_v31 = vadd.f32 %v2439_v3, %v1820_v38  ;;  %v2683_v35 = vpack.c.bf16 %v2652_v4, %v2651_v18  ;;  %v2590_v60 = vmul.f32 %v7480_v37, %v2554_v63  ;;  %v2623_v12 = vadd.f32 %v7488_v44, %v2587_v56  ;;  %v7537_v56 = vpop.f32.mrf.mxu0 }
 0x244   : > { %v5378_v9 = vpop.f32.mrf.mxu1  ;;  %v2657_v5 = vmax.f32 %v2625_v2, 0.0  ;;  %v1857_v3 = vadd.f32 %v7449_v25, %v7417_v21 }
 0x245   : > { %v2588_v39 = vmul.f32 %v7480_v37, %v2552_v31  ;;  %v2557_v28 = vadd.f32 %v5378_v9, %v1841_v50  ;;  %5402 = vmatprep.mubr.msk.bf16.mxu0 %vm8971_vm7, %v2683_v35  ;;  %5437 = vmatmul.mubr.msk.bf16.vlgmr.msra.gmra.mxu1 %vm8972_vm8, %v2683_v35  ;;  %v2626_v10 = vadd.f32 %v7488_v44, %v2590_v60  ;;  %v2655_v53 = vmax.f32 %v2623_v12, 0.0  ;;  %vm8975_vm7 = vmmov %vm8970_vm1 }
 0x246   : > { %v2452_v42 = vpop.f32.mrf.mxu1  ;;  %5403 = vmatmul.mubr.msk.bf16.vlgmr.msra.gmra.mxu0 %vm8973_vm11, %v7507_v24  ;;  %5440 = vmatprep.mubr.msk.bf16.mxu1 %vm8974_vm5, %v7507_v24  ;;  %vm8976_vm8 = vmmov %vm8970_vm1  ;;  %v1860_v12 = vadd.f32 %v7461_v57, %v7423_v34 }
 0x247   : > { %v2624_v52 = vadd.f32 %v7488_v44, %v2588_v39  ;;  %v2593_v32 = vmul.f32 %v7480_v37, %v2557_v28  ;;  %v2555_v51 = vadd.f32 %v2452_v42, %v1833_v20  ;;  %5469 = vmatpush3.bf16.msra.mxu0 %v7398_v41  ;;  %v2658_v6 = vmax.f32 %v2626_v10, 0.0  ;;  %v7552_v39 = vpop.f32.mrf.mxu0  ;;  %vm8977_vm11 = vmmov %vm8970_vm1 }
 0x248   : > { %v5379_v40 = vpop.f32.mrf.mxu1  ;;  %vm8978_vm5 = vmmov %vm8970_vm1 }
 0x249   : > { %v2656_v38 = vmax.f32 %v2624_v52, 0.0  ;;  %v2591_v18 = vmul.f32 %v7480_v37, %v2555_v51  ;;  %v2558_v4 = vadd.f32 %v5379_v40, %v1844_v16  ;;  %v7539_v22 = vpack.c.bf16 %v2658_v6, %v2657_v5  ;;  %v7570_v5 = vpop.f32.mrf.mxu0 }
 0x24a   : > { %v2455_v63 = vpop.f32.mrf.mxu1  ;;  %v2629_v41 = vadd.f32 %v7488_v44, %v2593_v32  ;;  %v1852_v16 = vadd.f32 %v7467_v8, %v7427_v29 }
 0x24b   : > { %v2594_v50 = vmul.f32 %v7480_v37, %v2558_v4  ;;  %v2556_v31 = vadd.f32 %v2455_v63, %v1836_v30  ;;  %v7547_v35 = vpack.c.bf16 %v2656_v38, %v2655_v53  ;;  %v2627_v2 = vadd.f32 %v7488_v44, %v2591_v18 }
 0x24c   : > { %v5382_v61 = vpop.f32.mrf.mxu1  ;;  %v2661_v49 = vmax.f32 %v2629_v41, 0.0  ;;  %v1873_v38 = vadd.f32 %v7473_v48, %v7429_v14  ;;  %v1865_v4 = vadd.f32 %v7482_v7, %v7433_v46  ;;  %v1876_v48 = vadd.f32 %v7491_v13, %v7435_v17  ;;  %v1896_v14 = vpop.f32.mrf.mxu0 }
 0x24d   : > { %v2630_v60 = vadd.f32 %v7488_v44, %v2594_v50  ;;  %v2592_v9 = vmul.f32 %v7480_v37, %v2556_v31  ;;  %v2561_v20 = vadd.f32 %v5382_v61, %v1857_v3  ;;  %5406 = vmatprep.mubr.msk.bf16.mxu0 %vm8970_vm1, %v7547_v35  ;;  %5441 = vmatmul.mubr.msk.bf16.gmra.mxu1 %vm8975_vm7, %v7547_v35  ;;  %v2659_v52 = vmax.f32 %v2627_v2, 0.0  ;;  %vm8979_vm7 = vmmov %vm8970_vm1 }
 0x24e   : > { %v2468_v25 = vpop.f32.mrf.mxu1  ;;  %5407 = vmatmul.mubr.msk.bf16.gmra.mxu0 %vm8976_vm8, %v7539_v22  ;;  %5444 = vmatprep.mubr.msk.bf16.mxu1 %vm8977_vm11, %v7539_v22  ;;  %vm8980_vm8 = vmmov %vm8970_vm1  ;;  %v1868_v61 = vadd.f32 %v7499_v15, %v7439_v27  ;;  %v1881_v27 = vadd.f32 %v7521_v23, %v7445_v47 }
 0x24f   : > { %v2662_v21 = vmax.f32 %v2630_v60, 0.0  ;;  %v2628_v36 = vadd.f32 %v7488_v44, %v2592_v9  ;;  %v2559_v28 = vadd.f32 %v2468_v25, %v1849_v0  ;;  %v2597_v10 = vmul.f32 %v7480_v37, %v2561_v20  ;;  %v5361_v20 = vpop.f32.mrf.mxu0  ;;  %vm8981_vm11 = vmmov %vm8970_vm1 }
 0x250   : > { %v5383_v42 = vpop.f32.mrf.mxu1 }
 0x251   : > { %v7568_v32 = vpack.c.bf16 %v2662_v21, %v2661_v49  ;;  %v2660_v51 = vmax.f32 %v2628_v36, 0.0  ;;  %v2595_v6 = vmul.f32 %v7480_v37, %v2559_v28  ;;  %v2562_v40 = vadd.f32 %v5383_v42, %v1860_v12 }
 0x252   : > { %v2471_v30 = vpop.f32.mrf.mxu1  ;;  %v2633_v18 = vadd.f32 %v7488_v44, %v2597_v10  ;;  %v1889_v36 = vadd.f32 %v7509_v11, %v7441_v54 }
 0x253   : > { %v2560_v57 = vadd.f32 %v2471_v30, %v1852_v16  ;;  %v7575_v34 = vpack.c.bf16 %v2660_v51, %v2659_v52  ;;  %v2598_v8 = vmul.f32 %v7480_v37, %v2562_v40  ;;  %v2631_v3 = vadd.f32 %v7488_v44, %v2595_v6  ;;  %v1899_v40 = vpop.f32.mrf.mxu0 }
 0x254   : > { %v5386_v29 = vpop.f32.mrf.mxu1  ;;  %v2665_v13 = vmax.f32 %v2633_v18, 0.0 }
 0x255   : > { %v2596_v53 = vmul.f32 %v7480_v37, %v2560_v57  ;;  %v2565_v63 = vadd.f32 %v5386_v29, %v1873_v38  ;;  %5410 = vmatprep.mubr.msk.bf16.mxu0 %vm8978_vm5, %v7575_v34  ;;  %v2634_v41 = vadd.f32 %v7488_v44, %v2598_v8  ;;  %5445 = vmatmul.mubr.msk.bf16.gmra.mxu1 %vm8970_vm1, %v7575_v34  ;;  %v2663_v25 = vmax.f32 %v2631_v3, 0.0  ;;  %vm8982_vm5 = vmmov %vm8970_vm1 }
 0x256   : > { %v2484_v50 = vpop.f32.mrf.mxu1  ;;  %5411 = vmatmul.mubr.msk.bf16.gmra.mxu0 %vm8979_vm7, %v7568_v32  ;;  %5448 = vmatprep.mubr.msk.bf16.mxu1 %vm8980_vm8, %v7568_v32  ;;  %vm8983_vm7 = vmmov %vm8970_vm1  ;;  %v1892_v38 = vadd.f32 %v7537_v56, %v7447_v58  ;;  %v1884_v57 = vadd.f32 %v7552_v39, %v7451_v55 }
 0x257   : > { %v2632_v7 = vadd.f32 %v7488_v44, %v2596_v53  ;;  %v2601_v46 = vmul.f32 %v7480_v37, %v2565_v63  ;;  %v2563_v31 = vadd.f32 %v2484_v50, %v1865_v4  ;;  %v2666_v17 = vmax.f32 %v2634_v41, 0.0  ;;  %vm8984_vm8 = vmmov %vm8970_vm1 }
 0x258   : > { %v5387_v0 = vpop.f32.mrf.mxu1  ;;  %v1905_v50 = vadd.f32 %v7570_v5, %v7453_v45  ;;  %v1908_v45 = vadd.f32 %v5361_v20, %v7459_v43 }
 0x259   : > { %v2664_v2 = vmax.f32 %v2632_v7, 0.0  ;;  %v2599_v60 = vmul.f32 %v7480_v37, %v2563_v31  ;;  %v2566_v9 = vadd.f32 %v5387_v0, %v1876_v48  ;;  %v7599_v49 = vpack.c.bf16 %v2666_v17, %v2665_v13  ;;  %v5364_v48 = vpop.f32.mrf.mxu0 }
 0x25a   : > { %v2487_v21 = vpop.f32.mrf.mxu1  ;;  %v2637_v28 = vadd.f32 %v7488_v44, %v2601_v46  ;;  %v1897_v46 = vadd.f32 %v1896_v14, %v7457_v33 }
 0x25b   : > { %v2602_v12 = vmul.f32 %v7480_v37, %v2566_v9  ;;  %v2564_v10 = vadd.f32 %v2487_v21, %v1868_v61  ;;  %v7607_v42 = vpack.c.bf16 %v2664_v2, %v2663_v25  ;;  %v2635_v16 = vadd.f32 %v7488_v44, %v2599_v60  ;;  %v1912_v5 = vpop.f32.mrf.mxu0 }
 0x25c   : > { %v5390_v15 = vpop.f32.mrf.mxu1  ;;  %v2669_v11 = vmax.f32 %v2637_v28, 0.0 }
 0x25d   : > { %v2638_v52 = vadd.f32 %v7488_v44, %v2602_v12  ;;  %v2600_v51 = vmul.f32 %v7480_v37, %v2564_v10  ;;  %v2569_v6 = vadd.f32 %v5390_v15, %v1889_v36  ;;  %5414 = vmatprep.mubr.msk.bf16.mxu0 %vm8981_vm11, %v7607_v42  ;;  %5449 = vmatmul.mubr.msk.bf16.gmra.mxu1 %vm8982_vm5, %v7607_v42  ;;  %v2667_v29 = vmax.f32 %v2635_v16, 0.0  ;;  %vm8985_vm11 = vmmov %vm8970_vm1  ;;  %v5365_v28 = vpop.f32.mrf.mxu0 }
 0x25e   : > { %v2500_v54 = vpop.f32.mrf.mxu1  ;;  %5415 = vmatmul.mubr.msk.bf16.gmra.mxu0 %vm8970_vm1, %v7599_v49  ;;  %5452 = vmatprep.mubr.msk.bf16.mxu1 %vm8983_vm7, %v7599_v49  ;;  %vm8986_vm5 = vmmov %vm8970_vm1  ;;  %v1900_v36 = vadd.f32 %v1899_v40, %v7463_v62  ;;  %v1921_v15 = vadd.f32 %v5364_v48, %v7465_v1 }
 0x25f   : > { %v2670_v47 = vmax.f32 %v2638_v52, 0.0  ;;  %v2636_v23 = vadd.f32 %v7488_v44, %v2600_v51  ;;  %v2567_v30 = vadd.f32 %v2500_v54, %v1881_v27  ;;  %v2605_v18 = vmul.f32 %v7480_v37, %v2569_v6  ;;  %vm8987_vm7 = vmmov %vm8970_vm1 }
 0x260   : > { %v5391_v8 = vpop.f32.mrf.mxu1 }
 0x261   : > { %v7626_v4 = vpack.c.bf16 %v2670_v47, %v2669_v11  ;;  %v2668_v53 = vmax.f32 %v2636_v23, 0.0  ;;  %v2603_v63 = vmul.f32 %v7480_v37, %v2567_v30  ;;  %v2570_v3 = vadd.f32 %v5391_v8, %v1892_v38  ;;  %v1915_v23 = vpop.f32.mrf.mxu0 }
 0x262   : > { %v2503_v41 = vpop.f32.mrf.mxu1  ;;  %v2641_v55 = vadd.f32 %v7488_v44, %v2605_v18  ;;  %v1913_v11 = vadd.f32 %v1912_v5, %v7469_v19  ;;  %v1924_v47 = vadd.f32 %v5365_v28, %v7471_v59 }
 0x263   : > { %v7631_v7 = vpack.c.bf16 %v2668_v53, %v2667_v29  ;;  %v2568_v58 = vadd.f32 %v2503_v41, %v1884_v57  ;;  %v2606_v56 = vmul.f32 %v7480_v37, %v2570_v3  ;;  %v2639_v31 = vadd.f32 %v7488_v44, %v2603_v63 }
 0x264   : > { %v5394_v39 = vpop.f32.mrf.mxu1  ;;  %v2673_v60 = vmax.f32 %v2641_v55, 0.0  ;;  %v1916_v53 = vadd.f32 %v1915_v23, %v7475_v26 }
 0x265   : > { %v2604_v13 = vmul.f32 %v7480_v37, %v2568_v58  ;;  %v2573_v17 = vadd.f32 %v5394_v39, %v1905_v50  ;;  %5418 = vmatprep.mubr.msk.bf16.mxu0 %vm8984_vm8, %v7631_v7  ;;  %v2642_v0 = vadd.f32 %v7488_v44, %v2606_v56  ;;  %5453 = vmatmul.mubr.msk.bf16.gmra.mxu1 %vm8985_vm11, %v7631_v7  ;;  %v2671_v20 = vmax.f32 %v2639_v31, 0.0  ;;  %vm8988_vm8 = vmmov %vm8970_vm1 }
 0x266   : > { %v2516_v61 = vpop.f32.mrf.mxu1  ;;  %5419 = vmatmul.mubr.msk.bf16.gmra.mxu0 %vm8986_vm5, %v7626_v4  ;;  %5456 = vmatprep.mubr.msk.bf16.mxu1 %vm8970_vm1, %v7626_v4  ;;  %vm8989_vm11 = vmmov %vm8970_vm1 }
 0x267   : > { %v2640_v2 = vadd.f32 %v7488_v44, %v2604_v13  ;;  %v2609_v33 = vmul.f32 %v7480_v37, %v2573_v17  ;;  %v2571_v14 = vadd.f32 %v2516_v61, %v1897_v46  ;;  %v2674_v43 = vmax.f32 %v2642_v0, 0.0  ;;  %vm8990_vm5 = vmmov %vm8970_vm1 }
 0x268   : > { %v5395_v9 = vpop.f32.mrf.mxu1 }
 0x269   : > { %v2672_v25 = vmax.f32 %v2640_v2, 0.0  ;;  %v2574_v21 = vadd.f32 %v5395_v9, %v1908_v45  ;;  %v7651_v12 = vpack.c.bf16 %v2674_v43, %v2673_v60  ;;  %v2607_v10 = vmul.f32 %v7480_v37, %v2571_v14 }
 0x26a   : > { %v2519_v27 = vpop.f32.mrf.mxu1  ;;  %v2645_v52 = vadd.f32 %v7488_v44, %v2609_v33 }
 0x26b   : > { %v7655_v16 = vpack.c.bf16 %v2672_v25, %v2671_v20  ;;  %v2610_v51 = vmul.f32 %v7480_v37, %v2574_v21  ;;  %v2572_v6 = vadd.f32 %v2519_v27, %v1900_v36  ;;  %v2643_v1 = vadd.f32 %v7488_v44, %v2607_v10 }
 0x26c   : > { %v5398_v54 = vpop.f32.mrf.mxu1  ;;  %v2677_v57 = vmax.f32 %v2645_v52, 0.0 }
 0x26d   : > { %v2646_v62 = vadd.f32 %v7488_v44, %v2610_v51  ;;  %v2577_v40 = vadd.f32 %v5398_v54, %v1921_v15  ;;  %5422 = vmatprep.mubr.msk.bf16.mxu0 %vm8987_vm7, %v7655_v16  ;;  %v2608_v30 = vmul.f32 %v7480_v37, %v2572_v6  ;;  %5457 = vmatmul.mubr.msk.bf16.gmra.mxu1 %vm8988_vm8, %v7655_v16  ;;  %v2675_v41 = vmax.f32 %v2643_v1, 0.0  ;;  %vm8991_vm7 = vmmov %vm8970_vm1 }
 0x26e   : > { %v2532_v38 = vpop.f32.mrf.mxu1  ;;  %5423 = vmatmul.mubr.msk.bf16.gmra.mxu0 %vm8989_vm11, %v7651_v12  ;;  %5460 = vmatprep.mubr.msk.bf16.mxu1 %vm8990_vm5, %v7651_v12  ;;  %vm8992_vm8 = vmmov %vm8970_vm1 }
 0x26f   : > { %v2678_v18 = vmax.f32 %v2646_v62, 0.0  ;;  %v2613_v19 = vmul.f32 %v7480_v37, %v2577_v40  ;;  %v2575_v8 = vadd.f32 %v2532_v38, %v1913_v11  ;;  %v2644_v59 = vadd.f32 %v7488_v44, %v2608_v30  ;;  %vm8993_vm11 = vmmov %vm8970_vm1 }
 0x270   : > { %v5399_v29 = vpop.f32.mrf.mxu1  ;;  %vm8994_vm5 = vmmov %vm8970_vm1 }
 0x271   : > { %v2696_v63 = vpack.c.bf16 %v2678_v18, %v2677_v57  ;;  %v2611_v48 = vmul.f32 %v7480_v37, %v2575_v8  ;;  %v2578_v3 = vadd.f32 %v5399_v29, %v1924_v47  ;;  %v2676_v50 = vmax.f32 %v2644_v59, 0.0 }
 0x272   : > { %v2535_v58 = vpop.f32.mrf.mxu1  ;;  %v2649_v55 = vadd.f32 %v7488_v44, %v2613_v19 }
 0x273   : > { %v2614_v56 = vmul.f32 %v7480_v37, %v2578_v3  ;;  %v2576_v39 = vadd.f32 %v2535_v58, %v1916_v53  ;;  %v2695_v46 = vpack.c.bf16 %v2676_v50, %v2675_v41  ;;  %v2647_v31 = vadd.f32 %v7488_v44, %v2611_v48 }
 0x274   : > { %v2681_v26 = vmax.f32 %v2649_v55, 0.0 }
 0x275   : > { %v2650_v13 = vadd.f32 %v7488_v44, %v2614_v56  ;;  %v2612_v17 = vmul.f32 %v7480_v37, %v2576_v39  ;;  %5426 = vmatprep.mubr.msk.bf16.mxu0 %vm8970_vm1, %v2695_v46  ;;  %5461 = vmatmul.mubr.msk.bf16.gmra.mxu1 %vm8991_vm7, %v2695_v46  ;;  %v2679_v0 = vmax.f32 %v2647_v31, 0.0  ;;  %vm8997_vm7 = vmmov %vm8970_vm1  ;;  %v9010_v37 = vmov 0  }
 0x276   : > { %5427 = vmatmul.mubr.msk.bf16.gmra.mxu0 %vm8992_vm8, %v2696_v63  ;;  %5464 = vmatprep.mubr.msk.bf16.mxu1 %vm8993_vm11, %v2696_v63  ;;  %vm8998_vm8 = vmmov %vm8970_vm1 }
 0x277   : > { %v2682_v45 = vmax.f32 %v2650_v13, 0.0  ;;  %v2648_v5 = vadd.f32 %v7488_v44, %v2612_v17  ;;  %vm8999_vm11 = vmmov %vm8970_vm1  ;;  %v5640_v44 = vld [vmem:[%s8502_s2 + $0x50] sm:$0xff]  }
 0x278   : > { %5502 = vmatprep.subr.bf16.mxu1 %v5640_v44 }
 0x279   : > { %v2698_v61 = vpack.c.bf16 %v2682_v45, %v2681_v26  ;;  %v2680_v2 = vmax.f32 %v2648_v5, 0.0  ;;  %5503 = vmatpush3.bf16.msra.mxu1 %v5640_v44 }
 0x27b   : > { %v2697_v33 = vpack.c.bf16 %v2680_v2, %v2679_v0  ;;  %v7767_v0 = vld [vmem:[%s8503_s3 + $0x3] ss:$0 sm:$0xff] }
 0x27d   : > { %5430 = vmatprep.mubr.msk.bf16.mxu0 %vm8994_vm5, %v2697_v33  ;;  %5465 = vmatmul.mubr.msk.bf16.gmra.mxu1 %vm8995_vm9, %v2697_v33  ;;  %vm9002_vm9 = vmmov %vm8970_vm1 }
 0x27e   : > { %5431 = vmatmul.mubr.msk.bf16.gmra.mxu0 %vm8996_vm3, %v2698_v61  ;;  %vm9001_vm3 = vmmov %vm8970_vm1 }
 0x27f   : > { %5470 = vmatprep.mubr.msk.bf16.mxu0 %vm8970_vm1, %v7507_v24  ;;  %vm9003_vm5 = vmmov %vm8970_vm1  ;;  %v5641_v24 = vld [vmem:[%s8502_s2 + $0x48] sm:$0xff]  }
 0x280   : > { %5536 = vmatprep.subr.bf16.mxu0 %v5641_v24 }
 0x286   : > { %5471 = vmatmul.mubr.msk.bf16.vlgmr.msra.gmra.mxu0 %vm8997_vm7, %v7547_v35  ;;  %vm9005_vm7 = vmmov %vm8970_vm1 }
 0x287   : > { %5474 = vmatprep.mubr.msk.bf16.mxu0 %vm8998_vm8, %v7539_v22  ;;  %vm9006_vm8 = vmmov %vm8970_vm1  ;;  %v7725_v22 = vld [vmem:[%s8502_s2 + $0x58] sm:$0xff]   ;;  %5537 = vmatpush3.bf16.msra.mxu0 %v5641_v24 }
 0x288   : > { %5570 = vmatprep.subr.bf16.mxu1 %v7725_v22 }
 0x28e   : > { %5475 = vmatmul.mubr.msk.bf16.gmra.mxu0 %vm8999_vm11, %v7575_v34  ;;  %vm9007_vm11 = vmmov %vm8970_vm1 }
 0x28f   : > { %5478 = vmatprep.mubr.msk.bf16.mxu0 %vm9000_vm10, %v7568_v32  ;;  %vm9004_vm10 = vmmov %vm8970_vm1 }
 0x296   : > { %5479 = vmatmul.mubr.msk.bf16.gmra.mxu0 %vm9001_vm3, %v7607_v42  ;;  %vm9008_vm3 = vmmov %vm8970_vm1 }
 0x297   : > { %5482 = vmatprep.mubr.msk.bf16.mxu0 %vm9002_vm9, %v7599_v49  ;;  %vm9009_vm9 = vmmov %vm8970_vm1 }
 0x29e   : > { %5483 = vmatmul.mubr.msk.bf16.gmra.mxu0 %vm9003_vm5, %v7631_v7  ;;  %vm9017_vm5 = vmmov %vm8970_vm1 }
 0x29f   : > { %5486 = vmatprep.mubr.msk.bf16.mxu0 %vm8970_vm1, %v7626_v4 }
 0x2a6   : > { %5487 = vmatmul.mubr.msk.bf16.gmra.mxu0 %vm9004_vm10, %v7655_v16  ;;  %vm9018_vm10 = vsmask.f32 256 }
 0x2a7   : > { %5490 = vmatprep.mubr.msk.bf16.mxu0 %vm9005_vm7, %v7651_v12  ;;  %vm9020_vm7 = vmmov %vm8970_vm1 }
 0x2ae   : > { %5491 = vmatmul.mubr.msk.bf16.gmra.mxu0 %vm9006_vm8, %v2695_v46  ;;  %vm9024_vm8 = vsmask.f32 7424 }
 0x2af   : > { %5494 = vmatprep.mubr.msk.bf16.mxu0 %vm9007_vm11, %v2696_v63  ;;  %vm9027_vm11 = vmmov %vm9018_vm10 }
 0x2b6   : > { %5495 = vmatmul.mubr.msk.bf16.gmra.mxu0 %vm9008_vm3, %v2697_v33  ;;  %vm9028_vm3 = vmmov %vm9024_vm8 }
 0x2b7   : > { %5498 = vmatprep.mubr.msk.bf16.mxu0 %vm9009_vm9, %v2698_v61  ;;  %vm9029_vm9 = vmmov %vm9018_vm10 }
 0x2be   : > { %5499 = vmatmul.mubr.bf16.gmra.mxu0 %v9010_v37 }
 0x305   : > { %v5438_v35 = vpop.f32.mrf.mxu1 }
 0x306   : > { %v5404_v32 = vpop.f32.mrf.mxu0 }
 0x307   : > { %v2958_v34 = vpop.f32.mrf.mxu1  ;;  %v2967_v13 = vadd.f32 %v5438_v35, %v5404_v32 }
 0x308   : > { %v2791_v49 = vpop.f32.mrf.mxu0 }
 0x309   : > { %v5439_v42 = vpop.f32.mrf.mxu1  ;;  %v2959_v45 = vadd.f32 %v2958_v34, %v2791_v49 }
 0x30a   : > { %v5405_v4 = vpop.f32.mrf.mxu0 }
 0x30b   : > { %v2961_v7 = vpop.f32.mrf.mxu1  ;;  %v2970_v2 = vadd.f32 %v5439_v42, %v5405_v4 }
 0x30c   : > { %v2794_v14 = vpop.f32.mrf.mxu0 }
 0x30d   : > { %v5442_v60 = vpop.f32.mrf.mxu1  ;;  %v2962_v24 = vadd.f32 %v2961_v7, %v2794_v14 }
 0x30e   : > { %v5408_v43 = vpop.f32.mrf.mxu0 }
 0x30f   : > { %v2974_v9 = vpop.f32.mrf.mxu1 }
 0x310   : > { %v2807_v20 = vpop.f32.mrf.mxu0 }
 0x311   : > { %v5443_v25 = vpop.f32.mrf.mxu1  ;;  %v2975_v32 = vadd.f32 %v2974_v9, %v2807_v20 }
 0x312   : > { %v5409_v21 = vpop.f32.mrf.mxu0 }
 0x313   : > { %v2977_v28 = vpop.f32.mrf.mxu1 }
 0x314   : > { %v2810_v36 = vpop.f32.mrf.mxu0 }
 0x315   : > { %v5446_v27 = vpop.f32.mrf.mxu1 }
 0x316   : > { %v5412_v12 = vpop.f32.mrf.mxu0 }
 0x317   : > { %v2990_v52 = vpop.f32.mrf.mxu1 }
 0x318   : > { %v2823_v10 = vpop.f32.mrf.mxu0 }
 0x319   : > { %v5447_v54 = vpop.f32.mrf.mxu1 }
 0x31a   : > { %v5413_v15 = vpop.f32.mrf.mxu0 }
 0x31b   : > { %v2993_v40 = vpop.f32.mrf.mxu1 }
 0x31c   : > { %v2826_v16 = vpop.f32.mrf.mxu0 }
 0x31d   : > { %v5450_v1 = vpop.f32.mrf.mxu1 }
 0x31e   : > { %v5416_v51 = vpop.f32.mrf.mxu0 }
 0x31f   : > { %v3006_v57 = vpop.f32.mrf.mxu1 }
 0x320   : > { %v2839_v6 = vpop.f32.mrf.mxu0 }
 0x321   : > { %v5451_v8 = vpop.f32.mrf.mxu1 }
 0x322   : > { %v7728_v11 = vpop.f32.mrf.mxu0 }
 0x323   : > { %v3009_v53 = vpop.f32.mrf.mxu1 }
 0x324   : > { %v7730_v62 = vpop.f32.mrf.mxu0 }
 0x325   : > { %v5454_v3 = vpop.f32.mrf.mxu1 }
 0x326   : > { %v7732_v47 = vpop.f32.mrf.mxu0 }
 0x327   : > { %v3022_v58 = vpop.f32.mrf.mxu1 }
 0x328   : > { %v7734_v23 = vpop.f32.mrf.mxu0 }
 0x329   : > { %v5455_v39 = vpop.f32.mrf.mxu1 }
 0x32a   : > { %v7736_v30 = vpop.f32.mrf.mxu0 }
 0x32b   : > { %v3025_v17 = vpop.f32.mrf.mxu1 }
 0x32c   : > { %v7738_v38 = vpop.f32.mrf.mxu0 }
 0x32d   : > { %v5458_v44 = vpop.f32.mrf.mxu1 }
 0x32e   : > { %v7740_v18 = vpop.f32.mrf.mxu0 }
 0x32f   : > { %v3038_v42 = vpop.f32.mrf.mxu1 }
 0x330   : > { %v7742_v19 = vpop.f32.mrf.mxu0 }
 0x332   : > { %v7744_v59 = vpop.f32.mrf.mxu0 }
 0x334   : > { %v7746_v29 = vpop.f32.mrf.mxu0 }
 0x336   : > { %v7748_v63 = vpop.f32.mrf.mxu0 }
 0x338   : > { %v7750_v48 = vpop.f32.mrf.mxu0 }
 0x33a   : > { %v7752_v41 = vpop.f32.mrf.mxu0 }
 0x33b   : > { %9011 = vst [vmem:[#allocation6_spill] sm:$0xff] %v7752_v41  ;;  %v2991_v41 = vadd.f32 %v2990_v52, %v2823_v10  ;;  %v7788_v10 = vadd.f32 %v5454_v3, %v7732_v47  ;;  %v7794_v52 = vadd.f32 %v5455_v39, %v7736_v30 }
 0x33c   : > { %v7754_v50 = vpop.f32.mrf.mxu0 }
 0x33d   : > { %9012 = vst [vmem:[#allocation9_spill] sm:$0xff] %v7754_v50  ;;  %v2999_v50 = vadd.f32 %v5446_v27, %v5412_v12  ;;  %v7785_v12 = vadd.f32 %v3009_v53, %v7730_v62  ;;  %v7791_v27 = vadd.f32 %v3022_v58, %v7734_v23  ;;  %v7812_v53 = vadd.f32 %v3038_v42, %v7742_v19 }
 0x33e   : > { %v7756_v55 = vpop.f32.mrf.mxu0 }
 0x33f   : > { %9013 = vst [vmem:[#allocation8_spill] sm:$0xff] %v7756_v55  ;;  %v2978_v55 = vadd.f32 %v2977_v28, %v2810_v36  ;;  %v7782_v28 = vadd.f32 %v5451_v8, %v7728_v11  ;;  %v7809_v8 = vadd.f32 %v5458_v44, %v7740_v18 }
 0x340   : > { %v7758_v56 = vpop.f32.mrf.mxu0 }
 0x341   : > { %9014 = vst [vmem:[#allocation12_spill] sm:$0xff] %v7758_v56 }
 0x342   : > { %v7760_v46 = vpop.f32.mrf.mxu0 }
 0x343   : > { %9015 = vst [vmem:[#allocation11_spill] sm:$0xff] %v7760_v46 }
 0x344   : > { %v7762_v31 = vpop.f32.mrf.mxu0 }
 0x345   : > { %9016 = vst [vmem:[#allocation14_spill] sm:$0xff] %v7762_v31  ;;  %v2983_v31 = vadd.f32 %v5442_v60, %v5408_v43  ;;  %v7775_v60 = vadd.f32 %v5450_v1, %v5416_v51  ;;  %v7777_v43 = vadd.f32 %v3006_v57, %v2839_v6  ;;  %v7797_v51 = vadd.f32 %v3025_v17, %v7738_v38 }
 0x346   : > { %v5472_v26 = vpop.f32.mrf.mxu0 }
 0x347   : > { %v3256_v5 = vadd.f32 %v5472_v26, %v2967_v13  ;;  %v2986_v26 = vadd.f32 %v5443_v25, %v5409_v21 }
 0x348   : > { %v3127_v61 = vpop.f32.mrf.mxu0 }
 0x349   : > { %v3254_v33 = vadd.f32 %v3127_v61, %v2959_v45  ;;  %v3292_v46 = vadd.f32 %v7767_v0, %v3256_v5  ;;  %v3002_v45 = vadd.f32 %v5447_v54, %v5413_v15  ;;  %v7773_v5 = vadd.f32 %v2993_v40, %v2826_v16  ;;  %v5459_v15 = vpop.f32.mrf.mxu1 }
 0x34a   : > { %v5473_v37 = vpop.f32.mrf.mxu0  ;;  %v7815_v3 = vadd.f32 %v5459_v15, %v7744_v59 }
 0x34b   : > { %v3257_v56 = vadd.f32 %v5473_v37, %v2970_v2  ;;  %v3290_v34 = vadd.f32 %v7767_v0, %v3254_v33  ;;  %v3324_v61 = vmax.f32 %v3292_v46, 0.0  ;;  %v3041_v58 = vpop.f32.mrf.mxu1 }
 0x34c   : > { %v3130_v35 = vpop.f32.mrf.mxu0 }
 0x34d   : > { %v3293_v49 = vadd.f32 %v7767_v0, %v3257_v56  ;;  %v3255_v13 = vadd.f32 %v3130_v35, %v2962_v24  ;;  %v3322_v56 = vmax.f32 %v3290_v34, 0.0  ;;  %v7825_v34 = vadd.f32 %v3041_v58, %v7746_v29 }
 0x34e   : > { %v5476_v4 = vpop.f32.mrf.mxu0 }
 0x34f   : > { %v3325_v7 = vmax.f32 %v3293_v49, 0.0  ;;  %v3291_v14 = vadd.f32 %v7767_v0, %v3255_v13  ;;  %v3260_v9 = vadd.f32 %v5476_v4, %v2983_v31  ;;  %v5462_v49 = vpop.f32.mrf.mxu1 }
 0x350   : > { %v3143_v20 = vpop.f32.mrf.mxu0 }
 0x351   : > { %v7779_v25 = vpack.c.bf16 %v3325_v7, %v3324_v61  ;;  %v3323_v21 = vmax.f32 %v3291_v14, 0.0  ;;  %v3258_v36 = vadd.f32 %v3143_v20, %v2975_v32  ;;  %v3296_v62 = vadd.f32 %v7767_v0, %v3260_v9 }
 0x352   : > { %v5477_v16 = vpop.f32.mrf.mxu0 }
 0x353   : > { %v3378_v6 = vshrl.u32 %v7779_v25, 16  ;;  %v3354_v54 = vpack.c.bf16 %v3323_v21, %v3322_v56  ;;  %v3381_v11 = vshll.u32 %v7779_v25, 16  ;;  %v3294_v40 = vadd.f32 %v7767_v0, %v3258_v36 }
 0x354   : > { %v3261_v47 = vadd.f32 %v5477_v16, %v2986_v26  ;;  %v3146_v23 = vpop.f32.mrf.mxu0  ;;  %v3328_v19 = vmax.f32 %v3296_v62, 0.0 }
 0x355   : > { %v7805_v1 = vrot.slane %v3378_v6, 7  ;;  %v3371_v30 = vshrl.u32 %v3354_v54, 16  ;;  %v3259_v57 = vadd.f32 %v3146_v23, %v2978_v55  ;;  %5504 = vmatprep.mubr.msk.bf16.mxu1 %vm9017_vm5, %v3354_v54  ;;  %v3374_v38 = vshll.u32 %v3354_v54, 16  ;;  %v3054_v54 = vpop.f32.mrf.mxu1  ;;  %vm9031_vm5 = vmmov %vm8970_vm1 }
 0x356   : > { %v3297_v39 = vadd.f32 %v7767_v0, %v3261_v47  ;;  %v5480_v46 = vpop.f32.mrf.mxu0  ;;  %5505 = vmatmul.mubr.msk.bf16.vlgmr.msra.gmra.mxu1 %vm8970_vm1, %v7779_v25  ;;  %v3326_v2 = vmax.f32 %v3294_v40, 0.0  ;;  %v3950_v7 = vrot.slane %v3381_v11, 1 }
 0x357   : > { %v3383_v55 = vor.u32 %v3381_v11, %v7805_v1  ;;  %v3295_v31 = vadd.f32 %v7767_v0, %v3259_v57  ;;  %v3264_v17 = vadd.f32 %v5480_v46, %v2999_v50  ;;  %5571 = vmatpush3.bf16.msra.mxu1 %v7725_v22  ;;  %v3373_v18 = vrot.slane %v3371_v30, 7 }
 0x358   : > { %v3329_v33 = vmax.f32 %v3297_v39, 0.0  ;;  %v3159_v59 = vpop.f32.mrf.mxu0  ;;  %v3948_v44 = vrot.slane %v3374_v38, 1  ;;  %v7854_v46 = vadd.f32 %v5462_v49, %v7748_v63 }
 0x359   : > { %v3327_v37 = vmax.f32 %v3295_v31, 0.0  ;;  %v3300_v24 = vadd.f32 %v7767_v0, %v3264_v17  ;;  %v3262_v35 = vadd.f32 %v3159_v59, %v2991_v41  ;;  %v3376_v32 = vor.u32 %v3374_v38, %v3373_v18 }
 0x35a   : > { %v7827_v13 = vpack.c.bf16 %v3329_v33, %v3328_v19  ;;  %v5481_v50 = vpop.f32.mrf.mxu0  ;;  %v3384_v22 = vsel %vm9018_vm10, %v3373_v18, %v3383_v55  ;;  %v3949_v26 = vor.u32 %v3948_v44, %v3371_v30  ;;  %v3952_v17 = vor.u32 %v3950_v7, %v3378_v6 }
 0x35b   : > { %v3356_v42 = vpack.c.bf16 %v3327_v37, %v3326_v2  ;;  %v3332_v4 = vmax.f32 %v3300_v24, 0.0  ;;  %v3265_v61 = vadd.f32 %v5481_v50, %v3002_v45  ;;  %v3298_v41 = vadd.f32 %v7767_v0, %v3262_v35 }
 0x35c   : > { %v3394_v14 = vshrl.u32 %v7827_v13, 16  ;;  %v3397_v9 = vshll.u32 %v7827_v13, 16  ;;  %v3162_v20 = vpop.f32.mrf.mxu0  ;;  %v3513_v56 = vsel %vm6778_vm14, 0, %v3376_v32  ;;  %v3515_v45 = vsel %vm6732_vm12, %v3384_v22, 0  ;;  %vm9023_vm14 = vmmov %vm8970_vm1  ;;  %v5463_v22 = vpop.f32.mrf.mxu1 }
 0x35d   : > { %v3386_v21 = vshrl.u32 %v3356_v42, 16  ;;  %v3389_v36 = vshll.u32 %v3356_v42, 16  ;;  %v3301_v15 = vadd.f32 %v7767_v0, %v3265_v61  ;;  %5508 = vmatprep.mubr.msk.bf16.mxu1 %vm9020_vm7, %v3356_v42  ;;  %v3263_v62 = vadd.f32 %v3162_v20, %v7773_v5  ;;  %vm9025_vm12 = vmmov %vm8970_vm1  ;;  %v9032_v20 = vld [vmem:[#allocation31_spill] sm:$0xff] }
 0x35e   : > { %v7841_v11 = vrot.slane %v3394_v14, 7  ;;  %v3514_v47 = vsel %vm6743_vm4, %v3513_v56, 0  ;;  %v5484_v23 = vpop.f32.mrf.mxu0  ;;  %5509 = vmatmul.mubr.msk.bf16.gmra.mxu1 %vm9023_vm14, %v7827_v13  ;;  %v7849_v30 = vsel %vm9024_vm8, %v3949_v26, %v3950_v7  ;;  %vm9026_vm4 = vmmov %vm8970_vm1  ;;  %v7862_v18 = vadd.f32 %v3054_v54, %v7750_v48 }
 0x35f   : > { %v3953_v57 = vrot.slane %v3389_v36, 1  ;;  %v3333_v38 = vmax.f32 %v3301_v15, 0.0  ;;  %5538 = vmatprep.mubr.msk.bf16.mxu0 %vm9025_vm12, %v3514_v47  ;;  %v3268_v58 = vadd.f32 %v5484_v23, %v7775_v60  ;;  %v3388_v39 = vrot.slane %v3386_v21, 7  ;;  %vm9035_vm7 = vmmov %vm9028_vm3  ;;  %v9036_v15 = vld [vmem:[#allocation6_spill] sm:$0xff] }
 0x360   : > { %v3299_v5 = vadd.f32 %v7767_v0, %v3263_v62  ;;  %5539 = vmatmul.mubr.msk.bf16.vlgmr.msra.gmra.mxu0 %vm9026_vm4, %v3515_v45  ;;  %v3175_v55 = vpop.f32.mrf.mxu0  ;;  %v3399_v31 = vor.u32 %v3397_v9, %v7841_v11  ;;  %v3330_v63 = vmax.f32 %v3298_v41, 0.0  ;;  %v3956_v48 = vrot.slane %v3397_v9, 1  ;;  %vm9037_vm14 = vmmov %vm8970_vm1 }
 0x361   : > { %v7864_v19 = vpack.c.bf16 %v3333_v38, %v3332_v4  ;;  %v3266_v60 = vadd.f32 %v3175_v55, %v7777_v43  ;;  %v3391_v2 = vor.u32 %v3389_v36, %v3388_v39  ;;  %v7869_v37 = vsel %vm9028_vm3, %v3952_v17, %v3953_v57  ;;  %v3057_v38 = vpop.f32.mrf.mxu1  ;;  %vm9038_vm8 = vmmov %vm9029_vm9 }
 0x362   : > { %v3331_v33 = vmax.f32 %v3299_v5, 0.0  ;;  %v5485_v59 = vpop.f32.mrf.mxu0  ;;  %v3400_v44 = vsel %vm9027_vm11, %v3388_v39, %v3399_v31  ;;  %v3304_v25 = vadd.f32 %v7767_v0, %v3268_v58  ;;  %v3955_v6 = vor.u32 %v3953_v57, %v3386_v21  ;;  %vm9039_vm12 = vmmov %vm9038_vm8 }
 0x363   : > { %v3410_v24 = vshrl.u32 %v7864_v19, 16  ;;  %v3413_v35 = vshll.u32 %v7864_v19, 16  ;;  %v3269_v43 = vadd.f32 %v5485_v59, %v7782_v28  ;;  %v3392_v50 = vsel %vm9029_vm9, %v7805_v1, %v3391_v2  ;;  %vm9040_vm4 = vmmov %vm8970_vm1 }
 0x364   : > { %v7874_v32 = vpack.c.bf16 %v3331_v33, %v3330_v63  ;;  %v3178_v49 = vpop.f32.mrf.mxu0  ;;  %v3302_v42 = vadd.f32 %v7767_v0, %v3266_v60  ;;  %v3516_v7 = vsel %vm6794_vm15, %v3392_v50, 0  ;;  %vm9033_vm10 = vnez %v9032_v20  ;;  %vm9034_vm15 = vmmov %vm8970_vm1 }
 0x365   : > { %v7881_v26 = vrot.slane %v3410_v24, 7  ;;  %v3267_v4 = vadd.f32 %v3178_v49, %v7785_v12  ;;  %v3305_v41 = vadd.f32 %v7767_v0, %v3269_v43  ;;  %5542 = vmatprep.mubr.msk.bf16.mxu0 %vm8970_vm1, %v3516_v7  ;;  %v3517_v29 = vsel %vm9033_vm10, %v3400_v44, 0  ;;  %vm9045_vm9 = vmmov %vm9035_vm7  ;;  %v9047_v7 = vld [vmem:[#allocation9_spill] sm:$0xff] }
 0x366   : > { %v3402_v9 = vshrl.u32 %v7874_v32, 16  ;;  %v3405_v28 = vshll.u32 %v7874_v32, 16  ;;  %5512 = vmatprep.mubr.msk.bf16.mxu1 %vm9031_vm5, %v7874_v32  ;;  %v5488_v1 = vpop.f32.mrf.mxu0  ;;  %v7901_v36 = vsel %vm9035_vm7, %v3955_v6, %v3956_v48  ;;  %v7904_v16 = vadd.f32 %v5463_v22, %v9036_v15  ;;  %vm9046_vm5 = vmmov %vm8970_vm1 }
 0x367   : > { %v3303_v12 = vadd.f32 %v7767_v0, %v3267_v4  ;;  %v3272_v56 = vadd.f32 %v5488_v1, %v7788_v10  ;;  %5513 = vmatmul.mubr.msk.bf16.gmra.mxu1 %vm9034_vm15, %v7864_v19  ;;  %v3415_v21 = vor.u32 %v3413_v35, %v7881_v26  ;;  %v3336_v45 = vmax.f32 %v3304_v25, 0.0  ;;  %vm9048_vm10 = vmmov %vm8970_vm1 }
 0x368   : > { %v3337_v54 = vmax.f32 %v3305_v41, 0.0  ;;  %5543 = vmatmul.mubr.msk.bf16.gmra.mxu0 %vm9037_vm14, %v3517_v29  ;;  %v3191_v62 = vpop.f32.mrf.mxu0  ;;  %v3404_v40 = vrot.slane %v3402_v9, 7  ;;  %v3334_v47 = vmax.f32 %v3302_v42, 0.0  ;;  %v3959_v31 = vrot.slane %v3405_v28, 1  ;;  %vm9050_vm15 = vmmov %vm9038_vm8 }
 0x369   : > { %v3335_v23 = vmax.f32 %v3303_v12, 0.0  ;;  %v3308_v10 = vadd.f32 %v7767_v0, %v3272_v56  ;;  %v3270_v57 = vadd.f32 %v3191_v62, %v7791_v27  ;;  %v3958_v2 = vor.u32 %v3956_v48, %v3394_v14  ;;  %v5466_v14 = vpop.f32.mrf.mxu1  ;;  %vm9051_vm14 = vmmov %vm9038_vm8 }
 0x36a   : > { %v7909_v58 = vpack.c.bf16 %v3337_v54, %v3336_v45  ;;  %v5489_v39 = vpop.f32.mrf.mxu0  ;;  %v3407_v5 = vor.u32 %v3405_v28, %v3404_v40  ;;  %v3416_v55 = vsel %vm9038_vm8, %v3404_v40, %v3415_v21  ;;  %v3962_v63 = vrot.slane %v3413_v35, 1 }
 0x36b   : > { %v7912_v17 = vpack.c.bf16 %v3335_v23, %v3334_v47  ;;  %v3273_v60 = vadd.f32 %v5489_v39, %v7794_v52  ;;  %v3340_v59 = vmax.f32 %v3308_v10, 0.0  ;;  %v3306_v27 = vadd.f32 %v7767_v0, %v3270_v57  ;;  %v9041_v52 = vld [vmem:[#allocation32_spill] sm:$0xff] }
 0x36c   : > { %v3426_v33 = vshrl.u32 %v7909_v58, 16  ;;  %v3194_v44 = vpop.f32.mrf.mxu0  ;;  %v3408_v25 = vsel %vm9039_vm12, %v7841_v11, %v3407_v5  ;;  %v3429_v6 = vshll.u32 %v7909_v58, 16  ;;  %vm9042_vm11 = vnez %v9041_v52  ;;  %v9043_v11 = vld [vmem:[#allocation39_spill] sm:$0xff]  ;;  %vm9054_vm12 = vmmov %vm8970_vm1 }
 0x36d   : > { %v3418_v32 = vshrl.u32 %v7912_v17, 16  ;;  %v3309_v43 = vadd.f32 %v7767_v0, %v3273_v60  ;;  %5516 = vmatprep.mubr.msk.bf16.mxu1 %vm9040_vm4, %v7912_v17  ;;  %v3519_v13 = vsel %vm9042_vm11, %v3416_v55, 0  ;;  %v3271_v35 = vadd.f32 %v3194_v44, %v7797_v51  ;;  %vm9055_vm4 = vmmov %vm8970_vm1  ;;  %v9056_v44 = vld [vmem:[#allocation40_spill] sm:$0xff] }
 0x36e   : > { %v7930_v48 = vrot.slane %v3426_v33, 7  ;;  %vm9044_vm3 = vnez %v9043_v11  ;;  %v5492_v50 = vpop.f32.mrf.mxu0  ;;  %v7936_v22 = vsel %vm9045_vm9, %v3958_v2, %v3959_v31  ;;  %v3421_v42 = vshll.u32 %v7912_v17, 16  ;;  %vm9059_vm9 = vmmov %vm9035_vm7 }
 0x36f   : > { %v3518_v49 = vsel %vm9044_vm3, %v3408_v25, 0  ;;  %v3341_v4 = vmax.f32 %v3309_v43, 0.0  ;;  %v3276_v61 = vadd.f32 %v5492_v50, %v7809_v8  ;;  %5517 = vmatmul.mubr.msk.bf16.gmra.mxu1 %vm8970_vm1, %v7909_v58  ;;  %v3420_v51 = vrot.slane %v3418_v32, 7  ;;  %v9049_v8 = vld [vmem:[#allocation8_spill] sm:$0xff]  ;;  %vm9058_vm3 = vmmov %vm8970_vm1 }
 0x370   : > { %5546 = vmatprep.mubr.msk.bf16.mxu0 %vm9046_vm5, %v3518_v49  ;;  %v7946_v28 = vadd.f32 %v3057_v38, %v9047_v7  ;;  %v3307_v41 = vadd.f32 %v7767_v0, %v3271_v35  ;;  %v3207_v1 = vpop.f32.mrf.mxu0  ;;  %v3431_v20 = vor.u32 %v3429_v6, %v7930_v48  ;;  %v3961_v29 = vor.u32 %v3959_v31, %v3402_v9  ;;  %v3070_v31 = vpop.f32.mrf.mxu1  ;;  %vm9061_vm5 = vmmov %vm8970_vm1 }
 0x371   : > { %5547 = vmatmul.mubr.msk.bf16.gmra.mxu0 %vm9048_vm10, %v3519_v13  ;;  %v7954_v12 = vadd.f32 %v5466_v14, %v9049_v8  ;;  %v7956_v56 = vpack.c.bf16 %v3341_v4, %v3340_v59  ;;  %v3274_v21 = vadd.f32 %v3207_v1, %v7812_v53  ;;  %v3423_v15 = vor.u32 %v3421_v42, %v3420_v51  ;;  %v9060_v14 = vld [vmem:[#allocation12_spill] sm:$0xff]  ;;  %vm9062_vm1 = vmmov %vm9051_vm14 }
 0x372   : > { %v3338_v45 = vmax.f32 %v3306_v27, 0.0  ;;  %v3339_v54 = vmax.f32 %v3307_v41, 0.0  ;;  %v5493_v62 = vpop.f32.mrf.mxu0  ;;  %v3432_v40 = vsel %vm9050_vm15, %v3420_v51, %v3431_v20  ;;  %v7961_v47 = vsel %vm9035_vm7, %v3961_v29, %v3962_v63  ;;  %vm9063_vm10 = vmmov %vm9062_vm1 }
 0x373   : > { %v3442_v23 = vshrl.u32 %v7956_v56, 16  ;;  %v3312_v9 = vadd.f32 %v7767_v0, %v3276_v61  ;;  %v3964_v10 = vor.u32 %v3962_v63, %v3410_v24  ;;  %v3965_v57 = vrot.slane %v3421_v42, 1  ;;  %v9052_v24 = vld [vmem:[#allocation41_spill] sm:$0xff]  ;;  %vm9064_vm15 = vmmov %vm9058_vm3 }
 0x374   : > { %v3445_v38 = vshll.u32 %v7956_v56, 16  ;;  %v7968_v53 = vpack.c.bf16 %v3339_v54, %v3338_v45  ;;  %v3277_v39 = vadd.f32 %v5493_v62, %v7815_v3  ;;  %v3210_v5 = vpop.f32.mrf.mxu0  ;;  %v3424_v55 = vsel %vm9051_vm14, %v7881_v26, %v3423_v15  ;;  %v5467_v54 = vpop.f32.mrf.mxu1 }
 0x375   : > { %v7975_v60 = vrot.slane %v3442_v23, 7  ;;  %v3310_v2 = vadd.f32 %v7767_v0, %v3274_v21  ;;  %v3275_v19 = vadd.f32 %v3210_v5, %v7825_v34  ;;  %vm9053_vm8 = vnez %v9052_v24 }
 0x376   : > { %v3520_v63 = vsel %vm9053_vm8, %v3424_v55, 0  ;;  %v3434_v59 = vshrl.u32 %v7968_v53, 16  ;;  %v3437_v3 = vshll.u32 %v7968_v53, 16  ;;  %v3313_v27 = vadd.f32 %v7767_v0, %v3277_v39  ;;  %5520 = vmatprep.mubr.msk.bf16.mxu1 %vm9054_vm12, %v7968_v53  ;;  %v5496_v26 = vpop.f32.mrf.mxu0  ;;  %v9067_v55 = vld [vmem:[#allocation33_spill] sm:$0xff]  ;;  %vm9069_vm8 = vmmov %vm9059_vm9 }
 0x377   : > { %5550 = vmatprep.mubr.msk.bf16.mxu0 %vm9055_vm4, %v3520_v63  ;;  %vm9057_vm11 = vnez %v9056_v44  ;;  %v3311_v34 = vadd.f32 %v7767_v0, %v3275_v19  ;;  %v3280_v43 = vadd.f32 %v5496_v26, %v7854_v46  ;;  %5521 = vmatmul.mubr.msk.bf16.gmra.mxu1 %vm9058_vm3, %v7956_v56  ;;  %v3447_v52 = vor.u32 %v3445_v38, %v7975_v60  ;;  %vm9070_vm12 = vmmov %vm9058_vm3  ;;  %v3073_v26 = vpop.f32.mrf.mxu1 }
 0x378   : > { %v3521_v25 = vsel %vm9057_vm11, %v3432_v40, 0  ;;  %v7997_v13 = vsel %vm9059_vm9, %v3964_v10, %v3965_v57  ;;  %v3071_v35 = vadd.f32 %v3070_v31, %v9060_v14  ;;  %v3344_v11 = vmax.f32 %v3312_v9, 0.0  ;;  %v3223_v50 = vpop.f32.mrf.mxu0  ;;  %vm9071_vm4 = vmmov %vm9058_vm3 }
 0x379   : > { %v3345_v49 = vmax.f32 %v3313_v27, 0.0  ;;  %5551 = vmatmul.mubr.msk.bf16.gmra.mxu0 %vm9061_vm5, %v3521_v25  ;;  %v3436_v46 = vrot.slane %v3434_v59, 7  ;;  %v3342_v42 = vmax.f32 %v3310_v2, 0.0  ;;  %v3343_v4 = vmax.f32 %v3311_v34, 0.0  ;;  %vm9073_vm11 = vmmov %vm9058_vm3 }
 0x37a   : > { %v3316_v61 = vadd.f32 %v7767_v0, %v3280_v43  ;;  %v3278_v51 = vadd.f32 %v3223_v50, %v7862_v18  ;;  %v5497_v41 = vpop.f32.mrf.mxu0  ;;  %v3967_v29 = vor.u32 %v3965_v57, %v3418_v32  ;;  %v3968_v15 = vrot.slane %v3429_v6, 1  ;;  %v9065_v6 = vld [vmem:[#allocation42_spill] sm:$0xff]  ;;  %vm9074_vm3 = vmmov %vm9062_vm1 }
 0x37b   : > { %v8005_v7 = vpack.c.bf16 %v3345_v49, %v3344_v11  ;;  %v3439_v1 = vor.u32 %v3437_v3, %v3436_v46  ;;  %v3448_v20 = vsel %vm9062_vm1, %v3436_v46, %v3447_v52  ;;  %v8010_v8 = vpack.c.bf16 %v3343_v4, %v3342_v42  ;;  %vm9075_vm9 = vmmov %vm9069_vm8 }
 0x37c   : > { %v3281_v21 = vadd.f32 %v5497_v41, %v7904_v16  ;;  %v3971_v45 = vrot.slane %v3437_v3, 1  ;;  %v3348_v62 = vmax.f32 %v3316_v61, 0.0  ;;  %v3314_v40 = vadd.f32 %v7767_v0, %v3278_v51  ;;  %v3226_v9 = vpop.f32.mrf.mxu0  ;;  %v9072_v3 = vld [vmem:[#allocation11_spill] sm:$0xff]  ;;  %v9076_v61 = vld [vmem:[#allocation14_spill] sm:$0xff]  ;;  %vm9077_vm5 = vmmov %vm9062_vm1 }
 0x37d   : > { %v3458_v18 = vshrl.u32 %v8005_v7, 16  ;;  %v3440_v10 = vsel %vm9063_vm10, %v7930_v48, %v3439_v1  ;;  %v3461_v17 = vshll.u32 %v8005_v7, 16  ;;  %v3450_v32 = vshrl.u32 %v8010_v8, 16  ;;  %5524 = vmatprep.mubr.msk.bf16.mxu1 %vm9064_vm15, %v8010_v8  ;;  %vm9080_vm10 = vmmov %vm9071_vm4 }
 0x37e   : > { %v3317_v16 = vadd.f32 %v7767_v0, %v3281_v21  ;;  %vm9066_vm7 = vnez %v9065_v6  ;;  %v3279_v5 = vadd.f32 %v3226_v9, %v7946_v28  ;;  %vm9068_vm14 = vnez %v9067_v55  ;;  %v5500_v31 = vpop.f32.mrf.mxu0  ;;  %vm9081_vm15 = vmmov %vm9071_vm4 }
 0x37f   : > { %v3523_v57 = vsel %vm9066_vm7, %v3448_v20, 0  ;;  %v8028_v39 = vrot.slane %v3458_v18, 7  ;;  %v3522_v48 = vsel %vm9068_vm14, %v3440_v10, 0  ;;  %v8034_v2 = vsel %vm9069_vm8, %v3967_v29, %v3968_v15  ;;  %5525 = vmatmul.mubr.msk.bf16.gmra.mxu1 %vm9071_vm4, %v8005_v7  ;;  %vm9082_vm7 = vmmov %vm9071_vm4 }
 0x380   : > { %v3453_v19 = vshll.u32 %v8010_v8, 16  ;;  %v3349_v24 = vmax.f32 %v3317_v16, 0.0  ;;  %5554 = vmatprep.mubr.msk.bf16.mxu0 %vm9070_vm12, %v3522_v48  ;;  %v3284_v63 = vadd.f32 %v5500_v31, %v7954_v12  ;;  %v3452_v28 = vrot.slane %v3450_v32, 7  ;;  %v3239_v25 = vpop.f32.mrf.mxu0  ;;  %vm9085_vm12 = vmmov %vm9071_vm4 }
 0x381   : > { %v3082_v27 = vadd.f32 %v5467_v54, %v9072_v3  ;;  %v3315_v44 = vadd.f32 %v7767_v0, %v3279_v5  ;;  %5555 = vmatmul.mubr.msk.bf16.gmra.mxu0 %vm9073_vm11, %v3523_v57  ;;  %v3463_v34 = vor.u32 %v3461_v17, %v8028_v39  ;;  %v3970_v43 = vor.u32 %v3968_v15, %v3426_v33  ;;  %vm9086_vm4 = vmmov %vm9074_vm3 }
 0x382   : > { %v3346_v12 = vmax.f32 %v3314_v40, 0.0  ;;  %v8049_v52 = vpack.c.bf16 %v3349_v24, %v3348_v62  ;;  %v3282_v14 = vadd.f32 %v3239_v25, %v3071_v35  ;;  %v3455_v11 = vor.u32 %v3453_v19, %v3452_v28  ;;  %v5501_v46 = vpop.f32.mrf.mxu0  ;;  %v9078_v40 = vld [vmem:[#allocation35_spill] sm:$0xff]  ;;  %vm9087_vm11 = vmmov %vm9069_vm8 }
 0x383   : > { %v3347_v49 = vmax.f32 %v3315_v44, 0.0  ;;  %v3320_v50 = vadd.f32 %v7767_v0, %v3284_v63  ;;  %v3464_v42 = vsel %vm9074_vm3, %v3452_v28, %v3463_v34  ;;  %v8054_v4 = vsel %vm9075_vm9, %v3970_v43, %v3971_v45  ;;  %vm9088_vm9 = vmmov %vm9082_vm7 }
 0x384   : > { %v3074_v51 = vadd.f32 %v3073_v26, %v9076_v61  ;;  %v3474_v41 = vshrl.u32 %v8049_v52, 16  ;;  %v3973_v58 = vor.u32 %v3971_v45, %v3434_v59  ;;  %v3974_v33 = vrot.slane %v3445_v38, 1  ;;  %v3242_v29 = vpop.f32.mrf.mxu0 }
 0x385   : > { %v3477_v35 = vshll.u32 %v8049_v52, 16  ;;  %v3366_v1 = vpack.c.bf16 %v3347_v49, %v3346_v12  ;;  %v3285_v20 = vadd.f32 %v5501_v46, %v3082_v27  ;;  %v3456_v21 = vsel %vm9077_vm5, %v7975_v60, %v3455_v11  ;;  %v9083_v60 = vld [vmem:[#allocation10_spill] sm:$0xff] }
 0x386   : > { %v3476_v15 = vrot.slane %v3474_v41, 7  ;;  %v3318_v54 = vadd.f32 %v7767_v0, %v3282_v14  ;;  %v3283_v62 = vadd.f32 %v3242_v29, %v3074_v51  ;;  %vm9079_vm1 = vnez %v9078_v40  ;;  %v9089_v14 = vld [vmem:[#allocation36_spill] sm:$0xff]  ;;  %v9093_v49 = vld [vmem:[#allocation38_spill] sm:$0xff]  ;;  %v9108_v40 = vld [vmem:[#allocation45_spill] sm:$0xff] }
 0x387   : > { %v3524_v9 = vsel %vm9079_vm1, %v3456_v21, 0  ;;  %v3466_v53 = vshrl.u32 %v3366_v1, 16  ;;  %v3469_v59 = vshll.u32 %v3366_v1, 16  ;;  %v3352_v45 = vmax.f32 %v3320_v50, 0.0  ;;  %5528 = vmatprep.mubr.msk.bf16.mxu1 %vm9080_vm10, %v3366_v1  ;;  %vm9091_vm1 = vmmov %vm9069_vm8 }
 0x388   : > { %v3321_v38 = vadd.f32 %v7767_v0, %v3285_v20  ;;  %5558 = vmatprep.mubr.msk.bf16.mxu0 %vm9081_vm15, %v3524_v9  ;;  %v3319_v10 = vadd.f32 %v7767_v0, %v3283_v62  ;;  %5529 = vmatmul.mubr.msk.bf16.gmra.mxu1 %vm9082_vm7, %v8049_v52  ;;  %vm9084_vm14 = vnez %v9083_v60  ;;  %v3479_v6 = vor.u32 %v3477_v35, %v3476_v15  ;;  %vm9092_vm10 = vmmov %vm9082_vm7 }
 0x389   : > { %v3525_v16 = vsel %vm9084_vm14, %v3464_v42, 0  ;;  %v8077_v57 = vsel %vm9069_vm8, %v3973_v58, %v3974_v33  ;;  %v3468_v55 = vrot.slane %v3466_v53, 7  ;;  %v3976_v48 = vor.u32 %v3974_v33, %v3442_v23  ;;  %vm9095_vm7 = vmmov %vm9091_vm1 }
 0x38a   : > { %v3353_v5 = vmax.f32 %v3321_v38, 0.0  ;;  %5559 = vmatmul.mubr.msk.bf16.gmra.mxu0 %vm9085_vm12, %v3525_v16  ;;  %v3977_v31 = vrot.slane %v3453_v19, 1  ;;  %v3350_v24 = vmax.f32 %v3318_v54, 0.0  ;;  %v3351_v0 = vmax.f32 %v3319_v10, 0.0  ;;  %vm9096_vm14 = vmmov %vm9088_vm9  ;;  %v9116_v38 = vld [vmem:[#allocation53_spill] sm:$0xff]  ;;  %v9122_v16 = vld [vmem:[#allocation50_spill] sm:$0xff] }
 0x38b   : > { %v3980_v63 = vrot.slane %v3461_v17, 1  ;;  %v3983_v28 = vrot.slane %v3469_v59, 1  ;;  %v3471_v27 = vor.u32 %v3469_v59, %v3468_v55  ;;  %v3480_v26 = vsel %vm9086_vm4, %v3468_v55, %v3479_v6  ;;  %vm9099_vm12 = vmmov %vm9088_vm9  ;;  %v9125_v6 = vld [vmem:[#allocation56_spill] sm:$0xff] }
 0x38c   : > { %v8082_v3 = vpack.c.bf16 %v3353_v5, %v3352_v45  ;;  %v3978_v44 = vsel %vm9087_vm11, %v3976_v48, %v3977_v31  ;;  %v3368_v25 = vpack.c.bf16 %v3351_v0, %v3350_v24  ;;  %v3979_v34 = vor.u32 %v3977_v31, %v3450_v32  ;;  %vm9100_vm4 = vmmov %vm9088_vm9  ;;  %v9113_v45 = vld [vmem:[#allocation48_spill] sm:$0xff] }
 0x38d   : > { %v3986_v43 = vrot.slane %v3477_v35, 1  ;;  %v3472_v17 = vsel %vm9074_vm3, %v8028_v39, %v3471_v27  ;;  %v3982_v19 = vor.u32 %v3980_v63, %v3458_v18  ;;  %vm9090_vm5 = vnez %v9089_v14  ;;  %v9097_v18 = vld [vmem:[#allocation43_spill] sm:$0xff]  ;;  %vm9101_vm11 = vmmov %vm9091_vm1  ;;  %v9144_v27 = vld [vmem:[#allocation5_spill] sm:$0xff] }
 0x38e   : > { %v3490_v56 = vshrl.u32 %v8082_v3, 16  ;;  %v3493_v23 = vshll.u32 %v8082_v3, 16  ;;  %v3482_v12 = vshrl.u32 %v3368_v25, 16  ;;  %v3485_v52 = vshll.u32 %v3368_v25, 16  ;;  %5532 = vmatprep.mubr.msk.bf16.mxu1 %vm9088_vm9, %v3368_v25  ;;  %vm9102_vm3 = vmmov %vm9091_vm1  ;;  %v9147_v25 = vld [vmem:[#allocation4_spill] sm:$0xff] }
 0x38f   : > { %v3526_v11 = vsel %vm9090_vm5, %v3472_v17, 0  ;;  %v3981_v8 = vsel %vm9091_vm1, %v3979_v34, %v3980_v63  ;;  %vm9094_vm15 = vnez %v9093_v49  ;;  %v3984_v39 = vsel %vm9095_vm7, %v3982_v19, %v3983_v28 }
 0x390   : > { %v3492_v32 = vrot.slane %v3490_v56, 7  ;;  %5562 = vmatprep.mubr.msk.bf16.mxu0 %vm9092_vm10, %v3526_v11  ;;  %v4012_v50 = vsel %vm9094_vm15, %v7849_v30, 0  ;;  %v3985_v7 = vor.u32 %v3983_v28, %v3466_v53  ;;  %5533 = vmatmul.mubr.msk.bf16.gmra.mxu1 %vm9096_vm14, %v8082_v3  ;;  %vm9098_vm8 = vnez %v9097_v18  ;;  %vm9107_vm15 = vmmov %vm9100_vm4  ;;  %v9110_v53 = vld [vmem:[#allocation54_spill] sm:$0xff] }
 0x391   : > { %v3527_v46 = vsel %vm9098_vm8, %v3480_v26, 0  ;;  %v3484_v42 = vrot.slane %v3482_v12, 7  ;;  %v3988_v61 = vor.u32 %v3986_v43, %v3474_v41  ;;  %v3989_v51 = vrot.slane %v3485_v52, 1  ;;  %5572 = vmatprep.mubr.msk.bf16.mxu1 %vm9100_vm4, %v4012_v50  ;;  %v9105_v41 = vld [vmem:[#allocation44_spill] sm:$0xff]  ;;  %vm9112_vm8 = vmmov %vm9100_vm4  ;;  %v8267_v28 = vld [vmem:[%s8503_s3 + $0x5] ss:$0 sm:$0xff] }
 0x392   : > { %5563 = vmatmul.mubr.msk.bf16.gmra.mxu0 %vm9099_vm12, %v3527_v46  ;;  %v3495_v58 = vor.u32 %v3493_v23, %v3492_v32  ;;  %v3987_v33 = vsel %vm9101_vm11, %v3985_v7, %v3986_v43  ;;  %v3992_v20 = vrot.slane %v3493_v23, 1  ;;  %vm9103_vm9 = vsmask.f32 256  ;;  %vm9115_vm11 = vmmov %vm9100_vm4  ;;  %v9149_v43 = vld [vmem:[#allocation7_spill] sm:$0xff] }
 0x393   : > { %v3487_v30 = vor.u32 %v3485_v52, %v3484_v42  ;;  %v3990_v35 = vsel %vm9102_vm3, %v3988_v61, %v3989_v51  ;;  %v3991_v1 = vor.u32 %v3989_v51, %v3482_v12  ;;  %vm9104_vm5 = vmmov %vm9103_vm9  ;;  %vm9106_vm10 = vnez %v9105_v41 }
 0x394   : > { %v3496_v29 = vsel %vm9103_vm9, %v3484_v42, %v3495_v58  ;;  %vm9109_vm7 = vnez %v9108_v40  ;;  %vm9111_vm14 = vnez %v9110_v53  ;;  %vm9114_vm12 = vnez %v9113_v45  ;;  %vm9118_vm9 = vmmov %vm9100_vm4 }
 0x395   : > { %v3488_v21 = vsel %vm9104_vm5, %v3476_v15, %v3487_v30  ;;  %v3993_v54 = vsel %vm9091_vm1, %v3991_v1, %v3992_v20  ;;  %v4013_v9 = vsel %vm9109_vm7, %v7869_v37, 0  ;;  %v3529_v59 = vsel %vm9111_vm14, %v3496_v29, 0  ;;  %v9119_v37 = vld [vmem:[#allocation49_spill] sm:$0xff]  ;;  %vm9121_vm1 = vmmov %vm9100_vm4 }
 0x396   : > { %v3528_v62 = vsel %vm9106_vm10, %v3488_v21, 0  ;;  %v4014_v15 = vsel %vm9114_vm12, %v7901_v36, 0  ;;  %vm9117_vm3 = vnez %v9116_v38  ;;  %vm9120_vm5 = vnez %v9119_v37  ;;  %vm9127_vm14 = vmmov %vm9121_vm1 }
 0x397   : > { %5566 = vmatprep.mubr.msk.bf16.mxu0 %vm9107_vm15, %v3528_v62  ;;  %v4015_v10 = vsel %vm9117_vm3, %v7936_v22, 0  ;;  %v4016_v60 = vsel %vm9120_vm5, %v7961_v47, 0  ;;  %vm9123_vm10 = vnez %v9122_v16  ;;  %vm9124_vm15 = vmmov %vm9121_vm1  ;;  %vm9126_vm7 = vnez %v9125_v6  ;;  %v9128_v22 = vld [vmem:[#allocation55_spill] sm:$0xff] }
 0x398   : > { %5573 = vmatmul.mubr.msk.bf16.vlgmr.msra.gmra.mxu1 %vm9112_vm8, %v4013_v9  ;;  %v4017_v36 = vsel %vm9123_vm10, %v7997_v13, 0  ;;  %v4018_v5 = vsel %vm9126_vm7, %v8034_v2, 0  ;;  %vm9129_vm8 = vnez %v9128_v22  ;;  %vm9130_vm12 = vmmov %vm9121_vm1  ;;  %v9131_v47 = vld [vmem:[#allocation3_spill] sm:$0xff]  ;;  %v9134_v13 = vld [vmem:[#allocation2_spill] sm:$0xff]  ;;  %v4022_v24 = vsel %vm7318_vm6, %v3981_v8, 0 }
 0x399   : > { %5576 = vmatprep.mubr.msk.bf16.mxu1 %vm9115_vm11, %v4014_v15  ;;  %v4019_v55 = vsel %vm9129_vm8, %v8054_v4, 0  ;;  %vm9133_vm11 = vmmov %vm9121_vm1  ;;  %vm9135_vm3 = vnez %v9134_v13  ;;  %v4023_v4 = vsel %vm7336_vm0, %v3984_v39, 0  ;;  %v4025_v3 = vsel %vm7356_vm2, %v3990_v35, 0 }
 0x39a   : > { %5567 = vmatmul.mubr.msk.bf16.gmra.mxu0 %vm9100_vm4, %v3529_v59  ;;  %vm9132_vm4 = vnez %v9131_v47  ;;  %v4021_v31 = vsel %vm9135_vm3, %v3978_v44, 0  ;;  %vm9138_vm5 = vmmov %vm9121_vm1  ;;  %vm9145_vm7 = vnez %v9144_v27  ;;  %v3994_v44 = vor.u32 %v3992_v20, %v3490_v56 }
 0x39b   : > { %v4020_v48 = vsel %vm9132_vm4, %v8077_v57, 0  ;;  %v4024_v57 = vsel %vm7340_vm13, %v3987_v33, 0  ;;  %vm9141_vm10 = vmmov %vm9121_vm1  ;;  %v4026_v26 = vsel %vm9145_vm7, %v3993_v54, 0  ;;  %vm9148_vm0 = vnez %v9147_v25 }
 0x39c   : > { %vm9146_vm6 = vmmov %vm9121_vm1  ;;  %v4011_v34 = vsel %vm9148_vm0, %v3994_v44, 0  ;;  %v5659_v44 = vld [vmem:[%s5747_s8 + $0x8] sm:$0xff]   ;;  %vm4573_vm2 = vcmask 125952  }
 0x39d   : > { %vm9151_vm13 = vmmov %vm9121_vm1  ;;  %v4351_v25 = vunpack.c.l.bf16 %v5659_v44 }
 0x3a0   : > { %5577 = vmatmul.mubr.msk.bf16.gmra.mxu1 %vm9118_vm9, %v4015_v10  ;;  %vm9136_vm9 = vmmov %vm9121_vm1 }
 0x3a1   : > { %5580 = vmatprep.mubr.msk.bf16.mxu1 %vm9121_vm1, %v4016_v60 }
 0x3a8   : > { %5581 = vmatmul.mubr.msk.bf16.gmra.mxu1 %vm9124_vm15, %v4017_v36  ;;  %vm9143_vm15 = vmmov %vm9121_vm1 }
 0x3a9   : > { %5584 = vmatprep.mubr.msk.bf16.mxu1 %vm9127_vm14, %v4018_v5  ;;  %vm9150_vm14 = vnez %v9149_v43  ;;  %v5660_v43 = vld [vmem:[%s5747_s8] sm:$0xff]  }
 0x3aa   : > { %v4027_v23 = vsel %vm9150_vm14, %v4011_v34, 0 }
 0x3b0   : > { %5585 = vmatmul.mubr.msk.bf16.gmra.mxu1 %vm9130_vm12, %v4019_v55 }
 0x3b1   : > { %5588 = vmatprep.mubr.msk.bf16.mxu1 %vm9133_vm11, %v4020_v48 }
 0x3b8   : > { %5589 = vmatmul.mubr.msk.bf16.gmra.mxu1 %vm9136_vm9, %v4021_v31 }
 0x3b9   : > { %5592 = vmatprep.mubr.msk.bf16.mxu1 %vm9138_vm5, %v4022_v24  ;;  %v8260_v24 = vld [vmem:[%s8503_s3 + $0x4] ss:$0 sm:$0xff] }
 0x3c0   : > { %5593 = vmatmul.mubr.msk.bf16.gmra.mxu1 %vm9121_vm1, %v4023_v4 }
 0x3c1   : > { %5596 = vmatprep.mubr.msk.bf16.mxu1 %vm9141_vm10, %v4024_v57 }
 0x3c8   : > { %5597 = vmatmul.mubr.msk.bf16.gmra.mxu1 %vm9143_vm15, %v4025_v3 }
 0x3c9   : > { %5600 = vmatprep.mubr.msk.bf16.mxu1 %vm9146_vm6, %v4026_v26 }
 0x3d0   : > { %5601 = vmatmul.mubr.msk.bf16.gmra.mxu1 %vm9151_vm13, %v4027_v23  ;;  %v4349_v23 = vunpack.c.l.bf16 %v5660_v43 }
 0x416   : > { %v5506_v17 = vpop.f32.mrf.mxu1 }
 0x418   : > { %v3606_v19 = vpop.f32.mrf.mxu1 }
 0x41a   : > { %v5507_v12 = vpop.f32.mrf.mxu1 }
 0x41c   : > { %v3609_v52 = vpop.f32.mrf.mxu1 }
 0x41e   : > { %v8175_v14 = vpop.f32.mrf.mxu1 }
 0x420   : > { %v5540_v11 = vpop.f32.mrf.mxu0  ;;  %v8177_v8 = vpop.f32.mrf.mxu1 }
 0x421   : > { %v3830_v2 = vadd.f32 %v5540_v11, %v5506_v17 }
 0x422   : > { %v3821_v56 = vpop.f32.mrf.mxu0  ;;  %v8179_v32 = vpop.f32.mrf.mxu1 }
 0x423   : > { %v3822_v4 = vadd.f32 %v3821_v56, %v3606_v19 }
 0x424   : > { %v5541_v49 = vpop.f32.mrf.mxu0  ;;  %v8181_v50 = vpop.f32.mrf.mxu1 }
 0x425   : > { %v3833_v27 = vadd.f32 %v5541_v49, %v5507_v12 }
 0x426   : > { %v3824_v39 = vpop.f32.mrf.mxu0 }
 0x427   : > { %v8183_v7 = vpop.f32.mrf.mxu1  ;;  %v3825_v11 = vadd.f32 %v3824_v39, %v3609_v52 }
 0x428   : > { %v8185_v18 = vpop.f32.mrf.mxu0 }
 0x429   : > { %v8187_v46 = vpop.f32.mrf.mxu1  ;;  %v3846_v52 = vadd.f32 %v8185_v18, %v8175_v14 }
 0x42a   : > { %v8189_v42 = vpop.f32.mrf.mxu0 }
 0x42b   : > { %v8191_v61 = vpop.f32.mrf.mxu1  ;;  %v3838_v14 = vadd.f32 %v8189_v42, %v8177_v8  ;;  %v5662_v42 = vld [vmem:[%s5747_s8 + $0x10] sm:$0xff]  }
 0x42c   : > { %v8193_v51 = vpop.f32.mrf.mxu0 }
 0x42d   : > { %v8195_v58 = vpop.f32.mrf.mxu1  ;;  %v3849_v18 = vadd.f32 %v8193_v51, %v8179_v32 }
 0x42e   : > { %v8199_v30 = vpop.f32.mrf.mxu0 }
 0x42f   : > { %v8197_v33 = vpop.f32.mrf.mxu1 }
 0x431   : > { %v8201_v35 = vpop.f32.mrf.mxu1  ;;  %v8205_v20 = vpop.f32.mrf.mxu0 }
 0x433   : > { %v8203_v1 = vpop.f32.mrf.mxu1  ;;  %v8211_v54 = vpop.f32.mrf.mxu0 }
 0x435   : > { %v8207_v29 = vpop.f32.mrf.mxu1  ;;  %v8217_v40 = vpop.f32.mrf.mxu0 }
 0x437   : > { %v8209_v21 = vpop.f32.mrf.mxu1  ;;  %v8223_v59 = vpop.f32.mrf.mxu0 }
 0x439   : > { %v8213_v41 = vpop.f32.mrf.mxu1  ;;  %v8229_v38 = vpop.f32.mrf.mxu0 }
 0x43b   : > { %v8215_v62 = vpop.f32.mrf.mxu1  ;;  %v8235_v60 = vpop.f32.mrf.mxu0 }
 0x43d   : > { %v8219_v9 = vpop.f32.mrf.mxu1  ;;  %v8241_v6 = vpop.f32.mrf.mxu0 }
 0x43f   : > { %v8221_v53 = vpop.f32.mrf.mxu1  ;;  %v8247_v55 = vpop.f32.mrf.mxu0 }
 0x441   : > { %v8225_v45 = vpop.f32.mrf.mxu1  ;;  %v8253_v13 = vpop.f32.mrf.mxu0 }
 0x443   : > { %v8227_v15 = vpop.f32.mrf.mxu1  ;;  %v8262_v63 = vpop.f32.mrf.mxu0 }
 0x445   : > { %v8231_v10 = vpop.f32.mrf.mxu1  ;;  %v8272_v19 = vpop.f32.mrf.mxu0 }
 0x448   : > { %v8233_v37 = vpop.f32.mrf.mxu1 }
 0x44a   : > { %v8237_v16 = vpop.f32.mrf.mxu1 }
 0x44c   : > { %v8239_v36 = vpop.f32.mrf.mxu1 }
 0x44e   : > { %v8243_v5 = vpop.f32.mrf.mxu1 }
 0x450   : > { %v8245_v22 = vpop.f32.mrf.mxu1 }
 0x452   : > { %v8249_v47 = vpop.f32.mrf.mxu1 }
 0x454   : > { %v8251_v48 = vpop.f32.mrf.mxu1 }
 0x455   : > { %9152 = vst [vmem:[#allocation13_spill] sm:$0xff] %v8251_v48 }
 0x456   : > { %v8255_v31 = vpop.f32.mrf.mxu1 }
 0x457   : > { %9153 = vst [vmem:[#allocation16_spill] sm:$0xff] %v8255_v31  ;;  %v4352_v31 = vunpack.c.h.bf16 %v5659_v44 }
 0x458   : > { %v5574_v0 = vpop.f32.mrf.mxu1 }
 0x459   : > { %v4247_v57 = vadd.f32 %v5574_v0, %v3830_v2 }
 0x45a   : > { %v4118_v3 = vpop.f32.mrf.mxu1 }
 0x45b   : > { %v4283_v26 = vmul.f32 %v8260_v24, %v4247_v57  ;;  %v4245_v34 = vadd.f32 %v4118_v3, %v3822_v4  ;;  %v4350_v3 = vunpack.c.h.bf16 %v5660_v43  ;;  %v5661_v43 = vld [vmem:[%s5747_s8 + $0x18] sm:$0xff]  }
 0x45c   : > { %v5575_v17 = vpop.f32.mrf.mxu1 }
 0x45d   : > { %v4319_v56 = vadd.f32 %v8267_v28, %v4283_v26  ;;  %v4281_v2 = vmul.f32 %v8260_v24, %v4245_v34  ;;  %v4248_v0 = vadd.f32 %v5575_v17, %v3833_v27  ;;  %v8280_v26 = vpop.f32.mrf.mxu0 }
 0x45e   : > { %v4121_v48 = vpop.f32.mrf.mxu1 }
 0x45f   : > { %v4383_v12 = vadd.f32 %v4351_v25, %v4319_v56  ;;  %v4317_v49 = vadd.f32 %v8267_v28, %v4281_v2  ;;  %v4284_v4 = vmul.f32 %v8260_v24, %v4248_v0  ;;  %v4246_v57 = vadd.f32 %v4121_v48, %v3825_v11  ;;  %v8301_v51 = vpop.f32.mrf.mxu0 }
 0x460   : > { %v5578_v39 = vpop.f32.mrf.mxu1 }
 0x461   : > { %v4415_v34 = vmax.f32 %v4383_v12, 0.0  ;;  %v4381_v27 = vadd.f32 %v4349_v23, %v4317_v49  ;;  %v4320_v44 = vadd.f32 %v8267_v28, %v4284_v4  ;;  %v4282_v25 = vmul.f32 %v8260_v24, %v4246_v57 }
 0x462   : > { %v4251_v48 = vadd.f32 %v5578_v39, %v3846_v52  ;;  %v4355_v23 = vunpack.c.l.bf16 %v5661_v43  ;;  %v4134_v17 = vpop.f32.mrf.mxu1  ;;  %v3841_v12 = vadd.f32 %v8199_v30, %v8181_v50  ;;  %v4353_v4 = vunpack.c.l.bf16 %v5662_v42 }
 0x463   : > { %v4962_v11 = vpack.c.bf16 %v4415_v34, %v4415_v34  ;;  %v4413_v56 = vmax.f32 %v4381_v27, 0.0  ;;  %v4384_v2 = vadd.f32 %v4352_v31, %v4320_v44  ;;  %v4318_v0 = vadd.f32 %v8267_v28, %v4282_v25 }
 0x464   : > { %v4287_v49 = vmul.f32 %v8260_v24, %v4251_v48  ;;  %v4249_v8 = vadd.f32 %v4134_v17, %v3838_v14  ;;  %v5579_v32 = vpop.f32.mrf.mxu1  ;;  %v3862_v34 = vadd.f32 %v8205_v20, %v8183_v7  ;;  %v4356_v27 = vunpack.c.h.bf16 %v5661_v43  ;;  %v8315_v43 = vpop.f32.mrf.mxu0 }
 0x465   : > { %4576 = vst.msk [vmem:[%s8289_s9 + $0x8] sm:$0xf] %vm4573_vm2, %v4962_v11  ;;  %v4960_v57 = vpack.c.bf16 %v4413_v56, %v4413_v56  ;;  %v4416_v52 = vmax.f32 %v4384_v2, 0.0  ;;  %v4382_v39 = vadd.f32 %v4350_v3, %v4318_v0  ;;  %v4252_v31 = vadd.f32 %v5579_v32, %v3849_v18  ;;  %v8323_v32 = vld [vmem:[%s5747_s8 + $0x20] sm:$0xff]  }
 0x466   : > { %v4323_v50 = vadd.f32 %v8267_v28, %v4287_v49  ;;  %v4285_v30 = vmul.f32 %v8260_v24, %v4249_v8  ;;  %v4137_v44 = vpop.f32.mrf.mxu1  ;;  %v3854_v3 = vadd.f32 %v8211_v54, %v8187_v46  ;;  %v4354_v18 = vunpack.c.h.bf16 %v5662_v42  ;;  %v5663_v46 = vld [vmem:[%s5747_s8 + $0x28] sm:$0xff]  }
 0x467   : > { %4574 = vst.msk [vmem:[%s8289_s9] sm:$0xf] %vm4573_vm2, %v4960_v57  ;;  %v4963_v25 = vpack.c.bf16 %v4416_v52, %v4416_v52  ;;  %v4414_v14 = vmax.f32 %v4382_v39, 0.0  ;;  %v4288_v48 = vmul.f32 %v8260_v24, %v4252_v31  ;;  %v4250_v17 = vadd.f32 %v4137_v44, %v3841_v12 }
 0x468   : > { %v4387_v7 = vadd.f32 %v4355_v23, %v4323_v50  ;;  %v4321_v20 = vadd.f32 %v8267_v28, %v4285_v30  ;;  %v5582_v11 = vpop.f32.mrf.mxu1  ;;  %v4359_v54 = vunpack.c.l.bf16 %v5663_v46  ;;  %v4357_v42 = vunpack.c.l.bf16 %v8323_v32 }
 0x469   : > { %4577 = vst.msk [vmem:[%s8289_s9 + $0xc] sm:$0xf] %vm4573_vm2, %v4963_v25  ;;  %v4961_v56 = vpack.c.bf16 %v4414_v14, %v4414_v14  ;;  %v4324_v2 = vadd.f32 %v8267_v28, %v4288_v48  ;;  %v4286_v0 = vmul.f32 %v8260_v24, %v4250_v17  ;;  %v4255_v12 = vadd.f32 %v5582_v11, %v3862_v34  ;;  %v8332_v25 = vpop.f32.mrf.mxu0 }
 0x46a   : > { %v4419_v49 = vmax.f32 %v4387_v7, 0.0  ;;  %v4385_v8 = vadd.f32 %v4353_v4, %v4321_v20  ;;  %v4150_v23 = vpop.f32.mrf.mxu1  ;;  %v3865_v34 = vadd.f32 %v8217_v40, %v8191_v61  ;;  %v4360_v44 = vunpack.c.h.bf16 %v5663_v46 }
 0x46b   : > { %4575 = vst.msk [vmem:[%s8289_s9 + $0x4] sm:$0xf] %vm4573_vm2, %v4961_v56  ;;  %v4388_v57 = vadd.f32 %v4356_v27, %v4324_v2  ;;  %v4322_v52 = vadd.f32 %v8267_v28, %v4286_v0  ;;  %v4291_v39 = vmul.f32 %v8260_v24, %v4255_v12  ;;  %v4253_v31 = vadd.f32 %v4150_v23, %v3854_v3  ;;  %v8349_v12 = vpop.f32.mrf.mxu0 }
 0x46c   : > { %v4966_v4 = vpack.c.bf16 %v4419_v49, %v4419_v49  ;;  %v4417_v50 = vmax.f32 %v4385_v8, 0.0  ;;  %v5583_v30 = vpop.f32.mrf.mxu1  ;;  %v3857_v7 = vadd.f32 %v8223_v59, %v8195_v58  ;;  %v3878_v3 = vadd.f32 %v8229_v38, %v8197_v33 }
 0x46d   : > { %v4420_v14 = vmax.f32 %v4388_v57, 0.0  ;;  %v4386_v48 = vadd.f32 %v4354_v18, %v4322_v52  ;;  %v4327_v27 = vadd.f32 %v8267_v28, %v4291_v39  ;;  %v4289_v17 = vmul.f32 %v8260_v24, %v4253_v31  ;;  %v5665_v57 = vld [vmem:[%s5747_s8 + $0x38] sm:$0xff]  }
 0x46e   : > { %4580 = vst.msk [vmem:[%s8289_s9 + $0x18] sm:$0xf] %vm4573_vm2, %v4966_v4  ;;  %v4964_v61 = vpack.c.bf16 %v4417_v50, %v4417_v50  ;;  %v4256_v40 = vadd.f32 %v5583_v30, %v3865_v34  ;;  %v4153_v20 = vpop.f32.mrf.mxu1  ;;  %v3870_v0 = vadd.f32 %v8235_v60, %v8201_v35  ;;  %v4358_v59 = vunpack.c.h.bf16 %v8323_v32 }
 0x46f   : > { %v4967_v11 = vpack.c.bf16 %v4420_v14, %v4420_v14  ;;  %v4418_v56 = vmax.f32 %v4386_v48, 0.0  ;;  %v4391_v2 = vadd.f32 %v4359_v54, %v4327_v27  ;;  %v4325_v18 = vadd.f32 %v8267_v28, %v4289_v17  ;;  %v8365_v48 = vpop.f32.mrf.mxu0 }
 0x470   : > { %4578 = vst.msk [vmem:[%s8289_s9 + $0x10] sm:$0xf] %vm4573_vm2, %v4964_v61  ;;  %v4292_v58 = vmul.f32 %v8260_v24, %v4256_v40  ;;  %v4254_v33 = vadd.f32 %v4153_v20, %v3857_v7  ;;  %v5586_v38 = vpop.f32.mrf.mxu1  ;;  %v3881_v35 = vadd.f32 %v8241_v6, %v8203_v1  ;;  %v4363_v32 = vunpack.c.l.bf16 %v5665_v57  ;;  %v5666_v6 = vld [vmem:[%s5747_s8 + $0x30] sm:$0xff]  }
 0x471   : > { %4581 = vst.msk [vmem:[%s8289_s9 + $0x1c] sm:$0xf] %vm4573_vm2, %v4967_v11  ;;  %v4965_v49 = vpack.c.bf16 %v4418_v56, %v4418_v56  ;;  %v4423_v8 = vmax.f32 %v4391_v2, 0.0  ;;  %v4389_v46 = vadd.f32 %v4357_v42, %v4325_v18  ;;  %v4259_v54 = vadd.f32 %v5586_v38, %v3878_v3  ;;  %v5667_v38 = vld [vmem:[%s5747_s8 + $0x48] sm:$0xff]  }
 0x472   : > { %v4328_v60 = vadd.f32 %v8267_v28, %v4292_v58  ;;  %v4290_v23 = vmul.f32 %v8260_v24, %v4254_v33  ;;  %v4166_v52 = vpop.f32.mrf.mxu1  ;;  %v3873_v4 = vadd.f32 %v8247_v55, %v8207_v29  ;;  %v4361_v30 = vunpack.c.l.bf16 %v5666_v6 }
 0x473   : > { %4579 = vst.msk [vmem:[%s8289_s9 + $0x14] sm:$0xf] %vm4573_vm2, %v4965_v49  ;;  %v4970_v39 = vpack.c.bf16 %v4423_v8, %v4423_v8  ;;  %v4421_v31 = vmax.f32 %v4389_v46, 0.0  ;;  %v4295_v34 = vmul.f32 %v8260_v24, %v4259_v54  ;;  %v4257_v42 = vadd.f32 %v4166_v52, %v3870_v0  ;;  %v8378_v49 = vpop.f32.mrf.mxu0 }
 0x474   : > { %v4392_v50 = vadd.f32 %v4360_v44, %v4328_v60  ;;  %v4326_v1 = vadd.f32 %v8267_v28, %v4290_v23  ;;  %v5587_v14 = vpop.f32.mrf.mxu1  ;;  %v4364_v55 = vunpack.c.h.bf16 %v5665_v57  ;;  %v4362_v40 = vunpack.c.h.bf16 %v5666_v6 }
 0x475   : > { %4584 = vst.msk [vmem:[%s8289_s9 + $0x28] sm:$0xf] %vm4573_vm2, %v4970_v39  ;;  %v4968_v27 = vpack.c.bf16 %v4421_v31, %v4421_v31  ;;  %v4331_v17 = vadd.f32 %v8267_v28, %v4295_v34  ;;  %v4293_v7 = vmul.f32 %v8260_v24, %v4257_v42  ;;  %v4260_v3 = vadd.f32 %v5587_v14, %v3881_v35 }
 0x476   : > { %v4424_v61 = vmax.f32 %v4392_v50, 0.0  ;;  %v4390_v29 = vadd.f32 %v4358_v59, %v4326_v1  ;;  %v4169_v44 = vpop.f32.mrf.mxu1  ;;  %v3894_v18 = vadd.f32 %v8253_v13, %v8209_v21  ;;  %v4367_v59 = vunpack.c.l.bf16 %v5667_v38 }
 0x477   : > { %4582 = vst.msk [vmem:[%s8289_s9 + $0x20] sm:$0xf] %vm4573_vm2, %v4968_v27  ;;  %v4395_v20 = vadd.f32 %v4363_v32, %v4331_v17  ;;  %v4329_v11 = vadd.f32 %v8267_v28, %v4293_v7  ;;  %v4296_v56 = vmul.f32 %v8260_v24, %v4260_v3  ;;  %v4258_v2 = vadd.f32 %v4169_v44, %v3873_v4  ;;  %v8395_v4 = vpop.f32.mrf.mxu0 }
 0x478   : > { %v4971_v0 = vpack.c.bf16 %v4424_v61, %v4424_v61  ;;  %v4422_v58 = vmax.f32 %v4390_v29, 0.0  ;;  %v5590_v33 = vpop.f32.mrf.mxu1  ;;  %v3886_v60 = vadd.f32 %v8262_v63, %v8213_v41  ;;  %v3897_v21 = vadd.f32 %v8272_v19, %v8215_v62  ;;  %v5668_v63 = vld [vmem:[%s5747_s8 + $0x40] sm:$0xff]  }
 0x479   : > { %v4427_v8 = vmax.f32 %v4395_v20, 0.0  ;;  %v4393_v46 = vadd.f32 %v4361_v30, %v4329_v11  ;;  %v4332_v54 = vadd.f32 %v8267_v28, %v4296_v56  ;;  %v4294_v35 = vmul.f32 %v8260_v24, %v4258_v2  ;;  %v3920_v20 = vpop.f32.mrf.mxu0 }
 0x47a   : > { %4585 = vst.msk [vmem:[%s8289_s9 + $0x2c] sm:$0xf] %vm4573_vm2, %v4971_v0  ;;  %v4969_v13 = vpack.c.bf16 %v4422_v58, %v4422_v58  ;;  %v4263_v23 = vadd.f32 %v5590_v33, %v3894_v18  ;;  %v4182_v57 = vpop.f32.mrf.mxu1  ;;  %v3889_v34 = vadd.f32 %v8280_v26, %v8219_v9  ;;  %v4365_v19 = vunpack.c.l.bf16 %v5668_v63  ;;  %v5669_v33 = vld [vmem:[%s5747_s8 + $0x58] sm:$0xff]  }
 0x47b   : > { %v4974_v32 = vpack.c.bf16 %v4427_v8, %v4427_v8  ;;  %v4425_v52 = vmax.f32 %v4393_v46, 0.0  ;;  %v4396_v39 = vadd.f32 %v4364_v55, %v4332_v54  ;;  %v4330_v31 = vadd.f32 %v8267_v28, %v4294_v35 }
 0x47c   : > { %4583 = vst.msk [vmem:[%s8289_s9 + $0x24] sm:$0xf] %vm4573_vm2, %v4969_v13  ;;  %v4299_v41 = vmul.f32 %v8260_v24, %v4263_v23  ;;  %v4261_v62 = vadd.f32 %v4182_v57, %v3886_v60  ;;  %v5591_v42 = vpop.f32.mrf.mxu1  ;;  %v3910_v9 = vadd.f32 %v8301_v51, %v8221_v53  ;;  %v4368_v27 = vunpack.c.h.bf16 %v5667_v38  ;;  %v8415_v38 = vld [vmem:[%s5747_s8 + $0x50] sm:$0xff]  }
 0x47d   : > { %4588 = vst.msk [vmem:[%s8289_s9 + $0x38] sm:$0xf] %vm4573_vm2, %v4974_v32  ;;  %v4972_v50 = vpack.c.bf16 %v4425_v52, %v4425_v52  ;;  %v4428_v1 = vmax.f32 %v4396_v39, 0.0  ;;  %v4394_v6 = vadd.f32 %v4362_v40, %v4330_v31  ;;  %v4264_v30 = vadd.f32 %v5591_v42, %v3897_v21  ;;  %v5568_v32 = vpop.f32.mrf.mxu0 }
 0x47e   : > { %v4335_v26 = vadd.f32 %v8267_v28, %v4299_v41  ;;  %v4297_v14 = vmul.f32 %v8260_v24, %v4261_v62  ;;  %v4185_v17 = vpop.f32.mrf.mxu1  ;;  %v3902_v55 = vadd.f32 %v8315_v43, %v8225_v45  ;;  %v4366_v44 = vunpack.c.h.bf16 %v5668_v63 }
 0x47f   : > { %4586 = vst.msk [vmem:[%s8289_s9 + $0x30] sm:$0xf] %vm4573_vm2, %v4972_v50  ;;  %v4975_v7 = vpack.c.bf16 %v4428_v1, %v4428_v1  ;;  %v4426_v3 = vmax.f32 %v4394_v6, 0.0  ;;  %v4300_v61 = vmul.f32 %v8260_v24, %v4264_v30  ;;  %v4262_v29 = vadd.f32 %v4185_v17, %v3889_v34  ;;  %v3933_v30 = vpop.f32.mrf.mxu0 }
 0x480   : > { %v4399_v53 = vadd.f32 %v4367_v59, %v4335_v26  ;;  %v4333_v51 = vadd.f32 %v8267_v28, %v4297_v14  ;;  %v5594_v40 = vpop.f32.mrf.mxu1  ;;  %v4371_v45 = vunpack.c.l.bf16 %v5669_v33  ;;  %v4369_v59 = vunpack.c.l.bf16 %v8415_v38 }
 0x481   : > { %4589 = vst.msk [vmem:[%s8289_s9 + $0x3c] sm:$0xf] %vm4573_vm2, %v4975_v7  ;;  %v4973_v11 = vpack.c.bf16 %v4426_v3, %v4426_v3  ;;  %v4336_v56 = vadd.f32 %v8267_v28, %v4300_v61  ;;  %v4298_v2 = vmul.f32 %v8260_v24, %v4262_v29  ;;  %v4267_v18 = vadd.f32 %v5594_v40, %v3910_v9  ;;  %v5671_v7 = vld [vmem:[%s5747_s8 + $0x68] sm:$0xff]  }
 0x482   : > { %v4431_v0 = vmax.f32 %v4399_v53, 0.0  ;;  %v4397_v58 = vadd.f32 %v4365_v19, %v4333_v51  ;;  %v4198_v43 = vpop.f32.mrf.mxu1  ;;  %v3913_v60 = vadd.f32 %v8332_v25, %v8227_v15  ;;  %v4372_v57 = vunpack.c.h.bf16 %v5669_v33 }
 0x483   : > { %4587 = vst.msk [vmem:[%s8289_s9 + $0x34] sm:$0xf] %vm4573_vm2, %v4973_v11  ;;  %v4400_v8 = vadd.f32 %v4368_v27, %v4336_v56  ;;  %v4334_v46 = vadd.f32 %v8267_v28, %v4298_v2  ;;  %v4303_v54 = vmul.f32 %v8260_v24, %v4267_v18  ;;  %v4265_v35 = vadd.f32 %v4198_v43, %v3902_v55  ;;  %v5569_v2 = vpop.f32.mrf.mxu0 }
 0x484   : > { %v4978_v21 = vpack.c.bf16 %v4431_v0, %v4431_v0  ;;  %v4429_v13 = vmax.f32 %v4397_v58, 0.0  ;;  %v5595_v23 = vpop.f32.mrf.mxu1  ;;  %v3905_v41 = vadd.f32 %v8349_v12, %v8231_v10  ;;  %v3926_v62 = vadd.f32 %v8365_v48, %v8233_v37 }
 0x485   : > { %v4432_v52 = vmax.f32 %v4400_v8, 0.0  ;;  %v4398_v39 = vadd.f32 %v4366_v44, %v4334_v46  ;;  %v4339_v31 = vadd.f32 %v8267_v28, %v4303_v54  ;;  %v4301_v34 = vmul.f32 %v8260_v24, %v4265_v35 }
 0x486   : > { %4592 = vst.msk [vmem:[%s8289_s9 + $0x48] sm:$0xf] %vm4573_vm2, %v4978_v21  ;;  %v4976_v15 = vpack.c.bf16 %v4429_v13, %v4429_v13  ;;  %v4268_v25 = vadd.f32 %v5595_v23, %v3913_v60  ;;  %v4201_v63 = vpop.f32.mrf.mxu1  ;;  %v3918_v6 = vadd.f32 %v8378_v49, %v8237_v16  ;;  %v4370_v12 = vunpack.c.h.bf16 %v8415_v38  ;;  %v3936_v23 = vpop.f32.mrf.mxu0 }
 0x487   : > { %v4979_v19 = vpack.c.bf16 %v4432_v52, %v4432_v52  ;;  %v4430_v42 = vmax.f32 %v4398_v39, 0.0  ;;  %v4403_v50 = vadd.f32 %v4371_v45, %v4339_v31  ;;  %v4337_v1 = vadd.f32 %v8267_v28, %v4301_v34 }
 0x488   : > { %4590 = vst.msk [vmem:[%s8289_s9 + $0x40] sm:$0xf] %vm4573_vm2, %v4976_v15  ;;  %v4304_v10 = vmul.f32 %v8260_v24, %v4268_v25  ;;  %v4266_v37 = vadd.f32 %v4201_v63, %v3905_v41  ;;  %v5598_v48 = vpop.f32.mrf.mxu1  ;;  %v3929_v16 = vadd.f32 %v8395_v4, %v8239_v36  ;;  %v4375_v3 = vunpack.c.l.bf16 %v5671_v7  ;;  %v5672_v4 = vld [vmem:[%s5747_s8 + $0x60] sm:$0xff]   ;;  %v9154_v41 = vld [vmem:[#allocation13_spill] sm:$0xff] }
 0x489   : > { %4593 = vst.msk [vmem:[%s8289_s9 + $0x4c] sm:$0xf] %vm4573_vm2, %v4979_v19  ;;  %v4977_v9 = vpack.c.bf16 %v4430_v42, %v4430_v42  ;;  %v4435_v26 = vmax.f32 %v4403_v50, 0.0  ;;  %v4401_v14 = vadd.f32 %v4369_v59, %v4337_v1  ;;  %v4271_v27 = vadd.f32 %v5598_v48, %v3926_v62  ;;  %v9155_v50 = vld [vmem:[#allocation16_spill] sm:$0xff] }
 0x48a   : > { %v4340_v49 = vadd.f32 %v8267_v28, %v4304_v10  ;;  %v4302_v17 = vmul.f32 %v8260_v24, %v4266_v37  ;;  %v4214_v61 = vpop.f32.mrf.mxu1  ;;  %v3921_v44 = vadd.f32 %v3920_v20, %v8243_v5  ;;  %v4373_v11 = vunpack.c.l.bf16 %v5672_v4 }
 0x48b   : > { %4591 = vst.msk [vmem:[%s8289_s9 + $0x44] sm:$0xf] %vm4573_vm2, %v4977_v9  ;;  %v4982_v29 = vpack.c.bf16 %v4435_v26, %v4435_v26  ;;  %v4433_v55 = vmax.f32 %v4401_v14, 0.0  ;;  %v4307_v53 = vmul.f32 %v8260_v24, %v4271_v27  ;;  %v4269_v51 = vadd.f32 %v4214_v61, %v3918_v6  ;;  %v5673_v6 = vld [vmem:[%s5747_s8 + $0x78] sm:$0xff]  }
 0x48c   : > { %v4404_v40 = vadd.f32 %v4372_v57, %v4340_v49  ;;  %v4338_v36 = vadd.f32 %v8267_v28, %v4302_v17  ;;  %v5599_v56 = vpop.f32.mrf.mxu1  ;;  %v4376_v38 = vunpack.c.h.bf16 %v5671_v7  ;;  %v3942_v54 = vadd.f32 %v5568_v32, %v8245_v22 }
 0x48d   : > { %4596 = vst.msk [vmem:[%s8289_s9 + $0x58] sm:$0xf] %vm4573_vm2, %v4982_v29  ;;  %v4980_v18 = vpack.c.bf16 %v4433_v55, %v4433_v55  ;;  %v4343_v0 = vadd.f32 %v8267_v28, %v4307_v53  ;;  %v4305_v58 = vmul.f32 %v8260_v24, %v4269_v51  ;;  %v4272_v33 = vadd.f32 %v5599_v56, %v3929_v16  ;;  %v5674_v16 = vld [vmem:[%s5747_s8 + $0x70] sm:$0xff]  }
 0x48e   : > { %v4436_v45 = vmax.f32 %v4404_v40, 0.0  ;;  %v4402_v43 = vadd.f32 %v4370_v12, %v4338_v36  ;;  %v4217_v5 = vpop.f32.mrf.mxu1  ;;  %v4374_v21 = vunpack.c.h.bf16 %v5672_v4  ;;  %v3934_v34 = vadd.f32 %v3933_v30, %v8249_v47 }
 0x48f   : > { %4594 = vst.msk [vmem:[%s8289_s9 + $0x50] sm:$0xf] %vm4573_vm2, %v4980_v18  ;;  %v4407_v20 = vadd.f32 %v4375_v3, %v4343_v0  ;;  %v4341_v59 = vadd.f32 %v8267_v28, %v4305_v58  ;;  %v4308_v8 = vmul.f32 %v8260_v24, %v4272_v33  ;;  %v4270_v46 = vadd.f32 %v4217_v5, %v3921_v44 }
 0x490   : > { %v4983_v35 = vpack.c.bf16 %v4436_v45, %v4436_v45  ;;  %v4434_v60 = vmax.f32 %v4402_v43, 0.0  ;;  %v5602_v13 = vpop.f32.mrf.mxu1  ;;  %v3945_v62 = vadd.f32 %v5569_v2, %v9154_v41  ;;  %v3937_v1 = vadd.f32 %v3936_v23, %v9155_v50 }
 0x491   : > { %v4439_v57 = vmax.f32 %v4407_v20, 0.0  ;;  %v4405_v52 = vadd.f32 %v4373_v11, %v4341_v59  ;;  %v4344_v39 = vadd.f32 %v8267_v28, %v4308_v8  ;;  %v4306_v31 = vmul.f32 %v8260_v24, %v4270_v46 }
 0x492   : > { %4597 = vst.msk [vmem:[%s8289_s9 + $0x5c] sm:$0xf] %vm4573_vm2, %v4983_v35  ;;  %v4981_v22 = vpack.c.bf16 %v4434_v60, %v4434_v60  ;;  %v4275_v32 = vadd.f32 %v5602_v13, %v3942_v54  ;;  %v4230_v15 = vpop.f32.mrf.mxu1  ;;  %v4379_v10 = vunpack.c.l.bf16 %v5673_v6  ;;  %v4377_v49 = vunpack.c.l.bf16 %v5674_v16 }
 0x493   : > { %v4986_v25 = vpack.c.bf16 %v4439_v57, %v4439_v57  ;;  %v4437_v63 = vmax.f32 %v4405_v52, 0.0  ;;  %v4408_v19 = vadd.f32 %v4376_v38, %v4344_v39  ;;  %v4342_v42 = vadd.f32 %v8267_v28, %v4306_v31 }
 0x494   : > { %4595 = vst.msk [vmem:[%s8289_s9 + $0x54] sm:$0xf] %vm4573_vm2, %v4981_v22  ;;  %v4311_v47 = vmul.f32 %v8260_v24, %v4275_v32  ;;  %v4273_v37 = vadd.f32 %v4230_v15, %v3934_v34  ;;  %v5603_v12 = vpop.f32.mrf.mxu1  ;;  %v4380_v17 = vunpack.c.h.bf16 %v5673_v6  ;;  %v4378_v4 = vunpack.c.h.bf16 %v5674_v16 }
 0x495   : > { %4600 = vst.msk [vmem:[%s8289_s9 + $0x68] sm:$0xf] %vm4573_vm2, %v4986_v25  ;;  %v4984_v48 = vpack.c.bf16 %v4437_v63, %v4437_v63  ;;  %v4440_v30 = vmax.f32 %v4408_v19, 0.0  ;;  %v4406_v9 = vadd.f32 %v4374_v21, %v4342_v42  ;;  %v4276_v26 = vadd.f32 %v5603_v12, %v3945_v62 }
 0x496   : > { %v4347_v14 = vadd.f32 %v8267_v28, %v4311_v47  ;;  %v4309_v27 = vmul.f32 %v8260_v24, %v4273_v37  ;;  %v4233_v7 = vpop.f32.mrf.mxu1 }
 0x497   : > { %4598 = vst.msk [vmem:[%s8289_s9 + $0x60] sm:$0xf] %vm4573_vm2, %v4984_v48  ;;  %v4987_v3 = vpack.c.bf16 %v4440_v30, %v4440_v30  ;;  %v4438_v61 = vmax.f32 %v4406_v9, 0.0  ;;  %v4312_v29 = vmul.f32 %v8260_v24, %v4276_v26  ;;  %v4274_v55 = vadd.f32 %v4233_v7, %v3937_v1 }
 0x498   : > { %v4411_v53 = vadd.f32 %v4379_v10, %v4347_v14  ;;  %v4345_v51 = vadd.f32 %v8267_v28, %v4309_v27 }
 0x499   : > { %4601 = vst.msk [vmem:[%s8289_s9 + $0x6c] sm:$0xf] %vm4573_vm2, %v4987_v3  ;;  %v4985_v44 = vpack.c.bf16 %v4438_v61, %v4438_v61  ;;  %v4348_v40 = vadd.f32 %v8267_v28, %v4312_v29  ;;  %v4310_v36 = vmul.f32 %v8260_v24, %v4274_v55 }
 0x49a   : > { %v4443_v11 = vmax.f32 %v4411_v53, 0.0  ;;  %v4409_v56 = vadd.f32 %v4377_v49, %v4345_v51 }
 0x49b   : > { %4599 = vst.msk [vmem:[%s8289_s9 + $0x64] sm:$0xf] %vm4573_vm2, %v4985_v44  ;;  %v4412_v2 = vadd.f32 %v4380_v17, %v4348_v40  ;;  %v4346_v18 = vadd.f32 %v8267_v28, %v4310_v36 }
 0x49c   : > { %v4990_v0 = vpack.c.bf16 %v4443_v11, %v4443_v11  ;;  %v4441_v58 = vmax.f32 %v4409_v56, 0.0 }
 0x49d   : > { %v4444_v33 = vmax.f32 %v4412_v2, 0.0  ;;  %v4410_v45 = vadd.f32 %v4378_v4, %v4346_v18 }
 0x49e   : > { %4604 = vst.msk [vmem:[%s8289_s9 + $0x78] sm:$0xf] %vm4573_vm2, %v4990_v0  ;;  %v4988_v43 = vpack.c.bf16 %v4441_v58, %v4441_v58 }
 0x49f   : > { %v4991_v38 = vpack.c.bf16 %v4444_v33, %v4444_v33  ;;  %v4442_v5 = vmax.f32 %v4410_v45, 0.0 }
 0x4a0   : > { %4602 = vst.msk [vmem:[%s8289_s9 + $0x70] sm:$0xf] %vm4573_vm2, %v4988_v43 }
 0x4a1   : > { %4605 = vst.msk [vmem:[%s8289_s9 + $0x7c] sm:$0xf] %vm4573_vm2, %v4991_v38  ;;  %v4989_v24 = vpack.c.bf16 %v4442_v5, %v4442_v5 }
 0x4a3   : > { %4603 = vst.msk [vmem:[%s8289_s9 + $0x74] sm:$0xf] %vm4573_vm2, %v4989_v24 }
 0x4a4 PF: > { %s14_s15 = sadd.s32 1, %s5681_s15  }
 0x4a5   : > { %p11_p4 = scmp.ge.s32.totalorder %s14_s15, 4  }
 0x4a7   :  { %13 = sbr.rel (!%p11_p4) target bundleno = 1 (0x1), region = 66 }

</bundles_post_ra>
